<compile_context>
chip_gen: v7x
topology: tpu7x:2x2x1
jax: 0.10.0
libtpu: 0.0.40
codegen_flags: <defaults>
</compile_context>

<pallas_src>
import jax
import jax.numpy as jnp
from jax.experimental import pallas as pl
from jax.experimental.pallas import tpu as pltpu

HIDDEN = 1024  # fixed by the module definition


def _round_up(x, m):
    return ((x + m - 1) // m) * m


def _vmem_capacity_bytes():
    """Physical VMEM per TensorCore for this generation (fallback: v7x 64 MiB)."""
    try:
        return int(pltpu.get_tpu_info().vmem_capacity_bytes)
    except Exception:
        return 64 << 20


def _ae_kernel(x_ref,
               w1_ref, b1_ref,
               w2_ref, b2_ref,
               w3_ref, b3_ref,
               w4_ref, b4_ref,
               code_ref, rec_ref):
    # x arrives f32; cast to bf16 in-kernel (VPU op, hidden under MXU work) so
    # the wrapper never materializes a separate bf16 copy of x in HBM.
    x = x_ref[...].astype(jnp.bfloat16)                              # (bt, Dp)

    h1 = jnp.dot(x, w1_ref[...], preferred_element_type=jnp.float32) + b1_ref[...]
    h1 = jnp.maximum(h1, 0.0).astype(jnp.bfloat16)

    code = jnp.dot(h1, w2_ref[...], preferred_element_type=jnp.float32) + b2_ref[...]
    code = jnp.maximum(code, 0.0)                                    # f32
    code_ref[...] = code.astype(code_ref.dtype)

    h3 = jnp.dot(code.astype(jnp.bfloat16), w3_ref[...],
                 preferred_element_type=jnp.float32) + b3_ref[...]
    h3 = jnp.maximum(h3, 0.0).astype(jnp.bfloat16)

    rec = jnp.dot(h3, w4_ref[...], preferred_element_type=jnp.float32) + b4_ref[...]
    rec_ref[...] = jnp.maximum(rec, 0.0).astype(rec_ref.dtype)


def prepare_params(params):
    """One-time parameter prep (call once, reuse across forward calls):
      * weights pre-transposed (in, out) and cast to bf16,
      * biases cast to f32,
      * feature dim D padded up to a lane-dense multiple of 128
        (extra W1 rows / W4 cols / b4 entries are zero -> no effect on math).
    """
    D = params["w1"].shape[0]
    Dp = _round_up(max(D, 128), 128)

    w1 = params["w1"].astype(jnp.bfloat16)
    w4 = params["w4"].astype(jnp.bfloat16)
    b4 = params["b4"].astype(jnp.float32)
    if Dp != D:
        w1 = jnp.pad(w1, ((0, Dp - D), (0, 0)))   # extra K rows (zeros)
        w4 = jnp.pad(w4, ((0, 0), (0, Dp - D)))   # extra N cols (zeros)
        b4 = jnp.pad(b4, ((0, 0), (0, Dp - D)))

    return {
        "D": D, "Dp": Dp,
        "w1": w1, "b1": params["b1"].astype(jnp.float32),
        "w2": params["w2"].astype(jnp.bfloat16), "b2": params["b2"].astype(jnp.float32),
        "w3": params["w3"].astype(jnp.bfloat16), "b3": params["b3"].astype(jnp.float32),
        "w4": w4, "b4": b4,
    }


def autoencoder_forward(x, prepared, *, batch_tile=512, out_dtype=jnp.float32):
    """x: [B, D] float32. prepared: output of prepare_params()."""
    B, D = x.shape
    assert D == prepared["D"], "feature dim mismatch vs prepared params"
    Dp = prepared["Dp"]

    # Batch tile: default 512 (fills the MXU M dim, amortizes ~0.35 us/step),
    # clamped to the 8-aligned batch. If a single tile would cover a
    # moderately large batch, split it so the grid has >=2 steps and the
    # "parallel" axis can shard across both v7x TensorCores.
    B8 = _round_up(B, 8)
    bt = min(_round_up(max(batch_tile, 8), 8), B8)
    if B8 > 256 and bt >= B8:
        bt = _round_up((B8 + 1) // 2, 8)
    Bp = _round_up(B8, bt)
    grid_len = Bp // bt

    # Pad batch and (if needed) feature dim; x stays f32, cast happens in-kernel.
    if Bp != B or Dp != D:
        x = jnp.pad(x, ((0, Bp - B), (0, Dp - D)))

    ws = [prepared["w1"], prepared["w2"], prepared["w3"], prepared["w4"]]
    bs = [prepared["b1"], prepared["b2"], prepared["b3"], prepared["b4"]]

    # VMEM budget: (default double-buffered) resident weights + biases +
    # double-buffered IO tiles + live f32 intermediates + headroom, capped
    # below this generation's physical VMEM per TensorCore.
    weight_bytes = 2 * sum(w.size * 2 for w in ws)              # bf16, 2 bufs
    bias_bytes = 2 * sum(b.size * 4 for b in bs)
    io_bytes = 2 * (bt * Dp * 4 + bt * HIDDEN * 4 + bt * Dp * 4)
    live_bytes = 3 * bt * HIDDEN * 4                            # h1/code/h3
    vmem_budget = weight_bytes + bias_bytes + io_bytes + live_bytes + (8 << 20)
    vmem_cap = _vmem_capacity_bytes() - (8 << 20)
    vmem_budget = min(_round_up(vmem_budget, 1 << 20), vmem_cap)

    # TODO(synk): for very large D (>~8k) tile W1 along K and W4 along N
    # (inner pltpu.emit_pipeline) instead of keeping them fully resident; the
    # fully-resident layout can exceed v7x's 64 MiB VMEM.
    resident = lambda shape: pl.BlockSpec(shape, lambda i: (0, 0))

    in_specs = [pl.BlockSpec((bt, Dp), lambda i: (i, 0))]
    for w, b in zip(ws, bs):
        in_specs += [resident(w.shape), resident(b.shape)]

    grid_spec = pltpu.PrefetchScalarGridSpec(
        num_scalar_prefetch=0,
        grid=(grid_len,),
        in_specs=in_specs,
        out_specs=[pl.BlockSpec((bt, HIDDEN), lambda i: (i, 0)),
                   pl.BlockSpec((bt, Dp), lambda i: (i, 0))],
    )

    call = pl.pallas_call(
        _ae_kernel,
        out_shape=(jax.ShapeDtypeStruct((Bp, HIDDEN), out_dtype),  # code
                   jax.ShapeDtypeStruct((Bp, Dp), out_dtype)),     # reconstructed
        grid_spec=grid_spec,
        compiler_params=pltpu.CompilerParams(
            dimension_semantics=("parallel",),     # batch axis shards across TCs
            vmem_limit_bytes=int(vmem_budget),
        ),
    )

    flat_params = []
    for w, b in zip(ws, bs):
        flat_params += [w, b]
    code, rec = call(x, *flat_params)

    if Bp != B or Dp != D:
        code = code[:B]
        rec = rec[:B, :D]
    return code, rec


def init_params(key, input_shape):
    """Deterministic PyTorch-style init (uniform +/- 1/sqrt(fan_in)).
    Weights stored pre-transposed as (in, out); everything f32."""
    dims = [
        (input_shape, HIDDEN),  # encoder_hidden_layer
        (HIDDEN, HIDDEN),       # encoder_output_layer
        (HIDDEN, HIDDEN),       # decoder_hidden_layer
        (HIDDEN, input_shape),  # decoder_output_layer
    ]
    params = {}
    for idx, (fan_in, fan_out) in enumerate(dims, start=1):
        key, kw, kb = jax.random.split(key, 3)
        bound = 1.0 / jnp.sqrt(jnp.float32(fan_in))
        params[f"w{idx}"] = jax.random.uniform(
            kw, (fan_in, fan_out), jnp.float32, -bound, bound)
        params[f"b{idx}"] = jax.random.uniform(
            kb, (1, fan_out), jnp.float32, -bound, bound)
    return params


def reference_forward(x, p):
    """Pure-JAX reference with the same mixed-precision recipe as the kernel."""
    bf, f32 = jnp.bfloat16, jnp.float32
    relu = lambda t: jnp.maximum(t, 0.0)
    h1 = relu(jnp.dot(x.astype(bf), p["w1"].astype(bf),
                      preferred_element_type=f32) + p["b1"])
    code = relu(jnp.dot(h1.astype(bf), p["w2"].astype(bf),
                        preferred_element_type=f32) + p["b2"])
    h3 = relu(jnp.dot(code.astype(bf), p["w3"].astype(bf),
                      preferred_element_type=f32) + p["b3"])
    rec = relu(jnp.dot(h3.astype(bf), p["w4"].astype(bf),
                       preferred_element_type=f32) + p["b4"])
    return code, rec


if __name__ == "__main__":
    key = jax.random.PRNGKey(0)
    batch, input_shape = 8, 256   # small test shapes; batch tile clamps to 8

    key, kx = jax.random.split(key)
    x = jax.random.normal(kx, (batch, input_shape), jnp.float32)
    params = init_params(key, input_shape)

    prepared = prepare_params(params)   # one-time bf16 cast + lane-dense padding
    code, rec = autoencoder_forward(x, prepared, batch_tile=512)
    jax.block_until_ready((code, rec))

    code_ref, rec_ref = reference_forward(x, params)
    assert code.shape == (batch, HIDDEN) and rec.shape == (batch, input_shape)
    assert jnp.allclose(code, code_ref, atol=2e-2, rtol=2e-2)
    assert jnp.allclose(rec, rec_ref, atol=2e-2, rtol=2e-2)

    print("KERNEL_OK")
</pallas_src>

<mosaic_0001>
module attributes {stable_mosaic.version = 11 : i64} {
  func.func @_ae_kernel(%arg0: i32, %arg1: memref<8x256xf32, #tpu.memory_space<vmem>>, %arg2: memref<256x1024xbf16, #tpu.memory_space<vmem>>, %arg3: memref<1x1024xf32, #tpu.memory_space<vmem>>, %arg4: memref<1024x1024xbf16, #tpu.memory_space<vmem>>, %arg5: memref<1x1024xf32, #tpu.memory_space<vmem>>, %arg6: memref<1024x1024xbf16, #tpu.memory_space<vmem>>, %arg7: memref<1x1024xf32, #tpu.memory_space<vmem>>, %arg8: memref<1024x256xbf16, #tpu.memory_space<vmem>>, %arg9: memref<1x256xf32, #tpu.memory_space<vmem>>, %arg10: memref<8x1024xf32, #tpu.memory_space<vmem>>, %arg11: memref<8x256xf32, #tpu.memory_space<vmem>>) attributes {dimension_semantics = [#tpu.dimension_semantics<parallel>], iteration_bounds = array<i64: 1>, scalar_prefetch = 0 : i64, scratch_operands = 0 : i64, tpu.core_type = #tpu.core_type<tc>, window_params = [{transform_indices = @transform_0, window_bounds = array<i64: 8, 256>}, {pipeline_mode = #tpu.pipeline_mode<synchronous>, transform_indices = @transform_1, window_bounds = array<i64: 256, 1024>}, {pipeline_mode = #tpu.pipeline_mode<synchronous>, transform_indices = @transform_2, window_bounds = array<i64: 1, 1024>}, {pipeline_mode = #tpu.pipeline_mode<synchronous>, transform_indices = @transform_3, window_bounds = array<i64: 1024, 1024>}, {pipeline_mode = #tpu.pipeline_mode<synchronous>, transform_indices = @transform_4, window_bounds = array<i64: 1, 1024>}, {pipeline_mode = #tpu.pipeline_mode<synchronous>, transform_indices = @transform_5, window_bounds = array<i64: 1024, 1024>}, {pipeline_mode = #tpu.pipeline_mode<synchronous>, transform_indices = @transform_6, window_bounds = array<i64: 1, 1024>}, {pipeline_mode = #tpu.pipeline_mode<synchronous>, transform_indices = @transform_7, window_bounds = array<i64: 1024, 256>}, {pipeline_mode = #tpu.pipeline_mode<synchronous>, transform_indices = @transform_8, window_bounds = array<i64: 1, 256>}, {transform_indices = @transform_9, window_bounds = array<i64: 8, 1024>}, {transform_indices = @transform_10, window_bounds = array<i64: 8, 256>}]} {
    %c0 = arith.constant 0 : index
    %c0_0 = arith.constant 0 : index
    %0 = vector.load %arg1[%c0, %c0_0] : memref<8x256xf32, #tpu.memory_space<vmem>>, vector<8x256xf32>
    %1 = arith.truncf %0 : vector<8x256xf32> to vector<8x256xbf16>
    %c0_1 = arith.constant 0 : index
    %c0_2 = arith.constant 0 : index
    %2 = vector.load %arg2[%c0_1, %c0_2] : memref<256x1024xbf16, #tpu.memory_space<vmem>>, vector<256x1024xbf16>
    %cst = arith.constant dense<0.000000e+00> : vector<8x1024xf32>
    %3 = tpu.matmul %1, %2, %cst {dimension_numbers = #tpu.dot_dimension_numbers<[1], [0], [0], [1], [0, 0, 1, 1], [], []>} : vector<8x256xbf16>, vector<256x1024xbf16>, vector<8x1024xf32> -> vector<8x1024xf32>
    %c0_3 = arith.constant 0 : index
    %c0_4 = arith.constant 0 : index
    %4 = vector.load %arg3[%c0_3, %c0_4] : memref<1x1024xf32, #tpu.memory_space<vmem>>, vector<1x1024xf32>
    %5 = vector.broadcast %4 : vector<1x1024xf32> to vector<8x1024xf32>
    %6 = arith.addf %3, %5 : vector<8x1024xf32>
    %cst_5 = arith.constant 0.000000e+00 : f32
    %7 = vector.broadcast %cst_5 : f32 to vector<8x1024xf32>
    %8 = arith.maximumf %6, %7 : vector<8x1024xf32>
    %9 = arith.truncf %8 : vector<8x1024xf32> to vector<8x1024xbf16>
    %c0_6 = arith.constant 0 : index
    %c0_7 = arith.constant 0 : index
    %10 = vector.load %arg4[%c0_6, %c0_7] : memref<1024x1024xbf16, #tpu.memory_space<vmem>>, vector<1024x1024xbf16>
    %cst_8 = arith.constant dense<0.000000e+00> : vector<8x1024xf32>
    %11 = tpu.matmul %9, %10, %cst_8 {dimension_numbers = #tpu.dot_dimension_numbers<[1], [0], [0], [1], [0, 0, 1, 1], [], []>} : vector<8x1024xbf16>, vector<1024x1024xbf16>, vector<8x1024xf32> -> vector<8x1024xf32>
    %c0_9 = arith.constant 0 : index
    %c0_10 = arith.constant 0 : index
    %12 = vector.load %arg5[%c0_9, %c0_10] : memref<1x1024xf32, #tpu.memory_space<vmem>>, vector<1x1024xf32>
    %13 = vector.broadcast %12 : vector<1x1024xf32> to vector<8x1024xf32>
    %14 = arith.addf %11, %13 : vector<8x1024xf32>
    %cst_11 = arith.constant 0.000000e+00 : f32
    %15 = vector.broadcast %cst_11 : f32 to vector<8x1024xf32>
    %16 = arith.maximumf %14, %15 : vector<8x1024xf32>
    %c0_12 = arith.constant 0 : index
    %c0_13 = arith.constant 0 : index
    %17 = vector.load %arg10[%c0_12, %c0_13] : memref<8x1024xf32, #tpu.memory_space<vmem>>, vector<8x1024xf32>
    tpu.vector_store %arg10[%c0_12, %c0_13], %16 {strides = array<i32>} : memref<8x1024xf32, #tpu.memory_space<vmem>>, vector<8x1024xf32>,
    %18 = arith.truncf %16 : vector<8x1024xf32> to vector<8x1024xbf16>
    %c0_14 = arith.constant 0 : index
    %c0_15 = arith.constant 0 : index
    %19 = vector.load %arg6[%c0_14, %c0_15] : memref<1024x1024xbf16, #tpu.memory_space<vmem>>, vector<1024x1024xbf16>
    %cst_16 = arith.constant dense<0.000000e+00> : vector<8x1024xf32>
    %20 = tpu.matmul %18, %19, %cst_16 {dimension_numbers = #tpu.dot_dimension_numbers<[1], [0], [0], [1], [0, 0, 1, 1], [], []>} : vector<8x1024xbf16>, vector<1024x1024xbf16>, vector<8x1024xf32> -> vector<8x1024xf32>
    %c0_17 = arith.constant 0 : index
    %c0_18 = arith.constant 0 : index
    %21 = vector.load %arg7[%c0_17, %c0_18] : memref<1x1024xf32, #tpu.memory_space<vmem>>, vector<1x1024xf32>
    %22 = vector.broadcast %21 : vector<1x1024xf32> to vector<8x1024xf32>
    %23 = arith.addf %20, %22 : vector<8x1024xf32>
    %cst_19 = arith.constant 0.000000e+00 : f32
    %24 = vector.broadcast %cst_19 : f32 to vector<8x1024xf32>
    %25 = arith.maximumf %23, %24 : vector<8x1024xf32>
    %26 = arith.truncf %25 : vector<8x1024xf32> to vector<8x1024xbf16>
    %c0_20 = arith.constant 0 : index
    %c0_21 = arith.constant 0 : index
    %27 = vector.load %arg8[%c0_20, %c0_21] : memref<1024x256xbf16, #tpu.memory_space<vmem>>, vector<1024x256xbf16>
    %cst_22 = arith.constant dense<0.000000e+00> : vector<8x256xf32>
    %28 = tpu.matmul %26, %27, %cst_22 {dimension_numbers = #tpu.dot_dimension_numbers<[1], [0], [0], [1], [0, 0, 1, 1], [], []>} : vector<8x1024xbf16>, vector<1024x256xbf16>, vector<8x256xf32> -> vector<8x256xf32>
    %c0_23 = arith.constant 0 : index
    %c0_24 = arith.constant 0 : index
    %29 = vector.load %arg9[%c0_23, %c0_24] : memref<1x256xf32, #tpu.memory_space<vmem>>, vector<1x256xf32>
    %30 = vector.broadcast %29 : vector<1x256xf32> to vector<8x256xf32>
    %31 = arith.addf %28, %30 : vector<8x256xf32>
    %cst_25 = arith.constant 0.000000e+00 : f32
    %32 = vector.broadcast %cst_25 : f32 to vector<8x256xf32>
    %33 = arith.maximumf %31, %32 : vector<8x256xf32>
    %c0_26 = arith.constant 0 : index
    %c0_27 = arith.constant 0 : index
    %34 = vector.load %arg11[%c0_26, %c0_27] : memref<8x256xf32, #tpu.memory_space<vmem>>, vector<8x256xf32>
    tpu.vector_store %arg11[%c0_26, %c0_27], %33 {strides = array<i32>} : memref<8x256xf32, #tpu.memory_space<vmem>>, vector<8x256xf32>,
    return
  }
  func.func @transform_0(%arg0: i32) -> (i32, i32) {
    %c0_i32 = arith.constant 0 : i32
    %c0_i32_0 = arith.constant 0 : i32
    return %arg0, %c0_i32 : i32, i32
  }
  func.func @transform_1(%arg0: i32) -> (i32, i32) {
    %c0_i32 = arith.constant 0 : i32
    %c0_i32_0 = arith.constant 0 : i32
    %c0_i32_1 = arith.constant 0 : i32
    return %c0_i32, %c0_i32_0 : i32, i32
  }
  func.func @transform_2(%arg0: i32) -> (i32, i32) {
    %c0_i32 = arith.constant 0 : i32
    %c0_i32_0 = arith.constant 0 : i32
    %c0_i32_1 = arith.constant 0 : i32
    return %c0_i32, %c0_i32_0 : i32, i32
  }
  func.func @transform_3(%arg0: i32) -> (i32, i32) {
    %c0_i32 = arith.constant 0 : i32
    %c0_i32_0 = arith.constant 0 : i32
    %c0_i32_1 = arith.constant 0 : i32
    return %c0_i32, %c0_i32_0 : i32, i32
  }
  func.func @transform_4(%arg0: i32) -> (i32, i32) {
    %c0_i32 = arith.constant 0 : i32
    %c0_i32_0 = arith.constant 0 : i32
    %c0_i32_1 = arith.constant 0 : i32
    return %c0_i32, %c0_i32_0 : i32, i32
  }
  func.func @transform_5(%arg0: i32) -> (i32, i32) {
    %c0_i32 = arith.constant 0 : i32
    %c0_i32_0 = arith.constant 0 : i32
    %c0_i32_1 = arith.constant 0 : i32
    return %c0_i32, %c0_i32_0 : i32, i32
  }
  func.func @transform_6(%arg0: i32) -> (i32, i32) {
    %c0_i32 = arith.constant 0 : i32
    %c0_i32_0 = arith.constant 0 : i32
    %c0_i32_1 = arith.constant 0 : i32
    return %c0_i32, %c0_i32_0 : i32, i32
  }
  func.func @transform_7(%arg0: i32) -> (i32, i32) {
    %c0_i32 = arith.constant 0 : i32
    %c0_i32_0 = arith.constant 0 : i32
    %c0_i32_1 = arith.constant 0 : i32
    return %c0_i32, %c0_i32_0 : i32, i32
  }
  func.func @transform_8(%arg0: i32) -> (i32, i32) {
    %c0_i32 = arith.constant 0 : i32
    %c0_i32_0 = arith.constant 0 : i32
    %c0_i32_1 = arith.constant 0 : i32
    return %c0_i32, %c0_i32_0 : i32, i32
  }
  func.func @transform_9(%arg0: i32) -> (i32, i32) {
    %c0_i32 = arith.constant 0 : i32
    %c0_i32_0 = arith.constant 0 : i32
    return %arg0, %c0_i32 : i32, i32
  }
  func.func @transform_10(%arg0: i32) -> (i32, i32) {
    %c0_i32 = arith.constant 0 : i32
    %c0_i32_0 = arith.constant 0 : i32
    return %arg0, %c0_i32 : i32, i32
  }
}

</mosaic_0001>

<bundles_post_ra>
// kernel: tpu_custom_call.1
= control target key start
LH: loop header
LB: loop body
LE: loop exit
PB: predicated region body
PF: predicated region fallthrough
CT: control target
= control target key end

     0   :  { %16 = vsyncpa [#allocation3], 0  ;;  %s12034_s0 = inlined_call_operand.hbm [shape: f32[8,256], index: 0, kind: input, shape index: {}]   ;;  %s12035_s1 = inlined_call_operand.hbm [shape: bf16[256,1024], index: 1, kind: input, shape index: {}]   ;;  %s12036_s2 = inlined_call_operand.hbm [shape: f32[1,1024], index: 2, kind: input, shape index: {}]   ;;  %s12037_s3 = inlined_call_operand.hbm [shape: bf16[1024,1024], index: 3, kind: input, shape index: {}]   ;;  %s12038_s4 = inlined_call_operand.hbm [shape: f32[1,1024], index: 4, kind: input, shape index: {}]   ;;  %s12039_s5 = inlined_call_operand.hbm [shape: bf16[1024,1024], index: 5, kind: input, shape index: {}]   ;;  %s12040_s6 = inlined_call_operand.hbm [shape: f32[1,1024], index: 6, kind: input, shape index: {}]   ;;  %s12041_s7 = inlined_call_operand.hbm [shape: bf16[1024,256], index: 7, kind: input, shape index: {}]   ;;  %s12042_s8 = inlined_call_operand.hbm [shape: f32[1,256], index: 8, kind: input, shape index: {}]   ;;  %s12043_s9 = inlined_call_operand.hbm [shape: f32[8,1024], index: 9, kind: output, shape index: {0}]   ;;  %s12044_s10 = inlined_call_operand.hbm [shape: f32[8,256], index: 10, kind: output, shape index: {1}]  }
   0x1   :  { %17 = vsyncpa [#allocation6], 0 }
   0x2   :  { %18 = vsyncpa [#allocation9], 0 }
   0x3   :  { %19 = vsyncpa [#allocation12], 0 }
   0x4   :  { %20 = vsyncpa [#allocation15], 0 }
   0x5   :  { %21 = vsyncpa [#allocation4], 0 }
   0x6   :  { %22 = vsyncpa [#allocation19], 0  ;;  %s11574_s13 = smov [#allocation5]   ;;  %s11318_s17 = scalar_lea.hbm %s12035_s1, 16384 }
   0x7   :  { %s38_s14 = sshll.u32 %s11574_s13, 4  ;;  %p11319_p0 = scmp.ne.s32.totalorder %s12035_s1, %s11318_s17  ;;  %s39_s14 = int_to_ptr.vmem [resolvable:$true] %s38_s14 }
   0x8   :  { %p11322_p1 = scmp.lt.u32.totalorder %s11318_s17, %s12035_s1 }
   0xa   :  { %p11324_p2 = pnand %p11322_p1, %p11319_p0 }
   0xc   :  { %11327 = shalt.err (!%p11324_p2)
}
   0xd   :  { %s11328_s22 = scalar_lea.vmem %s39_s14, 16384  ;;  %p11333_p4 = scmp.lt.s32.totalorder %s39_s14, %s39_s14 }
   0xe   :  { %p11329_p3 = scmp.ne.s32.totalorder %s39_s14, %s11328_s22  ;;  %p11334_p5 = scmp.lt.s32.totalorder %s11328_s22, %s11328_s22 }
  0x10   :  { %p11335_p6 = por %p11334_p5, %p11333_p4 }
  0x12   :  { %p11336_p7 = pnand %p11335_p6, %p11329_p3 }
  0x14   :  { %11339 = shalt.err (!%p11336_p7)
}
  0x15   :  { %s11575_s23 = smov 512   ;;  %s11576_s24 = smov 32  }
  0x16   :  { %44 = dma.hbm_to_vmem [thread:$0]  %s12035_s1, 16384, %s39_s14, [#allocation6], %s11575_s23, %s11575_s23, %s11576_s24  }
  0x17   :  { %s11577_s27 = smov [#allocation8]   ;;  %s11578_s29 = smov [#allocation11]  }
  0x18   :  { %s60_s28 = sshll.u32 %s11577_s27, 4  ;;  %s82_s30 = sshll.u32 %s11578_s29, 4  ;;  %s61_s28 = int_to_ptr.vmem [resolvable:$true] %s60_s28  ;;  %s83_s30 = int_to_ptr.vmem [resolvable:$true] %s82_s30 }
  0x19   :  { %s11340_s13 = scalar_lea.hbm %s12037_s3, 65536 }
  0x1a   :  { %p11341_p8 = scmp.ne.s32.totalorder %s12037_s3, %s11340_s13  ;;  %p11344_p9 = scmp.lt.u32.totalorder %s11340_s13, %s12037_s3 }
  0x1c   :  { %p11346_p10 = pnand %p11344_p9, %p11341_p8 }
  0x1e   :  { %11349 = shalt.err (!%p11346_p10)
}
  0x1f   :  { %s11350_s1 = scalar_lea.vmem %s61_s28, 65536  ;;  %p11355_p12 = scmp.lt.s32.totalorder %s61_s28, %s61_s28 }
  0x20   :  { %p11351_p11 = scmp.ne.s32.totalorder %s61_s28, %s11350_s1  ;;  %p11356_p13 = scmp.lt.s32.totalorder %s11350_s1, %s11350_s1 }
  0x22   :  { %p11357_p0 = por %p11356_p13, %p11355_p12 }
  0x24   :  { %p11358_p1 = pnand %p11357_p0, %p11351_p11 }
  0x26   :  { %11361 = shalt.err (!%p11358_p1)
}
  0x27   :  { %66 = dma.hbm_to_vmem [thread:$0]  %s12037_s3, 65536, %s61_s28, [#allocation9], %s11575_s23, %s11575_s23, %s11576_s24  }
  0x28   :  { %s11362_s22 = scalar_lea.hbm %s12039_s5, 65536 }
  0x29   :  { %p11363_p2 = scmp.ne.s32.totalorder %s12039_s5, %s11362_s22  ;;  %p11366_p3 = scmp.lt.u32.totalorder %s11362_s22, %s12039_s5 }
  0x2b   :  { %p11368_p4 = pnand %p11366_p3, %p11363_p2 }
  0x2d   :  { %11371 = shalt.err (!%p11368_p4)
}
  0x2e   :  { %s11372_s11 = scalar_lea.vmem %s83_s30, 65536  ;;  %p11377_p6 = scmp.lt.s32.totalorder %s83_s30, %s83_s30 }
  0x2f   :  { %p11373_p5 = scmp.ne.s32.totalorder %s83_s30, %s11372_s11  ;;  %p11378_p7 = scmp.lt.s32.totalorder %s11372_s11, %s11372_s11 }
  0x31   :  { %p11379_p8 = por %p11378_p7, %p11377_p6 }
  0x33   :  { %p11380_p9 = pnand %p11379_p8, %p11373_p5 }
  0x35   :  { %11383 = shalt.err (!%p11380_p9)
}
  0x36   :  { %88 = dma.hbm_to_vmem [thread:$0]  %s12039_s5, 65536, %s83_s30, [#allocation12], %s11575_s23, %s11575_s23, %s11576_s24  }
  0x37   :  { %s11579_s12 = smov [#allocation14]   ;;  %s11384_s17 = scalar_lea.hbm %s12041_s7, 16384 }
  0x38   :  { %s104_s13 = sshll.u32 %s11579_s12, 4  ;;  %p11385_p10 = scmp.ne.s32.totalorder %s12041_s7, %s11384_s17  ;;  %s105_s13 = int_to_ptr.vmem [resolvable:$true] %s104_s13 }
  0x39   :  { %p11388_p11 = scmp.lt.u32.totalorder %s11384_s17, %s12041_s7 }
  0x3b   :  { %p11390_p12 = pnand %p11388_p11, %p11385_p10 }
  0x3d   :  { %11393 = shalt.err (!%p11390_p12)
}
  0x3e   :  { %s11394_s20 = scalar_lea.vmem %s105_s13, 16384  ;;  %p11399_p0 = scmp.lt.s32.totalorder %s105_s13, %s105_s13 }
  0x3f   :  { %p11395_p13 = scmp.ne.s32.totalorder %s105_s13, %s11394_s20  ;;  %p11400_p1 = scmp.lt.s32.totalorder %s11394_s20, %s11394_s20 }
  0x41   :  { %p11401_p2 = por %p11400_p1, %p11399_p0 }
  0x43   :  { %p11402_p3 = pnand %p11401_p2, %p11395_p13 }
  0x45   :  { %11405 = shalt.err (!%p11402_p3)
}
  0x46   :  { %s11580_s5 = smov 128   ;;  %s11581_s23 = smov 8  }
  0x47   :  { %110 = dma.hbm_to_vmem [thread:$0]  %s12041_s7, 16384, %s105_s13, [#allocation15], %s11580_s5, %s11580_s5, %s11581_s23  }
  0x48   :  { %s11582_s21 = smov [#allocation2]   ;;  %s11583_s25 = smov [#allocation7]  }
  0x49   :  { %s29_s22 = sshll.u32 %s11582_s21, 4  ;;  %s51_s26 = sshll.u32 %s11583_s25, 4  ;;  %s30_s22 = int_to_ptr.vmem [resolvable:$true] %s29_s22  ;;  %s52_s26 = int_to_ptr.vmem [resolvable:$true] %s51_s26 }
  0x4a   :  { %s11406_s11 = scalar_lea.hbm %s12034_s0, 256 }
  0x4b   :  { %p11407_p4 = scmp.ne.s32.totalorder %s12034_s0, %s11406_s11  ;;  %p11410_p5 = scmp.lt.u32.totalorder %s11406_s11, %s12034_s0 }
  0x4d   :  { %p11412_p6 = pnand %p11410_p5, %p11407_p4 }
  0x4f   :  { %11415 = shalt.err (!%p11412_p6)
}
  0x50   :  { %s11416_s7 = scalar_lea.vmem %s30_s22, 256  ;;  %p11421_p8 = scmp.lt.s32.totalorder %s30_s22, %s30_s22 }
  0x51   :  { %p11417_p7 = scmp.ne.s32.totalorder %s30_s22, %s11416_s7  ;;  %p11422_p9 = scmp.lt.s32.totalorder %s11416_s7, %s11416_s7 }
  0x53   :  { %p11423_p10 = por %p11422_p9, %p11421_p8 }
  0x55   :  { %p11424_p11 = pnand %p11423_p10, %p11417_p7 }
  0x57   :  { %11427 = shalt.err (!%p11424_p11)
}
  0x58   :  { %32 = dma.hbm_to_vmem [thread:$0]  %s12034_s0, 256, %s30_s22, [#allocation3]  }
  0x59   :  { %s11428_s1 = scalar_lea.hbm %s12036_s2, 128 }
  0x5a   :  { %p11429_p12 = scmp.ne.s32.totalorder %s12036_s2, %s11428_s1  ;;  %p11432_p13 = scmp.lt.u32.totalorder %s11428_s1, %s12036_s2 }
  0x5c   :  { %p11434_p0 = pnand %p11432_p13, %p11429_p12 }
  0x5e   :  { %11437 = shalt.err (!%p11434_p0)
}
  0x5f   :  { %s11438_s23 = scalar_lea.vmem %s52_s26, 128  ;;  %p11443_p2 = scmp.lt.s32.totalorder %s52_s26, %s52_s26 }
  0x60   :  { %p11439_p1 = scmp.ne.s32.totalorder %s52_s26, %s11438_s23  ;;  %p11444_p3 = scmp.lt.s32.totalorder %s11438_s23, %s11438_s23 }
  0x62   :  { %p11445_p4 = por %p11444_p3, %p11443_p2 }
  0x64   :  { %p11446_p5 = pnand %p11445_p4, %p11439_p1 }
  0x66   :  { %11449 = shalt.err (!%p11446_p5)
}
  0x67   :  { %54 = dma.hbm_to_vmem [thread:$0]  %s12036_s2, 128, %s52_s26, [#allocation6]  }
  0x68   :  { %s11584_s30 = smov [#allocation10]   ;;  %s11585_s22 = smov [#allocation13]  }
  0x69   :  { %s73_s21 = sshll.u32 %s11584_s30, 4  ;;  %s95_s25 = sshll.u32 %s11585_s22, 4  ;;  %s74_s21 = int_to_ptr.vmem [resolvable:$true] %s73_s21  ;;  %s96_s25 = int_to_ptr.vmem [resolvable:$true] %s95_s25 }
  0x6a   :  { %s11450_s11 = scalar_lea.hbm %s12038_s4, 128 }
  0x6b   :  { %p11451_p6 = scmp.ne.s32.totalorder %s12038_s4, %s11450_s11  ;;  %p11454_p7 = scmp.lt.u32.totalorder %s11450_s11, %s12038_s4 }
  0x6d   :  { %p11456_p8 = pnand %p11454_p7, %p11451_p6 }
  0x6f   :  { %11459 = shalt.err (!%p11456_p8)
}
  0x70   :  { %s11460_s2 = scalar_lea.vmem %s74_s21, 128  ;;  %p11465_p10 = scmp.lt.s32.totalorder %s74_s21, %s74_s21 }
  0x71   :  { %p11461_p9 = scmp.ne.s32.totalorder %s74_s21, %s11460_s2  ;;  %p11466_p11 = scmp.lt.s32.totalorder %s11460_s2, %s11460_s2 }
  0x73   :  { %p11467_p12 = por %p11466_p11, %p11465_p10 }
  0x75   :  { %p11468_p13 = pnand %p11467_p12, %p11461_p9 }
  0x77   :  { %11471 = shalt.err (!%p11468_p13)
}
  0x78   :  { %76 = dma.hbm_to_vmem [thread:$0]  %s12038_s4, 128, %s74_s21, [#allocation9]  }
  0x79   :  { %s11472_s17 = scalar_lea.hbm %s12040_s6, 128 }
  0x7a   :  { %p11473_p0 = scmp.ne.s32.totalorder %s12040_s6, %s11472_s17  ;;  %p11476_p1 = scmp.lt.u32.totalorder %s11472_s17, %s12040_s6 }
  0x7c   :  { %p11478_p2 = pnand %p11476_p1, %p11473_p0 }
  0x7e   :  { %11481 = shalt.err (!%p11478_p2)
}
  0x7f   :  { %s11482_s20 = scalar_lea.vmem %s96_s25, 128  ;;  %p11487_p4 = scmp.lt.s32.totalorder %s96_s25, %s96_s25 }
  0x80   :  { %p11483_p3 = scmp.ne.s32.totalorder %s96_s25, %s11482_s20  ;;  %p11488_p5 = scmp.lt.s32.totalorder %s11482_s20, %s11482_s20 }
  0x82   :  { %p11489_p6 = por %p11488_p5, %p11487_p4 }
  0x84   :  { %p11490_p7 = pnand %p11489_p6, %p11483_p3 }
  0x86   :  { %11493 = shalt.err (!%p11490_p7)
}
  0x87   :  { %98 = dma.hbm_to_vmem [thread:$0]  %s12040_s6, 128, %s96_s25, [#allocation12]  }
  0x88   :  { %s11586_s23 = smov [#allocation16]   ;;  %s11494_s21 = scalar_lea.hbm %s12042_s8, 32 }
  0x89   :  { %s117_s0 = sshll.u32 %s11586_s23, 4  ;;  %p11495_p8 = scmp.ne.s32.totalorder %s12042_s8, %s11494_s21  ;;  %s118_s0 = int_to_ptr.vmem [resolvable:$true] %s117_s0 }
  0x8a   :  { %p11498_p9 = scmp.lt.u32.totalorder %s11494_s21, %s12042_s8 }
  0x8c   :  { %p11500_p10 = pnand %p11498_p9, %p11495_p8 }
  0x8e   :  { %11503 = shalt.err (!%p11500_p10)
}
  0x8f   :  { %s11504_s3 = scalar_lea.vmem %s118_s0, 32  ;;  %p11509_p12 = scmp.lt.s32.totalorder %s118_s0, %s118_s0 }
  0x90   :  { %p11505_p11 = scmp.ne.s32.totalorder %s118_s0, %s11504_s3  ;;  %p11510_p13 = scmp.lt.s32.totalorder %s11504_s3, %s11504_s3 }
  0x92   :  { %p11511_p0 = por %p11510_p13, %p11509_p12 }
  0x94   :  { %p11512_p1 = pnand %p11511_p0, %p11505_p11 }
  0x96   :  { %11515 = shalt.err (!%p11512_p1)
}
  0x97   :  { %120 = dma.hbm_to_vmem [thread:$0]  %s12042_s8, 32, %s118_s0, [#allocation15]  }
  0x98   :  { %11560 = dma.done.wait [#allocation3], 256  }
  0x99   :  { %11561 = vsyncadd [#allocation3], 4294967040 }
  0x9a   :  { %11562 = dma.done.wait [#allocation6], 16512  }
  0x9b   :  { %11563 = vsyncadd [#allocation6], 4294950784 }
  0x9c   :  { %11564 = dma.done.wait [#allocation9], 65664  }
  0x9d   :  { %11565 = vsyncadd [#allocation9], 4294901632 }
  0x9e   :  { %11566 = dma.done.wait [#allocation12], 65664  }
  0x9f   :  { %11567 = vsyncadd [#allocation12], 4294901632 }
  0xa0   :  { %11568 = dma.done.wait [#allocation15], 16416  }
  0xa1   :  { %11569 = vsyncadd [#allocation15], 4294950880  ;;  %v152_v0 = vld [vmem:[#allocation5] sm:$0xff]  ;;  %v149_v17 = vld [vmem:[#allocation2 + $0x8] sm:$0xff]  ;;  %s11587_s8 = smov [#allocation17]  }
  0xa2   :  { %v156_v1 = vld [vmem:[#allocation5 + $0x20] sm:$0xff]  ;;  %v11761_v18 = vpack.c.bf16 %v149_v17, %v149_v17  ;;  %s9676_s28 = sshll.u32 %s11587_s8, 4  ;;  %s9677_s28 = int_to_ptr.vmem [resolvable:$true] %s9676_s28 }
  0xa3   :  { %v160_v2 = vld [vmem:[#allocation5 + $0x40] sm:$0xff]  ;;  %v9704_v3 = vcombine.high %v152_v0, %v156_v1  ;;  %v9703_v4 = vcombine.low %v152_v0, %v156_v1  ;;  %v153_v0 = vld [vmem:[#allocation5 + $0x8] sm:$0xff]  ;;  %s11516_s12 = scalar_lea.vmem %s9677_s28, 1024  ;;  %p11521_p3 = scmp.lt.s32.totalorder %s9677_s28, %s9677_s28 }
  0xa4   :  { %v164_v5 = vld [vmem:[#allocation5 + $0x60] sm:$0xff]  ;;  %994 = vmatprep.mubr.bf16.mxu1 %v11761_v18  ;;  %v157_v1 = vld [vmem:[#allocation5 + $0x28] sm:$0xff]  ;;  %p11517_p2 = scmp.ne.s32.totalorder %s9677_s28, %s11516_s12  ;;  %p11522_p4 = scmp.lt.s32.totalorder %s11516_s12, %s11516_s12 }
  0xa5   :  { %v9712_v6 = vcombine.high %v160_v2, %v164_v5  ;;  %v168_v7 = vld [vmem:[#allocation5 + $0x80] sm:$0xff]  ;;  %962 = vmatprep.subr.bf16.mxu1 %v9704_v3  ;;  %v9711_v9 = vcombine.low %v160_v2, %v164_v5  ;;  %v148_v3 = vld [vmem:[#allocation2] sm:$0xff]  ;;  %v161_v5 = vld [vmem:[#allocation5 + $0x48] sm:$0xff] }
  0xa6   :  { %v172_v8 = vld [vmem:[#allocation5 + $0xa0] sm:$0xff]  ;;  %963 = vmatpush1.bf16.msra.mxu1 %v9703_v4  ;;  %p11523_p5 = por %p11522_p4, %p11521_p3 }
  0xa7   :  { %964 = vmatprep.subr.bf16.mxu1 %v9712_v6  ;;  %v9720_v10 = vcombine.high %v168_v7, %v172_v8  ;;  %v176_v11 = vld [vmem:[#allocation5 + $0xc0] sm:$0xff]  ;;  %v9719_v13 = vcombine.low %v168_v7, %v172_v8  ;;  %v165_v6 = vld [vmem:[#allocation5 + $0x68] sm:$0xff]  ;;  %v9706_v7 = vcombine.high %v153_v0, %v157_v1  ;;  %v11764_v8 = vpack.c.bf16 %v148_v3, %v148_v3 }
  0xa8   :  { %v180_v12 = vld [vmem:[#allocation5 + $0xe0] sm:$0xff]  ;;  %p11524_p6 = pnand %p11523_p5, %p11517_p2 }
  0xa9   :  { %v9728_v14 = vcombine.high %v176_v11, %v180_v12  ;;  %v184_v15 = vld [vmem:[#allocation5 + $0x100] sm:$0xff]  ;;  %v9727_v19 = vcombine.low %v176_v11, %v180_v12  ;;  %v173_v11 = vld [vmem:[#allocation5 + $0xa8] sm:$0xff]  ;;  %v9714_v12 = vcombine.high %v161_v5, %v165_v6 }
  0xaa   :  { %965 = vmatpush1.bf16.msra.mxu1 %v9711_v9  ;;  %v188_v16 = vld [vmem:[#allocation5 + $0x120] sm:$0xff]  ;;  %v9705_v9 = vcombine.low %v153_v0, %v157_v1 }
  0xab   :  { %966 = vmatprep.subr.bf16.mxu1 %v9720_v10  ;;  %v9736_v20 = vcombine.high %v184_v15, %v188_v16  ;;  %v192_v21 = vld [vmem:[#allocation5 + $0x140] sm:$0xff]  ;;  %v9735_v23 = vcombine.low %v184_v15, %v188_v16  ;;  %v169_v10 = vld [vmem:[#allocation5 + $0x88] sm:$0xff] }
  0xac   :  { %v196_v22 = vld [vmem:[#allocation5 + $0x160] sm:$0xff]  ;;  %v181_v15 = vld [vmem:[#allocation5 + $0xe8] sm:$0xff]  ;;  %v9722_v16 = vcombine.high %v169_v10, %v173_v11  ;;  %v9721_v17 = vcombine.low %v169_v10, %v173_v11 }
  0xad   :  { %v9744_v24 = vcombine.high %v192_v21, %v196_v22  ;;  %v200_v25 = vld [vmem:[#allocation5 + $0x180] sm:$0xff]  ;;  %v9743_v27 = vcombine.low %v192_v21, %v196_v22 }
  0xae   :  { %967 = vmatpush1.bf16.msra.mxu1 %v9719_v13  ;;  %v204_v26 = vld [vmem:[#allocation5 + $0x1a0] sm:$0xff]  ;;  %v9713_v13 = vcombine.low %v161_v5, %v165_v6  ;;  %v253_v5 = vld [vmem:[#allocation5 + $0x328] sm:$0xff] }
  0xaf   :  { %968 = vmatprep.subr.bf16.mxu1 %v9728_v14  ;;  %v9752_v28 = vcombine.high %v200_v25, %v204_v26  ;;  %v208_v29 = vld [vmem:[#allocation5 + $0x1c0] sm:$0xff]  ;;  %v9751_v31 = vcombine.low %v200_v25, %v204_v26  ;;  %v177_v14 = vld [vmem:[#allocation5 + $0xc8] sm:$0xff] }
  0xb0   :  { %v212_v30 = vld [vmem:[#allocation5 + $0x1e0] sm:$0xff]  ;;  %v9730_v21 = vcombine.high %v177_v14, %v181_v15  ;;  %v9729_v22 = vcombine.low %v177_v14, %v181_v15  ;;  %v197_v25 = vld [vmem:[#allocation5 + $0x168] sm:$0xff] }
  0xb1   :  { %v9760_v32 = vcombine.high %v208_v29, %v212_v30  ;;  %v216_v33 = vld [vmem:[#allocation5 + $0x200] sm:$0xff]  ;;  %v9759_v35 = vcombine.low %v208_v29, %v212_v30  ;;  %v205_v29 = vld [vmem:[#allocation5 + $0x1a8] sm:$0xff] }
  0xb2   :  { %969 = vmatpush1.bf16.msra.mxu1 %v9727_v19  ;;  %v220_v34 = vld [vmem:[#allocation5 + $0x220] sm:$0xff]  ;;  %v185_v19 = vld [vmem:[#allocation5 + $0x108] sm:$0xff] }
  0xb3   :  { %970 = vmatprep.subr.bf16.mxu1 %v9736_v20  ;;  %v224_v36 = vld [vmem:[#allocation5 + $0x240] sm:$0xff]  ;;  %v9768_v38 = vcombine.high %v216_v33, %v220_v34  ;;  %v9767_v39 = vcombine.low %v216_v33, %v220_v34  ;;  %v189_v20 = vld [vmem:[#allocation5 + $0x128] sm:$0xff] }
  0xb4   :  { %v228_v37 = vld [vmem:[#allocation5 + $0x260] sm:$0xff]  ;;  %v9737_v26 = vcombine.low %v185_v19, %v189_v20  ;;  %v213_v33 = vld [vmem:[#allocation5 + $0x1e8] sm:$0xff] }
  0xb5   :  { %v232_v40 = vld [vmem:[#allocation5 + $0x280] sm:$0xff]  ;;  %v9776_v42 = vcombine.high %v224_v36, %v228_v37  ;;  %v9775_v43 = vcombine.low %v224_v36, %v228_v37  ;;  %v217_v36 = vld [vmem:[#allocation5 + $0x208] sm:$0xff] }
  0xb6   :  { %971 = vmatpush1.bf16.msra.mxu1 %v9735_v23  ;;  %v236_v41 = vld [vmem:[#allocation5 + $0x2a0] sm:$0xff]  ;;  %v9738_v23 = vcombine.high %v185_v19, %v189_v20  ;;  %v221_v37 = vld [vmem:[#allocation5 + $0x228] sm:$0xff] }
  0xb7   :  { %972 = vmatprep.subr.bf16.mxu1 %v9744_v24  ;;  %v240_v44 = vld [vmem:[#allocation5 + $0x2c0] sm:$0xff]  ;;  %v9784_v46 = vcombine.high %v232_v40, %v236_v41  ;;  %v9783_v47 = vcombine.low %v232_v40, %v236_v41  ;;  %v193_v24 = vld [vmem:[#allocation5 + $0x148] sm:$0xff] }
  0xb8   :  { %v244_v45 = vld [vmem:[#allocation5 + $0x2e0] sm:$0xff]  ;;  %v9745_v30 = vcombine.low %v193_v24, %v197_v25  ;;  %v1174_v6 = vld [vmem:[#allocation8 + $0x100] sm:$0xff] }
  0xb9   :  { %v248_v48 = vld [vmem:[#allocation5 + $0x300] sm:$0xff]  ;;  %v9792_v50 = vcombine.high %v240_v44, %v244_v45  ;;  %v9791_v51 = vcombine.low %v240_v44, %v244_v45  ;;  %v225_v44 = vld [vmem:[#allocation5 + $0x248] sm:$0xff] }
  0xba   :  { %973 = vmatpush1.bf16.msra.mxu1 %v9743_v27  ;;  %v252_v49 = vld [vmem:[#allocation5 + $0x320] sm:$0xff]  ;;  %v9746_v27 = vcombine.high %v193_v24, %v197_v25  ;;  %v229_v45 = vld [vmem:[#allocation5 + $0x268] sm:$0xff] }
  0xbb   :  { %974 = vmatprep.subr.bf16.mxu1 %v9752_v28  ;;  %v256_v52 = vld [vmem:[#allocation5 + $0x340] sm:$0xff]  ;;  %v9800_v54 = vcombine.high %v248_v48, %v252_v49  ;;  %v9799_v55 = vcombine.low %v248_v48, %v252_v49  ;;  %v201_v28 = vld [vmem:[#allocation5 + $0x188] sm:$0xff]  ;;  %v9769_v48 = vcombine.low %v217_v36, %v221_v37 }
  0xbc   :  { %v260_v53 = vld [vmem:[#allocation5 + $0x360] sm:$0xff]  ;;  %v9753_v34 = vcombine.low %v201_v28, %v205_v29  ;;  %v261_v14 = vld [vmem:[#allocation5 + $0x368] sm:$0xff] }
  0xbd   :  { %v264_v56 = vld [vmem:[#allocation5 + $0x380] sm:$0xff]  ;;  %v9808_v58 = vcombine.high %v256_v52, %v260_v53  ;;  %v9807_v59 = vcombine.low %v256_v52, %v260_v53  ;;  %v233_v52 = vld [vmem:[#allocation5 + $0x288] sm:$0xff] }
  0xbe   :  { %975 = vmatpush1.bf16.msra.mxu1 %v9751_v31  ;;  %v268_v57 = vld [vmem:[#allocation5 + $0x3a0] sm:$0xff]  ;;  %v9754_v31 = vcombine.high %v201_v28, %v205_v29  ;;  %v237_v53 = vld [vmem:[#allocation5 + $0x2a8] sm:$0xff] }
  0xbf   :  { %976 = vmatprep.subr.bf16.mxu1 %v9760_v32  ;;  %v272_v60 = vld [vmem:[#allocation5 + $0x3c0] sm:$0xff]  ;;  %v9816_v62 = vcombine.high %v264_v56, %v268_v57  ;;  %v9815_v63 = vcombine.low %v264_v56, %v268_v57  ;;  %v209_v32 = vld [vmem:[#allocation5 + $0x1c8] sm:$0xff]  ;;  %v9777_v56 = vcombine.low %v225_v44, %v229_v45  ;;  %v9785_v0 = vcombine.low %v233_v52, %v237_v53 }
  0xc0   :  { %v276_v61 = vld [vmem:[#allocation5 + $0x3e0] sm:$0xff]  ;;  %v9761_v40 = vcombine.low %v209_v32, %v213_v33  ;;  %v1182_v15 = vld [vmem:[#allocation8 + $0x140] sm:$0xff] }
  0xc1   :  { %v9824_v2 = vcombine.high %v272_v60, %v276_v61  ;;  %v9823_v4 = vcombine.low %v272_v60, %v276_v61  ;;  %v241_v60 = vld [vmem:[#allocation5 + $0x2c8] sm:$0xff] }
  0xc2   :  { %977 = vmatpush1.bf16.msra.mxu1 %v9759_v35  ;;  %v9762_v35 = vcombine.high %v209_v32, %v213_v33  ;;  %v245_v61 = vld [vmem:[#allocation5 + $0x2e8] sm:$0xff] }
  0xc3   :  { %978 = vmatprep.subr.bf16.mxu1 %v9768_v38  ;;  %v1142_v38 = vld [vmem:[#allocation8] sm:$0xff] }
  0xc4   :  { %v1190_v24 = vld [vmem:[#allocation8 + $0x180] sm:$0xff] }
  0xc5   :  { %v1194_v25 = vld [vmem:[#allocation8 + $0x1a0] sm:$0xff] }
  0xc6   :  { %979 = vmatpush1.bf16.msra.mxu1 %v9767_v39  ;;  %v1146_v39 = vld [vmem:[#allocation8 + $0x20] sm:$0xff]  ;;  %v9879_v29 = vcombine.low %v1190_v24, %v1194_v25 }
  0xc7   :  { %980 = vmatprep.subr.bf16.mxu1 %v9776_v42  ;;  %v9832_v41 = vcombine.high %v1142_v38, %v1146_v39  ;;  %v9770_v42 = vcombine.high %v217_v36, %v221_v37  ;;  %v1198_v32 = vld [vmem:[#allocation8 + $0x1c0] sm:$0xff] }
  0xc8   :  { %v1202_v33 = vld [vmem:[#allocation8 + $0x1e0] sm:$0xff] }
  0xc9   :  { %4256 = vmatprep.subr.bf16.mxu0 %v9832_v41  ;;  %v9887_v37 = vcombine.low %v1198_v32, %v1202_v33  ;;  %v1210_v41 = vld [vmem:[#allocation8 + $0x220] sm:$0xff] }
  0xca   :  { %981 = vmatpush1.bf16.msra.mxu1 %v9775_v43  ;;  %v9831_v43 = vcombine.low %v1142_v38, %v1146_v39  ;;  %v154_v38 = vld [vmem:[#allocation5 + $0x10] sm:$0xff] }
  0xcb   :  { %982 = vmatprep.subr.bf16.mxu1 %v9784_v46  ;;  %v1150_v46 = vld [vmem:[#allocation8 + $0x40] sm:$0xff]  ;;  %v158_v39 = vld [vmem:[#allocation5 + $0x30] sm:$0xff] }
  0xcc   :  { %4257 = vmatpush1.bf16.msra.mxu0 %v9831_v43 }
  0xce   :  { %983 = vmatpush1.bf16.msra.mxu1 %v9783_v47  ;;  %v1154_v47 = vld [vmem:[#allocation8 + $0x60] sm:$0xff] }
  0xcf   :  { %984 = vmatprep.subr.bf16.mxu1 %v9792_v50  ;;  %v9840_v49 = vcombine.high %v1150_v46, %v1154_v47  ;;  %v9778_v50 = vcombine.high %v225_v44, %v229_v45  ;;  %v9708_v44 = vcombine.high %v154_v38, %v158_v39 }
  0xd1   :  { %4258 = vmatprep.subr.bf16.mxu0 %v9840_v49  ;;  %v1218_v49 = vld [vmem:[#allocation8 + $0x260] sm:$0xff] }
  0xd2   :  { %985 = vmatpush1.bf16.msra.mxu1 %v9791_v51  ;;  %v9839_v51 = vcombine.low %v1150_v46, %v1154_v47  ;;  %v162_v46 = vld [vmem:[#allocation5 + $0x50] sm:$0xff] }
  0xd3   :  { %986 = vmatprep.subr.bf16.mxu1 %v9800_v54  ;;  %v1158_v54 = vld [vmem:[#allocation8 + $0x80] sm:$0xff]  ;;  %v166_v47 = vld [vmem:[#allocation5 + $0x70] sm:$0xff] }
  0xd4   :  { %4259 = vmatpush1.bf16.msra.mxu0 %v9839_v51 }
  0xd6   :  { %987 = vmatpush1.bf16.msra.mxu1 %v9799_v55  ;;  %v1162_v55 = vld [vmem:[#allocation8 + $0xa0] sm:$0xff] }
  0xd7   :  { %988 = vmatprep.subr.bf16.mxu1 %v9808_v58  ;;  %v9848_v57 = vcombine.high %v1158_v54, %v1162_v55  ;;  %v9786_v58 = vcombine.high %v233_v52, %v237_v53  ;;  %v9716_v52 = vcombine.high %v162_v46, %v166_v47 }
  0xd9   :  { %4260 = vmatprep.subr.bf16.mxu0 %v9848_v57  ;;  %v1226_v57 = vld [vmem:[#allocation8 + $0x2a0] sm:$0xff] }
  0xda   :  { %989 = vmatpush1.bf16.msra.mxu1 %v9807_v59  ;;  %v9847_v59 = vcombine.low %v1158_v54, %v1162_v55  ;;  %v170_v54 = vld [vmem:[#allocation5 + $0x90] sm:$0xff] }
  0xdb   :  { %990 = vmatprep.subr.bf16.mxu1 %v9816_v62  ;;  %v1166_v62 = vld [vmem:[#allocation8 + $0xc0] sm:$0xff]  ;;  %v174_v55 = vld [vmem:[#allocation5 + $0xb0] sm:$0xff] }
  0xdc   :  { %4261 = vmatpush1.bf16.msra.mxu0 %v9847_v59 }
  0xde   :  { %991 = vmatpush1.bf16.msra.mxu1 %v9815_v63  ;;  %v1170_v63 = vld [vmem:[#allocation8 + $0xe0] sm:$0xff] }
  0xdf   :  { %992 = vmatprep.subr.bf16.mxu1 %v9824_v2  ;;  %v9856_v1 = vcombine.high %v1166_v62, %v1170_v63  ;;  %v9794_v2 = vcombine.high %v241_v60, %v245_v61  ;;  %v9855_v3 = vcombine.low %v1166_v62, %v1170_v63  ;;  %v178_v62 = vld [vmem:[#allocation5 + $0xd0] sm:$0xff] }
  0xe0   :  { %v182_v63 = vld [vmem:[#allocation5 + $0xf0] sm:$0xff] }
  0xe1   :  { %4262 = vmatprep.subr.bf16.mxu0 %v9856_v1  ;;  %v1234_v1 = vld [vmem:[#allocation8 + $0x2e0] sm:$0xff] }
  0xe2   :  { %993 = vmatpush1.bf16.msra.mxu1 %v9823_v4  ;;  %v249_v4 = vld [vmem:[#allocation5 + $0x308] sm:$0xff]  ;;  %4263 = vmatpush1.bf16.msra.mxu0 %v9855_v3 }
  0xe3   :  { %1003 = vmatprep.subr.bf16.mxu1 %v9706_v7  ;;  %v1178_v7 = vld [vmem:[#allocation8 + $0x120] sm:$0xff]  ;;  %v9802_v11 = vcombine.high %v249_v4, %v253_v5 }
  0xe4   :  { %v9864_v10 = vcombine.high %v1174_v6, %v1178_v7 }
  0xe5   :  { %995 = vmatmul.mubr.bf16.vlgmr.msra.gmra.mrb[0].mxu1 %v11764_v8 }
  0xe6   :  { %1004 = vmatpush1.bf16.msra.mxu1 %v9705_v9  ;;  %1035 = vmatprep.mubr.bf16.mxu1 %v11761_v18  ;;  %v9793_v9 = vcombine.low %v241_v60, %v245_v61  ;;  %v9724_v61 = vcombine.high %v170_v54, %v174_v55 }
  0xe7   :  { %1005 = vmatprep.subr.bf16.mxu1 %v9714_v12  ;;  %v9863_v12 = vcombine.low %v1174_v6, %v1178_v7  ;;  %4264 = vmatprep.subr.bf16.mxu0 %v9864_v10  ;;  %v186_v6 = vld [vmem:[#allocation5 + $0x110] sm:$0xff]  ;;  %v1242_v10 = vld [vmem:[#allocation8 + $0x320] sm:$0xff] }
  0xe8   :  { %v190_v7 = vld [vmem:[#allocation5 + $0x130] sm:$0xff] }
  0xe9   :  { %4265 = vmatpush1.bf16.msra.mxu0 %v9863_v12 }
  0xea   :  { %1006 = vmatpush1.bf16.msra.mxu1 %v9713_v13  ;;  %v257_v13 = vld [vmem:[#allocation5 + $0x348] sm:$0xff] }
  0xeb   :  { %1007 = vmatprep.subr.bf16.mxu1 %v9722_v16  ;;  %v1186_v16 = vld [vmem:[#allocation8 + $0x160] sm:$0xff]  ;;  %v9810_v20 = vcombine.high %v257_v13, %v261_v14 }
  0xec   :  { %v9872_v19 = vcombine.high %v1182_v15, %v1186_v16 }
  0xee   :  { %1008 = vmatpush1.bf16.msra.mxu1 %v9721_v17  ;;  %v9801_v17 = vcombine.low %v249_v4, %v253_v5  ;;  %4266 = vmatprep.subr.bf16.mxu0 %v9872_v19  ;;  %v9732_v5 = vcombine.high %v178_v62, %v182_v63  ;;  %v1250_v19 = vld [vmem:[#allocation8 + $0x360] sm:$0xff] }
  0xef   :  { %1009 = vmatprep.subr.bf16.mxu1 %v9730_v21  ;;  %v9871_v21 = vcombine.low %v1182_v15, %v1186_v16  ;;  %v194_v15 = vld [vmem:[#allocation5 + $0x150] sm:$0xff] }
  0xf0   :  { %v198_v16 = vld [vmem:[#allocation5 + $0x170] sm:$0xff] }
  0xf1   :  { %4267 = vmatpush1.bf16.msra.mxu0 %v9871_v21 }
  0xf2   :  { %1010 = vmatpush1.bf16.msra.mxu1 %v9729_v22  ;;  %v265_v22 = vld [vmem:[#allocation5 + $0x388] sm:$0xff] }
  0xf3   :  { %1011 = vmatprep.subr.bf16.mxu1 %v9738_v23  ;;  %v269_v23 = vld [vmem:[#allocation5 + $0x3a8] sm:$0xff] }
  0xf4   :  { %v9818_v28 = vcombine.high %v265_v22, %v269_v23 }
  0xf6   :  { %1012 = vmatpush1.bf16.msra.mxu1 %v9737_v26  ;;  %v9809_v26 = vcombine.low %v257_v13, %v261_v14  ;;  %v9740_v14 = vcombine.high %v186_v6, %v190_v7 }
  0xf7   :  { %1013 = vmatprep.subr.bf16.mxu1 %v9746_v27  ;;  %v9880_v27 = vcombine.high %v1190_v24, %v1194_v25  ;;  %v202_v24 = vld [vmem:[#allocation5 + $0x190] sm:$0xff] }
  0xf8   :  { %v206_v25 = vld [vmem:[#allocation5 + $0x1b0] sm:$0xff] }
  0xf9   :  { %4268 = vmatprep.subr.bf16.mxu0 %v9880_v27  ;;  %v1258_v27 = vld [vmem:[#allocation8 + $0x3a0] sm:$0xff] }
  0xfa   :  { %1014 = vmatpush1.bf16.msra.mxu1 %v9745_v30  ;;  %v273_v30 = vld [vmem:[#allocation5 + $0x3c8] sm:$0xff]  ;;  %4269 = vmatpush1.bf16.msra.mxu0 %v9879_v29 }
  0xfb   :  { %1015 = vmatprep.subr.bf16.mxu1 %v9754_v31  ;;  %v277_v31 = vld [vmem:[#allocation5 + $0x3e8] sm:$0xff] }
  0xfc   :  { %v9826_v36 = vcombine.high %v273_v30, %v277_v31 }
  0xfe   :  { %1016 = vmatpush1.bf16.msra.mxu1 %v9753_v34  ;;  %v9817_v34 = vcombine.low %v265_v22, %v269_v23  ;;  %v9748_v23 = vcombine.high %v194_v15, %v198_v16 }
  0xff   :  { %1017 = vmatprep.subr.bf16.mxu1 %v9762_v35  ;;  %v9888_v35 = vcombine.high %v1198_v32, %v1202_v33  ;;  %v210_v32 = vld [vmem:[#allocation5 + $0x1d0] sm:$0xff] }
 0x100   :  { %v214_v33 = vld [vmem:[#allocation5 + $0x1f0] sm:$0xff] }
 0x101   :  { %4270 = vmatprep.subr.bf16.mxu0 %v9888_v35  ;;  %v1266_v35 = vld [vmem:[#allocation8 + $0x3e0] sm:$0xff] }
 0x102   :  { %1018 = vmatpush1.bf16.msra.mxu1 %v9761_v40  ;;  %4271 = vmatpush1.bf16.msra.mxu0 %v9887_v37  ;;  %v1206_v40 = vld [vmem:[#allocation8 + $0x200] sm:$0xff] }
 0x103   :  { %1019 = vmatprep.subr.bf16.mxu1 %v9770_v42  ;;  %v9825_v42 = vcombine.low %v273_v30, %v277_v31  ;;  %v9896_v43 = vcombine.high %v1206_v40, %v1210_v41  ;;  %v9895_v45 = vcombine.low %v1206_v40, %v1210_v41  ;;  %v9756_v30 = vcombine.high %v202_v24, %v206_v25  ;;  %v218_v40 = vld [vmem:[#allocation5 + $0x210] sm:$0xff] }
 0x104   :  { %v222_v41 = vld [vmem:[#allocation5 + $0x230] sm:$0xff] }
 0x105   :  { %4272 = vmatprep.subr.bf16.mxu0 %v9896_v43  ;;  %v11772_v43 = vld [vmem:[#allocation8 + $0x420] sm:$0xff] }
 0x106   :  { %1020 = vmatpush1.bf16.msra.mxu1 %v9769_v48  ;;  %4273 = vmatpush1.bf16.msra.mxu0 %v9895_v45  ;;  %v1214_v48 = vld [vmem:[#allocation8 + $0x240] sm:$0xff] }
 0x107   :  { %1021 = vmatprep.subr.bf16.mxu1 %v9778_v50  ;;  %v9707_v50 = vcombine.low %v154_v38, %v158_v39  ;;  %v9904_v51 = vcombine.high %v1214_v48, %v1218_v49  ;;  %v9903_v53 = vcombine.low %v1214_v48, %v1218_v49  ;;  %v9764_v38 = vcombine.high %v210_v32, %v214_v33  ;;  %v226_v48 = vld [vmem:[#allocation5 + $0x250] sm:$0xff] }
 0x108   :  { %v230_v49 = vld [vmem:[#allocation5 + $0x270] sm:$0xff] }
 0x109   :  { %4274 = vmatprep.subr.bf16.mxu0 %v9904_v51  ;;  %v9780_v51 = vcombine.high %v226_v48, %v230_v49 }
 0x10a   :  { %1022 = vmatpush1.bf16.msra.mxu1 %v9777_v56  ;;  %4275 = vmatpush1.bf16.msra.mxu0 %v9903_v53  ;;  %v1222_v56 = vld [vmem:[#allocation8 + $0x280] sm:$0xff]  ;;  %v238_v53 = vld [vmem:[#allocation5 + $0x2b0] sm:$0xff] }
 0x10b   :  { %1023 = vmatprep.subr.bf16.mxu1 %v9786_v58  ;;  %v9715_v58 = vcombine.low %v162_v46, %v166_v47  ;;  %v9912_v59 = vcombine.high %v1222_v56, %v1226_v57  ;;  %v9911_v60 = vcombine.low %v1222_v56, %v1226_v57  ;;  %v9772_v46 = vcombine.high %v218_v40, %v222_v41  ;;  %v242_v56 = vld [vmem:[#allocation5 + $0x2d0] sm:$0xff] }
 0x10c   :  { %v246_v57 = vld [vmem:[#allocation5 + $0x2f0] sm:$0xff] }
 0x10d   :  { %4276 = vmatprep.subr.bf16.mxu0 %v9912_v59  ;;  %v9796_v59 = vcombine.high %v242_v56, %v246_v57 }
 0x10e   :  { %1024 = vmatpush1.bf16.msra.mxu1 %v9785_v0  ;;  %4277 = vmatpush1.bf16.msra.mxu0 %v9911_v60  ;;  %v1230_v0 = vld [vmem:[#allocation8 + $0x2c0] sm:$0xff]  ;;  %v250_v60 = vld [vmem:[#allocation5 + $0x310] sm:$0xff] }
 0x10f   :  { %1025 = vmatprep.subr.bf16.mxu1 %v9794_v2  ;;  %v9723_v2 = vcombine.low %v170_v54, %v174_v55  ;;  %v9920_v3 = vcombine.high %v1230_v0, %v1234_v1  ;;  %v9919_v4 = vcombine.low %v1230_v0, %v1234_v1  ;;  %v9779_v54 = vcombine.low %v226_v48, %v230_v49  ;;  %v258_v0 = vld [vmem:[#allocation5 + $0x350] sm:$0xff]  ;;  %v219_v48 = vld [vmem:[#allocation5 + $0x218] sm:$0xff] }
 0x110   :  { %v262_v1 = vld [vmem:[#allocation5 + $0x370] sm:$0xff]  ;;  %v223_v49 = vld [vmem:[#allocation5 + $0x238] sm:$0xff] }
 0x111   :  { %4278 = vmatprep.subr.bf16.mxu0 %v9920_v3  ;;  %v9812_v3 = vcombine.high %v258_v0, %v262_v1 }
 0x112   :  { %1026 = vmatpush1.bf16.msra.mxu1 %v9793_v9  ;;  %4279 = vmatpush1.bf16.msra.mxu0 %v9919_v4  ;;  %v1238_v9 = vld [vmem:[#allocation8 + $0x300] sm:$0xff]  ;;  %v266_v4 = vld [vmem:[#allocation5 + $0x390] sm:$0xff] }
 0x113   :  { %1027 = vmatprep.subr.bf16.mxu1 %v9802_v11  ;;  %v9731_v11 = vcombine.low %v178_v62, %v182_v63  ;;  %v9928_v12 = vcombine.high %v1238_v9, %v1242_v10  ;;  %v9927_v13 = vcombine.low %v1238_v9, %v1242_v10  ;;  %v9795_v62 = vcombine.low %v242_v56, %v246_v57  ;;  %v274_v9 = vld [vmem:[#allocation5 + $0x3d0] sm:$0xff]  ;;  %v235_v56 = vld [vmem:[#allocation5 + $0x298] sm:$0xff] }
 0x114   :  { %v278_v10 = vld [vmem:[#allocation5 + $0x3f0] sm:$0xff]  ;;  %v239_v57 = vld [vmem:[#allocation5 + $0x2b8] sm:$0xff] }
 0x115   :  { %4280 = vmatprep.subr.bf16.mxu0 %v9928_v12  ;;  %v9828_v12 = vcombine.high %v274_v9, %v278_v10 }
 0x116   :  { %1028 = vmatpush1.bf16.msra.mxu1 %v9801_v17  ;;  %4281 = vmatpush1.bf16.msra.mxu0 %v9927_v13  ;;  %v1246_v17 = vld [vmem:[#allocation8 + $0x340] sm:$0xff]  ;;  %v155_v13 = vld [vmem:[#allocation5 + $0x18] sm:$0xff] }
 0x117   :  { %1029 = vmatprep.subr.bf16.mxu1 %v9810_v20  ;;  %v9739_v20 = vcombine.low %v186_v6, %v190_v7  ;;  %v9936_v21 = vcombine.high %v1246_v17, %v1250_v19  ;;  %v9935_v22 = vcombine.low %v1246_v17, %v1250_v19  ;;  %v9811_v6 = vcombine.low %v258_v0, %v262_v1  ;;  %v163_v17 = vld [vmem:[#allocation5 + $0x58] sm:$0xff] }
 0x118   :  { %v167_v19 = vld [vmem:[#allocation5 + $0x78] sm:$0xff] }
 0x119   :  { %4282 = vmatprep.subr.bf16.mxu0 %v9936_v21  ;;  %v9718_v21 = vcombine.high %v163_v17, %v167_v19  ;;  %v251_v0 = vld [vmem:[#allocation5 + $0x318] sm:$0xff] }
 0x11a   :  { %1030 = vmatpush1.bf16.msra.mxu1 %v9809_v26  ;;  %4283 = vmatpush1.bf16.msra.mxu0 %v9935_v22  ;;  %v1254_v26 = vld [vmem:[#allocation8 + $0x380] sm:$0xff]  ;;  %v171_v22 = vld [vmem:[#allocation5 + $0x98] sm:$0xff] }
 0x11b   :  { %1031 = vmatprep.subr.bf16.mxu1 %v9818_v28  ;;  %v9747_v28 = vcombine.low %v194_v15, %v198_v16  ;;  %v9944_v29 = vcombine.high %v1254_v26, %v1258_v27  ;;  %v9943_v31 = vcombine.low %v1254_v26, %v1258_v27  ;;  %v9827_v15 = vcombine.low %v274_v9, %v278_v10  ;;  %v179_v26 = vld [vmem:[#allocation5 + $0xd8] sm:$0xff] }
 0x11c   :  { %v183_v27 = vld [vmem:[#allocation5 + $0xf8] sm:$0xff] }
 0x11d   :  { %4284 = vmatprep.subr.bf16.mxu0 %v9944_v29  ;;  %v9734_v29 = vcombine.high %v179_v26, %v183_v27  ;;  %v255_v1 = vld [vmem:[#allocation5 + $0x338] sm:$0xff] }
 0x11e   :  { %1032 = vmatpush1.bf16.msra.mxu1 %v9817_v34  ;;  %4285 = vmatpush1.bf16.msra.mxu0 %v9943_v31  ;;  %v1262_v34 = vld [vmem:[#allocation8 + $0x3c0] sm:$0xff]  ;;  %v191_v31 = vld [vmem:[#allocation5 + $0x138] sm:$0xff] }
 0x11f   :  { %1033 = vmatprep.subr.bf16.mxu1 %v9826_v36  ;;  %v9755_v36 = vcombine.low %v202_v24, %v206_v25  ;;  %v9952_v37 = vcombine.high %v1262_v34, %v1266_v35  ;;  %v9951_v39 = vcombine.low %v1262_v34, %v1266_v35  ;;  %v9717_v24 = vcombine.low %v163_v17, %v167_v19  ;;  %v195_v34 = vld [vmem:[#allocation5 + $0x158] sm:$0xff]  ;;  %v1143_v17 = vld [vmem:[#allocation8 + $0x8] sm:$0xff] }
 0x120   :  { %v199_v35 = vld [vmem:[#allocation5 + $0x178] sm:$0xff]  ;;  %v1147_v19 = vld [vmem:[#allocation8 + $0x28] sm:$0xff] }
 0x121   :  { %4286 = vmatprep.subr.bf16.mxu0 %v9952_v37  ;;  %v203_v37 = vld [vmem:[#allocation5 + $0x198] sm:$0xff] }
 0x122   :  { %1034 = vmatpush1.bf16.msra.mxu1 %v9825_v42  ;;  %4287 = vmatpush1.bf16.msra.mxu0 %v9951_v39  ;;  %v11770_v42 = vld [vmem:[#allocation8 + $0x400] sm:$0xff]  ;;  %v9749_v39 = vcombine.low %v195_v34, %v199_v35  ;;  %v267_v9 = vld [vmem:[#allocation5 + $0x398] sm:$0xff] }
 0x123   :  { %1044 = vmatprep.subr.bf16.mxu1 %v9708_v44  ;;  %v9763_v44 = vcombine.low %v210_v32, %v214_v33  ;;  %v9960_v45 = vcombine.high %v11770_v42, %v11772_v43  ;;  %v9959_v47 = vcombine.low %v11770_v42, %v11772_v43  ;;  %v9733_v32 = vcombine.low %v179_v26, %v183_v27  ;;  %v271_v10 = vld [vmem:[#allocation5 + $0x3b8] sm:$0xff]  ;;  %v1159_v26 = vld [vmem:[#allocation8 + $0x88] sm:$0xff]  ;;  %v1302_v43 = vld [vmem:[#allocation8 + $0x500] sm:$0xff] }
 0x124   :  { %v1163_v27 = vld [vmem:[#allocation8 + $0xa8] sm:$0xff] }
 0x125   :  { %1036 = vmatmul.mubr.bf16.vlgmr.msra.gmra.mrb[4].mxu1 %v11764_v8  ;;  %4297 = vmatprep.subr.bf16.mxu0 %v9960_v45 }
 0x126   :  { %1045 = vmatpush1.bf16.msra.mxu1 %v9707_v50  ;;  %1076 = vmatprep.mubr.bf16.mxu1 %v11761_v18  ;;  %v9771_v50 = vcombine.low %v218_v40, %v222_v41  ;;  %v211_v41 = vld [vmem:[#allocation5 + $0x1d8] sm:$0xff] }
 0x127   :  { %1046 = vmatprep.subr.bf16.mxu1 %v9716_v52  ;;  %v234_v52 = vld [vmem:[#allocation5 + $0x290] sm:$0xff] }
 0x128   :  { %v9788_v55 = vcombine.high %v234_v52, %v238_v53 }
 0x12a   :  { %1047 = vmatpush1.bf16.msra.mxu1 %v9715_v58  ;;  %v9787_v58 = vcombine.low %v234_v52, %v238_v53  ;;  %v227_v52 = vld [vmem:[#allocation5 + $0x258] sm:$0xff] }
 0x12b   :  { %1048 = vmatprep.subr.bf16.mxu1 %v9724_v61  ;;  %v254_v61 = vld [vmem:[#allocation5 + $0x330] sm:$0xff]  ;;  %v231_v53 = vld [vmem:[#allocation5 + $0x278] sm:$0xff] }
 0x12c   :  { %v9804_v63 = vcombine.high %v250_v60, %v254_v61 }
 0x12e   :  { %1049 = vmatpush1.bf16.msra.mxu1 %v9723_v2  ;;  %v9803_v2 = vcombine.low %v250_v60, %v254_v61  ;;  %v243_v60 = vld [vmem:[#allocation5 + $0x2d8] sm:$0xff] }
 0x12f   :  { %1050 = vmatprep.subr.bf16.mxu1 %v9732_v5  ;;  %v270_v5 = vld [vmem:[#allocation5 + $0x3b0] sm:$0xff]  ;;  %v247_v61 = vld [vmem:[#allocation5 + $0x2f8] sm:$0xff] }
 0x130   :  { %v9820_v7 = vcombine.high %v266_v4, %v270_v5 }
 0x132   :  { %1051 = vmatpush1.bf16.msra.mxu1 %v9731_v11  ;;  %v9819_v11 = vcombine.low %v266_v4, %v270_v5  ;;  %v259_v4 = vld [vmem:[#allocation5 + $0x358] sm:$0xff] }
 0x133   :  { %1052 = vmatprep.subr.bf16.mxu1 %v9740_v14  ;;  %v159_v14 = vld [vmem:[#allocation5 + $0x38] sm:$0xff] }
 0x134   :  { %v9710_v16 = vcombine.high %v155_v13, %v159_v14  ;;  %v263_v5 = vld [vmem:[#allocation5 + $0x378] sm:$0xff] }
 0x136   :  { %1053 = vmatpush1.bf16.msra.mxu1 %v9739_v20  ;;  %v9709_v20 = vcombine.low %v155_v13, %v159_v14  ;;  %v275_v13 = vld [vmem:[#allocation5 + $0x3d8] sm:$0xff] }
 0x137   :  { %1054 = vmatprep.subr.bf16.mxu1 %v9748_v23  ;;  %v175_v23 = vld [vmem:[#allocation5 + $0xb8] sm:$0xff] }
 0x138   :  { %v9726_v25 = vcombine.high %v171_v22, %v175_v23  ;;  %v279_v14 = vld [vmem:[#allocation5 + $0x3f8] sm:$0xff] }
 0x13a   :  { %1055 = vmatpush1.bf16.msra.mxu1 %v9747_v28  ;;  %v9725_v28 = vcombine.low %v171_v22, %v175_v23  ;;  %v1151_v22 = vld [vmem:[#allocation8 + $0x48] sm:$0xff] }
 0x13b   :  { %1056 = vmatprep.subr.bf16.mxu1 %v9756_v30  ;;  %v187_v30 = vld [vmem:[#allocation5 + $0x118] sm:$0xff]  ;;  %v1155_v23 = vld [vmem:[#allocation8 + $0x68] sm:$0xff] }
 0x13c   :  { %v9742_v33 = vcombine.high %v187_v30, %v191_v31 }
 0x13e   :  { %1057 = vmatpush1.bf16.msra.mxu1 %v9755_v36  ;;  %v9741_v36 = vcombine.low %v187_v30, %v191_v31  ;;  %v1167_v30 = vld [vmem:[#allocation8 + $0xc8] sm:$0xff] }
 0x13f   :  { %1058 = vmatprep.subr.bf16.mxu1 %v9764_v38  ;;  %v207_v38 = vld [vmem:[#allocation5 + $0x1b8] sm:$0xff]  ;;  %v1171_v31 = vld [vmem:[#allocation8 + $0xe8] sm:$0xff] }
 0x140   :  { %v9758_v40 = vcombine.high %v203_v37, %v207_v38  ;;  %v9757_v45 = vcombine.low %v203_v37, %v207_v38  ;;  %v9857_v37 = vcombine.low %v1167_v30, %v1171_v31 }
 0x142   :  { %1059 = vmatpush1.bf16.msra.mxu1 %v9763_v44  ;;  %v215_v44 = vld [vmem:[#allocation5 + $0x1f8] sm:$0xff] }
 0x143   :  { %1060 = vmatprep.subr.bf16.mxu1 %v9772_v46  ;;  %v9766_v46 = vcombine.high %v211_v41, %v215_v44 }
 0x146   :  { %1061 = vmatpush1.bf16.msra.mxu1 %v9771_v50  ;;  %v9765_v50 = vcombine.low %v211_v41, %v215_v44  ;;  %v11786_v44 = vld [vmem:[#allocation7] sm:$0xff] }
 0x147   :  { %1062 = vmatprep.subr.bf16.mxu1 %v9780_v51  ;;  %v9774_v51 = vcombine.high %v219_v48, %v223_v49 }
 0x14a   :  { %1063 = vmatpush1.bf16.msra.mxu1 %v9779_v54  ;;  %v9773_v54 = vcombine.low %v219_v48, %v223_v49  ;;  %v1191_v48 = vld [vmem:[#allocation8 + $0x188] sm:$0xff] }
 0x14b   :  { %1064 = vmatprep.subr.bf16.mxu1 %v9788_v55  ;;  %v9782_v55 = vcombine.high %v227_v52, %v231_v53  ;;  %v1195_v49 = vld [vmem:[#allocation8 + $0x1a8] sm:$0xff] }
 0x14e   :  { %1065 = vmatpush1.bf16.msra.mxu1 %v9787_v58  ;;  %v9781_v58 = vcombine.low %v227_v52, %v231_v53  ;;  %v9882_v53 = vcombine.high %v1191_v48, %v1195_v49 }
 0x14f   :  { %1066 = vmatprep.subr.bf16.mxu1 %v9796_v59  ;;  %v9790_v59 = vcombine.high %v235_v56, %v239_v57 }
 0x152   :  { %1067 = vmatpush1.bf16.msra.mxu1 %v9795_v62  ;;  %v9789_v62 = vcombine.low %v235_v56, %v239_v57  ;;  %v1203_v56 = vld [vmem:[#allocation8 + $0x1e8] sm:$0xff] }
 0x153   :  { %1068 = vmatprep.subr.bf16.mxu1 %v9804_v63  ;;  %v9798_v63 = vcombine.high %v243_v60, %v247_v61 }
 0x156   :  { %1069 = vmatpush1.bf16.msra.mxu1 %v9803_v2  ;;  %v9797_v2 = vcombine.low %v243_v60, %v247_v61  ;;  %v9881_v61 = vcombine.low %v1191_v48, %v1195_v49  ;;  %v1322_v48 = vld [vmem:[#allocation8 + $0x5a0] sm:$0xff]  ;;  %v1247_v49 = vld [vmem:[#allocation8 + $0x348] sm:$0xff] }
 0x157   :  { %1070 = vmatprep.subr.bf16.mxu1 %v9812_v3  ;;  %v9806_v3 = vcombine.high %v251_v0, %v255_v1 }
 0x15a   :  { %1071 = vmatpush1.bf16.msra.mxu1 %v9811_v6  ;;  %v9805_v6 = vcombine.low %v251_v0, %v255_v1  ;;  %v1278_v1 = vld [vmem:[#allocation8 + $0x440] sm:$0xff] }
 0x15b   :  { %1072 = vmatprep.subr.bf16.mxu1 %v9820_v7  ;;  %v9814_v7 = vcombine.high %v259_v4, %v263_v5 }
 0x15e   :  { %1073 = vmatpush1.bf16.msra.mxu1 %v9819_v11  ;;  %v9813_v11 = vcombine.low %v259_v4, %v263_v5  ;;  %v1207_v4 = vld [vmem:[#allocation8 + $0x208] sm:$0xff] }
 0x15f   :  { %1074 = vmatprep.subr.bf16.mxu1 %v9828_v12  ;;  %v9822_v12 = vcombine.high %v267_v9, %v271_v10  ;;  %v1211_v5 = vld [vmem:[#allocation8 + $0x228] sm:$0xff] }
 0x162   :  { %1075 = vmatpush1.bf16.msra.mxu1 %v9827_v15  ;;  %v9821_v15 = vcombine.low %v267_v9, %v271_v10 }
 0x163   :  { %1085 = vmatprep.subr.bf16.mxu1 %v9710_v16  ;;  %v9830_v16 = vcombine.high %v275_v13, %v279_v14 }
 0x165   :  { %1077 = vmatmul.mubr.bf16.vlgmr.msra.gmra.mrb[8].mxu1 %v11764_v8 }
 0x166   :  { %1086 = vmatpush1.bf16.msra.mxu1 %v9709_v20  ;;  %1117 = vmatprep.mubr.bf16.mxu1 %v11761_v18  ;;  %v9750_v18 = vcombine.high %v195_v34, %v199_v35  ;;  %v9829_v20 = vcombine.low %v275_v13, %v279_v14  ;;  %v9858_v34 = vcombine.high %v1167_v30, %v1171_v31  ;;  %v1175_v35 = vld [vmem:[#allocation8 + $0x108] sm:$0xff]  ;;  %v1290_v13 = vld [vmem:[#allocation8 + $0x4a0] sm:$0xff] }
 0x167   :  { %1087 = vmatprep.subr.bf16.mxu1 %v9718_v21  ;;  %v9834_v21 = vcombine.high %v1143_v17, %v1147_v19  ;;  %v1215_v14 = vld [vmem:[#allocation8 + $0x248] sm:$0xff] }
 0x16a   :  { %1088 = vmatpush1.bf16.msra.mxu1 %v9717_v24  ;;  %v9833_v24 = vcombine.low %v1143_v17, %v1147_v19  ;;  %v9897_v17 = vcombine.low %v1207_v4, %v1211_v5 }
 0x16b   :  { %1089 = vmatprep.subr.bf16.mxu1 %v9726_v25  ;;  %v9842_v25 = vcombine.high %v1151_v22, %v1155_v23 }
 0x16e   :  { %1090 = vmatpush1.bf16.msra.mxu1 %v9725_v28  ;;  %v9841_v28 = vcombine.low %v1151_v22, %v1155_v23  ;;  %v1298_v22 = vld [vmem:[#allocation8 + $0x4e0] sm:$0xff]  ;;  %v1223_v23 = vld [vmem:[#allocation8 + $0x288] sm:$0xff] }
 0x16f   :  { %1091 = vmatprep.subr.bf16.mxu1 %v9734_v29  ;;  %v9850_v29 = vcombine.high %v1159_v26, %v1163_v27 }
 0x172   :  { %1092 = vmatpush1.bf16.msra.mxu1 %v9733_v32  ;;  %v282_v32 = vlaneseq }
 0x173   :  { %1093 = vmatprep.subr.bf16.mxu1 %v9742_v33  ;;  %v9849_v33 = vcombine.low %v1159_v26, %v1163_v27 }
 0x176   :  { %1094 = vmatpush1.bf16.msra.mxu1 %v9741_v36  ;;  %v1179_v36 = vld [vmem:[#allocation8 + $0x128] sm:$0xff] }
 0x177   :  { %1095 = vmatprep.subr.bf16.mxu1 %v9750_v18  ;;  %v11781_v18 = vshrl.u32 %v282_v32, 7  ;;  %v9866_v38 = vcombine.high %v1175_v35, %v1179_v36  ;;  %v9865_v41 = vcombine.low %v1175_v35, %v1179_v36  ;;  %v1314_v35 = vld [vmem:[#allocation8 + $0x560] sm:$0xff]  ;;  %v1239_v36 = vld [vmem:[#allocation8 + $0x308] sm:$0xff] }
 0x17a   :  { %1096 = vmatpush1.bf16.msra.mxu1 %v9749_v39  ;;  %v1187_v39 = vld [vmem:[#allocation8 + $0x168] sm:$0xff] }
 0x17b   :  { %1097 = vmatprep.subr.bf16.mxu1 %v9758_v40  ;;  %v11784_v40 = vsub.s32 0, %v11781_v18 }
 0x17e   :  { %1098 = vmatpush1.bf16.msra.mxu1 %v9757_v45  ;;  %v11789_v45 = vsub.s32 1, %v11781_v18 }
 0x17f   :  { %1099 = vmatprep.subr.bf16.mxu1 %v9766_v46 }
 0x182   :  { %1100 = vmatpush1.bf16.msra.mxu1 %v9765_v50  ;;  %v285_v50 = vrot.slane %v11786_v44, %v11784_v40 }
 0x183   :  { %1101 = vmatprep.subr.bf16.mxu1 %v9774_v51  ;;  %v289_v51 = vrot.slane %v11786_v44, %v11789_v45 }
 0x186   :  { %1102 = vmatpush1.bf16.msra.mxu1 %v9773_v54 }
 0x187   :  { %1103 = vmatprep.subr.bf16.mxu1 %v9782_v55  ;;  %v1199_v55 = vld [vmem:[#allocation8 + $0x1c8] sm:$0xff] }
 0x188   :  { %v9890_v0 = vcombine.high %v1199_v55, %v1203_v56 }
 0x18a   :  { %1104 = vmatpush1.bf16.msra.mxu1 %v9781_v58 }
 0x18b   :  { %1105 = vmatprep.subr.bf16.mxu1 %v9790_v59 }
 0x18e   :  { %1106 = vmatpush1.bf16.msra.mxu1 %v9789_v62 }
 0x18f   :  { %1107 = vmatprep.subr.bf16.mxu1 %v9798_v63 }
 0x192   :  { %1108 = vmatpush1.bf16.msra.mxu1 %v9797_v2 }
 0x193   :  { %1109 = vmatprep.subr.bf16.mxu1 %v9806_v3  ;;  %v1282_v3 = vld [vmem:[#allocation8 + $0x460] sm:$0xff] }
 0x194   :  { %v9968_v10 = vcombine.high %v1278_v1, %v1282_v3 }
 0x196   :  { %1110 = vmatpush1.bf16.msra.mxu1 %v9805_v6 }
 0x197   :  { %1111 = vmatprep.subr.bf16.mxu1 %v9814_v7  ;;  %v9889_v7 = vcombine.low %v1199_v55, %v1203_v56  ;;  %v1326_v55 = vld [vmem:[#allocation8 + $0x5c0] sm:$0xff] }
 0x198   :  { %v1330_v56 = vld [vmem:[#allocation8 + $0x5e0] sm:$0xff] }
 0x19a   :  { %1112 = vmatpush1.bf16.msra.mxu1 %v9813_v11  ;;  %v9898_v11 = vcombine.high %v1207_v4, %v1211_v5 }
 0x19b   :  { %1113 = vmatprep.subr.bf16.mxu1 %v9822_v12  ;;  %v1286_v12 = vld [vmem:[#allocation8 + $0x480] sm:$0xff] }
 0x19c   :  { %v9976_v19 = vcombine.high %v1286_v12, %v1290_v13 }
 0x19e   :  { %1114 = vmatpush1.bf16.msra.mxu1 %v9821_v15  ;;  %v1219_v15 = vld [vmem:[#allocation8 + $0x268] sm:$0xff] }
 0x19f   :  { %1115 = vmatprep.subr.bf16.mxu1 %v9830_v16  ;;  %v9967_v16 = vcombine.low %v1278_v1, %v1282_v3  ;;  %v9905_v26 = vcombine.low %v1215_v14, %v1219_v15  ;;  %v1263_v1 = vld [vmem:[#allocation8 + $0x3c8] sm:$0xff]  ;;  %v10015_v3 = vcombine.low %v1326_v55, %v1330_v56 }
 0x1a2   :  { %1116 = vmatpush1.bf16.msra.mxu1 %v9829_v20  ;;  %v9906_v20 = vcombine.high %v1215_v14, %v1219_v15 }
 0x1a3   :  { %4420 = vmatprep.subr.bf16.mxu1 %v9834_v21  ;;  %v1294_v21 = vld [vmem:[#allocation8 + $0x4c0] sm:$0xff] }
 0x1a4   :  { %v9984_v27 = vcombine.high %v1294_v21, %v1298_v22  ;;  %v9983_v30 = vcombine.low %v1294_v21, %v1298_v22  ;;  %v1279_v21 = vld [vmem:[#allocation8 + $0x448] sm:$0xff] }
 0x1a5   :  { %1118 = vmatmul.mubr.bf16.vlgmr.msra.gmra.mrb[12].mxu1 %v11764_v8  ;;  %v1183_v8 = vld [vmem:[#allocation8 + $0x148] sm:$0xff] }
 0x1a6   :  { %4421 = vmatpush1.bf16.msra.mxu1 %v9833_v24  ;;  %v9874_v46 = vcombine.high %v1183_v8, %v1187_v39  ;;  %v9873_v52 = vcombine.low %v1183_v8, %v1187_v39  ;;  %v1227_v24 = vld [vmem:[#allocation8 + $0x2a8] sm:$0xff] }
 0x1a7   :  { %4422 = vmatprep.subr.bf16.mxu1 %v9842_v25  ;;  %v9975_v25 = vcombine.low %v1286_v12, %v1290_v13  ;;  %v9914_v42 = vcombine.high %v1223_v23, %v1227_v24  ;;  %v9913_v31 = vcombine.low %v1223_v23, %v1227_v24  ;;  %v1271_v12 = vld [vmem:[#allocation8 + $0x408] sm:$0xff] }
 0x1a8   :  { %v1275_v13 = vld [vmem:[#allocation8 + $0x428] sm:$0xff] }
 0x1a9   :  { %v1283_v22 = vld [vmem:[#allocation8 + $0x468] sm:$0xff]  ;;  %v9961_v24 = vcombine.low %v1271_v12, %v1275_v13 }
 0x1aa   :  { %4423 = vmatpush1.bf16.msra.mxu1 %v9841_v28  ;;  %v1231_v28 = vld [vmem:[#allocation8 + $0x2c8] sm:$0xff] }
 0x1ab   :  { %4424 = vmatprep.subr.bf16.mxu1 %v9850_v29  ;;  %v1235_v29 = vld [vmem:[#allocation8 + $0x2e8] sm:$0xff] }
 0x1ac   :  { %v9921_v8 = vcombine.low %v1231_v28, %v1235_v29 }
 0x1ae   :  { %4425 = vmatpush1.bf16.msra.mxu1 %v9849_v33  ;;  %v9922_v33 = vcombine.high %v1231_v28, %v1235_v29  ;;  %v9969_v29 = vcombine.low %v1279_v21, %v1283_v22 }
 0x1af   :  { %4426 = vmatprep.subr.bf16.mxu1 %v9858_v34  ;;  %v1310_v34 = vld [vmem:[#allocation8 + $0x540] sm:$0xff] }
 0x1b0   :  { %v10000_v39 = vcombine.high %v1310_v34, %v1314_v35 }
 0x1b2   :  { %4427 = vmatpush1.bf16.msra.mxu1 %v9857_v37  ;;  %v1243_v37 = vld [vmem:[#allocation8 + $0x328] sm:$0xff] }
 0x1b3   :  { %4428 = vmatprep.subr.bf16.mxu1 %v9866_v38 }
 0x1b6   :  { %4429 = vmatpush1.bf16.msra.mxu1 %v9865_v41  ;;  %v9930_v41 = vcombine.high %v1239_v36, %v1243_v37 }
 0x1b7   :  { %4430 = vmatprep.subr.bf16.mxu1 %v9874_v46  ;;  %v1318_v46 = vld [vmem:[#allocation8 + $0x580] sm:$0xff] }
 0x1b8   :  { %v996_v54 = vpop.f32.mrb[0].mxu1 }
 0x1b9   :  { %v997_v57 = vadd.f32 %v996_v54, %v285_v50  ;;  %v998_v58 = vpop.f32.mrb[1].mxu1  ;;  %v1251_v50 = vld [vmem:[#allocation8 + $0x368] sm:$0xff] }
 0x1ba   :  { %v999_v59 = vadd.f32 %v998_v58, %v289_v51  ;;  %v1000_v60 = vpop.f32.mrb[2].mxu1  ;;  %4431 = vmatpush1.bf16.msra.mxu1 %v9873_v52  ;;  %v9999_v51 = vcombine.low %v1310_v34, %v1314_v35  ;;  %v9929_v52 = vcombine.low %v1239_v36, %v1243_v37  ;;  %v9938_v54 = vcombine.high %v1247_v49, %v1251_v50  ;;  %v1259_v58 = vld [vmem:[#allocation8 + $0x3a8] sm:$0xff] }
 0x1bb   :  { %v1126_v62 = vmax.f32 %v997_v57, 0.0  ;;  %v1001_v63 = vpop.f32.mrb[3].mxu1  ;;  %4432 = vmatprep.subr.bf16.mxu1 %v9882_v53  ;;  %v10008_v53 = vcombine.high %v1318_v46, %v1322_v48  ;;  %v1255_v57 = vld [vmem:[#allocation8 + $0x388] sm:$0xff]  ;;  %v9937_v60 = vcombine.low %v1247_v49, %v1251_v50 }
 0x1bc   :  { %v1127_v2 = vmax.f32 %v999_v59, 0.0  ;;  %v10007_v59 = vcombine.low %v1318_v46, %v1322_v48  ;;  %v1334_v63 = vld [vmem:[#allocation8 + $0x600] sm:$0xff]  ;;  %v9945_v4 = vcombine.low %v1255_v57, %v1259_v58  ;;  %v1295_v34 = vld [vmem:[#allocation8 + $0x4c8] sm:$0xff] }
 0x1bd   :  { %v11797_v9 = vpack.c.bf16 %v1126_v62, %v1126_v62  ;;  %v9946_v62 = vcombine.high %v1255_v57, %v1259_v58  ;;  %v1299_v35 = vld [vmem:[#allocation8 + $0x4e8] sm:$0xff]  ;;  %v11807_v57 = vsub.s32 2, %v11781_v18 }
 0x1be   :  { %v11795_v6 = vpack.c.bf16 %v1127_v2, %v1127_v2  ;;  %4433 = vmatpush1.bf16.msra.mxu1 %v9881_v61  ;;  %v10016_v61 = vcombine.high %v1326_v55, %v1330_v56  ;;  %v1267_v2 = vld [vmem:[#allocation8 + $0x3e8] sm:$0xff]  ;;  %v9985_v50 = vcombine.low %v1295_v34, %v1299_v35 }
 0x1bf   :  { %4434 = vmatprep.subr.bf16.mxu1 %v9890_v0  ;;  %v1338_v0 = vld [vmem:[#allocation8 + $0x620] sm:$0xff]  ;;  %v9953_v15 = vcombine.low %v1263_v1, %v1267_v2  ;;  %v1303_v46 = vld [vmem:[#allocation8 + $0x508] sm:$0xff] }
 0x1c0   :  { %4288 = vmatprep.mubr.bf16.mxu0 %v11795_v6  ;;  %4452 = vmatprep.mubr.bf16.mxu1 %v11795_v6  ;;  %v10024_v5 = vcombine.high %v1334_v63, %v1338_v0  ;;  %v10023_v14 = vcombine.low %v1334_v63, %v1338_v0  ;;  %v1307_v48 = vld [vmem:[#allocation8 + $0x528] sm:$0xff]  ;;  %v1390_v63 = vld [vmem:[#allocation8 + $0x7c0] sm:$0xff] }
 0x1c1   :  { %4289 = vmatmul.mubr.bf16.vlgmr.msra.gmra.mrb[0].mxu0 %v11797_v9  ;;  %v1311_v55 = vld [vmem:[#allocation8 + $0x548] sm:$0xff]  ;;  %v1394_v0 = vld [vmem:[#allocation8 + $0x7e0] sm:$0xff] }
 0x1c2   :  { %4298 = vmatpush1.bf16.msra.mxu0 %v9959_v47  ;;  %4435 = vmatpush1.bf16.msra.mxu1 %v9889_v7  ;;  %v1306_v47 = vld [vmem:[#allocation8 + $0x520] sm:$0xff]  ;;  %v9954_v7 = vcombine.high %v1263_v1, %v1267_v2  ;;  %v1315_v56 = vld [vmem:[#allocation8 + $0x568] sm:$0xff] }
 0x1c3   :  { %4299 = vmatprep.subr.bf16.mxu0 %v9968_v10  ;;  %4436 = vmatprep.subr.bf16.mxu1 %v9898_v11  ;;  %v9992_v32 = vcombine.high %v1302_v43, %v1306_v47  ;;  %v9991_v38 = vcombine.low %v1302_v43, %v1306_v47  ;;  %v1342_v10 = vld [vmem:[#allocation8 + $0x640] sm:$0xff]  ;;  %v1287_v43 = vld [vmem:[#allocation8 + $0x488] sm:$0xff] }
 0x1c4   :  { %v1346_v11 = vld [vmem:[#allocation8 + $0x660] sm:$0xff]  ;;  %v1291_v47 = vld [vmem:[#allocation8 + $0x4a8] sm:$0xff] }
 0x1c5   :  { %v10031_v23 = vcombine.low %v1342_v10, %v1346_v11  ;;  %v9977_v37 = vcombine.low %v1287_v43, %v1291_v47  ;;  %v1319_v1 = vld [vmem:[#allocation8 + $0x588] sm:$0xff] }
 0x1c6   :  { %4300 = vmatpush1.bf16.msra.mxu0 %v9967_v16  ;;  %4437 = vmatpush1.bf16.msra.mxu1 %v9897_v17  ;;  %v10032_v16 = vcombine.high %v1342_v10, %v1346_v11  ;;  %v9962_v17 = vcombine.high %v1271_v12, %v1275_v13  ;;  %v1323_v2 = vld [vmem:[#allocation8 + $0x5a8] sm:$0xff]  ;;  %v10080_v10 = vcombine.high %v1390_v63, %v1394_v0  ;;  %v1398_v12 = vld [vmem:[#allocation8 + $0x800] sm:$0xff] }
 0x1c7   :  { %4301 = vmatprep.subr.bf16.mxu0 %v9976_v19  ;;  %4438 = vmatprep.subr.bf16.mxu1 %v9906_v20  ;;  %v1350_v19 = vld [vmem:[#allocation8 + $0x680] sm:$0xff]  ;;  %v10010_v11 = vcombine.high %v1319_v1, %v1323_v2 }
 0x1c8   :  { %v1354_v20 = vld [vmem:[#allocation8 + $0x6a0] sm:$0xff] }
 0x1c9   :  { %v10039_v28 = vcombine.low %v1350_v19, %v1354_v20 }
 0x1ca   :  { %4302 = vmatpush1.bf16.msra.mxu0 %v9975_v25  ;;  %4439 = vmatpush1.bf16.msra.mxu1 %v9905_v26  ;;  %v10040_v25 = vcombine.high %v1350_v19, %v1354_v20  ;;  %v9970_v26 = vcombine.high %v1279_v21, %v1283_v22  ;;  %v10079_v22 = vcombine.low %v1390_v63, %v1394_v0 }
 0x1cb   :  { %4303 = vmatprep.subr.bf16.mxu0 %v9984_v27  ;;  %4440 = vmatprep.subr.bf16.mxu1 %v9914_v42  ;;  %v1358_v27 = vld [vmem:[#allocation8 + $0x6c0] sm:$0xff] }
 0x1cc   :  { %v1362_v42 = vld [vmem:[#allocation8 + $0x6e0] sm:$0xff] }
 0x1cd   :  { %v10047_v36 = vcombine.low %v1358_v27, %v1362_v42 }
 0x1ce   :  { %4304 = vmatpush1.bf16.msra.mxu0 %v9983_v30  ;;  %4441 = vmatpush1.bf16.msra.mxu1 %v9913_v31  ;;  %v10048_v30 = vcombine.high %v1358_v27, %v1362_v42  ;;  %v9978_v31 = vcombine.high %v1287_v43, %v1291_v47  ;;  %v1406_v42 = vld [vmem:[#allocation8 + $0x840] sm:$0xff] }
 0x1cf   :  { %4305 = vmatprep.subr.bf16.mxu0 %v9992_v32  ;;  %4442 = vmatprep.subr.bf16.mxu1 %v9922_v33  ;;  %v1366_v32 = vld [vmem:[#allocation8 + $0x700] sm:$0xff] }
 0x1d0   :  { %v1370_v33 = vld [vmem:[#allocation8 + $0x720] sm:$0xff] }
 0x1d1   :  { %v10055_v49 = vcombine.low %v1366_v32, %v1370_v33  ;;  %v1410_v47 = vld [vmem:[#allocation8 + $0x860] sm:$0xff] }
 0x1d2   :  { %4306 = vmatpush1.bf16.msra.mxu0 %v9991_v38  ;;  %4443 = vmatpush1.bf16.msra.mxu1 %v9921_v8  ;;  %v10056_v38 = vcombine.high %v1366_v32, %v1370_v33  ;;  %v9986_v8 = vcombine.high %v1295_v34, %v1299_v35  ;;  %v10096_v34 = vcombine.high %v1406_v42, %v1410_v47 }
 0x1d3   :  { %4307 = vmatprep.subr.bf16.mxu0 %v10000_v39  ;;  %4444 = vmatprep.subr.bf16.mxu1 %v9930_v41  ;;  %v1374_v39 = vld [vmem:[#allocation8 + $0x740] sm:$0xff] }
 0x1d4   :  { %v1378_v41 = vld [vmem:[#allocation8 + $0x760] sm:$0xff] }
 0x1d5   :  { %v10063_v58 = vcombine.low %v1374_v39, %v1378_v41 }
 0x1d6   :  { %4308 = vmatpush1.bf16.msra.mxu0 %v9999_v51  ;;  %4445 = vmatpush1.bf16.msra.mxu1 %v9929_v52  ;;  %v10064_v51 = vcombine.high %v1374_v39, %v1378_v41  ;;  %v9994_v52 = vcombine.high %v1303_v46, %v1307_v48  ;;  %v10095_v39 = vcombine.low %v1406_v42, %v1410_v47 }
 0x1d7   :  { %4309 = vmatprep.subr.bf16.mxu0 %v10008_v53  ;;  %4446 = vmatprep.subr.bf16.mxu1 %v9938_v54  ;;  %v1382_v53 = vld [vmem:[#allocation8 + $0x780] sm:$0xff] }
 0x1d8   :  { %v1386_v54 = vld [vmem:[#allocation8 + $0x7a0] sm:$0xff] }
 0x1da   :  { %4310 = vmatpush1.bf16.msra.mxu0 %v10007_v59  ;;  %4447 = vmatpush1.bf16.msra.mxu1 %v9937_v60  ;;  %v9993_v59 = vcombine.low %v1303_v46, %v1307_v48  ;;  %v11810_v60 = vsub.s32 3, %v11781_v18 }
 0x1db   :  { %4311 = vmatprep.subr.bf16.mxu0 %v10016_v61  ;;  %4448 = vmatprep.subr.bf16.mxu1 %v9946_v62  ;;  %v10072_v61 = vcombine.high %v1382_v53, %v1386_v54  ;;  %v10002_v62 = vcombine.high %v1311_v55, %v1315_v56 }
 0x1de   :  { %4312 = vmatpush1.bf16.msra.mxu0 %v10015_v3  ;;  %4449 = vmatpush1.bf16.msra.mxu1 %v9945_v4  ;;  %v293_v3 = vrot.slane %v11786_v44, %v11807_v57  ;;  %v10071_v4 = vcombine.low %v1382_v53, %v1386_v54 }
 0x1df   :  { %4313 = vmatprep.subr.bf16.mxu0 %v10024_v5  ;;  %4450 = vmatprep.subr.bf16.mxu1 %v9954_v7  ;;  %v297_v5 = vrot.slane %v11786_v44, %v11810_v60  ;;  %v10001_v7 = vcombine.low %v1311_v55, %v1315_v56 }
 0x1e2   :  { %4314 = vmatpush1.bf16.msra.mxu0 %v10023_v14  ;;  %4451 = vmatpush1.bf16.msra.mxu1 %v9953_v15  ;;  %v1402_v14 = vld [vmem:[#allocation8 + $0x820] sm:$0xff]  ;;  %v1327_v15 = vld [vmem:[#allocation8 + $0x5c8] sm:$0xff] }
 0x1e3   :  { %4315 = vmatprep.subr.bf16.mxu0 %v10032_v16  ;;  %4461 = vmatprep.subr.bf16.mxu1 %v9962_v17  ;;  %v1331_v16 = vld [vmem:[#allocation8 + $0x5e8] sm:$0xff] }
 0x1e4   :  { %v10018_v27 = vcombine.high %v1327_v15, %v1331_v16  ;;  %v10017_v32 = vcombine.low %v1327_v15, %v1331_v16  ;;  %v1450_v15 = vld [vmem:[#allocation8 + $0x9a0] sm:$0xff]  ;;  %v1375_v16 = vld [vmem:[#allocation8 + $0x748] sm:$0xff] }
 0x1e5   :  { %4453 = vmatmul.mubr.bf16.vlgmr.msra.gmra.mrb[16].mxu1 %v11797_v9 }
 0x1e6   :  { %4316 = vmatpush1.bf16.msra.mxu0 %v10031_v23  ;;  %4462 = vmatpush1.bf16.msra.mxu1 %v9961_v24  ;;  %v10009_v23 = vcombine.low %v1319_v1, %v1323_v2 }
 0x1e7   :  { %4317 = vmatprep.subr.bf16.mxu0 %v10040_v25  ;;  %4463 = vmatprep.subr.bf16.mxu1 %v9970_v26  ;;  %v10088_v26 = vcombine.high %v1398_v12, %v1402_v14 }
 0x1ea   :  { %4318 = vmatpush1.bf16.msra.mxu0 %v10039_v28  ;;  %4464 = vmatpush1.bf16.msra.mxu1 %v9969_v29  ;;  %v1335_v28 = vld [vmem:[#allocation8 + $0x608] sm:$0xff] }
 0x1eb   :  { %4319 = vmatprep.subr.bf16.mxu0 %v10048_v30  ;;  %4465 = vmatprep.subr.bf16.mxu1 %v9978_v31  ;;  %v1339_v29 = vld [vmem:[#allocation8 + $0x628] sm:$0xff]  ;;  %v10087_v31 = vcombine.low %v1398_v12, %v1402_v14  ;;  %v1446_v14 = vld [vmem:[#allocation8 + $0x980] sm:$0xff] }
 0x1ec   :  { %v10026_v35 = vcombine.high %v1335_v28, %v1339_v29  ;;  %v10025_v41 = vcombine.low %v1335_v28, %v1339_v29  ;;  %v1462_v28 = vld [vmem:[#allocation8 + $0xa00] sm:$0xff] }
 0x1ed   :  { %v1466_v29 = vld [vmem:[#allocation8 + $0xa20] sm:$0xff] }
 0x1ee   :  { %4320 = vmatpush1.bf16.msra.mxu0 %v10047_v36  ;;  %4466 = vmatpush1.bf16.msra.mxu1 %v9977_v37  ;;  %v1414_v36 = vld [vmem:[#allocation8 + $0x880] sm:$0xff] }
 0x1ef   :  { %4321 = vmatprep.subr.bf16.mxu0 %v10056_v38  ;;  %4467 = vmatprep.subr.bf16.mxu1 %v9986_v8  ;;  %v1418_v37 = vld [vmem:[#allocation8 + $0x8a0] sm:$0xff]  ;;  %v1343_v38 = vld [vmem:[#allocation8 + $0x648] sm:$0xff] }
 0x1f0   :  { %v1347_v8 = vld [vmem:[#allocation8 + $0x668] sm:$0xff]  ;;  %v10104_v46 = vcombine.high %v1414_v36, %v1418_v37  ;;  %v10103_v53 = vcombine.low %v1414_v36, %v1418_v37  ;;  %v10152_v36 = vcombine.high %v1462_v28, %v1466_v29 }
 0x1f1   :  { %v10034_v48 = vcombine.high %v1343_v38, %v1347_v8  ;;  %v10033_v54 = vcombine.low %v1343_v38, %v1347_v8  ;;  %v1470_v38 = vld [vmem:[#allocation8 + $0xa40] sm:$0xff] }
 0x1f2   :  { %4322 = vmatpush1.bf16.msra.mxu0 %v10055_v49  ;;  %4468 = vmatpush1.bf16.msra.mxu1 %v9985_v50  ;;  %v1422_v49 = vld [vmem:[#allocation8 + $0x8c0] sm:$0xff] }
 0x1f3   :  { %4323 = vmatprep.subr.bf16.mxu0 %v10064_v51  ;;  %4469 = vmatprep.subr.bf16.mxu1 %v9994_v52  ;;  %v1426_v50 = vld [vmem:[#allocation8 + $0x8e0] sm:$0xff]  ;;  %v1351_v51 = vld [vmem:[#allocation8 + $0x688] sm:$0xff] }
 0x1f4   :  { %v1355_v52 = vld [vmem:[#allocation8 + $0x6a8] sm:$0xff]  ;;  %v10112_v55 = vcombine.high %v1422_v49, %v1426_v50  ;;  %v10111_v63 = vcombine.low %v1422_v49, %v1426_v50  ;;  %v1474_v8 = vld [vmem:[#allocation8 + $0xa60] sm:$0xff] }
 0x1f5   :  { %v10042_v56 = vcombine.high %v1351_v51, %v1355_v52  ;;  %v10041_v0 = vcombine.low %v1351_v51, %v1355_v52  ;;  %v10160_v49 = vcombine.high %v1470_v38, %v1474_v8  ;;  %v1478_v51 = vld [vmem:[#allocation8 + $0xa80] sm:$0xff] }
 0x1f6   :  { %4324 = vmatpush1.bf16.msra.mxu0 %v10063_v58  ;;  %4470 = vmatpush1.bf16.msra.mxu1 %v9993_v59  ;;  %v1430_v58 = vld [vmem:[#allocation8 + $0x900] sm:$0xff] }
 0x1f7   :  { %4325 = vmatprep.subr.bf16.mxu0 %v10072_v61  ;;  %4471 = vmatprep.subr.bf16.mxu1 %v10002_v62  ;;  %v1434_v59 = vld [vmem:[#allocation8 + $0x920] sm:$0xff]  ;;  %v1359_v61 = vld [vmem:[#allocation8 + $0x6c8] sm:$0xff] }
 0x1f8   :  { %v1037_v13 = vpop.f32.mrb[4].mxu1  ;;  %v1363_v62 = vld [vmem:[#allocation8 + $0x6e8] sm:$0xff]  ;;  %v10120_v1 = vcombine.high %v1430_v58, %v1434_v59  ;;  %v1482_v52 = vld [vmem:[#allocation8 + $0xaa0] sm:$0xff] }
 0x1f9   :  { %v1038_v17 = vadd.f32 %v1037_v13, %v293_v3  ;;  %v1039_v19 = vpop.f32.mrb[5].mxu1  ;;  %v10050_v2 = vcombine.high %v1359_v61, %v1363_v62  ;;  %v1438_v3 = vld [vmem:[#allocation8 + $0x940] sm:$0xff] }
 0x1fa   :  { %v1040_v20 = vadd.f32 %v1039_v19, %v297_v5  ;;  %4326 = vmatpush1.bf16.msra.mxu0 %v10071_v4  ;;  %v1041_v21 = vpop.f32.mrb[6].mxu1  ;;  %4472 = vmatpush1.bf16.msra.mxu1 %v10001_v7  ;;  %v1442_v4 = vld [vmem:[#allocation8 + $0x960] sm:$0xff]  ;;  %v1367_v5 = vld [vmem:[#allocation8 + $0x708] sm:$0xff] }
 0x1fb   :  { %v1128_v24 = vmax.f32 %v1038_v17, 0.0  ;;  %v1042_v25 = vpop.f32.mrb[7].mxu1  ;;  %4327 = vmatprep.subr.bf16.mxu0 %v10080_v10  ;;  %4473 = vmatprep.subr.bf16.mxu1 %v10010_v11  ;;  %v1371_v7 = vld [vmem:[#allocation8 + $0x728] sm:$0xff]  ;;  %v10119_v10 = vcombine.low %v1430_v58, %v1434_v59  ;;  %v10049_v11 = vcombine.low %v1359_v61, %v1363_v62  ;;  %v10128_v12 = vcombine.high %v1438_v3, %v1442_v4  ;;  %v1486_v61 = vld [vmem:[#allocation8 + $0xac0] sm:$0xff] }
 0x1fc   :  { %v1129_v43 = vmax.f32 %v1040_v20, 0.0  ;;  %v10058_v13 = vcombine.high %v1367_v5, %v1371_v7  ;;  %v1379_v17 = vld [vmem:[#allocation8 + $0x768] sm:$0xff]  ;;  %v10127_v19 = vcombine.low %v1438_v3, %v1442_v4  ;;  %v10057_v20 = vcombine.low %v1367_v5, %v1371_v7  ;;  %v1490_v62 = vld [vmem:[#allocation8 + $0xae0] sm:$0xff] }
 0x1fd   :  { %v11818_v33 = vpack.c.bf16 %v1128_v24, %v1128_v24  ;;  %v10136_v21 = vcombine.high %v1446_v14, %v1450_v15  ;;  %v1458_v24 = vld [vmem:[#allocation8 + $0x9e0] sm:$0xff]  ;;  %v1383_v25 = vld [vmem:[#allocation8 + $0x788] sm:$0xff]  ;;  %v10065_v42 = vcombine.low %v1375_v16, %v1379_v17  ;;  %v10168_v58 = vcombine.high %v1478_v51, %v1482_v52 }
 0x1fe   :  { %v11816_v30 = vpack.c.bf16 %v1129_v43, %v1129_v43  ;;  %4328 = vmatpush1.bf16.msra.mxu0 %v10079_v22  ;;  %4474 = vmatpush1.bf16.msra.mxu1 %v10009_v23  ;;  %v10066_v22 = vcombine.high %v1375_v16, %v1379_v17  ;;  %v1454_v23 = vld [vmem:[#allocation8 + $0x9c0] sm:$0xff]  ;;  %v10176_v3 = vcombine.high %v1486_v61, %v1490_v62 }
 0x1ff   :  { %4338 = vmatprep.subr.bf16.mxu0 %v10088_v26  ;;  %4475 = vmatprep.subr.bf16.mxu1 %v10018_v27  ;;  %v1387_v26 = vld [vmem:[#allocation8 + $0x7a8] sm:$0xff]  ;;  %v10135_v27 = vcombine.low %v1446_v14, %v1450_v15  ;;  %v10144_v43 = vcombine.high %v1454_v23, %v1458_v24  ;;  %v1494_v5 = vld [vmem:[#allocation8 + $0xb00] sm:$0xff] }
 0x200   :  { %4329 = vmatprep.mubr.bf16.mxu0 %v11816_v30  ;;  %4493 = vmatprep.mubr.bf16.mxu1 %v11816_v30  ;;  %v10074_v47 = vcombine.high %v1383_v25, %v1387_v26  ;;  %v1498_v7 = vld [vmem:[#allocation8 + $0xb20] sm:$0xff] }
 0x201   :  { %4330 = vmatmul.mubr.bf16.vlgmr.msra.gmra.mrb[0].mxu0 %v11818_v33  ;;  %v10184_v14 = vcombine.high %v1494_v5, %v1498_v7  ;;  %v1502_v16 = vld [vmem:[#allocation8 + $0xb40] sm:$0xff] }
 0x202   :  { %4339 = vmatpush1.bf16.msra.mxu0 %v10087_v31  ;;  %4476 = vmatpush1.bf16.msra.mxu1 %v10017_v32  ;;  %v1391_v31 = vld [vmem:[#allocation8 + $0x7c8] sm:$0xff]  ;;  %v1506_v17 = vld [vmem:[#allocation8 + $0xb60] sm:$0xff] }
 0x203   :  { %4340 = vmatprep.subr.bf16.mxu0 %v10096_v34  ;;  %4477 = vmatprep.subr.bf16.mxu1 %v10026_v35  ;;  %v1395_v32 = vld [vmem:[#allocation8 + $0x7e8] sm:$0xff]  ;;  %v10143_v34 = vcombine.low %v1454_v23, %v1458_v24  ;;  %v10073_v35 = vcombine.low %v1383_v25, %v1387_v26  ;;  %v10192_v23 = vcombine.high %v1502_v16, %v1506_v17  ;;  %v1510_v25 = vld [vmem:[#allocation8 + $0xb80] sm:$0xff] }
 0x204   :  { %v10082_v37 = vcombine.high %v1391_v31, %v1395_v32  ;;  %v1514_v26 = vld [vmem:[#allocation8 + $0xba0] sm:$0xff] }
 0x206   :  { %4341 = vmatpush1.bf16.msra.mxu0 %v10095_v39  ;;  %4478 = vmatpush1.bf16.msra.mxu1 %v10025_v41  ;;  %v1399_v39 = vld [vmem:[#allocation8 + $0x808] sm:$0xff] }
 0x207   :  { %4342 = vmatprep.subr.bf16.mxu0 %v10104_v46  ;;  %4479 = vmatprep.subr.bf16.mxu1 %v10034_v48  ;;  %v1403_v41 = vld [vmem:[#allocation8 + $0x828] sm:$0xff]  ;;  %v10151_v46 = vcombine.low %v1462_v28, %v1466_v29  ;;  %v10081_v48 = vcombine.low %v1391_v31, %v1395_v32  ;;  %v11828_v29 = vsub.s32 5, %v11781_v18  ;;  %v10200_v31 = vcombine.high %v1510_v25, %v1514_v26 }
 0x208   :  { %v10090_v50 = vcombine.high %v1399_v39, %v1403_v41 }
 0x20a   :  { %4343 = vmatpush1.bf16.msra.mxu0 %v10103_v53  ;;  %4480 = vmatpush1.bf16.msra.mxu1 %v10033_v54  ;;  %v1407_v53 = vld [vmem:[#allocation8 + $0x848] sm:$0xff] }
 0x20b   :  { %4344 = vmatprep.subr.bf16.mxu0 %v10112_v55  ;;  %4481 = vmatprep.subr.bf16.mxu1 %v10042_v56  ;;  %v1411_v54 = vld [vmem:[#allocation8 + $0x868] sm:$0xff]  ;;  %v10159_v55 = vcombine.low %v1470_v38, %v1474_v8  ;;  %v10089_v56 = vcombine.low %v1399_v39, %v1403_v41  ;;  %v10199_v8 = vcombine.low %v1510_v25, %v1514_v26  ;;  %v1554_v25 = vld [vmem:[#allocation8 + $0xce0] sm:$0xff] }
 0x20c   :  { %v10098_v59 = vcombine.high %v1407_v53, %v1411_v54  ;;  %v305_v39 = vrot.slane %v11786_v44, %v11828_v29  ;;  %v1479_v26 = vld [vmem:[#allocation8 + $0xa88] sm:$0xff] }
 0x20e   :  { %4345 = vmatpush1.bf16.msra.mxu0 %v10111_v63  ;;  %4482 = vmatpush1.bf16.msra.mxu1 %v10041_v0  ;;  %v1415_v63 = vld [vmem:[#allocation8 + $0x888] sm:$0xff] }
 0x20f   :  { %4346 = vmatprep.subr.bf16.mxu0 %v10120_v1  ;;  %4483 = vmatprep.subr.bf16.mxu1 %v10050_v2  ;;  %v1419_v0 = vld [vmem:[#allocation8 + $0x8a8] sm:$0xff]  ;;  %v10167_v1 = vcombine.low %v1478_v51, %v1482_v52  ;;  %v10097_v2 = vcombine.low %v1407_v53, %v1411_v54  ;;  %v1530_v51 = vld [vmem:[#allocation8 + $0xc20] sm:$0xff] }
 0x210   :  { %v10106_v4 = vcombine.high %v1415_v63, %v1419_v0  ;;  %v1455_v52 = vld [vmem:[#allocation8 + $0x9c8] sm:$0xff] }
 0x211   :  { %v1459_v53 = vld [vmem:[#allocation8 + $0x9e8] sm:$0xff] }
 0x212   :  { %4347 = vmatpush1.bf16.msra.mxu0 %v10119_v10  ;;  %4484 = vmatpush1.bf16.msra.mxu1 %v10049_v11  ;;  %v1423_v10 = vld [vmem:[#allocation8 + $0x8c8] sm:$0xff] }
 0x213   :  { %4348 = vmatprep.subr.bf16.mxu0 %v10128_v12  ;;  %4485 = vmatprep.subr.bf16.mxu1 %v10058_v13  ;;  %v1427_v11 = vld [vmem:[#allocation8 + $0x8e8] sm:$0xff]  ;;  %v10175_v12 = vcombine.low %v1486_v61, %v1490_v62  ;;  %v10105_v13 = vcombine.low %v1415_v63, %v1419_v0  ;;  %v10146_v0 = vcombine.high %v1455_v52, %v1459_v53 }
 0x214   :  { %v10114_v15 = vcombine.high %v1423_v10, %v1427_v11 }
 0x216   :  { %4349 = vmatpush1.bf16.msra.mxu0 %v10127_v19  ;;  %4486 = vmatpush1.bf16.msra.mxu1 %v10057_v20  ;;  %v1431_v19 = vld [vmem:[#allocation8 + $0x908] sm:$0xff] }
 0x217   :  { %4350 = vmatprep.subr.bf16.mxu0 %v10136_v21  ;;  %4487 = vmatprep.subr.bf16.mxu1 %v10066_v22  ;;  %v1435_v20 = vld [vmem:[#allocation8 + $0x928] sm:$0xff]  ;;  %v10183_v21 = vcombine.low %v1494_v5, %v1498_v7  ;;  %v10113_v22 = vcombine.low %v1423_v10, %v1427_v11  ;;  %v10145_v11 = vcombine.low %v1455_v52, %v1459_v53 }
 0x218   :  { %v10122_v24 = vcombine.high %v1431_v19, %v1435_v20  ;;  %v10121_v28 = vcombine.low %v1431_v19, %v1435_v20  ;;  %v1467_v5 = vld [vmem:[#allocation8 + $0xa28] sm:$0xff] }
 0x219   :  { %v1475_v19 = vld [vmem:[#allocation8 + $0xa68] sm:$0xff] }
 0x21a   :  { %4351 = vmatpush1.bf16.msra.mxu0 %v10135_v27  ;;  %4488 = vmatpush1.bf16.msra.mxu1 %v10065_v42  ;;  %v1439_v27 = vld [vmem:[#allocation8 + $0x948] sm:$0xff] }
 0x21b   :  { %4352 = vmatprep.subr.bf16.mxu0 %v10144_v43  ;;  %4489 = vmatprep.subr.bf16.mxu1 %v10074_v47  ;;  %v1443_v42 = vld [vmem:[#allocation8 + $0x968] sm:$0xff]  ;;  %v11825_v43 = vsub.s32 4, %v11781_v18  ;;  %v10191_v47 = vcombine.low %v1502_v16, %v1506_v17  ;;  %v1546_v16 = vld [vmem:[#allocation8 + $0xca0] sm:$0xff] }
 0x21c   :  { %v10130_v32 = vcombine.high %v1439_v27, %v1443_v42  ;;  %v10129_v41 = vcombine.low %v1439_v27, %v1443_v42  ;;  %v1471_v17 = vld [vmem:[#allocation8 + $0xa48] sm:$0xff] }
 0x21d   :  { %v301_v38 = vrot.slane %v11786_v44, %v11825_v43  ;;  %v1483_v27 = vld [vmem:[#allocation8 + $0xaa8] sm:$0xff] }
 0x21e   :  { %4353 = vmatpush1.bf16.msra.mxu0 %v10143_v34  ;;  %4490 = vmatpush1.bf16.msra.mxu1 %v10073_v35  ;;  %v1518_v34 = vld [vmem:[#allocation8 + $0xbc0] sm:$0xff] }
 0x21f   :  { %4354 = vmatprep.subr.bf16.mxu0 %v10152_v36  ;;  %4491 = vmatprep.subr.bf16.mxu1 %v10082_v37  ;;  %v1522_v35 = vld [vmem:[#allocation8 + $0xbe0] sm:$0xff]  ;;  %v1447_v36 = vld [vmem:[#allocation8 + $0x988] sm:$0xff] }
 0x220   :  { %v1451_v37 = vld [vmem:[#allocation8 + $0x9a8] sm:$0xff] }
 0x221   :  { %v10137_v61 = vcombine.low %v1447_v36, %v1451_v37 }
 0x222   :  { %4355 = vmatpush1.bf16.msra.mxu0 %v10151_v46  ;;  %4492 = vmatpush1.bf16.msra.mxu1 %v10081_v48  ;;  %v10208_v46 = vcombine.high %v1518_v34, %v1522_v35  ;;  %v10138_v48 = vcombine.high %v1447_v36, %v1451_v37  ;;  %v1491_v36 = vld [vmem:[#allocation8 + $0xae8] sm:$0xff] }
 0x223   :  { %4356 = vmatprep.subr.bf16.mxu0 %v10160_v49  ;;  %4502 = vmatprep.subr.bf16.mxu1 %v10090_v50  ;;  %v1526_v49 = vld [vmem:[#allocation8 + $0xc00] sm:$0xff] }
 0x224   :  { %v10216_v63 = vcombine.high %v1526_v49, %v1530_v51  ;;  %v10215_v10 = vcombine.low %v1526_v49, %v1530_v51  ;;  %v1499_v49 = vld [vmem:[#allocation8 + $0xb28] sm:$0xff] }
 0x225   :  { %4494 = vmatmul.mubr.bf16.vlgmr.msra.gmra.mrb[16].mxu1 %v11818_v33 }
 0x226   :  { %4357 = vmatpush1.bf16.msra.mxu0 %v10159_v55  ;;  %4503 = vmatpush1.bf16.msra.mxu1 %v10089_v56 }
 0x227   :  { %4358 = vmatprep.subr.bf16.mxu0 %v10168_v58  ;;  %4504 = vmatprep.subr.bf16.mxu1 %v10098_v59  ;;  %v10207_v59 = vcombine.low %v1518_v34, %v1522_v35  ;;  %v1562_v34 = vld [vmem:[#allocation8 + $0xd20] sm:$0xff]  ;;  %v1487_v35 = vld [vmem:[#allocation8 + $0xac8] sm:$0xff] }
 0x228   :  { %v10177_v51 = vcombine.low %v1487_v35, %v1491_v36 }
 0x22a   :  { %4359 = vmatpush1.bf16.msra.mxu0 %v10167_v1  ;;  %4505 = vmatpush1.bf16.msra.mxu1 %v10097_v2  ;;  %v1534_v1 = vld [vmem:[#allocation8 + $0xc40] sm:$0xff] }
 0x22b   :  { %4360 = vmatprep.subr.bf16.mxu0 %v10176_v3  ;;  %4506 = vmatprep.subr.bf16.mxu1 %v10106_v4  ;;  %v1538_v3 = vld [vmem:[#allocation8 + $0xc60] sm:$0xff]  ;;  %v1463_v4 = vld [vmem:[#allocation8 + $0xa08] sm:$0xff] }
 0x22c   :  { %v10223_v20 = vcombine.low %v1534_v1, %v1538_v3 }
 0x22e   :  { %4361 = vmatpush1.bf16.msra.mxu0 %v10175_v12  ;;  %4507 = vmatpush1.bf16.msra.mxu1 %v10105_v13  ;;  %v10224_v13 = vcombine.high %v1534_v1, %v1538_v3  ;;  %v1511_v1 = vld [vmem:[#allocation8 + $0xb88] sm:$0xff] }
 0x22f   :  { %4362 = vmatprep.subr.bf16.mxu0 %v10184_v14  ;;  %4508 = vmatprep.subr.bf16.mxu1 %v10114_v15  ;;  %v10154_v14 = vcombine.high %v1463_v4, %v1467_v5  ;;  %v1542_v15 = vld [vmem:[#allocation8 + $0xc80] sm:$0xff] }
 0x230   :  { %v10231_v42 = vcombine.low %v1542_v15, %v1546_v16 }
 0x232   :  { %4363 = vmatpush1.bf16.msra.mxu0 %v10183_v21  ;;  %4509 = vmatpush1.bf16.msra.mxu1 %v10113_v22  ;;  %v10153_v21 = vcombine.low %v1463_v4, %v1467_v5  ;;  %v10232_v22 = vcombine.high %v1542_v15, %v1546_v16  ;;  %v1523_v15 = vld [vmem:[#allocation8 + $0xbe8] sm:$0xff] }
 0x233   :  { %4364 = vmatprep.subr.bf16.mxu0 %v10192_v23  ;;  %4510 = vmatprep.subr.bf16.mxu1 %v10122_v24  ;;  %v10162_v23 = vcombine.high %v1471_v17, %v1475_v19  ;;  %v1550_v24 = vld [vmem:[#allocation8 + $0xcc0] sm:$0xff] }
 0x234   :  { %v10239_v37 = vcombine.low %v1550_v24, %v1554_v25 }
 0x236   :  { %4365 = vmatpush1.bf16.msra.mxu0 %v10191_v47  ;;  %4511 = vmatpush1.bf16.msra.mxu1 %v10121_v28  ;;  %v10161_v47 = vcombine.low %v1471_v17, %v1475_v19  ;;  %v10240_v28 = vcombine.high %v1550_v24, %v1554_v25  ;;  %v1531_v24 = vld [vmem:[#allocation8 + $0xc28] sm:$0xff] }
 0x237   :  { %4366 = vmatprep.subr.bf16.mxu0 %v10200_v31  ;;  %4512 = vmatprep.subr.bf16.mxu1 %v10130_v32  ;;  %v10170_v31 = vcombine.high %v1479_v26, %v1483_v27  ;;  %v1558_v32 = vld [vmem:[#allocation8 + $0xd00] sm:$0xff] }
 0x238   :  { %v1078_v50 = vpop.f32.mrb[8].mxu1 }
 0x239   :  { %v1079_v54 = vadd.f32 %v1078_v50, %v301_v38  ;;  %v1080_v55 = vpop.f32.mrb[9].mxu1  ;;  %v10169_v38 = vcombine.low %v1479_v26, %v1483_v27  ;;  %v10247_v50 = vcombine.low %v1558_v32, %v1562_v34 }
 0x23a   :  { %v1081_v56 = vadd.f32 %v1080_v55, %v305_v39  ;;  %4367 = vmatpush1.bf16.msra.mxu0 %v10199_v8  ;;  %v1082_v58 = vpop.f32.mrb[10].mxu1  ;;  %4513 = vmatpush1.bf16.msra.mxu1 %v10129_v41  ;;  %v10248_v8 = vcombine.high %v1558_v32, %v1562_v34  ;;  %v10178_v39 = vcombine.high %v1487_v35, %v1491_v36  ;;  %v1566_v41 = vld [vmem:[#allocation8 + $0xd40] sm:$0xff]  ;;  %v1539_v32 = vld [vmem:[#allocation8 + $0xc68] sm:$0xff] }
 0x23b   :  { %v1130_v62 = vmax.f32 %v1079_v54, 0.0  ;;  %v1083_v44 = vpop.f32.mrb[11].mxu1  ;;  %4368 = vmatprep.subr.bf16.mxu0 %v10208_v46  ;;  %4514 = vmatprep.subr.bf16.mxu1 %v10138_v48  ;;  %v1570_v46 = vld [vmem:[#allocation8 + $0xd60] sm:$0xff]  ;;  %v1495_v48 = vld [vmem:[#allocation8 + $0xb08] sm:$0xff] }
 0x23c   :  { %v1131_v2 = vmax.f32 %v1081_v56, 0.0  ;;  %v10256_v52 = vcombine.high %v1566_v41, %v1570_v46  ;;  %v10186_v53 = vcombine.high %v1495_v48, %v1499_v49  ;;  %v1574_v54 = vld [vmem:[#allocation8 + $0xd80] sm:$0xff]  ;;  %v1503_v56 = vld [vmem:[#allocation8 + $0xb48] sm:$0xff] }
 0x23d   :  { %v11836_v12 = vpack.c.bf16 %v1130_v62, %v1130_v62  ;;  %v1578_v55 = vld [vmem:[#allocation8 + $0xda0] sm:$0xff]  ;;  %v1507_v58 = vld [vmem:[#allocation8 + $0xb68] sm:$0xff] }
 0x23e   :  { %v11834_v7 = vpack.c.bf16 %v1131_v2, %v1131_v2  ;;  %4369 = vmatpush1.bf16.msra.mxu0 %v10207_v59  ;;  %4515 = vmatpush1.bf16.msra.mxu1 %v10137_v61  ;;  %v10255_v59 = vcombine.low %v1566_v41, %v1570_v46  ;;  %v10185_v61 = vcombine.low %v1495_v48, %v1499_v49  ;;  %v1515_v2 = vld [vmem:[#allocation8 + $0xba8] sm:$0xff] }
 0x23f   :  { %4379 = vmatprep.subr.bf16.mxu0 %v10216_v63  ;;  %4516 = vmatprep.subr.bf16.mxu1 %v10146_v0  ;;  %v10264_v62 = vcombine.high %v1574_v54, %v1578_v55  ;;  %v10194_v44 = vcombine.high %v1503_v56, %v1507_v58  ;;  %v1582_v63 = vld [vmem:[#allocation8 + $0xdc0] sm:$0xff]  ;;  %v10263_v3 = vcombine.low %v1574_v54, %v1578_v55  ;;  %v1547_v41 = vld [vmem:[#allocation8 + $0xca8] sm:$0xff] }
 0x240   :  { %4370 = vmatprep.mubr.bf16.mxu0 %v11834_v7  ;;  %4534 = vmatprep.mubr.bf16.mxu1 %v11834_v7  ;;  %v1586_v0 = vld [vmem:[#allocation8 + $0xde0] sm:$0xff]  ;;  %v10193_v4 = vcombine.low %v1503_v56, %v1507_v58  ;;  %v10201_v17 = vcombine.low %v1511_v1, %v1515_v2  ;;  %v1555_v54 = vld [vmem:[#allocation8 + $0xce8] sm:$0xff] }
 0x241   :  { %4371 = vmatmul.mubr.bf16.vlgmr.msra.gmra.mrb[0].mxu0 %v11836_v12  ;;  %v10272_v5 = vcombine.high %v1582_v63, %v1586_v0  ;;  %v10271_v16 = vcombine.low %v1582_v63, %v1586_v0  ;;  %v1563_v63 = vld [vmem:[#allocation8 + $0xd28] sm:$0xff] }
 0x242   :  { %4380 = vmatpush1.bf16.msra.mxu0 %v10215_v10  ;;  %4517 = vmatpush1.bf16.msra.mxu1 %v10145_v11  ;;  %v10202_v10 = vcombine.high %v1511_v1, %v1515_v2  ;;  %v1590_v11 = vld [vmem:[#allocation8 + $0xe00] sm:$0xff] }
 0x243   :  { %4381 = vmatprep.subr.bf16.mxu0 %v10224_v13  ;;  %4518 = vmatprep.subr.bf16.mxu1 %v10154_v14  ;;  %v1594_v13 = vld [vmem:[#allocation8 + $0xe20] sm:$0xff]  ;;  %v1519_v14 = vld [vmem:[#allocation8 + $0xbc8] sm:$0xff] }
 0x244   :  { %v10280_v19 = vcombine.high %v1590_v11, %v1594_v13  ;;  %v10279_v25 = vcombine.low %v1590_v11, %v1594_v13  ;;  %v10209_v26 = vcombine.low %v1519_v14, %v1523_v15  ;;  %v1571_v11 = vld [vmem:[#allocation8 + $0xd68] sm:$0xff]  ;;  %v11843_v13 = vsub.s32 6, %v11781_v18 }
 0x246   :  { %4382 = vmatpush1.bf16.msra.mxu0 %v10223_v20  ;;  %4519 = vmatpush1.bf16.msra.mxu1 %v10153_v21  ;;  %v10210_v20 = vcombine.high %v1519_v14, %v1523_v15  ;;  %v1598_v21 = vld [vmem:[#allocation8 + $0xe40] sm:$0xff] }
 0x247   :  { %4383 = vmatprep.subr.bf16.mxu0 %v10232_v22  ;;  %4520 = vmatprep.subr.bf16.mxu1 %v10162_v23  ;;  %v1602_v22 = vld [vmem:[#allocation8 + $0xe60] sm:$0xff]  ;;  %v1527_v23 = vld [vmem:[#allocation8 + $0xc08] sm:$0xff] }
 0x248   :  { %v10288_v27 = vcombine.high %v1598_v21, %v1602_v22  ;;  %v10287_v34 = vcombine.low %v1598_v21, %v1602_v22  ;;  %v10217_v35 = vcombine.low %v1527_v23, %v1531_v24  ;;  %v1650_v21 = vld [vmem:[#allocation8 + $0xfe0] sm:$0xff]  ;;  %v1575_v22 = vld [vmem:[#allocation8 + $0xd88] sm:$0xff] }
 0x24a   :  { %4384 = vmatpush1.bf16.msra.mxu0 %v10231_v42  ;;  %4521 = vmatpush1.bf16.msra.mxu1 %v10161_v47  ;;  %v10218_v42 = vcombine.high %v1527_v23, %v1531_v24  ;;  %v1606_v47 = vld [vmem:[#allocation8 + $0xe80] sm:$0xff]  ;;  %v1579_v23 = vld [vmem:[#allocation8 + $0xda8] sm:$0xff]  ;;  %v11316_v24 = vld [vmem:[#allocation7] sm:$0xff] }
 0x24b   :  { %4385 = vmatprep.subr.bf16.mxu0 %v10240_v28  ;;  %4522 = vmatprep.subr.bf16.mxu1 %v10170_v31  ;;  %v1610_v28 = vld [vmem:[#allocation8 + $0xea0] sm:$0xff]  ;;  %v1535_v31 = vld [vmem:[#allocation8 + $0xc48] sm:$0xff] }
 0x24c   :  { %v10296_v36 = vcombine.high %v1606_v47, %v1610_v28  ;;  %v10295_v46 = vcombine.low %v1606_v47, %v1610_v28  ;;  %v10225_v48 = vcombine.low %v1535_v31, %v1539_v32  ;;  %v10266_v47 = vcombine.high %v1575_v22, %v1579_v23  ;;  %v1144_v28 = vld [vmem:[#allocation8 + $0x10] sm:$0xff] }
 0x24e   :  { %4386 = vmatpush1.bf16.msra.mxu0 %v10239_v37  ;;  %4523 = vmatpush1.bf16.msra.mxu1 %v10169_v38  ;;  %v10226_v37 = vcombine.high %v1535_v31, %v1539_v32  ;;  %v1614_v38 = vld [vmem:[#allocation8 + $0xec0] sm:$0xff]  ;;  %v1148_v32 = vld [vmem:[#allocation8 + $0x30] sm:$0xff] }
 0x24f   :  { %4387 = vmatprep.subr.bf16.mxu0 %v10248_v8  ;;  %4524 = vmatprep.subr.bf16.mxu1 %v10178_v39  ;;  %v1618_v8 = vld [vmem:[#allocation8 + $0xee0] sm:$0xff]  ;;  %v1543_v39 = vld [vmem:[#allocation8 + $0xc88] sm:$0xff] }
 0x250   :  { %v10304_v49 = vcombine.high %v1614_v38, %v1618_v8  ;;  %v10303_v55 = vcombine.low %v1614_v38, %v1618_v8  ;;  %v10233_v56 = vcombine.low %v1543_v39, %v1547_v41 }
 0x252   :  { %4388 = vmatpush1.bf16.msra.mxu0 %v10247_v50  ;;  %4525 = vmatpush1.bf16.msra.mxu1 %v10177_v51  ;;  %v10234_v50 = vcombine.high %v1543_v39, %v1547_v41  ;;  %v1622_v51 = vld [vmem:[#allocation8 + $0xf00] sm:$0xff]  ;;  %v10265_v41 = vcombine.low %v1575_v22, %v1579_v23  ;;  %v1176_v23 = vld [vmem:[#allocation8 + $0x110] sm:$0xff] }
 0x253   :  { %4389 = vmatprep.subr.bf16.mxu0 %v10256_v52  ;;  %4526 = vmatprep.subr.bf16.mxu1 %v10186_v53  ;;  %v1626_v52 = vld [vmem:[#allocation8 + $0xf20] sm:$0xff]  ;;  %v1551_v53 = vld [vmem:[#allocation8 + $0xcc8] sm:$0xff] }
 0x254   :  { %v10312_v58 = vcombine.high %v1622_v51, %v1626_v52  ;;  %v10311_v0 = vcombine.low %v1622_v51, %v1626_v52  ;;  %v10241_v1 = vcombine.low %v1551_v53, %v1555_v54  ;;  %v1152_v52 = vld [vmem:[#allocation8 + $0x50] sm:$0xff] }
 0x256   :  { %4390 = vmatpush1.bf16.msra.mxu0 %v10255_v59  ;;  %4527 = vmatpush1.bf16.msra.mxu1 %v10185_v61  ;;  %v10242_v59 = vcombine.high %v1551_v53, %v1555_v54  ;;  %v1630_v61 = vld [vmem:[#allocation8 + $0xf40] sm:$0xff]  ;;  %v1156_v53 = vld [vmem:[#allocation8 + $0x70] sm:$0xff]  ;;  %v1591_v54 = vld [vmem:[#allocation8 + $0xe08] sm:$0xff] }
 0x257   :  { %4391 = vmatprep.subr.bf16.mxu0 %v10264_v62  ;;  %4528 = vmatprep.subr.bf16.mxu1 %v10194_v44  ;;  %v1634_v62 = vld [vmem:[#allocation8 + $0xf60] sm:$0xff]  ;;  %v1559_v44 = vld [vmem:[#allocation8 + $0xd08] sm:$0xff] }
 0x258   :  { %v10320_v2 = vcombine.high %v1630_v61, %v1634_v62  ;;  %v10319_v14 = vcombine.low %v1630_v61, %v1634_v62  ;;  %v10249_v15 = vcombine.low %v1559_v44, %v1563_v63  ;;  %v9844_v62 = vcombine.high %v1152_v52, %v1156_v53 }
 0x25a   :  { %4392 = vmatpush1.bf16.msra.mxu0 %v10263_v3  ;;  %4529 = vmatpush1.bf16.msra.mxu1 %v10193_v4  ;;  %v10250_v3 = vcombine.high %v1559_v44, %v1563_v63  ;;  %v1638_v4 = vld [vmem:[#allocation8 + $0xf80] sm:$0xff]  ;;  %v1160_v44 = vld [vmem:[#allocation8 + $0x90] sm:$0xff] }
 0x25b   :  { %4393 = vmatprep.subr.bf16.mxu0 %v10272_v5  ;;  %4530 = vmatprep.subr.bf16.mxu1 %v10202_v10  ;;  %v1642_v5 = vld [vmem:[#allocation8 + $0xfa0] sm:$0xff]  ;;  %v1567_v10 = vld [vmem:[#allocation8 + $0xd48] sm:$0xff] }
 0x25e   :  { %4394 = vmatpush1.bf16.msra.mxu0 %v10271_v16  ;;  %4531 = vmatpush1.bf16.msra.mxu1 %v10201_v17  ;;  %v11846_v16 = vsub.s32 7, %v11781_v18  ;;  %v10328_v17 = vcombine.high %v1638_v4, %v1642_v5 }
 0x25f   :  { %4395 = vmatprep.subr.bf16.mxu0 %v10280_v19  ;;  %4532 = vmatprep.subr.bf16.mxu1 %v10210_v20  ;;  %v10258_v19 = vcombine.high %v1567_v10, %v1571_v11  ;;  %v1646_v20 = vld [vmem:[#allocation8 + $0xfc0] sm:$0xff] }
 0x260   :  { %v10336_v18 = vcombine.high %v1646_v20, %v1650_v21  ;;  %v10335_v39 = vcombine.low %v1646_v20, %v1650_v21 }
 0x262   :  { %4396 = vmatpush1.bf16.msra.mxu0 %v10279_v25  ;;  %4533 = vmatpush1.bf16.msra.mxu1 %v10209_v26  ;;  %v309_v25 = vrot.slane %v11316_v24, %v11843_v13  ;;  %v10327_v26 = vcombine.low %v1638_v4, %v1642_v5 }
 0x263   :  { %4397 = vmatprep.subr.bf16.mxu0 %v10288_v27  ;;  %4543 = vmatprep.subr.bf16.mxu1 %v10218_v42  ;;  %v313_v27 = vrot.slane %v11316_v24, %v11846_v16  ;;  %v10257_v42 = vcombine.low %v1567_v10, %v1571_v11  ;;  %v1168_v11 = vld [vmem:[#allocation8 + $0xd0] sm:$0xff] }
 0x264   :  { %v1180_v24 = vld [vmem:[#allocation8 + $0x130] sm:$0xff] }
 0x265   :  { %4535 = vmatmul.mubr.bf16.vlgmr.msra.gmra.mrb[16].mxu1 %v11836_v12 }
 0x266   :  { %4398 = vmatpush1.bf16.msra.mxu0 %v10287_v34  ;;  %4544 = vmatpush1.bf16.msra.mxu1 %v10217_v35  ;;  %v1583_v34 = vld [vmem:[#allocation8 + $0xdc8] sm:$0xff] }
 0x267   :  { %4399 = vmatprep.subr.bf16.mxu0 %v10296_v36  ;;  %4545 = vmatprep.subr.bf16.mxu1 %v10226_v37  ;;  %v1587_v35 = vld [vmem:[#allocation8 + $0xde8] sm:$0xff] }
 0x26a   :  { %4400 = vmatpush1.bf16.msra.mxu0 %v10295_v46  ;;  %4546 = vmatpush1.bf16.msra.mxu1 %v10225_v48 }
 0x26b   :  { %4401 = vmatprep.subr.bf16.mxu0 %v10304_v49  ;;  %4547 = vmatprep.subr.bf16.mxu1 %v10234_v50  ;;  %v9836_v49 = vcombine.high %v1144_v28, %v1148_v32  ;;  %v10274_v50 = vcombine.high %v1583_v34, %v1587_v35 }
 0x26e   :  { %4402 = vmatpush1.bf16.msra.mxu0 %v10303_v55  ;;  %4548 = vmatpush1.bf16.msra.mxu1 %v10233_v56  ;;  %v1595_v55 = vld [vmem:[#allocation8 + $0xe28] sm:$0xff] }
 0x26f   :  { %4403 = vmatprep.subr.bf16.mxu0 %v10312_v58  ;;  %4549 = vmatprep.subr.bf16.mxu1 %v10242_v59  ;;  %v9835_v58 = vcombine.low %v1144_v28, %v1148_v32  ;;  %v10273_v59 = vcombine.low %v1583_v34, %v1587_v35  ;;  %v10282_v63 = vcombine.high %v1591_v54, %v1595_v55  ;;  %v1184_v28 = vld [vmem:[#allocation8 + $0x150] sm:$0xff]  ;;  %v1623_v32 = vld [vmem:[#allocation8 + $0xf08] sm:$0xff] }
 0x270   :  { %v10281_v4 = vcombine.low %v1591_v54, %v1595_v55  ;;  %v1627_v34 = vld [vmem:[#allocation8 + $0xf28] sm:$0xff]  ;;  %v9867_v35 = vcombine.low %v1176_v23, %v1180_v24 }
 0x271   :  { %v1639_v54 = vld [vmem:[#allocation8 + $0xf88] sm:$0xff] }
 0x272   :  { %4404 = vmatpush1.bf16.msra.mxu0 %v10311_v0  ;;  %4550 = vmatpush1.bf16.msra.mxu1 %v10241_v1  ;;  %v1164_v0 = vld [vmem:[#allocation8 + $0xb0] sm:$0xff]  ;;  %v1599_v1 = vld [vmem:[#allocation8 + $0xe48] sm:$0xff] }
 0x273   :  { %4405 = vmatprep.subr.bf16.mxu0 %v10320_v2  ;;  %4551 = vmatprep.subr.bf16.mxu1 %v10250_v3  ;;  %v1603_v2 = vld [vmem:[#allocation8 + $0xe68] sm:$0xff]  ;;  %v9843_v3 = vcombine.low %v1152_v52, %v1156_v53  ;;  %v9852_v5 = vcombine.high %v1160_v44, %v1164_v0  ;;  %v1200_v52 = vld [vmem:[#allocation8 + $0x1d0] sm:$0xff] }
 0x274   :  { %v10290_v10 = vcombine.high %v1599_v1, %v1603_v2  ;;  %v10289_v20 = vcombine.low %v1599_v1, %v1603_v2  ;;  %v1204_v53 = vld [vmem:[#allocation8 + $0x1f0] sm:$0xff]  ;;  %v1643_v55 = vld [vmem:[#allocation8 + $0xfa8] sm:$0xff] }
 0x275   :  { %v1647_v1 = vld [vmem:[#allocation8 + $0xfc8] sm:$0xff] }
 0x276   :  { %4406 = vmatpush1.bf16.msra.mxu0 %v10319_v14  ;;  %4552 = vmatpush1.bf16.msra.mxu1 %v10249_v15  ;;  %v1172_v14 = vld [vmem:[#allocation8 + $0xf0] sm:$0xff]  ;;  %v1607_v15 = vld [vmem:[#allocation8 + $0xe88] sm:$0xff] }
 0x277   :  { %4407 = vmatprep.subr.bf16.mxu0 %v10328_v17  ;;  %4553 = vmatprep.subr.bf16.mxu1 %v10258_v19  ;;  %v1611_v17 = vld [vmem:[#allocation8 + $0xea8] sm:$0xff]  ;;  %v9851_v19 = vcombine.low %v1160_v44, %v1164_v0  ;;  %v9860_v21 = vcombine.high %v1168_v11, %v1172_v14  ;;  %v10330_v44 = vcombine.high %v1639_v54, %v1643_v55  ;;  %v1212_v0 = vld [vmem:[#allocation8 + $0x230] sm:$0xff] }
 0x278   :  { %v1119_v31 = vpop.f32.mrb[12].mxu1  ;;  %v10298_v22 = vcombine.high %v1607_v15, %v1611_v17  ;;  %v1651_v2 = vld [vmem:[#allocation8 + $0xfe8] sm:$0xff] }
 0x279   :  { %v1120_v36 = vadd.f32 %v1119_v31, %v309_v25  ;;  %v1121_v37 = vpop.f32.mrb[13].mxu1  ;;  %v1615_v25 = vld [vmem:[#allocation8 + $0xec8] sm:$0xff]  ;;  %v1188_v31 = vld [vmem:[#allocation8 + $0x170] sm:$0xff] }
 0x27a   :  { %v1122_v38 = vadd.f32 %v1121_v37, %v313_v27  ;;  %4408 = vmatpush1.bf16.msra.mxu0 %v10327_v26  ;;  %v1123_v8 = vpop.f32.mrb[14].mxu1  ;;  %4554 = vmatpush1.bf16.msra.mxu1 %v10257_v42  ;;  %v1619_v26 = vld [vmem:[#allocation8 + $0xee8] sm:$0xff]  ;;  %v9859_v27 = vcombine.low %v1168_v11, %v1172_v14  ;;  %v10297_v42 = vcombine.low %v1607_v15, %v1611_v17  ;;  %v1216_v11 = vld [vmem:[#allocation8 + $0x250] sm:$0xff]  ;;  %v1145_v15 = vld [vmem:[#allocation8 + $0x18] sm:$0xff] }
 0x27b   :  { %v1132_v46 = vmax.f32 %v1120_v36, 0.0  ;;  %v1124_v48 = vpop.f32.mrb[15].mxu1  ;;  %4409 = vmatprep.subr.bf16.mxu0 %v10336_v18  ;;  %4555 = vmatprep.subr.bf16.mxu1 %v10266_v47  ;;  %v9868_v18 = vcombine.high %v1176_v23, %v1180_v24  ;;  %v10306_v47 = vcombine.high %v1615_v25, %v1619_v26  ;;  %v10305_v36 = vcombine.low %v1615_v25, %v1619_v26  ;;  %v1192_v8 = vld [vmem:[#allocation8 + $0x190] sm:$0xff]  ;;  %v1149_v17 = vld [vmem:[#allocation8 + $0x38] sm:$0xff] }
 0x27c   :  { %v1133_v51 = vmax.f32 %v1122_v38, 0.0  ;;  %v9876_v37 = vcombine.high %v1184_v28, %v1188_v31  ;;  %v10314_v38 = vcombine.high %v1623_v32, %v1627_v34  ;;  %v9875_v48 = vcombine.low %v1184_v28, %v1188_v31  ;;  %v1220_v14 = vld [vmem:[#allocation8 + $0x270] sm:$0xff]  ;;  %v1153_v25 = vld [vmem:[#allocation8 + $0x58] sm:$0xff] }
 0x27d   :  { %v11852_v61 = vpack.c.bf16 %v1132_v46, %v1132_v46  ;;  %v1635_v46 = vld [vmem:[#allocation8 + $0xf68] sm:$0xff]  ;;  %v1224_v23 = vld [vmem:[#allocation8 + $0x290] sm:$0xff]  ;;  %v1157_v26 = vld [vmem:[#allocation8 + $0x78] sm:$0xff] }
 0x27e   :  { %v11850_v56 = vpack.c.bf16 %v1133_v51, %v1133_v51  ;;  %4410 = vmatpush1.bf16.msra.mxu0 %v10335_v39  ;;  %4556 = vmatpush1.bf16.msra.mxu1 %v10265_v41  ;;  %v1196_v39 = vld [vmem:[#allocation8 + $0x1b0] sm:$0xff]  ;;  %v1631_v41 = vld [vmem:[#allocation8 + $0xf48] sm:$0xff]  ;;  %v9846_v28 = vcombine.high %v1153_v25, %v1157_v26 }
 0x27f   :  { %4584 = vmatprep.subr.bf16.mxu0 %v9836_v49  ;;  %4557 = vmatprep.subr.bf16.mxu1 %v10274_v50  ;;  %v10313_v49 = vcombine.low %v1623_v32, %v1627_v34  ;;  %v9884_v50 = vcombine.high %v1192_v8, %v1196_v39  ;;  %v10322_v51 = vcombine.high %v1631_v41, %v1635_v46  ;;  %v1228_v24 = vld [vmem:[#allocation8 + $0x2b0] sm:$0xff]  ;;  %v1161_v32 = vld [vmem:[#allocation8 + $0x98] sm:$0xff] }
 0x280   :  { %4411 = vmatprep.mubr.bf16.mxu0 %v11850_v56  ;;  %4575 = vmatprep.mubr.bf16.mxu1 %v11850_v56  ;;  %v1236_v31 = vld [vmem:[#allocation8 + $0x2f0] sm:$0xff]  ;;  %v1165_v34 = vld [vmem:[#allocation8 + $0xb8] sm:$0xff] }
 0x281   :  { %4412 = vmatmul.mubr.bf16.vlgmr.msra.gmra.mrb[0].mxu0 %v11852_v61 }
 0x282   :  { %4585 = vmatpush1.bf16.msra.mxu0 %v9835_v58  ;;  %4558 = vmatpush1.bf16.msra.mxu1 %v10273_v59  ;;  %v9883_v58 = vcombine.low %v1192_v8, %v1196_v39  ;;  %v10321_v59 = vcombine.low %v1631_v41, %v1635_v46  ;;  %v1240_v8 = vld [vmem:[#allocation8 + $0x310] sm:$0xff]  ;;  %v1169_v41 = vld [vmem:[#allocation8 + $0xd8] sm:$0xff] }
 0x283   :  { %4616 = vmatprep.mubr.bf16.mxu0 %v11795_v6  ;;  %4586 = vmatprep.subr.bf16.mxu0 %v9844_v62  ;;  %v9892_v62 = vcombine.high %v1200_v52, %v1204_v53  ;;  %v1244_v39 = vld [vmem:[#allocation8 + $0x330] sm:$0xff]  ;;  %v1173_v46 = vld [vmem:[#allocation8 + $0xf8] sm:$0xff] }
 0x284   :  { %4559 = vmatprep.subr.bf16.mxu1 %v10282_v63  ;;  %v1208_v63 = vld [vmem:[#allocation8 + $0x210] sm:$0xff] }
 0x286   :  { %4587 = vmatpush1.bf16.msra.mxu0 %v9843_v3  ;;  %4560 = vmatpush1.bf16.msra.mxu1 %v10281_v4  ;;  %v9891_v3 = vcombine.low %v1200_v52, %v1204_v53  ;;  %v10329_v4 = vcombine.low %v1639_v54, %v1643_v55  ;;  %v1248_v52 = vld [vmem:[#allocation8 + $0x350] sm:$0xff]  ;;  %v1177_v54 = vld [vmem:[#allocation8 + $0x118] sm:$0xff]  ;;  %v9931_v55 = vcombine.low %v1240_v8, %v1244_v39 }
 0x287   :  { %4588 = vmatprep.subr.bf16.mxu0 %v9852_v5  ;;  %4561 = vmatprep.subr.bf16.mxu1 %v10290_v10  ;;  %v9900_v5 = vcombine.high %v1208_v63, %v1212_v0  ;;  %v10338_v10 = vcombine.high %v1647_v1, %v1651_v2  ;;  %v1252_v53 = vld [vmem:[#allocation8 + $0x370] sm:$0xff] }
 0x28a   :  { %4589 = vmatpush1.bf16.msra.mxu0 %v9851_v19  ;;  %4562 = vmatpush1.bf16.msra.mxu1 %v10289_v20  ;;  %v9899_v19 = vcombine.low %v1208_v63, %v1212_v0  ;;  %v10337_v20 = vcombine.low %v1647_v1, %v1651_v2  ;;  %v1260_v63 = vld [vmem:[#allocation8 + $0x3b0] sm:$0xff]  ;;  %v1185_v0 = vld [vmem:[#allocation8 + $0x158] sm:$0xff]  ;;  %v9939_v2 = vcombine.low %v1248_v52, %v1252_v53 }
 0x28b   :  { %4590 = vmatprep.subr.bf16.mxu0 %v9860_v21  ;;  %4563 = vmatprep.subr.bf16.mxu1 %v10298_v22  ;;  %v9908_v21 = vcombine.high %v1216_v11, %v1220_v14  ;;  %v9838_v22 = vcombine.high %v1145_v15, %v1149_v17  ;;  %v1189_v1 = vld [vmem:[#allocation8 + $0x178] sm:$0xff] }
 0x28e   :  { %4591 = vmatpush1.bf16.msra.mxu0 %v9859_v27  ;;  %4564 = vmatpush1.bf16.msra.mxu1 %v10297_v42  ;;  %v9907_v27 = vcombine.low %v1216_v11, %v1220_v14  ;;  %v9837_v42 = vcombine.low %v1145_v15, %v1149_v17  ;;  %v1268_v11 = vld [vmem:[#allocation8 + $0x3f0] sm:$0xff]  ;;  %v1193_v14 = vld [vmem:[#allocation8 + $0x198] sm:$0xff] }
 0x28f   :  { %4592 = vmatprep.subr.bf16.mxu0 %v9868_v18  ;;  %4565 = vmatprep.subr.bf16.mxu1 %v10306_v47  ;;  %v9916_v18 = vcombine.high %v1224_v23, %v1228_v24  ;;  %v1232_v47 = vld [vmem:[#allocation8 + $0x2d0] sm:$0xff]  ;;  %v1197_v15 = vld [vmem:[#allocation8 + $0x1b8] sm:$0xff] }
 0x292   :  { %4593 = vmatpush1.bf16.msra.mxu0 %v9867_v35  ;;  %4566 = vmatpush1.bf16.msra.mxu1 %v10305_v36  ;;  %v9915_v35 = vcombine.low %v1224_v23, %v1228_v24  ;;  %v9845_v36 = vcombine.low %v1153_v25, %v1157_v26  ;;  %v1276_v23 = vld [vmem:[#allocation8 + $0x430] sm:$0xff]  ;;  %v1201_v24 = vld [vmem:[#allocation8 + $0x1d8] sm:$0xff] }
 0x293   :  { %4594 = vmatprep.subr.bf16.mxu0 %v9876_v37  ;;  %4567 = vmatprep.subr.bf16.mxu1 %v10314_v38  ;;  %v9924_v37 = vcombine.high %v1232_v47, %v1236_v31  ;;  %v9854_v38 = vcombine.high %v1161_v32, %v1165_v34  ;;  %v1205_v25 = vld [vmem:[#allocation8 + $0x1f8] sm:$0xff] }
 0x296   :  { %4595 = vmatpush1.bf16.msra.mxu0 %v9875_v48  ;;  %4568 = vmatpush1.bf16.msra.mxu1 %v10313_v49  ;;  %v9923_v48 = vcombine.low %v1232_v47, %v1236_v31  ;;  %v9853_v49 = vcombine.low %v1161_v32, %v1165_v34  ;;  %v1280_v47 = vld [vmem:[#allocation8 + $0x450] sm:$0xff]  ;;  %v1209_v31 = vld [vmem:[#allocation8 + $0x218] sm:$0xff] }
 0x297   :  { %4596 = vmatprep.subr.bf16.mxu0 %v9884_v50  ;;  %4569 = vmatprep.subr.bf16.mxu1 %v10322_v51  ;;  %v9932_v50 = vcombine.high %v1240_v8, %v1244_v39  ;;  %v9862_v51 = vcombine.high %v1169_v41, %v1173_v46  ;;  %v1213_v32 = vld [vmem:[#allocation8 + $0x238] sm:$0xff]  ;;  %v1292_v8 = vld [vmem:[#allocation8 + $0x4b0] sm:$0xff] }
 0x298   :  { %v1217_v39 = vld [vmem:[#allocation8 + $0x258] sm:$0xff] }
 0x29a   :  { %4597 = vmatpush1.bf16.msra.mxu0 %v9883_v58  ;;  %4570 = vmatpush1.bf16.msra.mxu1 %v10321_v59  ;;  %v9861_v58 = vcombine.low %v1169_v41, %v1173_v46  ;;  %v9940_v59 = vcombine.high %v1248_v52, %v1252_v53  ;;  %v1221_v41 = vld [vmem:[#allocation8 + $0x278] sm:$0xff]  ;;  %v1300_v52 = vld [vmem:[#allocation8 + $0x4f0] sm:$0xff] }
 0x29b   :  { %4598 = vmatprep.subr.bf16.mxu0 %v9892_v62  ;;  %4571 = vmatprep.subr.bf16.mxu1 %v10330_v44  ;;  %v1256_v44 = vld [vmem:[#allocation8 + $0x390] sm:$0xff]  ;;  %v1225_v53 = vld [vmem:[#allocation8 + $0x298] sm:$0xff] }
 0x29c   :  { %v9947_v17 = vcombine.low %v1256_v44, %v1260_v63 }
 0x29e   :  { %4599 = vmatpush1.bf16.msra.mxu0 %v9891_v3  ;;  %4572 = vmatpush1.bf16.msra.mxu1 %v10329_v4  ;;  %v9948_v4 = vcombine.high %v1256_v44, %v1260_v63  ;;  %v1308_v44 = vld [vmem:[#allocation8 + $0x530] sm:$0xff]  ;;  %v1233_v63 = vld [vmem:[#allocation8 + $0x2d8] sm:$0xff] }
 0x29f   :  { %4600 = vmatprep.subr.bf16.mxu0 %v9900_v5  ;;  %4573 = vmatprep.subr.bf16.mxu1 %v10338_v10  ;;  %v9878_v5 = vcombine.high %v1185_v0, %v1189_v1  ;;  %v1264_v10 = vld [vmem:[#allocation8 + $0x3d0] sm:$0xff] }
 0x2a0   :  { %v9955_v26 = vcombine.low %v1264_v10, %v1268_v11 }
 0x2a2   :  { %4601 = vmatpush1.bf16.msra.mxu0 %v9899_v19  ;;  %4574 = vmatpush1.bf16.msra.mxu1 %v10337_v20  ;;  %v9877_v19 = vcombine.low %v1185_v0, %v1189_v1  ;;  %v9956_v20 = vcombine.high %v1264_v10, %v1268_v11  ;;  %v1237_v0 = vld [vmem:[#allocation8 + $0x2f8] sm:$0xff]  ;;  %v1316_v10 = vld [vmem:[#allocation8 + $0x570] sm:$0xff] }
 0x2a3   :  { %4602 = vmatprep.subr.bf16.mxu0 %v9908_v21  ;;  %4748 = vmatprep.subr.bf16.mxu1 %v9838_v22  ;;  %v9886_v21 = vcombine.high %v1193_v14, %v1197_v15  ;;  %v1272_v22 = vld [vmem:[#allocation8 + $0x410] sm:$0xff]  ;;  %v1241_v11 = vld [vmem:[#allocation8 + $0x318] sm:$0xff] }
 0x2a4   :  { %v9963_v34 = vcombine.low %v1272_v22, %v1276_v23 }
 0x2a5   :  { %4576 = vmatmul.mubr.bf16.vlgmr.msra.gmra.mrb[16].mxu1 %v11852_v61 }
 0x2a6   :  { %4603 = vmatpush1.bf16.msra.mxu0 %v9907_v27  ;;  %4749 = vmatpush1.bf16.msra.mxu1 %v9837_v42  ;;  %v9885_v27 = vcombine.low %v1193_v14, %v1197_v15  ;;  %v9964_v42 = vcombine.high %v1272_v22, %v1276_v23  ;;  %v1245_v14 = vld [vmem:[#allocation8 + $0x338] sm:$0xff]  ;;  %v1324_v22 = vld [vmem:[#allocation8 + $0x5b0] sm:$0xff] }
 0x2a7   :  { %4780 = vmatprep.mubr.bf16.mxu1 %v11795_v6  ;;  %4604 = vmatprep.subr.bf16.mxu0 %v9916_v18  ;;  %v1181_v6 = vld [vmem:[#allocation8 + $0x138] sm:$0xff]  ;;  %v9894_v18 = vcombine.high %v1201_v24, %v1205_v25 }
 0x2a8   :  { %4750 = vmatprep.subr.bf16.mxu1 %v9846_v28  ;;  %v9870_v62 = vcombine.high %v1177_v54, %v1181_v6  ;;  %v9869_v3 = vcombine.low %v1177_v54, %v1181_v6  ;;  %v1284_v28 = vld [vmem:[#allocation8 + $0x470] sm:$0xff]  ;;  %v1229_v54 = vld [vmem:[#allocation8 + $0x2b8] sm:$0xff] }
 0x2a9   :  { %v9971_v46 = vcombine.low %v1280_v47, %v1284_v28  ;;  %v1249_v23 = vld [vmem:[#allocation8 + $0x358] sm:$0xff] }
 0x2aa   :  { %4605 = vmatpush1.bf16.msra.mxu0 %v9915_v35  ;;  %4751 = vmatpush1.bf16.msra.mxu1 %v9845_v36  ;;  %v9893_v35 = vcombine.low %v1201_v24, %v1205_v25  ;;  %v9972_v36 = vcombine.high %v1280_v47, %v1284_v28  ;;  %v1253_v24 = vld [vmem:[#allocation8 + $0x378] sm:$0xff]  ;;  %v1332_v47 = vld [vmem:[#allocation8 + $0x5f0] sm:$0xff] }
 0x2ab   :  { %4606 = vmatprep.subr.bf16.mxu0 %v9924_v37  ;;  %4752 = vmatprep.subr.bf16.mxu1 %v9854_v38  ;;  %v9902_v37 = vcombine.high %v1209_v31, %v1213_v32  ;;  %v1288_v38 = vld [vmem:[#allocation8 + $0x490] sm:$0xff]  ;;  %v1257_v28 = vld [vmem:[#allocation8 + $0x398] sm:$0xff] }
 0x2ac   :  { %v9979_v6 = vcombine.low %v1288_v38, %v1292_v8 }
 0x2ae   :  { %4607 = vmatpush1.bf16.msra.mxu0 %v9923_v48  ;;  %4753 = vmatpush1.bf16.msra.mxu1 %v9853_v49  ;;  %v9901_v48 = vcombine.low %v1209_v31, %v1213_v32  ;;  %v9980_v49 = vcombine.high %v1288_v38, %v1292_v8  ;;  %v1261_v31 = vld [vmem:[#allocation8 + $0x3b8] sm:$0xff]  ;;  %v1340_v38 = vld [vmem:[#allocation8 + $0x630] sm:$0xff] }
 0x2af   :  { %4608 = vmatprep.subr.bf16.mxu0 %v9932_v50  ;;  %4754 = vmatprep.subr.bf16.mxu1 %v9862_v51  ;;  %v9910_v50 = vcombine.high %v1217_v39, %v1221_v41  ;;  %v1296_v51 = vld [vmem:[#allocation8 + $0x4d0] sm:$0xff]  ;;  %v1265_v8 = vld [vmem:[#allocation8 + $0x3d8] sm:$0xff] }
 0x2b0   :  { %v9987_v1 = vcombine.low %v1296_v51, %v1300_v52 }
 0x2b2   :  { %4609 = vmatpush1.bf16.msra.mxu0 %v9931_v55  ;;  %4755 = vmatpush1.bf16.msra.mxu1 %v9861_v58  ;;  %v9909_v55 = vcombine.low %v1217_v39, %v1221_v41  ;;  %v9988_v58 = vcombine.high %v1296_v51, %v1300_v52  ;;  %v1269_v39 = vld [vmem:[#allocation8 + $0x3f8] sm:$0xff]  ;;  %v1348_v51 = vld [vmem:[#allocation8 + $0x670] sm:$0xff] }
 0x2b3   :  { %4610 = vmatprep.subr.bf16.mxu0 %v9940_v59  ;;  %4756 = vmatprep.subr.bf16.mxu1 %v9870_v62  ;;  %v9918_v59 = vcombine.high %v1225_v53, %v1229_v54  ;;  %v1304_v62 = vld [vmem:[#allocation8 + $0x510] sm:$0xff]  ;;  %v1273_v52 = vld [vmem:[#allocation8 + $0x418] sm:$0xff] }
 0x2b4   :  { %v9995_v15 = vcombine.low %v1304_v62, %v1308_v44 }
 0x2b6   :  { %4611 = vmatpush1.bf16.msra.mxu0 %v9939_v2  ;;  %4757 = vmatpush1.bf16.msra.mxu1 %v9869_v3  ;;  %v9917_v2 = vcombine.low %v1225_v53, %v1229_v54  ;;  %v9996_v3 = vcombine.high %v1304_v62, %v1308_v44  ;;  %v1277_v53 = vld [vmem:[#allocation8 + $0x438] sm:$0xff]  ;;  %v1356_v62 = vld [vmem:[#allocation8 + $0x6b0] sm:$0xff] }
 0x2b7   :  { %4612 = vmatprep.subr.bf16.mxu0 %v9948_v4  ;;  %4758 = vmatprep.subr.bf16.mxu1 %v9878_v5  ;;  %v9926_v4 = vcombine.high %v1233_v63, %v1237_v0  ;;  %v1312_v5 = vld [vmem:[#allocation8 + $0x550] sm:$0xff]  ;;  %v1281_v44 = vld [vmem:[#allocation8 + $0x458] sm:$0xff] }
 0x2b8   :  { %v10003_v25 = vcombine.low %v1312_v5, %v1316_v10 }
 0x2ba   :  { %4613 = vmatpush1.bf16.msra.mxu0 %v9947_v17  ;;  %4759 = vmatpush1.bf16.msra.mxu1 %v9877_v19  ;;  %v9925_v17 = vcombine.low %v1233_v63, %v1237_v0  ;;  %v10004_v19 = vcombine.high %v1312_v5, %v1316_v10  ;;  %v1285_v63 = vld [vmem:[#allocation8 + $0x478] sm:$0xff]  ;;  %v1364_v5 = vld [vmem:[#allocation8 + $0x6f0] sm:$0xff] }
 0x2bb   :  { %4614 = vmatprep.subr.bf16.mxu0 %v9956_v20  ;;  %4760 = vmatprep.subr.bf16.mxu1 %v9886_v21  ;;  %v9934_v20 = vcombine.high %v1241_v11, %v1245_v14  ;;  %v1320_v21 = vld [vmem:[#allocation8 + $0x590] sm:$0xff]  ;;  %v1289_v10 = vld [vmem:[#allocation8 + $0x498] sm:$0xff] }
 0x2bc   :  { %v10011_v32 = vcombine.low %v1320_v21, %v1324_v22 }
 0x2be   :  { %4615 = vmatpush1.bf16.msra.mxu0 %v9955_v26  ;;  %4761 = vmatpush1.bf16.msra.mxu1 %v9885_v27  ;;  %v9933_v26 = vcombine.low %v1241_v11, %v1245_v14  ;;  %v10012_v27 = vcombine.high %v1320_v21, %v1324_v22  ;;  %v1293_v11 = vld [vmem:[#allocation8 + $0x4b8] sm:$0xff]  ;;  %v1372_v21 = vld [vmem:[#allocation8 + $0x730] sm:$0xff] }
 0x2bf   :  { %4625 = vmatprep.subr.bf16.mxu0 %v9964_v42  ;;  %4762 = vmatprep.subr.bf16.mxu1 %v9894_v18  ;;  %v9942_v42 = vcombine.high %v1249_v23, %v1253_v24  ;;  %v1328_v18 = vld [vmem:[#allocation8 + $0x5d0] sm:$0xff]  ;;  %v1297_v22 = vld [vmem:[#allocation8 + $0x4d8] sm:$0xff] }
 0x2c0   :  { %v10019_v41 = vcombine.low %v1328_v18, %v1332_v47 }
 0x2c1   :  { %4617 = vmatmul.mubr.bf16.vlgmr.msra.gmra.mrb[4].mxu0 %v11797_v9 }
 0x2c2   :  { %4626 = vmatpush1.bf16.msra.mxu0 %v9963_v34  ;;  %4657 = vmatprep.mubr.bf16.mxu0 %v11816_v30  ;;  %v9941_v34 = vcombine.low %v1249_v23, %v1253_v24  ;;  %v1301_v23 = vld [vmem:[#allocation8 + $0x4f8] sm:$0xff] }
 0x2c3   :  { %4763 = vmatpush1.bf16.msra.mxu1 %v9893_v35  ;;  %4627 = vmatprep.subr.bf16.mxu0 %v9972_v36  ;;  %v10020_v35 = vcombine.high %v1328_v18, %v1332_v47  ;;  %v9950_v36 = vcombine.high %v1257_v28, %v1261_v31  ;;  %v1309_v18 = vld [vmem:[#allocation8 + $0x538] sm:$0xff] }
 0x2c4   :  { %4764 = vmatprep.subr.bf16.mxu1 %v9902_v37  ;;  %v1336_v37 = vld [vmem:[#allocation8 + $0x610] sm:$0xff] }
 0x2c5   :  { %v10027_v54 = vcombine.low %v1336_v37, %v1340_v38 }
 0x2c6   :  { %4628 = vmatpush1.bf16.msra.mxu0 %v9971_v46  ;;  %v9949_v46 = vcombine.low %v1257_v28, %v1261_v31  ;;  %v9989_v28 = vcombine.low %v1297_v22, %v1301_v23 }
 0x2c7   :  { %4765 = vmatpush1.bf16.msra.mxu1 %v9901_v48  ;;  %4629 = vmatprep.subr.bf16.mxu0 %v9980_v49  ;;  %v10028_v48 = vcombine.high %v1336_v37, %v1340_v38  ;;  %v9958_v49 = vcombine.high %v1265_v8, %v1269_v39  ;;  %v1317_v37 = vld [vmem:[#allocation8 + $0x578] sm:$0xff] }
 0x2c8   :  { %4766 = vmatprep.subr.bf16.mxu1 %v9910_v50  ;;  %v1344_v50 = vld [vmem:[#allocation8 + $0x650] sm:$0xff] }
 0x2c9   :  { %v10035_v0 = vcombine.low %v1344_v50, %v1348_v51 }
 0x2ca   :  { %4630 = vmatpush1.bf16.msra.mxu0 %v9979_v6  ;;  %v9957_v6 = vcombine.low %v1265_v8, %v1269_v39 }
 0x2cb   :  { %4767 = vmatpush1.bf16.msra.mxu1 %v9909_v55  ;;  %4631 = vmatprep.subr.bf16.mxu0 %v9988_v58  ;;  %v10036_v55 = vcombine.high %v1344_v50, %v1348_v51  ;;  %v9966_v58 = vcombine.high %v1273_v52, %v1277_v53  ;;  %v1325_v50 = vld [vmem:[#allocation8 + $0x5b8] sm:$0xff] }
 0x2cc   :  { %4768 = vmatprep.subr.bf16.mxu1 %v9918_v59  ;;  %v1352_v59 = vld [vmem:[#allocation8 + $0x690] sm:$0xff] }
 0x2cd   :  { %v10043_v14 = vcombine.low %v1352_v59, %v1356_v62 }
 0x2ce   :  { %4632 = vmatpush1.bf16.msra.mxu0 %v9987_v1  ;;  %v9965_v1 = vcombine.low %v1273_v52, %v1277_v53 }
 0x2cf   :  { %4769 = vmatpush1.bf16.msra.mxu1 %v9917_v2  ;;  %4633 = vmatprep.subr.bf16.mxu0 %v9996_v3  ;;  %v10044_v2 = vcombine.high %v1352_v59, %v1356_v62  ;;  %v9974_v3 = vcombine.high %v1281_v44, %v1285_v63  ;;  %v1333_v59 = vld [vmem:[#allocation8 + $0x5f8] sm:$0xff] }
 0x2d0   :  { %4770 = vmatprep.subr.bf16.mxu1 %v9926_v4  ;;  %v1360_v4 = vld [vmem:[#allocation8 + $0x6d0] sm:$0xff] }
 0x2d1   :  { %v10051_v24 = vcombine.low %v1360_v4, %v1364_v5 }
 0x2d2   :  { %4634 = vmatpush1.bf16.msra.mxu0 %v9995_v15  ;;  %v9973_v15 = vcombine.low %v1281_v44, %v1285_v63 }
 0x2d3   :  { %4771 = vmatpush1.bf16.msra.mxu1 %v9925_v17  ;;  %4635 = vmatprep.subr.bf16.mxu0 %v10004_v19  ;;  %v10052_v17 = vcombine.high %v1360_v4, %v1364_v5  ;;  %v9982_v19 = vcombine.high %v1289_v10, %v1293_v11  ;;  %v1341_v4 = vld [vmem:[#allocation8 + $0x638] sm:$0xff] }
 0x2d4   :  { %4772 = vmatprep.subr.bf16.mxu1 %v9934_v20  ;;  %v1368_v20 = vld [vmem:[#allocation8 + $0x710] sm:$0xff] }
 0x2d5   :  { %v10059_v47 = vcombine.low %v1368_v20, %v1372_v21 }
 0x2d6   :  { %4636 = vmatpush1.bf16.msra.mxu0 %v10003_v25  ;;  %v9981_v25 = vcombine.low %v1289_v10, %v1293_v11 }
 0x2d7   :  { %4773 = vmatpush1.bf16.msra.mxu1 %v9933_v26  ;;  %4637 = vmatprep.subr.bf16.mxu0 %v10012_v27  ;;  %v10060_v26 = vcombine.high %v1368_v20, %v1372_v21  ;;  %v1376_v27 = vld [vmem:[#allocation8 + $0x750] sm:$0xff]  ;;  %v1349_v20 = vld [vmem:[#allocation8 + $0x678] sm:$0xff] }
 0x2d8   :  { %4774 = vmatprep.subr.bf16.mxu1 %v9942_v42  ;;  %v1380_v42 = vld [vmem:[#allocation8 + $0x770] sm:$0xff] }
 0x2d9   :  { %v10068_v31 = vcombine.high %v1376_v27, %v1380_v42  ;;  %v10067_v38 = vcombine.low %v1376_v27, %v1380_v42  ;;  %v1357_v27 = vld [vmem:[#allocation8 + $0x6b8] sm:$0xff] }
 0x2da   :  { %4638 = vmatpush1.bf16.msra.mxu0 %v10011_v32 }
 0x2db   :  { %4775 = vmatpush1.bf16.msra.mxu1 %v9941_v34  ;;  %4639 = vmatprep.subr.bf16.mxu0 %v10020_v35  ;;  %v1384_v34 = vld [vmem:[#allocation8 + $0x790] sm:$0xff] }
 0x2dc   :  { %4776 = vmatprep.subr.bf16.mxu1 %v9950_v36  ;;  %v1388_v35 = vld [vmem:[#allocation8 + $0x7b0] sm:$0xff]  ;;  %v1313_v36 = vld [vmem:[#allocation8 + $0x558] sm:$0xff] }
 0x2dd   :  { %v10076_v39 = vcombine.high %v1384_v34, %v1388_v35  ;;  %v10075_v51 = vcombine.low %v1384_v34, %v1388_v35  ;;  %v10005_v52 = vcombine.low %v1313_v36, %v1317_v37  ;;  %v1365_v34 = vld [vmem:[#allocation8 + $0x6f8] sm:$0xff] }
 0x2de   :  { %4640 = vmatpush1.bf16.msra.mxu0 %v10019_v41  ;;  %v10006_v41 = vcombine.high %v1313_v36, %v1317_v37 }
 0x2df   :  { %4777 = vmatpush1.bf16.msra.mxu1 %v9949_v46  ;;  %4641 = vmatprep.subr.bf16.mxu0 %v10028_v48  ;;  %v1392_v46 = vld [vmem:[#allocation8 + $0x7d0] sm:$0xff] }
 0x2e0   :  { %4778 = vmatprep.subr.bf16.mxu1 %v9958_v49  ;;  %v1396_v48 = vld [vmem:[#allocation8 + $0x7f0] sm:$0xff]  ;;  %v1321_v49 = vld [vmem:[#allocation8 + $0x598] sm:$0xff] }
 0x2e1   :  { %v10084_v53 = vcombine.high %v1392_v46, %v1396_v48  ;;  %v10083_v62 = vcombine.low %v1392_v46, %v1396_v48  ;;  %v10013_v44 = vcombine.low %v1321_v49, %v1325_v50  ;;  %v1373_v46 = vld [vmem:[#allocation8 + $0x738] sm:$0xff] }
 0x2e2   :  { %4642 = vmatpush1.bf16.msra.mxu0 %v10027_v54  ;;  %v10014_v54 = vcombine.high %v1321_v49, %v1325_v50 }
 0x2e3   :  { %4779 = vmatpush1.bf16.msra.mxu1 %v9957_v6  ;;  %4643 = vmatprep.subr.bf16.mxu0 %v10036_v55  ;;  %v1400_v6 = vld [vmem:[#allocation8 + $0x810] sm:$0xff] }
 0x2e4   :  { %4789 = vmatprep.subr.bf16.mxu1 %v9966_v58  ;;  %v1404_v55 = vld [vmem:[#allocation8 + $0x830] sm:$0xff]  ;;  %v1329_v58 = vld [vmem:[#allocation8 + $0x5d8] sm:$0xff] }
 0x2e5   :  { %v10092_v63 = vcombine.high %v1400_v6, %v1404_v55  ;;  %v10091_v5 = vcombine.low %v1400_v6, %v1404_v55  ;;  %v10021_v10 = vcombine.low %v1329_v58, %v1333_v59  ;;  %v1381_v6 = vld [vmem:[#allocation8 + $0x778] sm:$0xff] }
 0x2e6   :  { %4644 = vmatpush1.bf16.msra.mxu0 %v10035_v0  ;;  %4781 = vmatmul.mubr.bf16.vlgmr.msra.gmra.mrb[20].mxu1 %v11797_v9  ;;  %v9990_v9 = vcombine.high %v1297_v22, %v1301_v23  ;;  %v10022_v0 = vcombine.high %v1329_v58, %v1333_v59 }
 0x2e7   :  { %4790 = vmatpush1.bf16.msra.mxu1 %v9965_v1  ;;  %4821 = vmatprep.mubr.bf16.mxu1 %v11816_v30  ;;  %v1305_v30 = vld [vmem:[#allocation8 + $0x518] sm:$0xff]  ;;  %v1408_v1 = vld [vmem:[#allocation8 + $0x850] sm:$0xff] }
 0x2e8   :  { %4645 = vmatprep.subr.bf16.mxu0 %v10044_v2  ;;  %4791 = vmatprep.subr.bf16.mxu1 %v9974_v3  ;;  %v9998_v32 = vcombine.high %v1305_v30, %v1309_v18  ;;  %v9997_v8 = vcombine.low %v1305_v30, %v1309_v18  ;;  %v1412_v2 = vld [vmem:[#allocation8 + $0x870] sm:$0xff]  ;;  %v1337_v3 = vld [vmem:[#allocation8 + $0x618] sm:$0xff] }
 0x2e9   :  { %v10100_v11 = vcombine.high %v1408_v1, %v1412_v2  ;;  %v10099_v21 = vcombine.low %v1408_v1, %v1412_v2  ;;  %v10029_v22 = vcombine.low %v1337_v3, %v1341_v4  ;;  %v1389_v1 = vld [vmem:[#allocation8 + $0x7b8] sm:$0xff] }
 0x2ea   :  { %4646 = vmatpush1.bf16.msra.mxu0 %v10043_v14  ;;  %v10030_v14 = vcombine.high %v1337_v3, %v1341_v4 }
 0x2eb   :  { %4792 = vmatpush1.bf16.msra.mxu1 %v9973_v15  ;;  %4647 = vmatprep.subr.bf16.mxu0 %v10052_v17  ;;  %v1416_v15 = vld [vmem:[#allocation8 + $0x890] sm:$0xff] }
 0x2ec   :  { %4793 = vmatprep.subr.bf16.mxu1 %v9982_v19  ;;  %v1420_v17 = vld [vmem:[#allocation8 + $0x8b0] sm:$0xff]  ;;  %v1345_v19 = vld [vmem:[#allocation8 + $0x658] sm:$0xff] }
 0x2ed   :  { %v10108_v23 = vcombine.high %v1416_v15, %v1420_v17  ;;  %v10107_v42 = vcombine.low %v1416_v15, %v1420_v17  ;;  %v10037_v30 = vcombine.low %v1345_v19, %v1349_v20  ;;  %v1397_v15 = vld [vmem:[#allocation8 + $0x7f8] sm:$0xff] }
 0x2ee   :  { %4648 = vmatpush1.bf16.msra.mxu0 %v10051_v24  ;;  %v10038_v24 = vcombine.high %v1345_v19, %v1349_v20 }
 0x2ef   :  { %4794 = vmatpush1.bf16.msra.mxu1 %v9981_v25  ;;  %4649 = vmatprep.subr.bf16.mxu0 %v10060_v26  ;;  %v1424_v25 = vld [vmem:[#allocation8 + $0x8d0] sm:$0xff] }
 0x2f0   :  { %4795 = vmatprep.subr.bf16.mxu1 %v9990_v9  ;;  %v1428_v26 = vld [vmem:[#allocation8 + $0x8f0] sm:$0xff]  ;;  %v1353_v9 = vld [vmem:[#allocation8 + $0x698] sm:$0xff] }
 0x2f1   :  { %v10116_v18 = vcombine.high %v1424_v25, %v1428_v26  ;;  %v10115_v35 = vcombine.low %v1424_v25, %v1428_v26  ;;  %v10045_v36 = vcombine.low %v1353_v9, %v1357_v27  ;;  %v1405_v25 = vld [vmem:[#allocation8 + $0x838] sm:$0xff] }
 0x2f2   :  { %4650 = vmatpush1.bf16.msra.mxu0 %v10059_v47  ;;  %v10046_v47 = vcombine.high %v1353_v9, %v1357_v27 }
 0x2f3   :  { %4796 = vmatpush1.bf16.msra.mxu1 %v9989_v28  ;;  %4651 = vmatprep.subr.bf16.mxu0 %v10068_v31  ;;  %v1432_v28 = vld [vmem:[#allocation8 + $0x910] sm:$0xff] }
 0x2f4   :  { %4797 = vmatprep.subr.bf16.mxu1 %v9998_v32  ;;  %v1436_v31 = vld [vmem:[#allocation8 + $0x930] sm:$0xff]  ;;  %v1361_v32 = vld [vmem:[#allocation8 + $0x6d8] sm:$0xff] }
 0x2f5   :  { %v10124_v37 = vcombine.high %v1432_v28, %v1436_v31  ;;  %v10123_v48 = vcombine.low %v1432_v28, %v1436_v31  ;;  %v10053_v49 = vcombine.low %v1361_v32, %v1365_v34  ;;  %v1413_v28 = vld [vmem:[#allocation8 + $0x878] sm:$0xff] }
 0x2f6   :  { %4652 = vmatpush1.bf16.msra.mxu0 %v10067_v38  ;;  %v10054_v38 = vcombine.high %v1361_v32, %v1365_v34 }
 0x2f7   :  { %4798 = vmatpush1.bf16.msra.mxu1 %v9997_v8  ;;  %4653 = vmatprep.subr.bf16.mxu0 %v10076_v39  ;;  %v1440_v8 = vld [vmem:[#allocation8 + $0x950] sm:$0xff] }
 0x2f8   :  { %4799 = vmatprep.subr.bf16.mxu1 %v10006_v41  ;;  %v1444_v39 = vld [vmem:[#allocation8 + $0x970] sm:$0xff]  ;;  %v1369_v41 = vld [vmem:[#allocation8 + $0x718] sm:$0xff] }
 0x2f9   :  { %v10132_v50 = vcombine.high %v1440_v8, %v1444_v39  ;;  %v10131_v55 = vcombine.low %v1440_v8, %v1444_v39  ;;  %v10061_v58 = vcombine.low %v1369_v41, %v1373_v46  ;;  %v1421_v8 = vld [vmem:[#allocation8 + $0x8b8] sm:$0xff] }
 0x2fa   :  { %4654 = vmatpush1.bf16.msra.mxu0 %v10075_v51  ;;  %v10062_v51 = vcombine.high %v1369_v41, %v1373_v46 }
 0x2fb   :  { %4800 = vmatpush1.bf16.msra.mxu1 %v10005_v52  ;;  %4655 = vmatprep.subr.bf16.mxu0 %v10084_v53  ;;  %v1448_v52 = vld [vmem:[#allocation8 + $0x990] sm:$0xff] }
 0x2fc   :  { %4801 = vmatprep.subr.bf16.mxu1 %v10014_v54  ;;  %v1452_v53 = vld [vmem:[#allocation8 + $0x9b0] sm:$0xff]  ;;  %v1377_v54 = vld [vmem:[#allocation8 + $0x758] sm:$0xff] }
 0x2fd   :  { %v10140_v59 = vcombine.high %v1448_v52, %v1452_v53  ;;  %v10139_v2 = vcombine.low %v1448_v52, %v1452_v53  ;;  %v10069_v3 = vcombine.low %v1377_v54, %v1381_v6  ;;  %v1429_v52 = vld [vmem:[#allocation8 + $0x8f8] sm:$0xff] }
 0x2fe   :  { %4656 = vmatpush1.bf16.msra.mxu0 %v10083_v62  ;;  %v10070_v62 = vcombine.high %v1377_v54, %v1381_v6 }
 0x2ff   :  { %4802 = vmatpush1.bf16.msra.mxu1 %v10013_v44  ;;  %4666 = vmatprep.subr.bf16.mxu0 %v10092_v63  ;;  %v1456_v44 = vld [vmem:[#allocation8 + $0x9d0] sm:$0xff] }
 0x300   :  { %4803 = vmatprep.subr.bf16.mxu1 %v10022_v0  ;;  %v1460_v63 = vld [vmem:[#allocation8 + $0x9f0] sm:$0xff]  ;;  %v1385_v0 = vld [vmem:[#allocation8 + $0x798] sm:$0xff] }
 0x301   :  { %4658 = vmatmul.mubr.bf16.vlgmr.msra.gmra.mrb[4].mxu0 %v11818_v33  ;;  %v10148_v4 = vcombine.high %v1456_v44, %v1460_v63  ;;  %v10147_v17 = vcombine.low %v1456_v44, %v1460_v63  ;;  %v10077_v19 = vcombine.low %v1385_v0, %v1389_v1 }
 0x302   :  { %4667 = vmatpush1.bf16.msra.mxu0 %v10091_v5  ;;  %4698 = vmatprep.mubr.bf16.mxu0 %v11834_v7  ;;  %v10078_v5 = vcombine.high %v1385_v0, %v1389_v1  ;;  %v1512_v1 = vld [vmem:[#allocation8 + $0xb90] sm:$0xff] }
 0x303   :  { %4804 = vmatpush1.bf16.msra.mxu1 %v10021_v10  ;;  %4668 = vmatprep.subr.bf16.mxu0 %v10100_v11  ;;  %v1464_v10 = vld [vmem:[#allocation8 + $0xa10] sm:$0xff] }
 0x304   :  { %4805 = vmatprep.subr.bf16.mxu1 %v10030_v14  ;;  %v1468_v11 = vld [vmem:[#allocation8 + $0xa30] sm:$0xff]  ;;  %v1393_v14 = vld [vmem:[#allocation8 + $0x7d8] sm:$0xff] }
 0x305   :  { %v10156_v20 = vcombine.high %v1464_v10, %v1468_v11  ;;  %v10155_v26 = vcombine.low %v1464_v10, %v1468_v11  ;;  %v10085_v9 = vcombine.low %v1393_v14, %v1397_v15 }
 0x306   :  { %4669 = vmatpush1.bf16.msra.mxu0 %v10099_v21  ;;  %v10086_v21 = vcombine.high %v1393_v14, %v1397_v15  ;;  %v1520_v15 = vld [vmem:[#allocation8 + $0xbd0] sm:$0xff] }
 0x307   :  { %4806 = vmatpush1.bf16.msra.mxu1 %v10029_v22  ;;  %4670 = vmatprep.subr.bf16.mxu0 %v10108_v23  ;;  %v1472_v22 = vld [vmem:[#allocation8 + $0xa50] sm:$0xff] }
 0x308   :  { %4807 = vmatprep.subr.bf16.mxu1 %v10038_v24  ;;  %v1476_v23 = vld [vmem:[#allocation8 + $0xa70] sm:$0xff]  ;;  %v1401_v24 = vld [vmem:[#allocation8 + $0x818] sm:$0xff] }
 0x309   :  { %v10164_v27 = vcombine.high %v1472_v22, %v1476_v23  ;;  %v10163_v31 = vcombine.low %v1472_v22, %v1476_v23  ;;  %v10093_v32 = vcombine.low %v1401_v24, %v1405_v25 }
 0x30a   :  { %4671 = vmatpush1.bf16.msra.mxu0 %v10107_v42  ;;  %v10094_v42 = vcombine.high %v1401_v24, %v1405_v25  ;;  %v1528_v25 = vld [vmem:[#allocation8 + $0xc10] sm:$0xff] }
 0x30b   :  { %4808 = vmatpush1.bf16.msra.mxu1 %v10037_v30  ;;  %4672 = vmatprep.subr.bf16.mxu0 %v10116_v18  ;;  %v1480_v30 = vld [vmem:[#allocation8 + $0xa90] sm:$0xff] }
 0x30c   :  { %4809 = vmatprep.subr.bf16.mxu1 %v10046_v47  ;;  %v1484_v18 = vld [vmem:[#allocation8 + $0xab0] sm:$0xff]  ;;  %v1409_v47 = vld [vmem:[#allocation8 + $0x858] sm:$0xff] }
 0x30d   :  { %v10172_v34 = vcombine.high %v1480_v30, %v1484_v18  ;;  %v10171_v39 = vcombine.low %v1480_v30, %v1484_v18  ;;  %v10101_v41 = vcombine.low %v1409_v47, %v1413_v28 }
 0x30e   :  { %4673 = vmatpush1.bf16.msra.mxu0 %v10115_v35  ;;  %v10102_v35 = vcombine.high %v1409_v47, %v1413_v28  ;;  %v1536_v28 = vld [vmem:[#allocation8 + $0xc50] sm:$0xff] }
 0x30f   :  { %4810 = vmatpush1.bf16.msra.mxu1 %v10045_v36  ;;  %4674 = vmatprep.subr.bf16.mxu0 %v10124_v37  ;;  %v1488_v36 = vld [vmem:[#allocation8 + $0xad0] sm:$0xff] }
 0x310   :  { %4811 = vmatprep.subr.bf16.mxu1 %v10054_v38  ;;  %v1492_v37 = vld [vmem:[#allocation8 + $0xaf0] sm:$0xff]  ;;  %v1417_v38 = vld [vmem:[#allocation8 + $0x898] sm:$0xff] }
 0x311   :  { %v10180_v46 = vcombine.high %v1488_v36, %v1492_v37  ;;  %v10179_v53 = vcombine.low %v1488_v36, %v1492_v37  ;;  %v10109_v54 = vcombine.low %v1417_v38, %v1421_v8 }
 0x312   :  { %4675 = vmatpush1.bf16.msra.mxu0 %v10123_v48  ;;  %v10110_v48 = vcombine.high %v1417_v38, %v1421_v8  ;;  %v1544_v8 = vld [vmem:[#allocation8 + $0xc90] sm:$0xff] }
 0x313   :  { %4812 = vmatpush1.bf16.msra.mxu1 %v10053_v49  ;;  %4676 = vmatprep.subr.bf16.mxu0 %v10132_v50  ;;  %v1496_v49 = vld [vmem:[#allocation8 + $0xb10] sm:$0xff] }
 0x314   :  { %4813 = vmatprep.subr.bf16.mxu1 %v10062_v51  ;;  %v1500_v50 = vld [vmem:[#allocation8 + $0xb30] sm:$0xff]  ;;  %v1425_v51 = vld [vmem:[#allocation8 + $0x8d8] sm:$0xff] }
 0x315   :  { %v10188_v6 = vcombine.high %v1496_v49, %v1500_v50  ;;  %v10117_v44 = vcombine.low %v1425_v51, %v1429_v52 }
 0x316   :  { %4677 = vmatpush1.bf16.msra.mxu0 %v10131_v55  ;;  %v1504_v55 = vld [vmem:[#allocation8 + $0xb50] sm:$0xff] }
 0x317   :  { %4814 = vmatpush1.bf16.msra.mxu1 %v10061_v58  ;;  %4678 = vmatprep.subr.bf16.mxu0 %v10140_v59  ;;  %v1508_v58 = vld [vmem:[#allocation8 + $0xb70] sm:$0xff]  ;;  %v1437_v59 = vld [vmem:[#allocation8 + $0x938] sm:$0xff] }
 0x318   :  { %4815 = vmatprep.subr.bf16.mxu1 %v10070_v62  ;;  %v10187_v62 = vcombine.low %v1496_v49, %v1500_v50  ;;  %v10196_v63 = vcombine.high %v1504_v55, %v1508_v58 }
 0x31a   :  { %4679 = vmatpush1.bf16.msra.mxu0 %v10139_v2  ;;  %v1516_v2 = vld [vmem:[#allocation8 + $0xbb0] sm:$0xff] }
 0x31b   :  { %4816 = vmatpush1.bf16.msra.mxu1 %v10069_v3  ;;  %4680 = vmatprep.subr.bf16.mxu0 %v10148_v4  ;;  %v1441_v3 = vld [vmem:[#allocation8 + $0x958] sm:$0xff]  ;;  %v10204_v11 = vcombine.high %v1512_v1, %v1516_v2 }
 0x31c   :  { %4817 = vmatprep.subr.bf16.mxu1 %v10078_v5  ;;  %v1445_v4 = vld [vmem:[#allocation8 + $0x978] sm:$0xff]  ;;  %v10195_v5 = vcombine.low %v1504_v55, %v1508_v58 }
 0x31d   :  { %v10134_v14 = vcombine.high %v1441_v3, %v1445_v4  ;;  %v10133_v22 = vcombine.low %v1441_v3, %v1445_v4  ;;  %v1568_v4 = vld [vmem:[#allocation8 + $0xd50] sm:$0xff] }
 0x31e   :  { %4681 = vmatpush1.bf16.msra.mxu0 %v10147_v17  ;;  %v1524_v17 = vld [vmem:[#allocation8 + $0xbf0] sm:$0xff] }
 0x31f   :  { %4818 = vmatpush1.bf16.msra.mxu1 %v10077_v19  ;;  %4682 = vmatprep.subr.bf16.mxu0 %v10156_v20  ;;  %v1449_v19 = vld [vmem:[#allocation8 + $0x998] sm:$0xff]  ;;  %v10212_v23 = vcombine.high %v1520_v15, %v1524_v17 }
 0x320   :  { %4819 = vmatprep.subr.bf16.mxu1 %v10086_v21  ;;  %v1453_v20 = vld [vmem:[#allocation8 + $0x9b8] sm:$0xff]  ;;  %v10203_v21 = vcombine.low %v1512_v1, %v1516_v2 }
 0x321   :  { %v10142_v24 = vcombine.high %v1449_v19, %v1453_v20  ;;  %v10141_v30 = vcombine.low %v1449_v19, %v1453_v20 }
 0x322   :  { %4683 = vmatpush1.bf16.msra.mxu0 %v10155_v26  ;;  %v1532_v26 = vld [vmem:[#allocation8 + $0xc30] sm:$0xff] }
 0x323   :  { %4820 = vmatpush1.bf16.msra.mxu1 %v10085_v9  ;;  %4684 = vmatprep.subr.bf16.mxu0 %v10164_v27  ;;  %v1457_v9 = vld [vmem:[#allocation8 + $0x9d8] sm:$0xff]  ;;  %v10220_v18 = vcombine.high %v1528_v25, %v1532_v26 }
 0x324   :  { %4830 = vmatprep.subr.bf16.mxu1 %v10094_v42  ;;  %v1461_v27 = vld [vmem:[#allocation8 + $0x9f8] sm:$0xff]  ;;  %v10211_v42 = vcombine.low %v1520_v15, %v1524_v17  ;;  %v11870_v15 = vld [vmem:[#allocation10] sm:$0xff] }
 0x325   :  { %v10150_v47 = vcombine.high %v1457_v9, %v1461_v27  ;;  %v10149_v36 = vcombine.low %v1457_v9, %v1461_v27  ;;  %v1663_v9 = vrot.slane %v11870_v15, %v11789_v45 }
 0x326   :  { %4685 = vmatpush1.bf16.msra.mxu0 %v10163_v31  ;;  %4822 = vmatmul.mubr.bf16.vlgmr.msra.gmra.mrb[20].mxu1 %v11818_v33  ;;  %v10118_v33 = vcombine.high %v1425_v51, %v1429_v52  ;;  %v1540_v31 = vld [vmem:[#allocation8 + $0xc70] sm:$0xff] }
 0x327   :  { %4831 = vmatpush1.bf16.msra.mxu1 %v10093_v32  ;;  %4862 = vmatprep.mubr.bf16.mxu1 %v11834_v7  ;;  %v1433_v7 = vld [vmem:[#allocation8 + $0x918] sm:$0xff]  ;;  %v10228_v37 = vcombine.high %v1536_v28, %v1540_v31  ;;  %v1552_v52 = vld [vmem:[#allocation8 + $0xcd0] sm:$0xff] }
 0x328   :  { %4686 = vmatprep.subr.bf16.mxu0 %v10172_v34  ;;  %4832 = vmatprep.subr.bf16.mxu1 %v10102_v35  ;;  %v10126_v0 = vcombine.high %v1433_v7, %v1437_v59  ;;  %v10125_v10 = vcombine.low %v1433_v7, %v1437_v59  ;;  %v1465_v32 = vld [vmem:[#allocation8 + $0xa18] sm:$0xff]  ;;  %v10219_v35 = vcombine.low %v1528_v25, %v1532_v26  ;;  %v1560_v59 = vld [vmem:[#allocation8 + $0xd10] sm:$0xff] }
 0x329   :  { %v1469_v34 = vld [vmem:[#allocation8 + $0xa38] sm:$0xff] }
 0x32a   :  { %4687 = vmatpush1.bf16.msra.mxu0 %v10171_v39  ;;  %v10158_v38 = vcombine.high %v1465_v32, %v1469_v34  ;;  %v1548_v39 = vld [vmem:[#allocation8 + $0xcb0] sm:$0xff]  ;;  %v10157_v49 = vcombine.low %v1465_v32, %v1469_v34  ;;  %v1509_v25 = vld [vmem:[#allocation8 + $0xb78] sm:$0xff] }
 0x32b   :  { %4833 = vmatpush1.bf16.msra.mxu1 %v10101_v41  ;;  %4688 = vmatprep.subr.bf16.mxu0 %v10180_v46  ;;  %v1473_v41 = vld [vmem:[#allocation8 + $0xa58] sm:$0xff]  ;;  %v10236_v50 = vcombine.high %v1544_v8, %v1548_v39 }
 0x32c   :  { %4834 = vmatprep.subr.bf16.mxu1 %v10110_v48  ;;  %v1477_v46 = vld [vmem:[#allocation8 + $0xa78] sm:$0xff]  ;;  %v10227_v48 = vcombine.low %v1536_v28, %v1540_v31  ;;  %v1588_v28 = vld [vmem:[#allocation8 + $0xdf0] sm:$0xff] }
 0x32d   :  { %v10166_v51 = vcombine.high %v1473_v41, %v1477_v46  ;;  %v10165_v55 = vcombine.low %v1473_v41, %v1477_v46  ;;  %v1513_v34 = vld [vmem:[#allocation8 + $0xb98] sm:$0xff] }
 0x32e   :  { %4689 = vmatpush1.bf16.msra.mxu0 %v10179_v53  ;;  %v1556_v53 = vld [vmem:[#allocation8 + $0xcf0] sm:$0xff] }
 0x32f   :  { %4835 = vmatpush1.bf16.msra.mxu1 %v10109_v54  ;;  %4690 = vmatprep.subr.bf16.mxu0 %v10188_v6  ;;  %v1481_v54 = vld [vmem:[#allocation8 + $0xa98] sm:$0xff]  ;;  %v10244_v58 = vcombine.high %v1552_v52, %v1556_v53 }
 0x330   :  { %4836 = vmatprep.subr.bf16.mxu1 %v10118_v33  ;;  %v1485_v6 = vld [vmem:[#allocation8 + $0xab8] sm:$0xff]  ;;  %v10235_v33 = vcombine.low %v1544_v8, %v1548_v39 }
 0x331   :  { %v10174_v7 = vcombine.high %v1481_v54, %v1485_v6  ;;  %v10173_v1 = vcombine.low %v1481_v54, %v1485_v6 }
 0x332   :  { %4691 = vmatpush1.bf16.msra.mxu0 %v10187_v62  ;;  %v1564_v62 = vld [vmem:[#allocation8 + $0xd30] sm:$0xff] }
 0x333   :  { %4837 = vmatpush1.bf16.msra.mxu1 %v10117_v44  ;;  %4692 = vmatprep.subr.bf16.mxu0 %v10196_v63  ;;  %v1489_v44 = vld [vmem:[#allocation8 + $0xad8] sm:$0xff]  ;;  %v10252_v2 = vcombine.high %v1560_v59, %v1564_v62 }
 0x334   :  { %4838 = vmatprep.subr.bf16.mxu1 %v10126_v0  ;;  %v1493_v63 = vld [vmem:[#allocation8 + $0xaf8] sm:$0xff]  ;;  %v10243_v0 = vcombine.low %v1552_v52, %v1556_v53 }
 0x335   :  { %v10182_v3 = vcombine.high %v1489_v44, %v1493_v63  ;;  %v10181_v17 = vcombine.low %v1489_v44, %v1493_v63  ;;  %v1521_v52 = vld [vmem:[#allocation8 + $0xbd8] sm:$0xff] }
 0x336   :  { %4693 = vmatpush1.bf16.msra.mxu0 %v10195_v5  ;;  %v1572_v5 = vld [vmem:[#allocation8 + $0xd70] sm:$0xff]  ;;  %v1525_v53 = vld [vmem:[#allocation8 + $0xbf8] sm:$0xff] }
 0x337   :  { %4839 = vmatpush1.bf16.msra.mxu1 %v10125_v10  ;;  %4694 = vmatprep.subr.bf16.mxu0 %v10204_v11  ;;  %v1497_v10 = vld [vmem:[#allocation8 + $0xb18] sm:$0xff]  ;;  %v10260_v19 = vcombine.high %v1568_v4, %v1572_v5  ;;  %v10259_v26 = vcombine.low %v1568_v4, %v1572_v5  ;;  %v10213_v63 = vcombine.low %v1521_v52, %v1525_v53 }
 0x338   :  { %4840 = vmatprep.subr.bf16.mxu1 %v10134_v14  ;;  %v1501_v11 = vld [vmem:[#allocation8 + $0xb38] sm:$0xff]  ;;  %v10251_v14 = vcombine.low %v1560_v59, %v1564_v62 }
 0x339   :  { %v10190_v20 = vcombine.high %v1497_v10, %v1501_v11  ;;  %v10189_v27 = vcombine.low %v1497_v10, %v1501_v11  ;;  %v1529_v59 = vld [vmem:[#allocation8 + $0xc18] sm:$0xff] }
 0x33a   :  { %4695 = vmatpush1.bf16.msra.mxu0 %v10203_v21  ;;  %v1576_v21 = vld [vmem:[#allocation8 + $0xd90] sm:$0xff]  ;;  %v1533_v62 = vld [vmem:[#allocation8 + $0xc38] sm:$0xff] }
 0x33b   :  { %4841 = vmatpush1.bf16.msra.mxu1 %v10133_v22  ;;  %4696 = vmatprep.subr.bf16.mxu0 %v10212_v23  ;;  %v1580_v22 = vld [vmem:[#allocation8 + $0xdb0] sm:$0xff]  ;;  %v1659_v23 = vrot.slane %v11870_v15, %v11784_v40  ;;  %v1537_v4 = vld [vmem:[#allocation8 + $0xc58] sm:$0xff]  ;;  %v10221_v11 = vcombine.low %v1529_v59, %v1533_v62 }
 0x33c   :  { %4842 = vmatprep.subr.bf16.mxu1 %v10142_v24  ;;  %v1505_v24 = vld [vmem:[#allocation8 + $0xb58] sm:$0xff] }
 0x33d   :  { %v10197_v41 = vcombine.low %v1505_v24, %v1509_v25  ;;  %v1541_v5 = vld [vmem:[#allocation8 + $0xc78] sm:$0xff] }
 0x33e   :  { %4697 = vmatpush1.bf16.msra.mxu0 %v10211_v42  ;;  %v10268_v42 = vcombine.high %v1576_v21, %v1580_v22 }
 0x33f   :  { %4843 = vmatpush1.bf16.msra.mxu1 %v10141_v30  ;;  %4707 = vmatprep.subr.bf16.mxu0 %v10220_v18  ;;  %v10198_v18 = vcombine.high %v1505_v24, %v1509_v25  ;;  %v10229_v24 = vcombine.low %v1537_v4, %v1541_v5 }
 0x340   :  { %4844 = vmatprep.subr.bf16.mxu1 %v10150_v47  ;;  %v1584_v47 = vld [vmem:[#allocation8 + $0xdd0] sm:$0xff] }
 0x341   :  { %4699 = vmatmul.mubr.bf16.vlgmr.msra.gmra.mrb[4].mxu0 %v11836_v12  ;;  %v10276_v46 = vcombine.high %v1584_v47, %v1588_v28  ;;  %v10275_v54 = vcombine.low %v1584_v47, %v1588_v28 }
 0x342   :  { %4708 = vmatpush1.bf16.msra.mxu0 %v10219_v35  ;;  %4739 = vmatprep.mubr.bf16.mxu0 %v11850_v56  ;;  %v1517_v35 = vld [vmem:[#allocation8 + $0xbb8] sm:$0xff] }
 0x343   :  { %4845 = vmatpush1.bf16.msra.mxu1 %v10149_v36  ;;  %4709 = vmatprep.subr.bf16.mxu0 %v10228_v37  ;;  %v10205_v6 = vcombine.low %v1513_v34, %v1517_v35 }
 0x344   :  { %4846 = vmatprep.subr.bf16.mxu1 %v10158_v38  ;;  %v10267_v38 = vcombine.low %v1576_v21, %v1580_v22  ;;  %v1545_v21 = vld [vmem:[#allocation8 + $0xc98] sm:$0xff] }
 0x345   :  { %v1549_v22 = vld [vmem:[#allocation8 + $0xcb8] sm:$0xff] }
 0x346   :  { %4710 = vmatpush1.bf16.msra.mxu0 %v10227_v48  ;;  %v10237_v47 = vcombine.low %v1545_v21, %v1549_v22 }
 0x347   :  { %4847 = vmatpush1.bf16.msra.mxu1 %v10157_v49  ;;  %4711 = vmatprep.subr.bf16.mxu0 %v10236_v50  ;;  %v10206_v49 = vcombine.high %v1513_v34, %v1517_v35  ;;  %v1592_v50 = vld [vmem:[#allocation8 + $0xe10] sm:$0xff]  ;;  %v1565_v34 = vld [vmem:[#allocation8 + $0xd38] sm:$0xff] }
 0x348   :  { %4848 = vmatprep.subr.bf16.mxu1 %v10166_v51  ;;  %v1596_v51 = vld [vmem:[#allocation8 + $0xe30] sm:$0xff] }
 0x349   :  { %v10283_v44 = vcombine.low %v1592_v50, %v1596_v51 }
 0x34a   :  { %4712 = vmatpush1.bf16.msra.mxu0 %v10235_v33  ;;  %v10284_v33 = vcombine.high %v1592_v50, %v1596_v51 }
 0x34b   :  { %4849 = vmatpush1.bf16.msra.mxu1 %v10165_v55  ;;  %4713 = vmatprep.subr.bf16.mxu0 %v10244_v58  ;;  %v10214_v55 = vcombine.high %v1521_v52, %v1525_v53  ;;  %v1600_v58 = vld [vmem:[#allocation8 + $0xe50] sm:$0xff] }
 0x34c   :  { %4850 = vmatprep.subr.bf16.mxu1 %v10174_v7  ;;  %v1604_v7 = vld [vmem:[#allocation8 + $0xe70] sm:$0xff] }
 0x34d   :  { %v10291_v10 = vcombine.low %v1600_v58, %v1604_v7 }
 0x34e   :  { %4714 = vmatpush1.bf16.msra.mxu0 %v10243_v0  ;;  %v10292_v0 = vcombine.high %v1600_v58, %v1604_v7  ;;  %v1581_v58 = vld [vmem:[#allocation8 + $0xdb8] sm:$0xff] }
 0x34f   :  { %4851 = vmatpush1.bf16.msra.mxu1 %v10173_v1  ;;  %4715 = vmatprep.subr.bf16.mxu0 %v10252_v2  ;;  %v10222_v1 = vcombine.high %v1529_v59, %v1533_v62  ;;  %v1608_v2 = vld [vmem:[#allocation8 + $0xe90] sm:$0xff]  ;;  %v1671_v59 = vrot.slane %v11870_v15, %v11810_v60 }
 0x350   :  { %4852 = vmatprep.subr.bf16.mxu1 %v10182_v3  ;;  %v1612_v3 = vld [vmem:[#allocation8 + $0xeb0] sm:$0xff] }
 0x352   :  { %4716 = vmatpush1.bf16.msra.mxu0 %v10251_v14  ;;  %v10300_v14 = vcombine.high %v1608_v2, %v1612_v3 }
 0x353   :  { %4853 = vmatpush1.bf16.msra.mxu1 %v10181_v17  ;;  %4717 = vmatprep.subr.bf16.mxu0 %v10260_v19  ;;  %v10230_v17 = vcombine.high %v1537_v4, %v1541_v5  ;;  %v1616_v19 = vld [vmem:[#allocation8 + $0xed0] sm:$0xff]  ;;  %v1585_v5 = vld [vmem:[#allocation8 + $0xdd8] sm:$0xff] }
 0x354   :  { %v4413_v30 = vpop.f32.mrb[0].mxu0  ;;  %4854 = vmatprep.subr.bf16.mxu1 %v10190_v20  ;;  %v1620_v20 = vld [vmem:[#allocation8 + $0xef0] sm:$0xff] }
 0x355   :  { %v10983_v31 = vadd.f32 %v4413_v30, %v1659_v23  ;;  %v4415_v32 = vpop.f32.mrb[1].mxu0  ;;  %v10299_v23 = vcombine.low %v1608_v2, %v1612_v3  ;;  %v10308_v25 = vcombine.high %v1616_v19, %v1620_v20  ;;  %v1557_v30 = vld [vmem:[#allocation8 + $0xcf8] sm:$0xff]  ;;  %v4940_v2 = vld [vmem:[#allocation11 + $0x20] sm:$0xff] }
 0x356   :  { %v10984_v36 = vadd.f32 %v4415_v32, %v1663_v9  ;;  %4718 = vmatpush1.bf16.msra.mxu0 %v10259_v26  ;;  %v4417_v37 = vpop.f32.mrb[2].mxu0  ;;  %v10238_v26 = vcombine.high %v1545_v21, %v1549_v22  ;;  %v1624_v9 = vld [vmem:[#allocation8 + $0xf10] sm:$0xff] }
 0x357   :  { %v11876_v8 = vmax.f32 %v10983_v31, 0.0  ;;  %4855 = vmatpush1.bf16.msra.mxu1 %v10189_v27  ;;  %v4418_v39 = vpop.f32.mrb[3].mxu0  ;;  %4719 = vmatprep.subr.bf16.mxu0 %v10268_v42  ;;  %v1628_v27 = vld [vmem:[#allocation8 + $0xf30] sm:$0xff]  ;;  %v1553_v42 = vld [vmem:[#allocation8 + $0xcd8] sm:$0xff] }
 0x358   :  { %v11878_v48 = vmax.f32 %v10984_v36, 0.0  ;;  %4856 = vmatprep.subr.bf16.mxu1 %v10198_v18  ;;  %v10307_v18 = vcombine.low %v1616_v19, %v1620_v20  ;;  %v10316_v28 = vcombine.high %v1624_v9, %v1628_v27  ;;  %v1632_v31 = vld [vmem:[#allocation8 + $0xf50] sm:$0xff]  ;;  %v10315_v35 = vcombine.low %v1624_v9, %v1628_v27  ;;  %v1597_v9 = vld [vmem:[#allocation8 + $0xe38] sm:$0xff] }
 0x359   :  { %4920 = vst [vmem:[#allocation17] sm:$0xff] %v11876_v8  ;;  %v1636_v32 = vld [vmem:[#allocation8 + $0xf70] sm:$0xff]  ;;  %v10245_v36 = vcombine.low %v1553_v42, %v1557_v30 }
 0x35a   :  { %4921 = vst [vmem:[#allocation17 + $0x8] sm:$0xff] %v11878_v48  ;;  %4720 = vmatpush1.bf16.msra.mxu0 %v10267_v38  ;;  %v10324_v37 = vcombine.high %v1632_v31, %v1636_v32  ;;  %v1640_v39 = vld [vmem:[#allocation8 + $0xf90] sm:$0xff]  ;;  %v10323_v50 = vcombine.low %v1632_v31, %v1636_v32  ;;  %v1601_v31 = vld [vmem:[#allocation8 + $0xe58] sm:$0xff] }
 0x35b   :  { %4857 = vmatpush1.bf16.msra.mxu1 %v10197_v41  ;;  %4721 = vmatprep.subr.bf16.mxu0 %v10276_v46  ;;  %v1644_v41 = vld [vmem:[#allocation8 + $0xfb0] sm:$0xff]  ;;  %v1569_v46 = vld [vmem:[#allocation8 + $0xd58] sm:$0xff] }
 0x35c   :  { %4858 = vmatprep.subr.bf16.mxu1 %v10206_v49  ;;  %v1573_v49 = vld [vmem:[#allocation8 + $0xd78] sm:$0xff]  ;;  %v10332_v52 = vcombine.high %v1640_v39, %v1644_v41  ;;  %v10331_v7 = vcombine.low %v1640_v39, %v1644_v41 }
 0x35d   :  { %v10262_v53 = vcombine.high %v1569_v46, %v1573_v49  ;;  %v10261_v62 = vcombine.low %v1569_v46, %v1573_v49  ;;  %v1605_v32 = vld [vmem:[#allocation8 + $0xe78] sm:$0xff] }
 0x35e   :  { %4722 = vmatpush1.bf16.msra.mxu0 %v10275_v54  ;;  %v1648_v54 = vld [vmem:[#allocation8 + $0xfd0] sm:$0xff]  ;;  %v1613_v39 = vld [vmem:[#allocation8 + $0xeb8] sm:$0xff]  ;;  %v10293_v46 = vcombine.low %v1601_v31, %v1605_v32 }
 0x35f   :  { %4859 = vmatpush1.bf16.msra.mxu1 %v10205_v6  ;;  %4723 = vmatprep.subr.bf16.mxu0 %v10284_v33  ;;  %v1652_v6 = vld [vmem:[#allocation8 + $0xff0] sm:$0xff]  ;;  %v1667_v33 = vrot.slane %v11870_v15, %v11807_v57 }
 0x360   :  { %4860 = vmatprep.subr.bf16.mxu1 %v10214_v55  ;;  %v1577_v55 = vld [vmem:[#allocation8 + $0xd98] sm:$0xff] }
 0x361   :  { %v10269_v20 = vcombine.low %v1577_v55, %v1581_v58 }
 0x362   :  { %4724 = vmatpush1.bf16.msra.mxu0 %v10283_v44  ;;  %v10340_v44 = vcombine.high %v1648_v54, %v1652_v6 }
 0x363   :  { %4861 = vmatpush1.bf16.msra.mxu1 %v10213_v63  ;;  %4725 = vmatprep.subr.bf16.mxu0 %v10292_v0  ;;  %v10270_v0 = vcombine.high %v1577_v55, %v1581_v58 }
 0x364   :  { %4871 = vmatprep.subr.bf16.mxu1 %v10222_v1  ;;  %v4936_v1 = vld [vmem:[#allocation11] sm:$0xff] }
 0x365   :  { %v10344_v21 = vcombine.high %v4936_v1, %v4940_v2  ;;  %v10343_v27 = vcombine.low %v4936_v1, %v4940_v2 }
 0x366   :  { %4726 = vmatpush1.bf16.msra.mxu0 %v10291_v10  ;;  %4863 = vmatmul.mubr.bf16.vlgmr.msra.gmra.mrb[20].mxu1 %v11836_v12  ;;  %v10246_v12 = vcombine.high %v1553_v42, %v1557_v30  ;;  %v1589_v10 = vld [vmem:[#allocation8 + $0xdf8] sm:$0xff] }
 0x367   :  { %4872 = vmatpush1.bf16.msra.mxu1 %v10221_v11  ;;  %4903 = vmatprep.mubr.bf16.mxu1 %v11850_v56  ;;  %v1561_v56 = vld [vmem:[#allocation8 + $0xd18] sm:$0xff]  ;;  %v10277_v42 = vcombine.low %v1585_v5, %v1589_v10 }
 0x368   :  { %4727 = vmatprep.subr.bf16.mxu0 %v10300_v14  ;;  %4873 = vmatprep.subr.bf16.mxu1 %v10230_v17  ;;  %v10254_v38 = vcombine.high %v1561_v56, %v1565_v34  ;;  %v10253_v51 = vcombine.low %v1561_v56, %v1565_v34  ;;  %v10339_v17 = vcombine.low %v1648_v54, %v1652_v6  ;;  %v1621_v54 = vld [vmem:[#allocation8 + $0xef8] sm:$0xff] }
 0x36a   :  { %4728 = vmatpush1.bf16.msra.mxu0 %v10299_v23  ;;  %v10278_v23 = vcombine.high %v1585_v5, %v1589_v10  ;;  %v1633_v5 = vld [vmem:[#allocation8 + $0xf58] sm:$0xff] }
 0x36b   :  { %4874 = vmatpush1.bf16.msra.mxu1 %v10229_v24  ;;  %4729 = vmatprep.subr.bf16.mxu0 %v10308_v25  ;;  %v4944_v24 = vld [vmem:[#allocation11 + $0x40] sm:$0xff]  ;;  %v1637_v10 = vld [vmem:[#allocation8 + $0xf78] sm:$0xff] }
 0x36c   :  { %4875 = vmatprep.subr.bf16.mxu1 %v10238_v26  ;;  %v4948_v25 = vld [vmem:[#allocation11 + $0x60] sm:$0xff]  ;;  %v1593_v26 = vld [vmem:[#allocation8 + $0xe18] sm:$0xff] }
 0x36d   :  { %v10352_v30 = vcombine.high %v4944_v24, %v4948_v25  ;;  %v10351_v56 = vcombine.low %v4944_v24, %v4948_v25  ;;  %v10285_v34 = vcombine.low %v1593_v26, %v1597_v9  ;;  %v1645_v24 = vld [vmem:[#allocation8 + $0xfb8] sm:$0xff] }
 0x36e   :  { %4730 = vmatpush1.bf16.msra.mxu0 %v10307_v18  ;;  %v11896_v18 = vpack.c.bf16 %v11878_v48, %v11878_v48  ;;  %v4960_v48 = vld [vmem:[#allocation11 + $0xc0] sm:$0xff] }
 0x36f   :  { %4876 = vmatpush1.bf16.msra.mxu1 %v10237_v47  ;;  %4731 = vmatprep.subr.bf16.mxu0 %v10316_v28  ;;  %v10286_v47 = vcombine.high %v1593_v26, %v1597_v9  ;;  %v4952_v28 = vld [vmem:[#allocation11 + $0x80] sm:$0xff]  ;;  %v10325_v26 = vcombine.low %v1633_v5, %v1637_v10 }
 0x370   :  { %4877 = vmatprep.subr.bf16.mxu1 %v10246_v12  ;;  %v4956_v12 = vld [vmem:[#allocation11 + $0xa0] sm:$0xff] }
 0x371   :  { %v10359_v41 = vcombine.low %v4952_v28, %v4956_v12 }
 0x372   :  { %4732 = vmatpush1.bf16.msra.mxu0 %v10315_v35  ;;  %v10360_v35 = vcombine.high %v4952_v28, %v4956_v12  ;;  %v1653_v28 = vld [vmem:[#allocation8 + $0xff8] sm:$0xff] }
 0x373   :  { %4878 = vmatpush1.bf16.msra.mxu1 %v10245_v36  ;;  %4733 = vmatprep.subr.bf16.mxu0 %v10324_v37  ;;  %v10294_v36 = vcombine.high %v1601_v31, %v1605_v32  ;;  %v4964_v37 = vld [vmem:[#allocation11 + $0xe0] sm:$0xff] }
 0x374   :  { %4879 = vmatprep.subr.bf16.mxu1 %v10254_v38  ;;  %v1609_v38 = vld [vmem:[#allocation8 + $0xe98] sm:$0xff]  ;;  %v10368_v49 = vcombine.high %v4960_v48, %v4964_v37  ;;  %v10367_v6 = vcombine.low %v4960_v48, %v4964_v37  ;;  %v4941_v48 = vld [vmem:[#allocation11 + $0x28] sm:$0xff] }
 0x376   :  { %4734 = vmatpush1.bf16.msra.mxu0 %v10323_v50  ;;  %v10302_v50 = vcombine.high %v1609_v38, %v1613_v39 }
 0x377   :  { %4880 = vmatpush1.bf16.msra.mxu1 %v10253_v51  ;;  %4735 = vmatprep.subr.bf16.mxu0 %v10332_v52  ;;  %v4968_v51 = vld [vmem:[#allocation11 + $0x100] sm:$0xff] }
 0x378   :  { %v4577_v63 = vpop.f32.mrb[16].mxu1  ;;  %4881 = vmatprep.subr.bf16.mxu1 %v10262_v53  ;;  %v4972_v52 = vld [vmem:[#allocation11 + $0x120] sm:$0xff]  ;;  %v1617_v53 = vld [vmem:[#allocation8 + $0xed8] sm:$0xff] }
 0x379   :  { %v10985_v3 = vadd.f32 %v4577_v63, %v1667_v33  ;;  %v4579_v4 = vpop.f32.mrb[17].mxu1  ;;  %v10301_v33 = vcombine.low %v1609_v38, %v1613_v39  ;;  %v10376_v55 = vcombine.high %v4968_v51, %v4972_v52  ;;  %v10310_v58 = vcombine.high %v1617_v53, %v1621_v54 }
 0x37a   :  { %v10986_v11 = vadd.f32 %v4579_v4, %v1671_v59  ;;  %4736 = vmatpush1.bf16.msra.mxu0 %v10331_v7  ;;  %v4581_v14 = vpop.f32.mrb[18].mxu1  ;;  %v4976_v7 = vld [vmem:[#allocation11 + $0x140] sm:$0xff]  ;;  %v10375_v63 = vcombine.low %v4968_v51, %v4972_v52  ;;  %v4949_v51 = vld [vmem:[#allocation11 + $0x68] sm:$0xff] }
 0x37b   :  { %v11888_v19 = vmax.f32 %v10985_v3, 0.0  ;;  %4882 = vmatpush1.bf16.msra.mxu1 %v10261_v62  ;;  %v4582_v15 = vpop.f32.mrb[19].mxu1  ;;  %4737 = vmatprep.subr.bf16.mxu0 %v10340_v44  ;;  %v4980_v59 = vld [vmem:[#allocation11 + $0x160] sm:$0xff]  ;;  %v1625_v62 = vld [vmem:[#allocation8 + $0xf18] sm:$0xff] }
 0x37c   :  { %v11890_v22 = vmax.f32 %v10986_v11, 0.0  ;;  %4883 = vmatprep.subr.bf16.mxu1 %v10270_v0  ;;  %v1629_v44 = vld [vmem:[#allocation8 + $0xf38] sm:$0xff]  ;;  %v10309_v0 = vcombine.low %v1617_v53, %v1621_v54  ;;  %v10384_v1 = vcombine.high %v4976_v7, %v4980_v59  ;;  %v4984_v3 = vld [vmem:[#allocation11 + $0x180] sm:$0xff]  ;;  %v10383_v11 = vcombine.low %v4976_v7, %v4980_v59  ;;  %v4957_v7 = vld [vmem:[#allocation11 + $0xa8] sm:$0xff] }
 0x37d   :  { %4922 = vst [vmem:[#allocation17 + $0x10] sm:$0xff] %v11888_v19  ;;  %v10318_v2 = vcombine.high %v1625_v62, %v1629_v44  ;;  %v4988_v4 = vld [vmem:[#allocation11 + $0x1a0] sm:$0xff]  ;;  %v10317_v14 = vcombine.low %v1625_v62, %v1629_v44  ;;  %v10326_v15 = vcombine.high %v1633_v5, %v1637_v10 }
 0x37e   :  { %4923 = vst [vmem:[#allocation17 + $0x18] sm:$0xff] %v11890_v22  ;;  %4738 = vmatpush1.bf16.msra.mxu0 %v10339_v17  ;;  %v10392_v17 = vcombine.high %v4984_v3, %v4988_v4  ;;  %v10391_v25 = vcombine.low %v4984_v3, %v4988_v4  ;;  %v4965_v3 = vld [vmem:[#allocation11 + $0xe8] sm:$0xff] }
 0x37f   :  { %4884 = vmatpush1.bf16.msra.mxu1 %v10269_v20  ;;  %8050 = vmatprep.subr.bf16.mxu0 %v10344_v21  ;;  %v4992_v20 = vld [vmem:[#allocation11 + $0x1c0] sm:$0xff] }
 0x380   :  { %4885 = vmatprep.subr.bf16.mxu1 %v10278_v23  ;;  %v4996_v21 = vld [vmem:[#allocation11 + $0x1e0] sm:$0xff]  ;;  %v1641_v23 = vld [vmem:[#allocation8 + $0xf98] sm:$0xff] }
 0x381   :  { %4740 = vmatmul.mubr.bf16.vlgmr.msra.gmra.mrb[4].mxu0 %v11852_v61  ;;  %v10400_v9 = vcombine.high %v4992_v20, %v4996_v21  ;;  %v10399_v12 = vcombine.low %v4992_v20, %v4996_v21  ;;  %v10333_v31 = vcombine.low %v1641_v23, %v1645_v24 }
 0x382   :  { %8051 = vmatpush1.bf16.msra.mxu0 %v10343_v27  ;;  %8082 = vmatprep.mubr.bf16.mxu0 %v11896_v18  ;;  %v10334_v27 = vcombine.high %v1641_v23, %v1645_v24 }
 0x383   :  { %4886 = vmatpush1.bf16.msra.mxu1 %v10277_v42  ;;  %8052 = vmatprep.subr.bf16.mxu0 %v10352_v30  ;;  %v5000_v42 = vld [vmem:[#allocation11 + $0x200] sm:$0xff] }
 0x384   :  { %4887 = vmatprep.subr.bf16.mxu1 %v10286_v47  ;;  %v5004_v30 = vld [vmem:[#allocation11 + $0x220] sm:$0xff]  ;;  %v1649_v47 = vld [vmem:[#allocation8 + $0xfd8] sm:$0xff] }
 0x385   :  { %v10408_v32 = vcombine.high %v5000_v42, %v5004_v30  ;;  %v10407_v37 = vcombine.low %v5000_v42, %v5004_v30  ;;  %v10341_v38 = vcombine.low %v1649_v47, %v1653_v28 }
 0x386   :  { %8053 = vmatpush1.bf16.msra.mxu0 %v10351_v56  ;;  %v10342_v56 = vcombine.high %v1649_v47, %v1653_v28 }
 0x387   :  { %4888 = vmatpush1.bf16.msra.mxu1 %v10285_v34  ;;  %8054 = vmatprep.subr.bf16.mxu0 %v10360_v35  ;;  %v5008_v34 = vld [vmem:[#allocation11 + $0x240] sm:$0xff] }
 0x388   :  { %4889 = vmatprep.subr.bf16.mxu1 %v10294_v36  ;;  %v5012_v35 = vld [vmem:[#allocation11 + $0x260] sm:$0xff]  ;;  %v4937_v36 = vld [vmem:[#allocation11 + $0x8] sm:$0xff] }
 0x389   :  { %v10416_v39 = vcombine.high %v5008_v34, %v5012_v35  ;;  %v10415_v52 = vcombine.low %v5008_v34, %v5012_v35  ;;  %v10345_v53 = vcombine.low %v4937_v36, %v4941_v48 }
 0x38a   :  { %8055 = vmatpush1.bf16.msra.mxu0 %v10359_v41  ;;  %v10346_v41 = vcombine.high %v4937_v36, %v4941_v48 }
 0x38b   :  { %4890 = vmatpush1.bf16.msra.mxu1 %v10293_v46  ;;  %8056 = vmatprep.subr.bf16.mxu0 %v10368_v49  ;;  %v5016_v46 = vld [vmem:[#allocation11 + $0x280] sm:$0xff] }
 0x38c   :  { %4891 = vmatprep.subr.bf16.mxu1 %v10302_v50  ;;  %v5020_v49 = vld [vmem:[#allocation11 + $0x2a0] sm:$0xff]  ;;  %v4945_v50 = vld [vmem:[#allocation11 + $0x48] sm:$0xff] }
 0x38d   :  { %v10424_v54 = vcombine.high %v5016_v46, %v5020_v49  ;;  %v10423_v59 = vcombine.low %v5016_v46, %v5020_v49  ;;  %v10353_v62 = vcombine.low %v4945_v50, %v4949_v51 }
 0x38e   :  { %8057 = vmatpush1.bf16.msra.mxu0 %v10367_v6  ;;  %v10354_v6 = vcombine.high %v4945_v50, %v4949_v51 }
 0x38f   :  { %4892 = vmatpush1.bf16.msra.mxu1 %v10301_v33  ;;  %8058 = vmatprep.subr.bf16.mxu0 %v10376_v55  ;;  %v5024_v33 = vld [vmem:[#allocation11 + $0x2c0] sm:$0xff] }
 0x390   :  { %4893 = vmatprep.subr.bf16.mxu1 %v10310_v58  ;;  %v5028_v55 = vld [vmem:[#allocation11 + $0x2e0] sm:$0xff]  ;;  %v4953_v58 = vld [vmem:[#allocation11 + $0x88] sm:$0xff] }
 0x391   :  { %v10432_v44 = vcombine.high %v5024_v33, %v5028_v55  ;;  %v10431_v4 = vcombine.low %v5024_v33, %v5028_v55  ;;  %v10361_v5 = vcombine.low %v4953_v58, %v4957_v7  ;;  %v11904_v55 = vpack.c.bf16 %v11876_v8, %v11876_v8 }
 0x392   :  { %8059 = vmatpush1.bf16.msra.mxu0 %v10375_v63  ;;  %v10362_v63 = vcombine.high %v4953_v58, %v4957_v7 }
 0x393   :  { %4894 = vmatpush1.bf16.msra.mxu1 %v10309_v0  ;;  %8060 = vmatprep.subr.bf16.mxu0 %v10384_v1  ;;  %v5032_v0 = vld [vmem:[#allocation11 + $0x300] sm:$0xff] }
 0x394   :  { %4895 = vmatprep.subr.bf16.mxu1 %v10318_v2  ;;  %v5036_v1 = vld [vmem:[#allocation11 + $0x320] sm:$0xff]  ;;  %v4961_v2 = vld [vmem:[#allocation11 + $0xc8] sm:$0xff] }
 0x395   :  { %v10370_v10 = vcombine.high %v4961_v2, %v4965_v3  ;;  %v10439_v20 = vcombine.low %v5032_v0, %v5036_v1  ;;  %v10369_v21 = vcombine.low %v4961_v2, %v4965_v3 }
 0x396   :  { %8061 = vmatpush1.bf16.msra.mxu0 %v10383_v11  ;;  %v5040_v11 = vld [vmem:[#allocation11 + $0x340] sm:$0xff] }
 0x397   :  { %4896 = vmatpush1.bf16.msra.mxu1 %v10317_v14  ;;  %8062 = vmatprep.subr.bf16.mxu0 %v10392_v17  ;;  %v5044_v14 = vld [vmem:[#allocation11 + $0x360] sm:$0xff]  ;;  %v4969_v17 = vld [vmem:[#allocation11 + $0x108] sm:$0xff] }
 0x398   :  { %4897 = vmatprep.subr.bf16.mxu1 %v10326_v15  ;;  %v4973_v15 = vld [vmem:[#allocation11 + $0x128] sm:$0xff]  ;;  %v10448_v23 = vcombine.high %v5040_v11, %v5044_v14  ;;  %v10447_v42 = vcombine.low %v5040_v11, %v5044_v14 }
 0x399   :  { %v10378_v24 = vcombine.high %v4969_v17, %v4973_v15  ;;  %v10377_v30 = vcombine.low %v4969_v17, %v4973_v15 }
 0x39a   :  { %8063 = vmatpush1.bf16.msra.mxu0 %v10391_v25  ;;  %v5048_v25 = vld [vmem:[#allocation11 + $0x380] sm:$0xff] }
 0x39b   :  { %4898 = vmatpush1.bf16.msra.mxu1 %v10325_v26  ;;  %8064 = vmatprep.subr.bf16.mxu0 %v10400_v9  ;;  %v5052_v26 = vld [vmem:[#allocation11 + $0x3a0] sm:$0xff]  ;;  %v4977_v9 = vld [vmem:[#allocation11 + $0x148] sm:$0xff] }
 0x39c   :  { %4899 = vmatprep.subr.bf16.mxu1 %v10334_v27  ;;  %v4981_v27 = vld [vmem:[#allocation11 + $0x168] sm:$0xff]  ;;  %v10456_v47 = vcombine.high %v5048_v25, %v5052_v26  ;;  %v10455_v34 = vcombine.low %v5048_v25, %v5052_v26 }
 0x39d   :  { %v10386_v28 = vcombine.high %v4977_v9, %v4981_v27  ;;  %v10385_v35 = vcombine.low %v4977_v9, %v4981_v27 }
 0x39e   :  { %8065 = vmatpush1.bf16.msra.mxu0 %v10399_v12  ;;  %v5056_v12 = vld [vmem:[#allocation11 + $0x3c0] sm:$0xff] }
 0x39f   :  { %4900 = vmatpush1.bf16.msra.mxu1 %v10333_v31  ;;  %8066 = vmatprep.subr.bf16.mxu0 %v10408_v32  ;;  %v5060_v31 = vld [vmem:[#allocation11 + $0x3e0] sm:$0xff]  ;;  %v4985_v32 = vld [vmem:[#allocation11 + $0x188] sm:$0xff] }
 0x3a0   :  { %4901 = vmatprep.subr.bf16.mxu1 %v10342_v56  ;;  %v4989_v56 = vld [vmem:[#allocation11 + $0x1a8] sm:$0xff]  ;;  %v10464_v36 = vcombine.high %v5056_v12, %v5060_v31  ;;  %v10463_v46 = vcombine.low %v5056_v12, %v5060_v31 }
 0x3a1   :  { %v10394_v48 = vcombine.high %v4985_v32, %v4989_v56  ;;  %v10393_v49 = vcombine.low %v4985_v32, %v4989_v56 }
 0x3a2   :  { %8067 = vmatpush1.bf16.msra.mxu0 %v10407_v37  ;;  %v5064_v37 = vld [vmem:[#allocation11 + $0x400] sm:$0xff] }
 0x3a3   :  { %4902 = vmatpush1.bf16.msra.mxu1 %v10341_v38  ;;  %8068 = vmatprep.subr.bf16.mxu0 %v10416_v39  ;;  %v5068_v38 = vld [vmem:[#allocation11 + $0x420] sm:$0xff]  ;;  %v4993_v39 = vld [vmem:[#allocation11 + $0x1c8] sm:$0xff] }
 0x3a4   :  { %8214 = vmatprep.subr.bf16.mxu1 %v10346_v41  ;;  %v4997_v41 = vld [vmem:[#allocation11 + $0x1e8] sm:$0xff]  ;;  %v10472_v50 = vcombine.high %v5064_v37, %v5068_v38  ;;  %v10471_v33 = vcombine.low %v5064_v37, %v5068_v38 }
 0x3a5   :  { %v10402_v51 = vcombine.high %v4993_v39, %v4997_v41  ;;  %v10401_v58 = vcombine.low %v4993_v39, %v4997_v41 }
 0x3a6   :  { %4904 = vmatmul.mubr.bf16.vlgmr.msra.gmra.mrb[20].mxu1 %v11852_v61  ;;  %8069 = vmatpush1.bf16.msra.mxu0 %v10415_v52  ;;  %v10440_v61 = vcombine.high %v5032_v0, %v5036_v1  ;;  %v5072_v52 = vld [vmem:[#allocation11 + $0x440] sm:$0xff]  ;;  %v5009_v0 = vld [vmem:[#allocation11 + $0x248] sm:$0xff] }
 0x3a7   :  { %8215 = vmatpush1.bf16.msra.mxu1 %v10345_v53  ;;  %8246 = vmatprep.mubr.bf16.mxu1 %v11896_v18  ;;  %v5076_v53 = vld [vmem:[#allocation11 + $0x460] sm:$0xff]  ;;  %v5013_v1 = vld [vmem:[#allocation11 + $0x268] sm:$0xff] }
 0x3a8   :  { %8070 = vmatprep.subr.bf16.mxu0 %v10424_v54  ;;  %8216 = vmatprep.subr.bf16.mxu1 %v10354_v6  ;;  %v5001_v54 = vld [vmem:[#allocation11 + $0x208] sm:$0xff]  ;;  %v10480_v7 = vcombine.high %v5072_v52, %v5076_v53  ;;  %v10479_v8 = vcombine.low %v5072_v52, %v5076_v53  ;;  %v10417_v14 = vcombine.low %v5009_v0, %v5013_v1 }
 0x3a9   :  { %v5005_v6 = vld [vmem:[#allocation11 + $0x228] sm:$0xff] }
 0x3aa   :  { %8071 = vmatpush1.bf16.msra.mxu0 %v10423_v59  ;;  %v11908_v59 = vpack.c.bf16 %v11890_v22, %v11890_v22  ;;  %v10409_v2 = vcombine.low %v5001_v54, %v5005_v6  ;;  %v5088_v22 = vld [vmem:[#allocation11 + $0x4c0] sm:$0xff] }
 0x3ab   :  { %8217 = vmatpush1.bf16.msra.mxu1 %v10353_v62  ;;  %8072 = vmatprep.subr.bf16.mxu0 %v10432_v44  ;;  %v10410_v62 = vcombine.high %v5001_v54, %v5005_v6  ;;  %v5080_v44 = vld [vmem:[#allocation11 + $0x480] sm:$0xff] }
 0x3ac   :  { %8218 = vmatprep.subr.bf16.mxu1 %v10362_v63  ;;  %v5084_v63 = vld [vmem:[#allocation11 + $0x4a0] sm:$0xff] }
 0x3ad   :  { %v10488_v3 = vcombine.high %v5080_v44, %v5084_v63  ;;  %v10487_v11 = vcombine.low %v5080_v44, %v5084_v63 }
 0x3ae   :  { %8073 = vmatpush1.bf16.msra.mxu0 %v10431_v4  ;;  %v10418_v4 = vcombine.high %v5009_v0, %v5013_v1 }
 0x3af   :  { %8219 = vmatpush1.bf16.msra.mxu1 %v10361_v5  ;;  %8074 = vmatprep.subr.bf16.mxu0 %v10440_v61  ;;  %v5092_v5 = vld [vmem:[#allocation11 + $0x4e0] sm:$0xff]  ;;  %v5017_v61 = vld [vmem:[#allocation11 + $0x288] sm:$0xff] }
 0x3b0   :  { %8220 = vmatprep.subr.bf16.mxu1 %v10370_v10  ;;  %v5021_v10 = vld [vmem:[#allocation11 + $0x2a8] sm:$0xff]  ;;  %v10496_v17 = vcombine.high %v5088_v22, %v5092_v5  ;;  %v10495_v25 = vcombine.low %v5088_v22, %v5092_v5 }
 0x3b1   :  { %v10426_v15 = vcombine.high %v5017_v61, %v5021_v10  ;;  %v10425_v26 = vcombine.low %v5017_v61, %v5021_v10 }
 0x3b2   :  { %8075 = vmatpush1.bf16.msra.mxu0 %v10439_v20  ;;  %v5096_v20 = vld [vmem:[#allocation11 + $0x500] sm:$0xff] }
 0x3b3   :  { %8221 = vmatpush1.bf16.msra.mxu1 %v10369_v21  ;;  %8076 = vmatprep.subr.bf16.mxu0 %v10448_v23  ;;  %v5100_v21 = vld [vmem:[#allocation11 + $0x520] sm:$0xff]  ;;  %v5025_v23 = vld [vmem:[#allocation11 + $0x2c8] sm:$0xff] }
 0x3b4   :  { %8222 = vmatprep.subr.bf16.mxu1 %v10378_v24  ;;  %v5029_v24 = vld [vmem:[#allocation11 + $0x2e8] sm:$0xff]  ;;  %v10504_v9 = vcombine.high %v5096_v20, %v5100_v21  ;;  %v10503_v12 = vcombine.low %v5096_v20, %v5100_v21 }
 0x3b5   :  { %v10434_v27 = vcombine.high %v5025_v23, %v5029_v24  ;;  %v10433_v31 = vcombine.low %v5025_v23, %v5029_v24 }
 0x3b6   :  { %8077 = vmatpush1.bf16.msra.mxu0 %v10447_v42  ;;  %v5104_v42 = vld [vmem:[#allocation11 + $0x540] sm:$0xff] }
 0x3b7   :  { %8223 = vmatpush1.bf16.msra.mxu1 %v10377_v30  ;;  %8078 = vmatprep.subr.bf16.mxu0 %v10456_v47  ;;  %v5108_v30 = vld [vmem:[#allocation11 + $0x560] sm:$0xff]  ;;  %v5033_v47 = vld [vmem:[#allocation11 + $0x308] sm:$0xff] }
 0x3b8   :  { %8224 = vmatprep.subr.bf16.mxu1 %v10386_v28  ;;  %v5037_v28 = vld [vmem:[#allocation11 + $0x328] sm:$0xff]  ;;  %v10512_v32 = vcombine.high %v5104_v42, %v5108_v30  ;;  %v10511_v37 = vcombine.low %v5104_v42, %v5108_v30 }
 0x3b9   :  { %v10442_v56 = vcombine.high %v5033_v47, %v5037_v28  ;;  %v10441_v38 = vcombine.low %v5033_v47, %v5037_v28 }
 0x3ba   :  { %8079 = vmatpush1.bf16.msra.mxu0 %v10455_v34  ;;  %v5112_v34 = vld [vmem:[#allocation11 + $0x580] sm:$0xff] }
 0x3bb   :  { %8225 = vmatpush1.bf16.msra.mxu1 %v10385_v35  ;;  %8080 = vmatprep.subr.bf16.mxu0 %v10464_v36  ;;  %v5116_v35 = vld [vmem:[#allocation11 + $0x5a0] sm:$0xff]  ;;  %v5041_v36 = vld [vmem:[#allocation11 + $0x348] sm:$0xff] }
 0x3bc   :  { %8226 = vmatprep.subr.bf16.mxu1 %v10394_v48  ;;  %v5045_v48 = vld [vmem:[#allocation11 + $0x368] sm:$0xff]  ;;  %v10520_v39 = vcombine.high %v5112_v34, %v5116_v35  ;;  %v10519_v52 = vcombine.low %v5112_v34, %v5116_v35 }
 0x3bd   :  { %v10450_v41 = vcombine.high %v5041_v36, %v5045_v48  ;;  %v10449_v53 = vcombine.low %v5041_v36, %v5045_v48 }
 0x3be   :  { %8081 = vmatpush1.bf16.msra.mxu0 %v10463_v46  ;;  %v5120_v46 = vld [vmem:[#allocation11 + $0x5c0] sm:$0xff] }
 0x3bf   :  { %8227 = vmatpush1.bf16.msra.mxu1 %v10393_v49  ;;  %8091 = vmatprep.subr.bf16.mxu0 %v10472_v50  ;;  %v5124_v49 = vld [vmem:[#allocation11 + $0x5e0] sm:$0xff]  ;;  %v5049_v50 = vld [vmem:[#allocation11 + $0x388] sm:$0xff] }
 0x3c0   :  { %8228 = vmatprep.subr.bf16.mxu1 %v10402_v51  ;;  %v5053_v51 = vld [vmem:[#allocation11 + $0x3a8] sm:$0xff]  ;;  %v10528_v54 = vcombine.high %v5120_v46, %v5124_v49  ;;  %v10527_v44 = vcombine.low %v5120_v46, %v5124_v49 }
 0x3c1   :  { %8083 = vmatmul.mubr.bf16.vlgmr.msra.gmra.mrb[8].mxu0 %v11904_v55  ;;  %v10458_v6 = vcombine.high %v5049_v50, %v5053_v51  ;;  %v10457_v63 = vcombine.low %v5049_v50, %v5053_v51 }
 0x3c2   :  { %8092 = vmatpush1.bf16.msra.mxu0 %v10471_v33  ;;  %8123 = vmatprep.mubr.bf16.mxu0 %v11908_v59  ;;  %v5128_v33 = vld [vmem:[#allocation11 + $0x600] sm:$0xff] }
 0x3c3   :  { %8229 = vmatpush1.bf16.msra.mxu1 %v10401_v58  ;;  %8093 = vmatprep.subr.bf16.mxu0 %v10480_v7  ;;  %v5132_v58 = vld [vmem:[#allocation11 + $0x620] sm:$0xff]  ;;  %v5057_v7 = vld [vmem:[#allocation11 + $0x3c8] sm:$0xff] }
 0x3c4   :  { %8230 = vmatprep.subr.bf16.mxu1 %v10410_v62  ;;  %v5061_v62 = vld [vmem:[#allocation11 + $0x3e8] sm:$0xff]  ;;  %v10536_v0 = vcombine.high %v5128_v33, %v5132_v58  ;;  %v10535_v22 = vcombine.low %v5128_v33, %v5132_v58 }
 0x3c5   :  { %v10466_v1 = vcombine.high %v5057_v7, %v5061_v62  ;;  %v10465_v5 = vcombine.low %v5057_v7, %v5061_v62 }
 0x3c6   :  { %8094 = vmatpush1.bf16.msra.mxu0 %v10479_v8  ;;  %v5136_v8 = vld [vmem:[#allocation11 + $0x640] sm:$0xff] }
 0x3c7   :  { %8231 = vmatpush1.bf16.msra.mxu1 %v10409_v2  ;;  %8095 = vmatprep.subr.bf16.mxu0 %v10488_v3  ;;  %v5140_v2 = vld [vmem:[#allocation11 + $0x660] sm:$0xff]  ;;  %v5065_v3 = vld [vmem:[#allocation11 + $0x408] sm:$0xff] }
 0x3c8   :  { %8232 = vmatprep.subr.bf16.mxu1 %v10418_v4  ;;  %v5069_v4 = vld [vmem:[#allocation11 + $0x428] sm:$0xff]  ;;  %v10544_v61 = vcombine.high %v5136_v8, %v5140_v2  ;;  %v10543_v20 = vcombine.low %v5136_v8, %v5140_v2 }
 0x3c9   :  { %v10474_v10 = vcombine.high %v5065_v3, %v5069_v4  ;;  %v10473_v21 = vcombine.low %v5065_v3, %v5069_v4 }
 0x3ca   :  { %8096 = vmatpush1.bf16.msra.mxu0 %v10487_v11  ;;  %v5144_v11 = vld [vmem:[#allocation11 + $0x680] sm:$0xff] }
 0x3cb   :  { %8233 = vmatpush1.bf16.msra.mxu1 %v10417_v14  ;;  %8097 = vmatprep.subr.bf16.mxu0 %v10496_v17  ;;  %v5148_v14 = vld [vmem:[#allocation11 + $0x6a0] sm:$0xff]  ;;  %v5073_v17 = vld [vmem:[#allocation11 + $0x448] sm:$0xff] }
 0x3cc   :  { %8234 = vmatprep.subr.bf16.mxu1 %v10426_v15  ;;  %v5077_v15 = vld [vmem:[#allocation11 + $0x468] sm:$0xff]  ;;  %v10552_v23 = vcombine.high %v5144_v11, %v5148_v14  ;;  %v10551_v42 = vcombine.low %v5144_v11, %v5148_v14 }
 0x3cd   :  { %v10482_v24 = vcombine.high %v5073_v17, %v5077_v15  ;;  %v10481_v30 = vcombine.low %v5073_v17, %v5077_v15 }
 0x3ce   :  { %8098 = vmatpush1.bf16.msra.mxu0 %v10495_v25  ;;  %v5152_v25 = vld [vmem:[#allocation11 + $0x6c0] sm:$0xff] }
 0x3cf   :  { %8235 = vmatpush1.bf16.msra.mxu1 %v10425_v26  ;;  %8099 = vmatprep.subr.bf16.mxu0 %v10504_v9  ;;  %v5156_v26 = vld [vmem:[#allocation11 + $0x6e0] sm:$0xff]  ;;  %v5081_v9 = vld [vmem:[#allocation11 + $0x488] sm:$0xff] }
 0x3d0   :  { %8236 = vmatprep.subr.bf16.mxu1 %v10434_v27  ;;  %v5085_v27 = vld [vmem:[#allocation11 + $0x4a8] sm:$0xff]  ;;  %v10560_v47 = vcombine.high %v5152_v25, %v5156_v26  ;;  %v10559_v34 = vcombine.low %v5152_v25, %v5156_v26  ;;  %v11916_v26 = vpack.c.bf16 %v11888_v19, %v11888_v19 }
 0x3d1   :  { %v10490_v28 = vcombine.high %v5081_v9, %v5085_v27  ;;  %v10489_v35 = vcombine.low %v5081_v9, %v5085_v27 }
 0x3d2   :  { %8100 = vmatpush1.bf16.msra.mxu0 %v10503_v12  ;;  %v5160_v12 = vld [vmem:[#allocation11 + $0x700] sm:$0xff] }
 0x3d3   :  { %8237 = vmatpush1.bf16.msra.mxu1 %v10433_v31  ;;  %8101 = vmatprep.subr.bf16.mxu0 %v10512_v32  ;;  %v5164_v31 = vld [vmem:[#allocation11 + $0x720] sm:$0xff]  ;;  %v5089_v32 = vld [vmem:[#allocation11 + $0x4c8] sm:$0xff] }
 0x3d4   :  { %8238 = vmatprep.subr.bf16.mxu1 %v10442_v56  ;;  %v5093_v56 = vld [vmem:[#allocation11 + $0x4e8] sm:$0xff]  ;;  %v10568_v36 = vcombine.high %v5160_v12, %v5164_v31  ;;  %v10567_v46 = vcombine.low %v5160_v12, %v5164_v31 }
 0x3d5   :  { %v10498_v48 = vcombine.high %v5089_v32, %v5093_v56  ;;  %v10497_v49 = vcombine.low %v5089_v32, %v5093_v56  ;;  %v5141_v12 = vld [vmem:[#allocation11 + $0x668] sm:$0xff] }
 0x3d6   :  { %8102 = vmatpush1.bf16.msra.mxu0 %v10511_v37  ;;  %v5168_v37 = vld [vmem:[#allocation11 + $0x740] sm:$0xff] }
 0x3d7   :  { %8239 = vmatpush1.bf16.msra.mxu1 %v10441_v38  ;;  %8103 = vmatprep.subr.bf16.mxu0 %v10520_v39  ;;  %v5172_v38 = vld [vmem:[#allocation11 + $0x760] sm:$0xff]  ;;  %v5097_v39 = vld [vmem:[#allocation11 + $0x508] sm:$0xff] }
 0x3d8   :  { %8240 = vmatprep.subr.bf16.mxu1 %v10450_v41  ;;  %v5101_v41 = vld [vmem:[#allocation11 + $0x528] sm:$0xff]  ;;  %v10576_v50 = vcombine.high %v5168_v37, %v5172_v38  ;;  %v10575_v33 = vcombine.low %v5168_v37, %v5172_v38 }
 0x3d9   :  { %v10506_v51 = vcombine.high %v5097_v39, %v5101_v41  ;;  %v10505_v58 = vcombine.low %v5097_v39, %v5101_v41 }
 0x3da   :  { %8104 = vmatpush1.bf16.msra.mxu0 %v10519_v52  ;;  %v5176_v52 = vld [vmem:[#allocation11 + $0x780] sm:$0xff] }
 0x3db   :  { %8241 = vmatpush1.bf16.msra.mxu1 %v10449_v53  ;;  %8105 = vmatprep.subr.bf16.mxu0 %v10528_v54  ;;  %v5180_v53 = vld [vmem:[#allocation11 + $0x7a0] sm:$0xff]  ;;  %v5105_v54 = vld [vmem:[#allocation11 + $0x548] sm:$0xff] }
 0x3dc   :  { %8242 = vmatprep.subr.bf16.mxu1 %v10458_v6  ;;  %v5109_v6 = vld [vmem:[#allocation11 + $0x568] sm:$0xff]  ;;  %v10584_v7 = vcombine.high %v5176_v52, %v5180_v53  ;;  %v10583_v8 = vcombine.low %v5176_v52, %v5180_v53 }
 0x3dd   :  { %v10514_v62 = vcombine.high %v5105_v54, %v5109_v6  ;;  %v10513_v2 = vcombine.low %v5105_v54, %v5109_v6 }
 0x3de   :  { %8106 = vmatpush1.bf16.msra.mxu0 %v10527_v44  ;;  %v5184_v44 = vld [vmem:[#allocation11 + $0x7c0] sm:$0xff] }
 0x3df   :  { %8243 = vmatpush1.bf16.msra.mxu1 %v10457_v63  ;;  %8107 = vmatprep.subr.bf16.mxu0 %v10536_v0  ;;  %v5188_v63 = vld [vmem:[#allocation11 + $0x7e0] sm:$0xff]  ;;  %v5113_v0 = vld [vmem:[#allocation11 + $0x588] sm:$0xff] }
 0x3e0   :  { %8244 = vmatprep.subr.bf16.mxu1 %v10466_v1  ;;  %v5117_v1 = vld [vmem:[#allocation11 + $0x5a8] sm:$0xff]  ;;  %v10592_v3 = vcombine.high %v5184_v44, %v5188_v63  ;;  %v10591_v11 = vcombine.low %v5184_v44, %v5188_v63 }
 0x3e1   :  { %v10522_v4 = vcombine.high %v5113_v0, %v5117_v1  ;;  %v10521_v14 = vcombine.low %v5113_v0, %v5117_v1 }
 0x3e2   :  { %8108 = vmatpush1.bf16.msra.mxu0 %v10535_v22  ;;  %v5192_v22 = vld [vmem:[#allocation11 + $0x800] sm:$0xff] }
 0x3e3   :  { %8245 = vmatpush1.bf16.msra.mxu1 %v10465_v5  ;;  %8109 = vmatprep.subr.bf16.mxu0 %v10544_v61  ;;  %v5196_v5 = vld [vmem:[#allocation11 + $0x820] sm:$0xff]  ;;  %v5121_v61 = vld [vmem:[#allocation11 + $0x5c8] sm:$0xff] }
 0x3e4   :  { %8255 = vmatprep.subr.bf16.mxu1 %v10474_v10  ;;  %v5125_v10 = vld [vmem:[#allocation11 + $0x5e8] sm:$0xff]  ;;  %v10600_v17 = vcombine.high %v5192_v22, %v5196_v5  ;;  %v10599_v25 = vcombine.low %v5192_v22, %v5196_v5 }
 0x3e5   :  { %v10530_v15 = vcombine.high %v5121_v61, %v5125_v10  ;;  %v10529_v9 = vcombine.low %v5121_v61, %v5125_v10 }
 0x3e6   :  { %8110 = vmatpush1.bf16.msra.mxu0 %v10543_v20  ;;  %8247 = vmatmul.mubr.bf16.vlgmr.msra.gmra.mrb[24].mxu1 %v11904_v55  ;;  %v5200_v20 = vld [vmem:[#allocation11 + $0x840] sm:$0xff] }
 0x3e7   :  { %8256 = vmatpush1.bf16.msra.mxu1 %v10473_v21  ;;  %8287 = vmatprep.mubr.bf16.mxu1 %v11908_v59  ;;  %v5204_v21 = vld [vmem:[#allocation11 + $0x860] sm:$0xff] }
 0x3e8   :  { %8111 = vmatprep.subr.bf16.mxu0 %v10552_v23  ;;  %8257 = vmatprep.subr.bf16.mxu1 %v10482_v24  ;;  %v5129_v23 = vld [vmem:[#allocation11 + $0x608] sm:$0xff]  ;;  %v10608_v27 = vcombine.high %v5200_v20, %v5204_v21  ;;  %v10607_v31 = vcombine.low %v5200_v20, %v5204_v21 }
 0x3e9   :  { %v5133_v24 = vld [vmem:[#allocation11 + $0x628] sm:$0xff] }
 0x3ea   :  { %8112 = vmatpush1.bf16.msra.mxu0 %v10551_v42  ;;  %v10538_v42 = vcombine.high %v5129_v23, %v5133_v24  ;;  %v10537_v32 = vcombine.low %v5129_v23, %v5133_v24 }
 0x3eb   :  { %8258 = vmatpush1.bf16.msra.mxu1 %v10481_v30  ;;  %8113 = vmatprep.subr.bf16.mxu0 %v10560_v47  ;;  %v5208_v30 = vld [vmem:[#allocation11 + $0x880] sm:$0xff] }
 0x3ec   :  { %8259 = vmatprep.subr.bf16.mxu1 %v10490_v28  ;;  %v5212_v47 = vld [vmem:[#allocation11 + $0x8a0] sm:$0xff]  ;;  %v5137_v28 = vld [vmem:[#allocation11 + $0x648] sm:$0xff] }
 0x3ed   :  { %v10616_v56 = vcombine.high %v5208_v30, %v5212_v47  ;;  %v10546_v19 = vcombine.high %v5137_v28, %v5141_v12  ;;  %v10615_v37 = vcombine.low %v5208_v30, %v5212_v47  ;;  %v10545_v38 = vcombine.low %v5137_v28, %v5141_v12 }
 0x3ee   :  { %8114 = vmatpush1.bf16.msra.mxu0 %v10559_v34  ;;  %v5216_v34 = vld [vmem:[#allocation11 + $0x8c0] sm:$0xff] }
 0x3ef   :  { %8260 = vmatpush1.bf16.msra.mxu1 %v10489_v35  ;;  %8115 = vmatprep.subr.bf16.mxu0 %v10568_v36  ;;  %v5220_v35 = vld [vmem:[#allocation11 + $0x8e0] sm:$0xff]  ;;  %v5145_v36 = vld [vmem:[#allocation11 + $0x688] sm:$0xff] }
 0x3f0   :  { %8261 = vmatprep.subr.bf16.mxu1 %v10498_v48  ;;  %v5149_v48 = vld [vmem:[#allocation11 + $0x6a8] sm:$0xff]  ;;  %v10624_v39 = vcombine.high %v5216_v34, %v5220_v35  ;;  %v10623_v52 = vcombine.low %v5216_v34, %v5220_v35 }
 0x3f1   :  { %v10554_v41 = vcombine.high %v5145_v36, %v5149_v48  ;;  %v10553_v53 = vcombine.low %v5145_v36, %v5149_v48 }
 0x3f2   :  { %8116 = vmatpush1.bf16.msra.mxu0 %v10567_v46  ;;  %v5224_v46 = vld [vmem:[#allocation11 + $0x900] sm:$0xff] }
 0x3f3   :  { %8262 = vmatpush1.bf16.msra.mxu1 %v10497_v49  ;;  %8117 = vmatprep.subr.bf16.mxu0 %v10576_v50  ;;  %v5228_v49 = vld [vmem:[#allocation11 + $0x920] sm:$0xff]  ;;  %v5153_v50 = vld [vmem:[#allocation11 + $0x6c8] sm:$0xff] }
 0x3f4   :  { %8263 = vmatprep.subr.bf16.mxu1 %v10506_v51  ;;  %v5157_v51 = vld [vmem:[#allocation11 + $0x6e8] sm:$0xff]  ;;  %v10632_v54 = vcombine.high %v5224_v46, %v5228_v49  ;;  %v10631_v44 = vcombine.low %v5224_v46, %v5228_v49 }
 0x3f5   :  { %v10562_v6 = vcombine.high %v5153_v50, %v5157_v51  ;;  %v10561_v63 = vcombine.low %v5153_v50, %v5157_v51 }
 0x3f6   :  { %8118 = vmatpush1.bf16.msra.mxu0 %v10575_v33  ;;  %v5232_v33 = vld [vmem:[#allocation11 + $0x940] sm:$0xff] }
 0x3f7   :  { %8264 = vmatpush1.bf16.msra.mxu1 %v10505_v58  ;;  %8119 = vmatprep.subr.bf16.mxu0 %v10584_v7  ;;  %v5236_v58 = vld [vmem:[#allocation11 + $0x960] sm:$0xff]  ;;  %v5161_v7 = vld [vmem:[#allocation11 + $0x708] sm:$0xff] }
 0x3f8   :  { %8265 = vmatprep.subr.bf16.mxu1 %v10514_v62  ;;  %v5165_v62 = vld [vmem:[#allocation11 + $0x728] sm:$0xff]  ;;  %v10640_v0 = vcombine.high %v5232_v33, %v5236_v58  ;;  %v10639_v22 = vcombine.low %v5232_v33, %v5236_v58 }
 0x3f9   :  { %v10570_v1 = vcombine.high %v5161_v7, %v5165_v62  ;;  %v10569_v5 = vcombine.low %v5161_v7, %v5165_v62 }
 0x3fa   :  { %8120 = vmatpush1.bf16.msra.mxu0 %v10583_v8  ;;  %v5240_v8 = vld [vmem:[#allocation11 + $0x980] sm:$0xff] }
 0x3fb   :  { %8266 = vmatpush1.bf16.msra.mxu1 %v10513_v2  ;;  %8121 = vmatprep.subr.bf16.mxu0 %v10592_v3  ;;  %v5244_v2 = vld [vmem:[#allocation11 + $0x9a0] sm:$0xff]  ;;  %v5169_v3 = vld [vmem:[#allocation11 + $0x748] sm:$0xff] }
 0x3fc   :  { %8267 = vmatprep.subr.bf16.mxu1 %v10522_v4  ;;  %v5173_v4 = vld [vmem:[#allocation11 + $0x768] sm:$0xff]  ;;  %v10648_v61 = vcombine.high %v5240_v8, %v5244_v2  ;;  %v10647_v20 = vcombine.low %v5240_v8, %v5244_v2 }
 0x3fd   :  { %v10578_v10 = vcombine.high %v5169_v3, %v5173_v4  ;;  %v10577_v21 = vcombine.low %v5169_v3, %v5173_v4 }
 0x3fe   :  { %8122 = vmatpush1.bf16.msra.mxu0 %v10591_v11  ;;  %v5248_v11 = vld [vmem:[#allocation11 + $0x9c0] sm:$0xff] }
 0x3ff   :  { %8268 = vmatpush1.bf16.msra.mxu1 %v10521_v14  ;;  %8132 = vmatprep.subr.bf16.mxu0 %v10600_v17  ;;  %v5252_v14 = vld [vmem:[#allocation11 + $0x9e0] sm:$0xff]  ;;  %v5177_v17 = vld [vmem:[#allocation11 + $0x788] sm:$0xff] }
 0x400   :  { %8269 = vmatprep.subr.bf16.mxu1 %v10530_v15  ;;  %v5181_v15 = vld [vmem:[#allocation11 + $0x7a8] sm:$0xff]  ;;  %v10656_v23 = vcombine.high %v5248_v11, %v5252_v14  ;;  %v10655_v30 = vcombine.low %v5248_v11, %v5252_v14 }
 0x401   :  { %8124 = vmatmul.mubr.bf16.vlgmr.msra.gmra.mrb[8].mxu0 %v11916_v26  ;;  %v10586_v24 = vcombine.high %v5177_v17, %v5181_v15  ;;  %v10585_v47 = vcombine.low %v5177_v17, %v5181_v15 }
 0x402   :  { %8133 = vmatpush1.bf16.msra.mxu0 %v10599_v25  ;;  %v5256_v25 = vld [vmem:[#allocation11 + $0xa00] sm:$0xff] }
 0x403   :  { %8270 = vmatpush1.bf16.msra.mxu1 %v10529_v9  ;;  %8134 = vmatprep.subr.bf16.mxu0 %v10608_v27  ;;  %v5260_v9 = vld [vmem:[#allocation11 + $0xa20] sm:$0xff]  ;;  %v5185_v27 = vld [vmem:[#allocation11 + $0x7c8] sm:$0xff] }
 0x404   :  { %8271 = vmatprep.subr.bf16.mxu1 %v10538_v42  ;;  %v5189_v42 = vld [vmem:[#allocation11 + $0x7e8] sm:$0xff]  ;;  %v10664_v28 = vcombine.high %v5256_v25, %v5260_v9  ;;  %v10663_v34 = vcombine.low %v5256_v25, %v5260_v9 }
 0x405   :  { %v10594_v12 = vcombine.high %v5185_v27, %v5189_v42  ;;  %v10593_v35 = vcombine.low %v5185_v27, %v5189_v42 }
 0x406   :  { %8135 = vmatpush1.bf16.msra.mxu0 %v10607_v31  ;;  %v5264_v31 = vld [vmem:[#allocation11 + $0xa40] sm:$0xff] }
 0x407   :  { %8272 = vmatpush1.bf16.msra.mxu1 %v10537_v32  ;;  %8136 = vmatprep.subr.bf16.mxu0 %v10616_v56  ;;  %v5268_v32 = vld [vmem:[#allocation11 + $0xa60] sm:$0xff]  ;;  %v5193_v56 = vld [vmem:[#allocation11 + $0x808] sm:$0xff] }
 0x408   :  { %8273 = vmatprep.subr.bf16.mxu1 %v10546_v19  ;;  %v5197_v19 = vld [vmem:[#allocation11 + $0x828] sm:$0xff]  ;;  %v10672_v36 = vcombine.high %v5264_v31, %v5268_v32  ;;  %v10671_v46 = vcombine.low %v5264_v31, %v5268_v32 }
 0x409   :  { %v10602_v48 = vcombine.high %v5193_v56, %v5197_v19  ;;  %v10601_v49 = vcombine.low %v5193_v56, %v5197_v19 }
 0x40a   :  { %8137 = vmatpush1.bf16.msra.mxu0 %v10615_v37  ;;  %v5272_v37 = vld [vmem:[#allocation11 + $0xa80] sm:$0xff] }
 0x40b   :  { %8274 = vmatpush1.bf16.msra.mxu1 %v10545_v38  ;;  %8138 = vmatprep.subr.bf16.mxu0 %v10624_v39  ;;  %v5276_v38 = vld [vmem:[#allocation11 + $0xaa0] sm:$0xff]  ;;  %v5201_v39 = vld [vmem:[#allocation11 + $0x848] sm:$0xff] }
 0x40c   :  { %8275 = vmatprep.subr.bf16.mxu1 %v10554_v41  ;;  %v5205_v41 = vld [vmem:[#allocation11 + $0x868] sm:$0xff]  ;;  %v10680_v50 = vcombine.high %v5272_v37, %v5276_v38  ;;  %v10679_v33 = vcombine.low %v5272_v37, %v5276_v38 }
 0x40d   :  { %v10610_v51 = vcombine.high %v5201_v39, %v5205_v41  ;;  %v10609_v58 = vcombine.low %v5201_v39, %v5205_v41 }
 0x40e   :  { %8139 = vmatpush1.bf16.msra.mxu0 %v10623_v52  ;;  %v5280_v52 = vld [vmem:[#allocation11 + $0xac0] sm:$0xff] }
 0x40f   :  { %8276 = vmatpush1.bf16.msra.mxu1 %v10553_v53  ;;  %8140 = vmatprep.subr.bf16.mxu0 %v10632_v54  ;;  %v5284_v53 = vld [vmem:[#allocation11 + $0xae0] sm:$0xff]  ;;  %v5209_v54 = vld [vmem:[#allocation11 + $0x888] sm:$0xff] }
 0x410   :  { %8277 = vmatprep.subr.bf16.mxu1 %v10562_v6  ;;  %v5213_v6 = vld [vmem:[#allocation11 + $0x8a8] sm:$0xff]  ;;  %v10688_v7 = vcombine.high %v5280_v52, %v5284_v53  ;;  %v10687_v8 = vcombine.low %v5280_v52, %v5284_v53 }
 0x411   :  { %v10618_v62 = vcombine.high %v5209_v54, %v5213_v6  ;;  %v10617_v2 = vcombine.low %v5209_v54, %v5213_v6  ;;  %v5265_v52 = vld [vmem:[#allocation11 + $0xa48] sm:$0xff] }
 0x412   :  { %8141 = vmatpush1.bf16.msra.mxu0 %v10631_v44  ;;  %v5288_v44 = vld [vmem:[#allocation11 + $0xb00] sm:$0xff]  ;;  %v5269_v53 = vld [vmem:[#allocation11 + $0xa68] sm:$0xff] }
 0x413   :  { %8278 = vmatpush1.bf16.msra.mxu1 %v10561_v63  ;;  %8142 = vmatprep.subr.bf16.mxu0 %v10640_v0  ;;  %v5292_v63 = vld [vmem:[#allocation11 + $0xb20] sm:$0xff]  ;;  %v5217_v0 = vld [vmem:[#allocation11 + $0x8c8] sm:$0xff]  ;;  %v10674_v6 = vcombine.high %v5265_v52, %v5269_v53 }
 0x414   :  { %8279 = vmatprep.subr.bf16.mxu1 %v10570_v1  ;;  %v5221_v1 = vld [vmem:[#allocation11 + $0x8e8] sm:$0xff]  ;;  %v10696_v3 = vcombine.high %v5288_v44, %v5292_v63  ;;  %v10695_v11 = vcombine.low %v5288_v44, %v5292_v63 }
 0x415   :  { %v10626_v4 = vcombine.high %v5217_v0, %v5221_v1  ;;  %v10625_v14 = vcombine.low %v5217_v0, %v5221_v1  ;;  %v5281_v44 = vld [vmem:[#allocation11 + $0xac8] sm:$0xff] }
 0x416   :  { %8143 = vmatpush1.bf16.msra.mxu0 %v10639_v22  ;;  %v5296_v22 = vld [vmem:[#allocation11 + $0xb40] sm:$0xff]  ;;  %v5285_v63 = vld [vmem:[#allocation11 + $0xae8] sm:$0xff] }
 0x417   :  { %8280 = vmatpush1.bf16.msra.mxu1 %v10569_v5  ;;  %8144 = vmatprep.subr.bf16.mxu0 %v10648_v61  ;;  %v5300_v5 = vld [vmem:[#allocation11 + $0xb60] sm:$0xff]  ;;  %v5225_v61 = vld [vmem:[#allocation11 + $0x908] sm:$0xff]  ;;  %v10690_v1 = vcombine.high %v5281_v44, %v5285_v63 }
 0x418   :  { %8281 = vmatprep.subr.bf16.mxu1 %v10578_v10  ;;  %v5229_v10 = vld [vmem:[#allocation11 + $0x928] sm:$0xff]  ;;  %v10704_v17 = vcombine.high %v5296_v22, %v5300_v5  ;;  %v10703_v25 = vcombine.low %v5296_v22, %v5300_v5  ;;  %v11926_v22 = vld [vmem:[#allocation10] sm:$0xff] }
 0x419   :  { %v10634_v15 = vcombine.high %v5225_v61, %v5229_v10  ;;  %v10633_v9 = vcombine.low %v5225_v61, %v5229_v10  ;;  %v1675_v5 = vrot.slane %v11926_v22, %v11825_v43  ;;  %v5297_v61 = vld [vmem:[#allocation11 + $0xb48] sm:$0xff] }
 0x41a   :  { %8145 = vmatpush1.bf16.msra.mxu0 %v10647_v20  ;;  %v5304_v20 = vld [vmem:[#allocation11 + $0xb80] sm:$0xff]  ;;  %v5301_v10 = vld [vmem:[#allocation11 + $0xb68] sm:$0xff] }
 0x41b   :  { %8282 = vmatpush1.bf16.msra.mxu1 %v10577_v21  ;;  %8146 = vmatprep.subr.bf16.mxu0 %v10656_v23  ;;  %v5308_v21 = vld [vmem:[#allocation11 + $0xba0] sm:$0xff]  ;;  %v5233_v23 = vld [vmem:[#allocation11 + $0x948] sm:$0xff] }
 0x41c   :  { %8283 = vmatprep.subr.bf16.mxu1 %v10586_v24  ;;  %v5237_v24 = vld [vmem:[#allocation11 + $0x968] sm:$0xff]  ;;  %v10712_v27 = vcombine.high %v5304_v20, %v5308_v21  ;;  %v10711_v31 = vcombine.low %v5304_v20, %v5308_v21 }
 0x41d   :  { %v10642_v42 = vcombine.high %v5233_v23, %v5237_v24  ;;  %v10641_v32 = vcombine.low %v5233_v23, %v5237_v24 }
 0x41e   :  { %8147 = vmatpush1.bf16.msra.mxu0 %v10655_v30  ;;  %v5312_v30 = vld [vmem:[#allocation11 + $0xbc0] sm:$0xff] }
 0x41f   :  { %8284 = vmatpush1.bf16.msra.mxu1 %v10585_v47  ;;  %8148 = vmatprep.subr.bf16.mxu0 %v10664_v28  ;;  %v5316_v47 = vld [vmem:[#allocation11 + $0xbe0] sm:$0xff]  ;;  %v5241_v28 = vld [vmem:[#allocation11 + $0x988] sm:$0xff] }
 0x420   :  { %8285 = vmatprep.subr.bf16.mxu1 %v10594_v12  ;;  %v5245_v12 = vld [vmem:[#allocation11 + $0x9a8] sm:$0xff]  ;;  %v10720_v56 = vcombine.high %v5312_v30, %v5316_v47  ;;  %v10719_v37 = vcombine.low %v5312_v30, %v5316_v47  ;;  %v10705_v30 = vcombine.low %v5297_v61, %v5301_v10 }
 0x421   :  { %v10650_v19 = vcombine.high %v5241_v28, %v5245_v12  ;;  %v10649_v38 = vcombine.low %v5241_v28, %v5245_v12  ;;  %v5328_v28 = vld [vmem:[#allocation11 + $0xc40] sm:$0xff] }
 0x422   :  { %8149 = vmatpush1.bf16.msra.mxu0 %v10663_v34  ;;  %v11920_v34 = vld [vmem:[#allocation11 + $0xc00] sm:$0xff] }
 0x423   :  { %8286 = vmatpush1.bf16.msra.mxu1 %v10593_v35  ;;  %8150 = vmatprep.subr.bf16.mxu0 %v10672_v36  ;;  %v11922_v35 = vld [vmem:[#allocation11 + $0xc20] sm:$0xff]  ;;  %v5249_v36 = vld [vmem:[#allocation11 + $0x9c8] sm:$0xff] }
 0x424   :  { %8296 = vmatprep.subr.bf16.mxu1 %v10602_v48  ;;  %v5253_v48 = vld [vmem:[#allocation11 + $0x9e8] sm:$0xff]  ;;  %v10728_v39 = vcombine.high %v11920_v34, %v11922_v35  ;;  %v5332_v12 = vld [vmem:[#allocation11 + $0xc60] sm:$0xff] }
 0x425   :  { %v10658_v41 = vcombine.high %v5249_v36, %v5253_v48 }
 0x426   :  { %8288 = vmatmul.mubr.bf16.vlgmr.msra.gmra.mrb[24].mxu1 %v11916_v26  ;;  %8151 = vmatpush1.bf16.msra.mxu0 %v10671_v46  ;;  %v5257_v46 = vld [vmem:[#allocation11 + $0xa08] sm:$0xff] }
 0x427   :  { %8297 = vmatpush1.bf16.msra.mxu1 %v10601_v49  ;;  %8152 = vmatprep.subr.bf16.mxu0 %v10680_v50  ;;  %v5261_v49 = vld [vmem:[#allocation11 + $0xa28] sm:$0xff]  ;;  %v10657_v50 = vcombine.low %v5249_v36, %v5253_v48  ;;  %v10727_v36 = vcombine.low %v11920_v34, %v11922_v35 }
 0x428   :  { %8298 = vmatprep.subr.bf16.mxu1 %v10610_v51  ;;  %v10666_v51 = vcombine.high %v5257_v46, %v5261_v49  ;;  %v10665_v54 = vcombine.low %v5257_v46, %v5261_v49  ;;  %v5340_v46 = vld [vmem:[#allocation11 + $0xca0] sm:$0xff]  ;;  %v5321_v49 = vld [vmem:[#allocation11 + $0xc08] sm:$0xff] }
 0x42a   :  { %8153 = vmatpush1.bf16.msra.mxu0 %v10679_v33  ;;  %v5273_v33 = vld [vmem:[#allocation11 + $0xa88] sm:$0xff] }
 0x42b   :  { %8299 = vmatpush1.bf16.msra.mxu1 %v10609_v58  ;;  %8154 = vmatprep.subr.bf16.mxu0 %v10688_v7  ;;  %v5277_v58 = vld [vmem:[#allocation11 + $0xaa8] sm:$0xff]  ;;  %v10673_v7 = vcombine.low %v5265_v52, %v5269_v53  ;;  %v5344_v53 = vld [vmem:[#allocation11 + $0xcc0] sm:$0xff] }
 0x42c   :  { %8300 = vmatprep.subr.bf16.mxu1 %v10618_v62  ;;  %v10682_v62 = vcombine.high %v5273_v33, %v5277_v58  ;;  %v10681_v0 = vcombine.low %v5273_v33, %v5277_v58  ;;  %v5333_v33 = vld [vmem:[#allocation11 + $0xc68] sm:$0xff] }
 0x42e   :  { %8155 = vmatpush1.bf16.msra.mxu0 %v10687_v8  ;;  %v5289_v8 = vld [vmem:[#allocation11 + $0xb08] sm:$0xff] }
 0x42f   :  { %8301 = vmatpush1.bf16.msra.mxu1 %v10617_v2  ;;  %8156 = vmatprep.subr.bf16.mxu0 %v10696_v3  ;;  %v5293_v2 = vld [vmem:[#allocation11 + $0xb28] sm:$0xff]  ;;  %v10689_v3 = vcombine.low %v5281_v44, %v5285_v63  ;;  %v5352_v63 = vld [vmem:[#allocation11 + $0xd00] sm:$0xff] }
 0x430   :  { %8302 = vmatprep.subr.bf16.mxu1 %v10626_v4  ;;  %v10698_v4 = vcombine.high %v5289_v8, %v5293_v2 }
 0x432   :  { %8157 = vmatpush1.bf16.msra.mxu0 %v10695_v11  ;;  %v1679_v11 = vrot.slane %v11926_v22, %v11828_v29 }
 0x433   :  { %8303 = vmatpush1.bf16.msra.mxu1 %v10625_v14  ;;  %8158 = vmatprep.subr.bf16.mxu0 %v10704_v17  ;;  %v10697_v14 = vcombine.low %v5289_v8, %v5293_v2  ;;  %v5341_v8 = vld [vmem:[#allocation11 + $0xca8] sm:$0xff] }
 0x434   :  { %8304 = vmatprep.subr.bf16.mxu1 %v10634_v15  ;;  %v10706_v15 = vcombine.high %v5297_v61, %v5301_v10  ;;  %v5360_v61 = vld [vmem:[#allocation11 + $0xd40] sm:$0xff] }
 0x435   :  { %v5364_v10 = vld [vmem:[#allocation11 + $0xd60] sm:$0xff] }
 0x436   :  { %8159 = vmatpush1.bf16.msra.mxu0 %v10703_v25  ;;  %v5305_v25 = vld [vmem:[#allocation11 + $0xb88] sm:$0xff] }
 0x437   :  { %8305 = vmatpush1.bf16.msra.mxu1 %v10633_v9  ;;  %8160 = vmatprep.subr.bf16.mxu0 %v10712_v27  ;;  %v5309_v9 = vld [vmem:[#allocation11 + $0xba8] sm:$0xff] }
 0x438   :  { %8306 = vmatprep.subr.bf16.mxu1 %v10642_v42 }
 0x43a   :  { %8161 = vmatpush1.bf16.msra.mxu0 %v10711_v31  ;;  %v10714_v31 = vcombine.high %v5305_v25, %v5309_v9 }
 0x43b   :  { %8307 = vmatpush1.bf16.msra.mxu1 %v10641_v32  ;;  %8162 = vmatprep.subr.bf16.mxu0 %v10720_v56  ;;  %v5313_v32 = vld [vmem:[#allocation11 + $0xbc8] sm:$0xff] }
 0x43c   :  { %8308 = vmatprep.subr.bf16.mxu1 %v10650_v19  ;;  %v5317_v56 = vld [vmem:[#allocation11 + $0xbe8] sm:$0xff] }
 0x43d   :  { %v10721_v34 = vcombine.low %v5313_v32, %v5317_v56 }
 0x43e   :  { %8163 = vmatpush1.bf16.msra.mxu0 %v10719_v37  ;;  %v10713_v37 = vcombine.low %v5305_v25, %v5309_v9  ;;  %v5353_v25 = vld [vmem:[#allocation11 + $0xd08] sm:$0xff] }
 0x43f   :  { %8309 = vmatpush1.bf16.msra.mxu1 %v10649_v38  ;;  %8173 = vmatprep.subr.bf16.mxu0 %v10728_v39  ;;  %v10736_v38 = vcombine.high %v5328_v28, %v5332_v12  ;;  %v10722_v39 = vcombine.high %v5313_v32, %v5317_v56  ;;  %v5357_v9 = vld [vmem:[#allocation11 + $0xd28] sm:$0xff] }
 0x440   :  { %8310 = vmatprep.subr.bf16.mxu1 %v10658_v41  ;;  %v5336_v41 = vld [vmem:[#allocation11 + $0xc80] sm:$0xff]  ;;  %v5365_v32 = vld [vmem:[#allocation11 + $0xd68] sm:$0xff] }
 0x441   :  { %v10744_v35 = vcombine.high %v5336_v41, %v5340_v46  ;;  %v10743_v58 = vcombine.low %v5336_v41, %v5340_v46  ;;  %v5388_v41 = vld [vmem:[#allocation11 + $0xe20] sm:$0xff]  ;;  %v5369_v46 = vld [vmem:[#allocation11 + $0xd88] sm:$0xff] }
 0x443   :  { %8311 = vmatpush1.bf16.msra.mxu1 %v10657_v50  ;;  %v5325_v50 = vld [vmem:[#allocation11 + $0xc28] sm:$0xff] }
 0x444   :  { %8312 = vmatprep.subr.bf16.mxu1 %v10666_v51  ;;  %v10735_v51 = vcombine.low %v5328_v28, %v5332_v12  ;;  %v10730_v52 = vcombine.high %v5321_v49, %v5325_v50  ;;  %v5376_v28 = vld [vmem:[#allocation11 + $0xdc0] sm:$0xff] }
 0x445   :  { %v5380_v12 = vld [vmem:[#allocation11 + $0xde0] sm:$0xff] }
 0x447   :  { %8313 = vmatpush1.bf16.msra.mxu1 %v10665_v54  ;;  %v5348_v54 = vld [vmem:[#allocation11 + $0xce0] sm:$0xff] }
 0x448   :  { %8314 = vmatprep.subr.bf16.mxu1 %v10674_v6  ;;  %v5329_v6 = vld [vmem:[#allocation11 + $0xc48] sm:$0xff]  ;;  %v10751_v2 = vcombine.low %v5344_v53, %v5348_v54 }
 0x449   :  { %v10738_v44 = vcombine.high %v5329_v6, %v5333_v33 }
 0x44b   :  { %8315 = vmatpush1.bf16.msra.mxu1 %v10673_v7  ;;  %v10729_v7 = vcombine.low %v5321_v49, %v5325_v50  ;;  %v5373_v49 = vld [vmem:[#allocation11 + $0xda8] sm:$0xff]  ;;  %v10783_v50 = vcombine.low %v5376_v28, %v5380_v12 }
 0x44c   :  { %8316 = vmatprep.subr.bf16.mxu1 %v10682_v62  ;;  %v10752_v62 = vcombine.high %v5344_v53, %v5348_v54  ;;  %v10778_v53 = vcombine.high %v5369_v46, %v5373_v49  ;;  %v5392_v54 = vld [vmem:[#allocation11 + $0xe40] sm:$0xff] }
 0x44f   :  { %8317 = vmatpush1.bf16.msra.mxu1 %v10681_v0  ;;  %v5356_v0 = vld [vmem:[#allocation11 + $0xd20] sm:$0xff] }
 0x450   :  { %8318 = vmatprep.subr.bf16.mxu1 %v10690_v1  ;;  %v5337_v1 = vld [vmem:[#allocation11 + $0xc88] sm:$0xff] }
 0x453   :  { %8319 = vmatpush1.bf16.msra.mxu1 %v10689_v3  ;;  %v10737_v3 = vcombine.low %v5329_v6, %v5333_v33  ;;  %v5396_v6 = vld [vmem:[#allocation11 + $0xe60] sm:$0xff] }
 0x454   :  { %v4741_v17 = vpop.f32.mrb[4].mxu0  ;;  %8320 = vmatprep.subr.bf16.mxu1 %v10698_v4  ;;  %v10760_v4 = vcombine.high %v5352_v63, %v5356_v0 }
 0x455   :  { %v10987_v20 = vadd.f32 %v4741_v17, %v1675_v5  ;;  %v4743_v21 = vpop.f32.mrb[5].mxu0  ;;  %v10746_v5 = vcombine.high %v5337_v1, %v5341_v8  ;;  %v10759_v17 = vcombine.low %v5352_v63, %v5356_v0 }
 0x456   :  { %v10988_v23 = vadd.f32 %v4743_v21, %v1679_v11  ;;  %v4745_v24 = vpop.f32.mrb[6].mxu0  ;;  %v5345_v11 = vld [vmem:[#allocation11 + $0xcc8] sm:$0xff] }
 0x457   :  { %v4916_v27 = vmax.f32 %v10987_v20, 0.0  ;;  %v4746_v42 = vpop.f32.mrb[7].mxu0  ;;  %8321 = vmatpush1.bf16.msra.mxu1 %v10697_v14  ;;  %v5349_v14 = vld [vmem:[#allocation11 + $0xce8] sm:$0xff]  ;;  %v10768_v20 = vcombine.high %v5360_v61, %v5364_v10  ;;  %v5372_v24 = vld [vmem:[#allocation11 + $0xda0] sm:$0xff] }
 0x458   :  { %v4917_v47 = vmax.f32 %v10988_v23, 0.0  ;;  %8322 = vmatprep.subr.bf16.mxu1 %v10706_v15  ;;  %v10745_v15 = vcombine.low %v5337_v1, %v5341_v8  ;;  %v10754_v21 = vcombine.high %v5345_v11, %v5349_v14  ;;  %v5368_v23 = vld [vmem:[#allocation11 + $0xd80] sm:$0xff]  ;;  %v10753_v42 = vcombine.low %v5345_v11, %v5349_v14  ;;  %v5385_v11 = vld [vmem:[#allocation11 + $0xe08] sm:$0xff] }
 0x459   :  { %4924 = vst [vmem:[#allocation17 + $0x20] sm:$0xff] %v4916_v27  ;;  %v11936_v48 = vpack.c.bf16 %v4916_v27, %v4916_v27  ;;  %v10767_v27 = vcombine.low %v5360_v61, %v5364_v10  ;;  %v10775_v56 = vcombine.low %v5368_v23, %v5372_v24  ;;  %v10777_v8 = vcombine.low %v5369_v46, %v5373_v49  ;;  %v5404_v61 = vld [vmem:[#allocation11 + $0xea0] sm:$0xff]  ;;  %v5389_v14 = vld [vmem:[#allocation11 + $0xe28] sm:$0xff] }
 0x45a   :  { %4925 = vst [vmem:[#allocation17 + $0x28] sm:$0xff] %v4917_v47  ;;  %v11932_v19 = vpack.c.bf16 %v4917_v47, %v4917_v47  ;;  %v10762_v47 = vcombine.high %v5353_v25, %v5357_v9  ;;  %v5428_v46 = vld [vmem:[#allocation11 + $0xf60] sm:$0xff]  ;;  %v5409_v49 = vld [vmem:[#allocation11 + $0xec8] sm:$0xff] }
 0x45b   :  { %8323 = vmatpush1.bf16.msra.mxu1 %v10705_v30  ;;  %v10776_v30 = vcombine.high %v5368_v23, %v5372_v24  ;;  %v10794_v23 = vcombine.high %v5385_v11, %v5389_v14  ;;  %v5408_v24 = vld [vmem:[#allocation11 + $0xec0] sm:$0xff] }
 0x45c   :  { %8164 = vmatprep.mubr.bf16.mxu0 %v11932_v19  ;;  %8328 = vmatprep.mubr.bf16.mxu1 %v11932_v19 }
 0x45d   :  { %8165 = vmatmul.mubr.bf16.vlgmr.msra.gmra.mrb[8].mxu0 %v11936_v48  ;;  %8324 = vmatprep.subr.bf16.mxu1 %v10714_v31  ;;  %v5361_v31 = vld [vmem:[#allocation11 + $0xd48] sm:$0xff] }
 0x45e   :  { %8174 = vmatpush1.bf16.msra.mxu0 %v10727_v36  ;;  %v10761_v36 = vcombine.low %v5353_v25, %v5357_v9  ;;  %v5412_v25 = vld [vmem:[#allocation11 + $0xee0] sm:$0xff]  ;;  %v5393_v9 = vld [vmem:[#allocation11 + $0xe48] sm:$0xff] }
 0x45f   :  { %8325 = vmatpush1.bf16.msra.mxu1 %v10713_v37  ;;  %8175 = vmatprep.subr.bf16.mxu0 %v10736_v38  ;;  %v10784_v37 = vcombine.high %v5376_v28, %v5380_v12  ;;  %v10770_v38 = vcombine.high %v5361_v31, %v5365_v32  ;;  %v5416_v12 = vld [vmem:[#allocation11 + $0xf00] sm:$0xff] }
 0x460   :  { %8326 = vmatprep.subr.bf16.mxu1 %v10722_v39  ;;  %v5384_v39 = vld [vmem:[#allocation11 + $0xe00] sm:$0xff] }
 0x461   :  { %v10791_v63 = vcombine.low %v5384_v39, %v5388_v41 }
 0x462   :  { %8176 = vmatpush1.bf16.msra.mxu0 %v10735_v51  ;;  %v1683_v51 = vrot.slane %v11926_v22, %v11843_v13 }
 0x463   :  { %8327 = vmatpush1.bf16.msra.mxu1 %v10721_v34  ;;  %8177 = vmatprep.subr.bf16.mxu0 %v10744_v35  ;;  %v1687_v34 = vrot.slane %v11926_v22, %v11846_v16  ;;  %v10769_v35 = vcombine.low %v5361_v31, %v5365_v32  ;;  %v5420_v31 = vld [vmem:[#allocation11 + $0xf20] sm:$0xff]  ;;  %v5401_v32 = vld [vmem:[#allocation11 + $0xe88] sm:$0xff] }
 0x464   :  { %8337 = vmatprep.subr.bf16.mxu1 %v10730_v52  ;;  %v10792_v52 = vcombine.high %v5384_v39, %v5388_v41  ;;  %v5424_v41 = vld [vmem:[#allocation11 + $0xf40] sm:$0xff] }
 0x466   :  { %8178 = vmatpush1.bf16.msra.mxu0 %v10743_v58  ;;  %8329 = vmatmul.mubr.bf16.vlgmr.msra.gmra.mrb[24].mxu1 %v11936_v48  ;;  %v5377_v58 = vld [vmem:[#allocation11 + $0xdc8] sm:$0xff] }
 0x467   :  { %8338 = vmatpush1.bf16.msra.mxu1 %v10729_v7  ;;  %8179 = vmatprep.subr.bf16.mxu0 %v10752_v62  ;;  %v5381_v7 = vld [vmem:[#allocation11 + $0xde8] sm:$0xff] }
 0x468   :  { %8339 = vmatprep.subr.bf16.mxu1 %v10738_v44 }
 0x46a   :  { %8180 = vmatpush1.bf16.msra.mxu0 %v10751_v2  ;;  %v10800_v2 = vcombine.high %v5392_v54, %v5396_v6 }
 0x46b   :  { %8340 = vmatpush1.bf16.msra.mxu1 %v10737_v3  ;;  %8181 = vmatprep.subr.bf16.mxu0 %v10760_v4  ;;  %v10786_v4 = vcombine.high %v5377_v58, %v5381_v7 }
 0x46c   :  { %8341 = vmatprep.subr.bf16.mxu1 %v10746_v5  ;;  %v5400_v5 = vld [vmem:[#allocation11 + $0xe80] sm:$0xff] }
 0x46e   :  { %8182 = vmatpush1.bf16.msra.mxu0 %v10759_v17  ;;  %v10799_v17 = vcombine.low %v5392_v54, %v5396_v6  ;;  %v5436_v54 = vld [vmem:[#allocation11 + $0xfa0] sm:$0xff]  ;;  %v5417_v6 = vld [vmem:[#allocation11 + $0xf08] sm:$0xff] }
 0x46f   :  { %8342 = vmatpush1.bf16.msra.mxu1 %v10745_v15  ;;  %8183 = vmatprep.subr.bf16.mxu0 %v10768_v20  ;;  %v10785_v20 = vcombine.low %v5377_v58, %v5381_v7  ;;  %v10831_v58 = vcombine.low %v5424_v41, %v5428_v46 }
 0x470   :  { %8343 = vmatprep.subr.bf16.mxu1 %v10754_v21  ;;  %v10808_v21 = vcombine.high %v5400_v5, %v5404_v61 }
 0x472   :  { %8184 = vmatpush1.bf16.msra.mxu0 %v10767_v27  ;;  %v5397_v27 = vld [vmem:[#allocation11 + $0xe68] sm:$0xff] }
 0x473   :  { %8344 = vmatpush1.bf16.msra.mxu1 %v10753_v42  ;;  %8185 = vmatprep.subr.bf16.mxu0 %v10776_v30  ;;  %v10807_v42 = vcombine.low %v5400_v5, %v5404_v61  ;;  %v10793_v30 = vcombine.low %v5385_v11, %v5389_v14  ;;  %v10802_v28 = vcombine.high %v5393_v9, %v5397_v27  ;;  %v4938_v61 = vld [vmem:[#allocation11 + $0x10] sm:$0xff]  ;;  %v5433_v11 = vld [vmem:[#allocation11 + $0xf88] sm:$0xff] }
 0x474   :  { %8345 = vmatprep.subr.bf16.mxu1 %v10762_v47  ;;  %v10816_v47 = vcombine.high %v5408_v24, %v5412_v25  ;;  %v5437_v14 = vld [vmem:[#allocation11 + $0xfa8] sm:$0xff] }
 0x476   :  { %8186 = vmatpush1.bf16.msra.mxu0 %v10775_v56  ;;  %v5405_v56 = vld [vmem:[#allocation11 + $0xea8] sm:$0xff] }
 0x477   :  { %8346 = vmatpush1.bf16.msra.mxu1 %v10761_v36  ;;  %8187 = vmatprep.subr.bf16.mxu0 %v10784_v37  ;;  %v10815_v36 = vcombine.low %v5408_v24, %v5412_v25  ;;  %v10801_v37 = vcombine.low %v5393_v9, %v5397_v27  ;;  %v10810_v39 = vcombine.high %v5401_v32, %v5405_v56  ;;  %v4946_v24 = vld [vmem:[#allocation11 + $0x50] sm:$0xff]  ;;  %v5441_v9 = vld [vmem:[#allocation11 + $0xfc8] sm:$0xff] }
 0x478   :  { %8347 = vmatprep.subr.bf16.mxu1 %v10770_v38  ;;  %v10824_v38 = vcombine.high %v5416_v12, %v5420_v31  ;;  %v4950_v25 = vld [vmem:[#allocation11 + $0x70] sm:$0xff]  ;;  %v5445_v27 = vld [vmem:[#allocation11 + $0xfe8] sm:$0xff] }
 0x479   :  { %v4905_v33 = vpop.f32.mrb[20].mxu1 }
 0x47a   :  { %v10989_v62 = vadd.f32 %v4905_v33, %v1683_v51  ;;  %8188 = vmatpush1.bf16.msra.mxu0 %v10783_v50  ;;  %v4907_v44 = vpop.f32.mrb[21].mxu1  ;;  %v5413_v50 = vld [vmem:[#allocation11 + $0xee8] sm:$0xff]  ;;  %v10823_v51 = vcombine.low %v5416_v12, %v5420_v31  ;;  %v10850_v12 = vcombine.high %v5441_v9, %v5445_v27  ;;  %v4954_v31 = vld [vmem:[#allocation11 + $0x90] sm:$0xff] }
 0x47b   :  { %v10990_v0 = vadd.f32 %v4907_v44, %v1687_v34  ;;  %v4909_v1 = vpop.f32.mrb[22].mxu1  ;;  %8348 = vmatpush1.bf16.msra.mxu1 %v10769_v35  ;;  %8189 = vmatprep.subr.bf16.mxu0 %v10792_v52  ;;  %v10809_v34 = vcombine.low %v5401_v32, %v5405_v56  ;;  %v10832_v35 = vcombine.high %v5424_v41, %v5428_v46  ;;  %v5421_v33 = vld [vmem:[#allocation11 + $0xf28] sm:$0xff]  ;;  %v4958_v32 = vld [vmem:[#allocation11 + $0xb0] sm:$0xff]  ;;  %v4939_v56 = vld [vmem:[#allocation11 + $0x18] sm:$0xff] }
 0x47c   :  { %v11946_v22 = vmax.f32 %v10989_v62, 0.0  ;;  %v4910_v3 = vpop.f32.mrb[23].mxu1  ;;  %8349 = vmatprep.subr.bf16.mxu1 %v10778_v53  ;;  %v10818_v52 = vcombine.high %v5409_v49, %v5413_v50  ;;  %v5432_v53 = vld [vmem:[#allocation11 + $0xf80] sm:$0xff]  ;;  %v10817_v7 = vcombine.low %v5409_v49, %v5413_v50  ;;  %v10826_v44 = vcombine.high %v5417_v6, %v5421_v33  ;;  %v5425_v1 = vld [vmem:[#allocation11 + $0xf48] sm:$0xff]  ;;  %v4962_v41 = vld [vmem:[#allocation11 + $0xd0] sm:$0xff] }
 0x47d   :  { %v4919_v10 = vmax.f32 %v10990_v0, 0.0  ;;  %v10840_v62 = vcombine.high %v5432_v53, %v5436_v54  ;;  %v5444_v0 = vld [vmem:[#allocation11 + $0xfe0] sm:$0xff]  ;;  %v10825_v3 = vcombine.low %v5417_v6, %v5421_v33  ;;  %v4966_v46 = vld [vmem:[#allocation11 + $0xf0] sm:$0xff]  ;;  %v4947_v49 = vld [vmem:[#allocation11 + $0x58] sm:$0xff] }
 0x47e   :  { %4926 = vst [vmem:[#allocation17 + $0x30] sm:$0xff] %v11946_v22  ;;  %8190 = vmatpush1.bf16.msra.mxu0 %v10791_v63  ;;  %v5440_v63 = vld [vmem:[#allocation11 + $0xfc0] sm:$0xff]  ;;  %v4951_v50 = vld [vmem:[#allocation11 + $0x78] sm:$0xff] }
 0x47f   :  { %4927 = vst [vmem:[#allocation17 + $0x38] sm:$0xff] %v4919_v10  ;;  %v11949_v15 = vpack.c.bf16 %v4919_v10, %v4919_v10  ;;  %8350 = vmatpush1.bf16.msra.mxu1 %v10777_v8  ;;  %8191 = vmatprep.subr.bf16.mxu0 %v10800_v2  ;;  %v5429_v8 = vld [vmem:[#allocation11 + $0xf68] sm:$0xff]  ;;  %v10839_v2 = vcombine.low %v5432_v53, %v5436_v54  ;;  %v4942_v10 = vld [vmem:[#allocation11 + $0x30] sm:$0xff]  ;;  %v4955_v6 = vld [vmem:[#allocation11 + $0x98] sm:$0xff] }
 0x480   :  { %8351 = vmatprep.subr.bf16.mxu1 %v10786_v4  ;;  %v10848_v4 = vcombine.high %v5440_v63, %v5444_v0  ;;  %v10834_v5 = vcombine.high %v5425_v1, %v5429_v8  ;;  %v4970_v53 = vld [vmem:[#allocation11 + $0x110] sm:$0xff]  ;;  %v4959_v33 = vld [vmem:[#allocation11 + $0xb8] sm:$0xff] }
 0x481   :  { %8205 = vmatprep.mubr.bf16.mxu0 %v11949_v15  ;;  %8369 = vmatprep.mubr.bf16.mxu1 %v11949_v15  ;;  %v4974_v54 = vld [vmem:[#allocation11 + $0x130] sm:$0xff] }
 0x482   :  { %8192 = vmatpush1.bf16.msra.mxu0 %v10799_v17  ;;  %v10847_v17 = vcombine.low %v5440_v63, %v5444_v0  ;;  %v4978_v63 = vld [vmem:[#allocation11 + $0x150] sm:$0xff] }
 0x483   :  { %8352 = vmatpush1.bf16.msra.mxu1 %v10785_v20  ;;  %8193 = vmatprep.subr.bf16.mxu0 %v10808_v21  ;;  %v10833_v20 = vcombine.low %v5425_v1, %v5429_v8  ;;  %v10348_v21 = vcombine.high %v4938_v61, %v4942_v10  ;;  %v4982_v0 = vld [vmem:[#allocation11 + $0x170] sm:$0xff]  ;;  %v4963_v1 = vld [vmem:[#allocation11 + $0xd8] sm:$0xff] }
 0x484   :  { %8353 = vmatprep.subr.bf16.mxu1 %v10794_v23  ;;  %v10842_v23 = vcombine.high %v5433_v11, %v5437_v14  ;;  %v4967_v8 = vld [vmem:[#allocation11 + $0xf8] sm:$0xff] }
 0x486   :  { %8194 = vmatpush1.bf16.msra.mxu0 %v10807_v42  ;;  %v10347_v42 = vcombine.low %v4938_v61, %v4942_v10  ;;  %v4986_v61 = vld [vmem:[#allocation11 + $0x190] sm:$0xff] }
 0x487   :  { %8354 = vmatpush1.bf16.msra.mxu1 %v10793_v30  ;;  %8195 = vmatprep.subr.bf16.mxu0 %v10816_v47  ;;  %v11955_v30 = vpack.c.bf16 %v11946_v22, %v11946_v22  ;;  %v10841_v47 = vcombine.low %v5433_v11, %v5437_v14  ;;  %v10849_v22 = vcombine.low %v5441_v9, %v5445_v27  ;;  %v4990_v10 = vld [vmem:[#allocation11 + $0x1b0] sm:$0xff]  ;;  %v4975_v11 = vld [vmem:[#allocation11 + $0x138] sm:$0xff] }
 0x488   :  { %8355 = vmatprep.subr.bf16.mxu1 %v10802_v28  ;;  %v10356_v28 = vcombine.high %v4946_v24, %v4950_v25  ;;  %v10387_v14 = vcombine.low %v4978_v63, %v4982_v0  ;;  %v4983_v9 = vld [vmem:[#allocation11 + $0x178] sm:$0xff]  ;;  %v10395_v27 = vcombine.low %v4986_v61, %v4990_v10 }
 0x48a   :  { %8196 = vmatpush1.bf16.msra.mxu0 %v10815_v36  ;;  %v4943_v36 = vld [vmem:[#allocation11 + $0x38] sm:$0xff] }
 0x48b   :  { %8356 = vmatpush1.bf16.msra.mxu1 %v10801_v37  ;;  %8197 = vmatprep.subr.bf16.mxu0 %v10824_v38  ;;  %v10355_v37 = vcombine.low %v4946_v24, %v4950_v25  ;;  %v10364_v38 = vcombine.high %v4954_v31, %v4958_v32  ;;  %v4998_v24 = vld [vmem:[#allocation11 + $0x1f0] sm:$0xff]  ;;  %v4979_v25 = vld [vmem:[#allocation11 + $0x158] sm:$0xff] }
 0x48c   :  { %8357 = vmatprep.subr.bf16.mxu1 %v10810_v39  ;;  %v10350_v39 = vcombine.high %v4939_v56, %v4943_v36 }
 0x48e   :  { %8198 = vmatpush1.bf16.msra.mxu0 %v10823_v51  ;;  %v10363_v51 = vcombine.low %v4954_v31, %v4958_v32  ;;  %v5006_v31 = vld [vmem:[#allocation11 + $0x230] sm:$0xff]  ;;  %v4987_v32 = vld [vmem:[#allocation11 + $0x198] sm:$0xff] }
 0x48f   :  { %8358 = vmatpush1.bf16.msra.mxu1 %v10809_v34  ;;  %8199 = vmatprep.subr.bf16.mxu0 %v10832_v35  ;;  %v10349_v34 = vcombine.low %v4939_v56, %v4943_v36  ;;  %v10372_v35 = vcombine.high %v4962_v41, %v4966_v46  ;;  %v4991_v56 = vld [vmem:[#allocation11 + $0x1b8] sm:$0xff] }
 0x490   :  { %8359 = vmatprep.subr.bf16.mxu1 %v10818_v52  ;;  %v10358_v52 = vcombine.high %v4947_v49, %v4951_v50 }
 0x492   :  { %8200 = vmatpush1.bf16.msra.mxu0 %v10831_v58  ;;  %v10371_v58 = vcombine.low %v4962_v41, %v4966_v46  ;;  %v5014_v41 = vld [vmem:[#allocation11 + $0x270] sm:$0xff]  ;;  %v4995_v46 = vld [vmem:[#allocation11 + $0x1d8] sm:$0xff] }
 0x493   :  { %8360 = vmatpush1.bf16.msra.mxu1 %v10817_v7  ;;  %8201 = vmatprep.subr.bf16.mxu0 %v10840_v62  ;;  %v10357_v7 = vcombine.low %v4947_v49, %v4951_v50  ;;  %v10380_v62 = vcombine.high %v4970_v53, %v4974_v54  ;;  %v4999_v49 = vld [vmem:[#allocation11 + $0x1f8] sm:$0xff] }
 0x494   :  { %8361 = vmatprep.subr.bf16.mxu1 %v10826_v44  ;;  %v10366_v44 = vcombine.high %v4955_v6, %v4959_v33 }
 0x496   :  { %8202 = vmatpush1.bf16.msra.mxu0 %v10839_v2  ;;  %v10379_v2 = vcombine.low %v4970_v53, %v4974_v54  ;;  %v5022_v53 = vld [vmem:[#allocation11 + $0x2b0] sm:$0xff]  ;;  %v5003_v54 = vld [vmem:[#allocation11 + $0x218] sm:$0xff] }
 0x497   :  { %8362 = vmatpush1.bf16.msra.mxu1 %v10825_v3  ;;  %8203 = vmatprep.subr.bf16.mxu0 %v10848_v4  ;;  %v10365_v3 = vcombine.low %v4955_v6, %v4959_v33  ;;  %v10388_v4 = vcombine.high %v4978_v63, %v4982_v0  ;;  %v5007_v6 = vld [vmem:[#allocation11 + $0x238] sm:$0xff]  ;;  %v5030_v63 = vld [vmem:[#allocation11 + $0x2f0] sm:$0xff] }
 0x498   :  { %8363 = vmatprep.subr.bf16.mxu1 %v10834_v5  ;;  %v10374_v5 = vcombine.high %v4963_v1, %v4967_v8  ;;  %v5011_v0 = vld [vmem:[#allocation11 + $0x258] sm:$0xff] }
 0x49a   :  { %8204 = vmatpush1.bf16.msra.mxu0 %v10847_v17  ;;  %v10373_v17 = vcombine.low %v4963_v1, %v4967_v8  ;;  %v5015_v1 = vld [vmem:[#allocation11 + $0x278] sm:$0xff] }
 0x49b   :  { %8364 = vmatpush1.bf16.msra.mxu1 %v10833_v20  ;;  %8378 = vmatprep.subr.bf16.mxu0 %v10348_v21  ;;  %v10396_v20 = vcombine.high %v4986_v61, %v4990_v10  ;;  %v5038_v61 = vld [vmem:[#allocation11 + $0x330] sm:$0xff]  ;;  %v5019_v10 = vld [vmem:[#allocation11 + $0x298] sm:$0xff] }
 0x49c   :  { %8365 = vmatprep.subr.bf16.mxu1 %v10842_v23  ;;  %v4994_v23 = vld [vmem:[#allocation11 + $0x1d0] sm:$0xff] }
 0x49d   :  { %8206 = vmatmul.mubr.bf16.vlgmr.msra.gmra.mrb[8].mxu0 %v11955_v30  ;;  %v10403_v36 = vcombine.low %v4994_v23, %v4998_v24 }
 0x49e   :  { %8379 = vmatpush1.bf16.msra.mxu0 %v10347_v42  ;;  %8410 = vmatprep.mubr.bf16.mxu0 %v11896_v18 }
 0x49f   :  { %8366 = vmatpush1.bf16.msra.mxu1 %v10841_v47  ;;  %8380 = vmatprep.subr.bf16.mxu0 %v10356_v28  ;;  %v10404_v47 = vcombine.high %v4994_v23, %v4998_v24  ;;  %v10390_v28 = vcombine.high %v4979_v25, %v4983_v9  ;;  %v5046_v23 = vld [vmem:[#allocation11 + $0x370] sm:$0xff]  ;;  %v5027_v24 = vld [vmem:[#allocation11 + $0x2d8] sm:$0xff] }
 0x4a0   :  { %8367 = vmatprep.subr.bf16.mxu1 %v10850_v12  ;;  %v5002_v12 = vld [vmem:[#allocation11 + $0x210] sm:$0xff] }
 0x4a1   :  { %v10411_v50 = vcombine.low %v5002_v12, %v5006_v31 }
 0x4a2   :  { %8381 = vmatpush1.bf16.msra.mxu0 %v10355_v37  ;;  %v10389_v37 = vcombine.low %v4979_v25, %v4983_v9  ;;  %v5031_v25 = vld [vmem:[#allocation11 + $0x2f8] sm:$0xff] }
 0x4a3   :  { %8368 = vmatpush1.bf16.msra.mxu1 %v10849_v22  ;;  %8382 = vmatprep.subr.bf16.mxu0 %v10364_v38  ;;  %v10412_v22 = vcombine.high %v5002_v12, %v5006_v31  ;;  %v10398_v38 = vcombine.high %v4987_v32, %v4991_v56  ;;  %v5054_v12 = vld [vmem:[#allocation11 + $0x3b0] sm:$0xff]  ;;  %v5035_v31 = vld [vmem:[#allocation11 + $0x318] sm:$0xff] }
 0x4a4   :  { %8542 = vmatprep.subr.bf16.mxu1 %v10350_v39  ;;  %v5010_v39 = vld [vmem:[#allocation11 + $0x250] sm:$0xff] }
 0x4a5   :  { %v10419_v33 = vcombine.low %v5010_v39, %v5014_v41 }
 0x4a6   :  { %8383 = vmatpush1.bf16.msra.mxu0 %v10363_v51  ;;  %8370 = vmatmul.mubr.bf16.vlgmr.msra.gmra.mrb[24].mxu1 %v11955_v30  ;;  %v10397_v51 = vcombine.low %v4987_v32, %v4991_v56  ;;  %v5039_v32 = vld [vmem:[#allocation11 + $0x338] sm:$0xff] }
 0x4a7   :  { %8543 = vmatpush1.bf16.msra.mxu1 %v10349_v34  ;;  %8574 = vmatprep.mubr.bf16.mxu1 %v11896_v18  ;;  %v4971_v18 = vld [vmem:[#allocation11 + $0x118] sm:$0xff]  ;;  %v10420_v34 = vcombine.high %v5010_v39, %v5014_v41  ;;  %v5062_v39 = vld [vmem:[#allocation11 + $0x3f0] sm:$0xff] }
 0x4a8   :  { %8384 = vmatprep.subr.bf16.mxu0 %v10372_v35  ;;  %8544 = vmatprep.subr.bf16.mxu1 %v10358_v52  ;;  %v10382_v21 = vcombine.high %v4971_v18, %v4975_v11  ;;  %v10381_v42 = vcombine.low %v4971_v18, %v4975_v11  ;;  %v10406_v35 = vcombine.high %v4995_v46, %v4999_v49  ;;  %v5018_v52 = vld [vmem:[#allocation11 + $0x290] sm:$0xff]  ;;  %v5023_v18 = vld [vmem:[#allocation11 + $0x2b8] sm:$0xff] }
 0x4a9   :  { %v10427_v8 = vcombine.low %v5018_v52, %v5022_v53  ;;  %v5043_v41 = vld [vmem:[#allocation11 + $0x358] sm:$0xff] }
 0x4aa   :  { %8385 = vmatpush1.bf16.msra.mxu0 %v10371_v58  ;;  %v10405_v58 = vcombine.low %v4995_v46, %v4999_v49  ;;  %v5047_v46 = vld [vmem:[#allocation11 + $0x378] sm:$0xff] }
 0x4ab   :  { %8545 = vmatpush1.bf16.msra.mxu1 %v10357_v7  ;;  %8386 = vmatprep.subr.bf16.mxu0 %v10380_v62  ;;  %v10428_v7 = vcombine.high %v5018_v52, %v5022_v53  ;;  %v10414_v62 = vcombine.high %v5003_v54, %v5007_v6  ;;  %v5070_v52 = vld [vmem:[#allocation11 + $0x430] sm:$0xff]  ;;  %v5051_v53 = vld [vmem:[#allocation11 + $0x398] sm:$0xff] }
 0x4ac   :  { %8546 = vmatprep.subr.bf16.mxu1 %v10366_v44  ;;  %v5026_v44 = vld [vmem:[#allocation11 + $0x2d0] sm:$0xff] }
 0x4ad   :  { %v10435_v11 = vcombine.low %v5026_v44, %v5030_v63 }
 0x4ae   :  { %8387 = vmatpush1.bf16.msra.mxu0 %v10379_v2  ;;  %v10413_v2 = vcombine.low %v5003_v54, %v5007_v6  ;;  %v5055_v54 = vld [vmem:[#allocation11 + $0x3b8] sm:$0xff] }
 0x4af   :  { %8547 = vmatpush1.bf16.msra.mxu1 %v10365_v3  ;;  %8388 = vmatprep.subr.bf16.mxu0 %v10388_v4  ;;  %v10436_v3 = vcombine.high %v5026_v44, %v5030_v63  ;;  %v10422_v4 = vcombine.high %v5011_v0, %v5015_v1  ;;  %v5078_v44 = vld [vmem:[#allocation11 + $0x470] sm:$0xff]  ;;  %v5059_v63 = vld [vmem:[#allocation11 + $0x3d8] sm:$0xff] }
 0x4b0   :  { %8548 = vmatprep.subr.bf16.mxu1 %v10374_v5  ;;  %v5034_v5 = vld [vmem:[#allocation11 + $0x310] sm:$0xff] }
 0x4b1   :  { %v10443_v9 = vcombine.low %v5034_v5, %v5038_v61 }
 0x4b2   :  { %8389 = vmatpush1.bf16.msra.mxu0 %v10387_v14  ;;  %v10421_v14 = vcombine.low %v5011_v0, %v5015_v1  ;;  %v5063_v0 = vld [vmem:[#allocation11 + $0x3f8] sm:$0xff] }
 0x4b3   :  { %8549 = vmatpush1.bf16.msra.mxu1 %v10373_v17  ;;  %8390 = vmatprep.subr.bf16.mxu0 %v10396_v20  ;;  %v10444_v17 = vcombine.high %v5034_v5, %v5038_v61  ;;  %v10430_v20 = vcombine.high %v5019_v10, %v5023_v18  ;;  %v5086_v5 = vld [vmem:[#allocation11 + $0x4b0] sm:$0xff]  ;;  %v5067_v61 = vld [vmem:[#allocation11 + $0x418] sm:$0xff] }
 0x4b4   :  { %8550 = vmatprep.subr.bf16.mxu1 %v10382_v21  ;;  %v5042_v21 = vld [vmem:[#allocation11 + $0x350] sm:$0xff] }
 0x4b5   :  { %v10451_v56 = vcombine.low %v5042_v21, %v5046_v23 }
 0x4b6   :  { %8391 = vmatpush1.bf16.msra.mxu0 %v10395_v27  ;;  %v10429_v27 = vcombine.low %v5019_v10, %v5023_v18  ;;  %v5071_v10 = vld [vmem:[#allocation11 + $0x438] sm:$0xff] }
 0x4b7   :  { %8551 = vmatpush1.bf16.msra.mxu1 %v10381_v42  ;;  %8392 = vmatprep.subr.bf16.mxu0 %v10404_v47  ;;  %v10452_v42 = vcombine.high %v5042_v21, %v5046_v23  ;;  %v10438_v47 = vcombine.high %v5027_v24, %v5031_v25  ;;  %v5094_v21 = vld [vmem:[#allocation11 + $0x4f0] sm:$0xff]  ;;  %v5075_v23 = vld [vmem:[#allocation11 + $0x458] sm:$0xff] }
 0x4b8   :  { %8552 = vmatprep.subr.bf16.mxu1 %v10390_v28  ;;  %v5050_v28 = vld [vmem:[#allocation11 + $0x390] sm:$0xff] }
 0x4b9   :  { %v10459_v49 = vcombine.low %v5050_v28, %v5054_v12 }
 0x4ba   :  { %8393 = vmatpush1.bf16.msra.mxu0 %v10403_v36  ;;  %v10437_v36 = vcombine.low %v5027_v24, %v5031_v25  ;;  %v5079_v24 = vld [vmem:[#allocation11 + $0x478] sm:$0xff] }
 0x4bb   :  { %8553 = vmatpush1.bf16.msra.mxu1 %v10389_v37  ;;  %8394 = vmatprep.subr.bf16.mxu0 %v10412_v22  ;;  %v10460_v37 = vcombine.high %v5050_v28, %v5054_v12  ;;  %v10446_v22 = vcombine.high %v5035_v31, %v5039_v32  ;;  %v5102_v28 = vld [vmem:[#allocation11 + $0x530] sm:$0xff]  ;;  %v5083_v12 = vld [vmem:[#allocation11 + $0x498] sm:$0xff] }
 0x4bc   :  { %8554 = vmatprep.subr.bf16.mxu1 %v10398_v38  ;;  %v5058_v38 = vld [vmem:[#allocation11 + $0x3d0] sm:$0xff] }
 0x4bd   :  { %v10467_v6 = vcombine.low %v5058_v38, %v5062_v39 }
 0x4be   :  { %8395 = vmatpush1.bf16.msra.mxu0 %v10411_v50  ;;  %v10445_v50 = vcombine.low %v5035_v31, %v5039_v32  ;;  %v5087_v31 = vld [vmem:[#allocation11 + $0x4b8] sm:$0xff] }
 0x4bf   :  { %8555 = vmatpush1.bf16.msra.mxu1 %v10397_v51  ;;  %8396 = vmatprep.subr.bf16.mxu0 %v10420_v34  ;;  %v10468_v51 = vcombine.high %v5058_v38, %v5062_v39  ;;  %v10454_v34 = vcombine.high %v5043_v41, %v5047_v46  ;;  %v5110_v38 = vld [vmem:[#allocation11 + $0x570] sm:$0xff]  ;;  %v5091_v39 = vld [vmem:[#allocation11 + $0x4d8] sm:$0xff] }
 0x4c0   :  { %8556 = vmatprep.subr.bf16.mxu1 %v10406_v35  ;;  %v5066_v35 = vld [vmem:[#allocation11 + $0x410] sm:$0xff] }
 0x4c1   :  { %v10475_v1 = vcombine.low %v5066_v35, %v5070_v52 }
 0x4c2   :  { %8397 = vmatpush1.bf16.msra.mxu0 %v10419_v33  ;;  %v10453_v33 = vcombine.low %v5043_v41, %v5047_v46  ;;  %v5095_v41 = vld [vmem:[#allocation11 + $0x4f8] sm:$0xff] }
 0x4c3   :  { %8557 = vmatpush1.bf16.msra.mxu1 %v10405_v58  ;;  %8398 = vmatprep.subr.bf16.mxu0 %v10428_v7  ;;  %v10476_v58 = vcombine.high %v5066_v35, %v5070_v52  ;;  %v10462_v7 = vcombine.high %v5051_v53, %v5055_v54  ;;  %v5103_v35 = vld [vmem:[#allocation11 + $0x538] sm:$0xff] }
 0x4c4   :  { %8558 = vmatprep.subr.bf16.mxu1 %v10414_v62  ;;  %v5074_v62 = vld [vmem:[#allocation11 + $0x450] sm:$0xff] }
 0x4c5   :  { %v10483_v18 = vcombine.low %v5074_v62, %v5078_v44 }
 0x4c6   :  { %8399 = vmatpush1.bf16.msra.mxu0 %v10427_v8  ;;  %v10461_v8 = vcombine.low %v5051_v53, %v5055_v54  ;;  %v10501_v53 = vcombine.low %v5091_v39, %v5095_v41 }
 0x4c7   :  { %8559 = vmatpush1.bf16.msra.mxu1 %v10413_v2  ;;  %8400 = vmatprep.subr.bf16.mxu0 %v10436_v3  ;;  %v10484_v2 = vcombine.high %v5074_v62, %v5078_v44  ;;  %v10470_v3 = vcombine.high %v5059_v63, %v5063_v0  ;;  %v5111_v62 = vld [vmem:[#allocation11 + $0x578] sm:$0xff] }
 0x4c8   :  { %8560 = vmatprep.subr.bf16.mxu1 %v10422_v4  ;;  %v5082_v4 = vld [vmem:[#allocation11 + $0x490] sm:$0xff] }
 0x4c9   :  { %v10491_v25 = vcombine.low %v5082_v4, %v5086_v5 }
 0x4ca   :  { %8401 = vmatpush1.bf16.msra.mxu0 %v10435_v11  ;;  %v10469_v11 = vcombine.low %v5059_v63, %v5063_v0 }
 0x4cb   :  { %8561 = vmatpush1.bf16.msra.mxu1 %v10421_v14  ;;  %8402 = vmatprep.subr.bf16.mxu0 %v10444_v17  ;;  %v10492_v14 = vcombine.high %v5082_v4, %v5086_v5  ;;  %v10478_v17 = vcombine.high %v5067_v61, %v5071_v10  ;;  %v5119_v4 = vld [vmem:[#allocation11 + $0x5b8] sm:$0xff] }
 0x4cc   :  { %8562 = vmatprep.subr.bf16.mxu1 %v10430_v20  ;;  %v5090_v20 = vld [vmem:[#allocation11 + $0x4d0] sm:$0xff] }
 0x4cd   :  { %v10499_v32 = vcombine.low %v5090_v20, %v5094_v21 }
 0x4ce   :  { %8403 = vmatpush1.bf16.msra.mxu0 %v10443_v9  ;;  %v10477_v9 = vcombine.low %v5067_v61, %v5071_v10 }
 0x4cf   :  { %8563 = vmatpush1.bf16.msra.mxu1 %v10429_v27  ;;  %8404 = vmatprep.subr.bf16.mxu0 %v10452_v42  ;;  %v10500_v27 = vcombine.high %v5090_v20, %v5094_v21  ;;  %v10486_v42 = vcombine.high %v5075_v23, %v5079_v24  ;;  %v5127_v20 = vld [vmem:[#allocation11 + $0x5f8] sm:$0xff] }
 0x4d0   :  { %8564 = vmatprep.subr.bf16.mxu1 %v10438_v47  ;;  %v5098_v47 = vld [vmem:[#allocation11 + $0x510] sm:$0xff] }
 0x4d1   :  { %v10507_v46 = vcombine.low %v5098_v47, %v5102_v28 }
 0x4d2   :  { %8405 = vmatpush1.bf16.msra.mxu0 %v10451_v56  ;;  %v10485_v56 = vcombine.low %v5075_v23, %v5079_v24 }
 0x4d3   :  { %8565 = vmatpush1.bf16.msra.mxu1 %v10437_v36  ;;  %8406 = vmatprep.subr.bf16.mxu0 %v10460_v37  ;;  %v10508_v36 = vcombine.high %v5098_v47, %v5102_v28  ;;  %v10494_v37 = vcombine.high %v5083_v12, %v5087_v31  ;;  %v5135_v47 = vld [vmem:[#allocation11 + $0x638] sm:$0xff] }
 0x4d4   :  { %8566 = vmatprep.subr.bf16.mxu1 %v10446_v22  ;;  %v5106_v22 = vld [vmem:[#allocation11 + $0x550] sm:$0xff] }
 0x4d5   :  { %v10515_v52 = vcombine.low %v5106_v22, %v5110_v38 }
 0x4d6   :  { %8407 = vmatpush1.bf16.msra.mxu0 %v10459_v49  ;;  %v10493_v49 = vcombine.low %v5083_v12, %v5087_v31 }
 0x4d7   :  { %8567 = vmatpush1.bf16.msra.mxu1 %v10445_v50  ;;  %8408 = vmatprep.subr.bf16.mxu0 %v10468_v51  ;;  %v10516_v50 = vcombine.high %v5106_v22, %v5110_v38  ;;  %v5114_v51 = vld [vmem:[#allocation11 + $0x590] sm:$0xff]  ;;  %v5143_v22 = vld [vmem:[#allocation11 + $0x678] sm:$0xff] }
 0x4d8   :  { %8568 = vmatprep.subr.bf16.mxu1 %v10454_v34  ;;  %v5118_v34 = vld [vmem:[#allocation11 + $0x5b0] sm:$0xff] }
 0x4d9   :  { %v10524_v54 = vcombine.high %v5114_v51, %v5118_v34  ;;  %v10523_v44 = vcombine.low %v5114_v51, %v5118_v34  ;;  %v5151_v51 = vld [vmem:[#allocation11 + $0x6b8] sm:$0xff] }
 0x4da   :  { %8409 = vmatpush1.bf16.msra.mxu0 %v10467_v6 }
 0x4db   :  { %8569 = vmatpush1.bf16.msra.mxu1 %v10453_v33  ;;  %8419 = vmatprep.subr.bf16.mxu0 %v10476_v58  ;;  %v5122_v33 = vld [vmem:[#allocation11 + $0x5d0] sm:$0xff] }
 0x4dc   :  { %8570 = vmatprep.subr.bf16.mxu1 %v10462_v7  ;;  %v5126_v58 = vld [vmem:[#allocation11 + $0x5f0] sm:$0xff]  ;;  %v5107_v7 = vld [vmem:[#allocation11 + $0x558] sm:$0xff] }
 0x4dd   :  { %8411 = vmatmul.mubr.bf16.vlgmr.msra.gmra.mrb[12].mxu0 %v11904_v55  ;;  %v10532_v0 = vcombine.high %v5122_v33, %v5126_v58  ;;  %v10531_v5 = vcombine.low %v5122_v33, %v5126_v58  ;;  %v10517_v61 = vcombine.low %v5107_v7, %v5111_v62  ;;  %v5159_v33 = vld [vmem:[#allocation11 + $0x6f8] sm:$0xff] }
 0x4de   :  { %8420 = vmatpush1.bf16.msra.mxu0 %v10475_v1  ;;  %8451 = vmatprep.mubr.bf16.mxu0 %v11908_v59  ;;  %v10518_v1 = vcombine.high %v5107_v7, %v5111_v62 }
 0x4df   :  { %8571 = vmatpush1.bf16.msra.mxu1 %v10461_v8  ;;  %8421 = vmatprep.subr.bf16.mxu0 %v10484_v2  ;;  %v5130_v8 = vld [vmem:[#allocation11 + $0x610] sm:$0xff] }
 0x4e0   :  { %8572 = vmatprep.subr.bf16.mxu1 %v10470_v3  ;;  %v5134_v2 = vld [vmem:[#allocation11 + $0x630] sm:$0xff]  ;;  %v5115_v3 = vld [vmem:[#allocation11 + $0x598] sm:$0xff] }
 0x4e1   :  { %v10540_v10 = vcombine.high %v5130_v8, %v5134_v2  ;;  %v10539_v21 = vcombine.low %v5130_v8, %v5134_v2  ;;  %v10525_v23 = vcombine.low %v5115_v3, %v5119_v4  ;;  %v5167_v8 = vld [vmem:[#allocation11 + $0x738] sm:$0xff] }
 0x4e2   :  { %8422 = vmatpush1.bf16.msra.mxu0 %v10483_v18  ;;  %v10526_v18 = vcombine.high %v5115_v3, %v5119_v4 }
 0x4e3   :  { %8573 = vmatpush1.bf16.msra.mxu1 %v10469_v11  ;;  %8423 = vmatprep.subr.bf16.mxu0 %v10492_v14  ;;  %v5138_v11 = vld [vmem:[#allocation11 + $0x650] sm:$0xff] }
 0x4e4   :  { %8583 = vmatprep.subr.bf16.mxu1 %v10478_v17  ;;  %v5142_v14 = vld [vmem:[#allocation11 + $0x670] sm:$0xff]  ;;  %v5123_v17 = vld [vmem:[#allocation11 + $0x5d8] sm:$0xff] }
 0x4e5   :  { %v10548_v24 = vcombine.high %v5138_v11, %v5142_v14  ;;  %v10547_v28 = vcombine.low %v5138_v11, %v5142_v14  ;;  %v10533_v12 = vcombine.low %v5123_v17, %v5127_v20  ;;  %v5175_v11 = vld [vmem:[#allocation11 + $0x778] sm:$0xff] }
 0x4e6   :  { %8424 = vmatpush1.bf16.msra.mxu0 %v10491_v25  ;;  %8575 = vmatmul.mubr.bf16.vlgmr.msra.gmra.mrb[28].mxu1 %v11904_v55  ;;  %v10502_v55 = vcombine.high %v5091_v39, %v5095_v41  ;;  %v10534_v25 = vcombine.high %v5123_v17, %v5127_v20 }
 0x4e7   :  { %8584 = vmatpush1.bf16.msra.mxu1 %v10477_v9  ;;  %8615 = vmatprep.mubr.bf16.mxu1 %v11908_v59  ;;  %v5099_v59 = vld [vmem:[#allocation11 + $0x518] sm:$0xff]  ;;  %v5146_v9 = vld [vmem:[#allocation11 + $0x690] sm:$0xff] }
 0x4e8   :  { %8425 = vmatprep.subr.bf16.mxu0 %v10500_v27  ;;  %8585 = vmatprep.subr.bf16.mxu1 %v10486_v42  ;;  %v10510_v6 = vcombine.high %v5099_v59, %v5103_v35  ;;  %v10509_v63 = vcombine.low %v5099_v59, %v5103_v35  ;;  %v5150_v27 = vld [vmem:[#allocation11 + $0x6b0] sm:$0xff]  ;;  %v5131_v42 = vld [vmem:[#allocation11 + $0x618] sm:$0xff] }
 0x4e9   :  { %v10556_v31 = vcombine.high %v5146_v9, %v5150_v27  ;;  %v10555_v38 = vcombine.low %v5146_v9, %v5150_v27  ;;  %v10541_v39 = vcombine.low %v5131_v42, %v5135_v47  ;;  %v5183_v9 = vld [vmem:[#allocation11 + $0x7b8] sm:$0xff] }
 0x4ea   :  { %8426 = vmatpush1.bf16.msra.mxu0 %v10499_v32  ;;  %v10542_v32 = vcombine.high %v5131_v42, %v5135_v47 }
 0x4eb   :  { %8586 = vmatpush1.bf16.msra.mxu1 %v10485_v56  ;;  %8427 = vmatprep.subr.bf16.mxu0 %v10508_v36  ;;  %v5154_v56 = vld [vmem:[#allocation11 + $0x6d0] sm:$0xff] }
 0x4ec   :  { %8587 = vmatprep.subr.bf16.mxu1 %v10494_v37  ;;  %v5158_v36 = vld [vmem:[#allocation11 + $0x6f0] sm:$0xff]  ;;  %v5139_v37 = vld [vmem:[#allocation11 + $0x658] sm:$0xff] }
 0x4ed   :  { %v10564_v41 = vcombine.high %v5154_v56, %v5158_v36  ;;  %v10563_v34 = vcombine.low %v5154_v56, %v5158_v36  ;;  %v10549_v59 = vcombine.low %v5139_v37, %v5143_v22  ;;  %v5191_v56 = vld [vmem:[#allocation11 + $0x7f8] sm:$0xff] }
 0x4ee   :  { %8428 = vmatpush1.bf16.msra.mxu0 %v10507_v46  ;;  %v10550_v46 = vcombine.high %v5139_v37, %v5143_v22 }
 0x4ef   :  { %8588 = vmatpush1.bf16.msra.mxu1 %v10493_v49  ;;  %8429 = vmatprep.subr.bf16.mxu0 %v10516_v50  ;;  %v5162_v49 = vld [vmem:[#allocation11 + $0x710] sm:$0xff] }
 0x4f0   :  { %8589 = vmatprep.subr.bf16.mxu1 %v10502_v55  ;;  %v5166_v50 = vld [vmem:[#allocation11 + $0x730] sm:$0xff]  ;;  %v5147_v55 = vld [vmem:[#allocation11 + $0x698] sm:$0xff] }
 0x4f1   :  { %v10572_v35 = vcombine.high %v5162_v49, %v5166_v50  ;;  %v10571_v58 = vcombine.low %v5162_v49, %v5166_v50  ;;  %v10557_v7 = vcombine.low %v5147_v55, %v5151_v51  ;;  %v5199_v49 = vld [vmem:[#allocation11 + $0x838] sm:$0xff] }
 0x4f2   :  { %8430 = vmatpush1.bf16.msra.mxu0 %v10515_v52  ;;  %v10558_v52 = vcombine.high %v5147_v55, %v5151_v51 }
 0x4f3   :  { %8590 = vmatpush1.bf16.msra.mxu1 %v10501_v53  ;;  %8431 = vmatprep.subr.bf16.mxu0 %v10524_v54  ;;  %v5170_v53 = vld [vmem:[#allocation11 + $0x750] sm:$0xff] }
 0x4f4   :  { %8591 = vmatprep.subr.bf16.mxu1 %v10510_v6  ;;  %v5174_v54 = vld [vmem:[#allocation11 + $0x770] sm:$0xff]  ;;  %v5155_v6 = vld [vmem:[#allocation11 + $0x6d8] sm:$0xff] }
 0x4f5   :  { %v10580_v62 = vcombine.high %v5170_v53, %v5174_v54  ;;  %v10579_v2 = vcombine.low %v5170_v53, %v5174_v54  ;;  %v10565_v3 = vcombine.low %v5155_v6, %v5159_v33  ;;  %v5207_v53 = vld [vmem:[#allocation11 + $0x878] sm:$0xff] }
 0x4f6   :  { %8432 = vmatpush1.bf16.msra.mxu0 %v10523_v44  ;;  %v10566_v44 = vcombine.high %v5155_v6, %v5159_v33 }
 0x4f7   :  { %8592 = vmatpush1.bf16.msra.mxu1 %v10509_v63  ;;  %8433 = vmatprep.subr.bf16.mxu0 %v10532_v0  ;;  %v5178_v63 = vld [vmem:[#allocation11 + $0x790] sm:$0xff] }
 0x4f8   :  { %8593 = vmatprep.subr.bf16.mxu1 %v10518_v1  ;;  %v5182_v0 = vld [vmem:[#allocation11 + $0x7b0] sm:$0xff]  ;;  %v5163_v1 = vld [vmem:[#allocation11 + $0x718] sm:$0xff] }
 0x4f9   :  { %v10588_v4 = vcombine.high %v5178_v63, %v5182_v0  ;;  %v10587_v14 = vcombine.low %v5178_v63, %v5182_v0  ;;  %v10573_v17 = vcombine.low %v5163_v1, %v5167_v8  ;;  %v5215_v63 = vld [vmem:[#allocation11 + $0x8b8] sm:$0xff] }
 0x4fa   :  { %8434 = vmatpush1.bf16.msra.mxu0 %v10531_v5  ;;  %v10574_v5 = vcombine.high %v5163_v1, %v5167_v8 }
 0x4fb   :  { %8594 = vmatpush1.bf16.msra.mxu1 %v10517_v61  ;;  %8435 = vmatprep.subr.bf16.mxu0 %v10540_v10  ;;  %v5186_v61 = vld [vmem:[#allocation11 + $0x7d0] sm:$0xff] }
 0x4fc   :  { %8595 = vmatprep.subr.bf16.mxu1 %v10526_v18  ;;  %v5190_v10 = vld [vmem:[#allocation11 + $0x7f0] sm:$0xff]  ;;  %v5171_v18 = vld [vmem:[#allocation11 + $0x758] sm:$0xff] }
 0x4fd   :  { %v10596_v20 = vcombine.high %v5186_v61, %v5190_v10  ;;  %v10595_v27 = vcombine.low %v5186_v61, %v5190_v10  ;;  %v10581_v42 = vcombine.low %v5171_v18, %v5175_v11  ;;  %v5223_v61 = vld [vmem:[#allocation11 + $0x8f8] sm:$0xff] }
 0x4fe   :  { %8436 = vmatpush1.bf16.msra.mxu0 %v10539_v21  ;;  %v10582_v21 = vcombine.high %v5171_v18, %v5175_v11 }
 0x4ff   :  { %8596 = vmatpush1.bf16.msra.mxu1 %v10525_v23  ;;  %8437 = vmatprep.subr.bf16.mxu0 %v10548_v24  ;;  %v5194_v23 = vld [vmem:[#allocation11 + $0x810] sm:$0xff] }
 0x500   :  { %8597 = vmatprep.subr.bf16.mxu1 %v10534_v25  ;;  %v5198_v24 = vld [vmem:[#allocation11 + $0x830] sm:$0xff]  ;;  %v5179_v25 = vld [vmem:[#allocation11 + $0x798] sm:$0xff] }
 0x501   :  { %v10604_v47 = vcombine.high %v5194_v23, %v5198_v24  ;;  %v10603_v36 = vcombine.low %v5194_v23, %v5198_v24  ;;  %v10589_v37 = vcombine.low %v5179_v25, %v5183_v9 }
 0x502   :  { %8438 = vmatpush1.bf16.msra.mxu0 %v10547_v28  ;;  %v10590_v28 = vcombine.high %v5179_v25, %v5183_v9  ;;  %v5250_v9 = vld [vmem:[#allocation11 + $0x9d0] sm:$0xff] }
 0x503   :  { %8598 = vmatpush1.bf16.msra.mxu1 %v10533_v12  ;;  %8439 = vmatprep.subr.bf16.mxu0 %v10556_v31  ;;  %v5202_v12 = vld [vmem:[#allocation11 + $0x850] sm:$0xff] }
 0x504   :  { %8599 = vmatprep.subr.bf16.mxu1 %v10542_v32  ;;  %v5206_v31 = vld [vmem:[#allocation11 + $0x870] sm:$0xff]  ;;  %v5187_v32 = vld [vmem:[#allocation11 + $0x7d8] sm:$0xff] }
 0x505   :  { %v10612_v22 = vcombine.high %v5202_v12, %v5206_v31  ;;  %v10611_v50 = vcombine.low %v5202_v12, %v5206_v31  ;;  %v10597_v55 = vcombine.low %v5187_v32, %v5191_v56 }
 0x506   :  { %8440 = vmatpush1.bf16.msra.mxu0 %v10555_v38  ;;  %v10598_v38 = vcombine.high %v5187_v32, %v5191_v56  ;;  %v5258_v56 = vld [vmem:[#allocation11 + $0xa10] sm:$0xff] }
 0x507   :  { %8600 = vmatpush1.bf16.msra.mxu1 %v10541_v39  ;;  %8441 = vmatprep.subr.bf16.mxu0 %v10564_v41  ;;  %v5210_v39 = vld [vmem:[#allocation11 + $0x890] sm:$0xff] }
 0x508   :  { %8601 = vmatprep.subr.bf16.mxu1 %v10550_v46  ;;  %v5214_v41 = vld [vmem:[#allocation11 + $0x8b0] sm:$0xff]  ;;  %v5195_v46 = vld [vmem:[#allocation11 + $0x818] sm:$0xff] }
 0x509   :  { %v10620_v51 = vcombine.high %v5210_v39, %v5214_v41  ;;  %v10619_v54 = vcombine.low %v5210_v39, %v5214_v41  ;;  %v10605_v6 = vcombine.low %v5195_v46, %v5199_v49 }
 0x50a   :  { %8442 = vmatpush1.bf16.msra.mxu0 %v10563_v34  ;;  %v10606_v34 = vcombine.high %v5195_v46, %v5199_v49  ;;  %v5266_v49 = vld [vmem:[#allocation11 + $0xa50] sm:$0xff] }
 0x50b   :  { %8602 = vmatpush1.bf16.msra.mxu1 %v10549_v59  ;;  %8443 = vmatprep.subr.bf16.mxu0 %v10572_v35  ;;  %v5218_v59 = vld [vmem:[#allocation11 + $0x8d0] sm:$0xff] }
 0x50c   :  { %8603 = vmatprep.subr.bf16.mxu1 %v10558_v52  ;;  %v5222_v35 = vld [vmem:[#allocation11 + $0x8f0] sm:$0xff]  ;;  %v5203_v52 = vld [vmem:[#allocation11 + $0x858] sm:$0xff] }
 0x50d   :  { %v10628_v33 = vcombine.high %v5218_v59, %v5222_v35  ;;  %v10627_v0 = vcombine.low %v5218_v59, %v5222_v35  ;;  %v10613_v1 = vcombine.low %v5203_v52, %v5207_v53 }
 0x50e   :  { %8444 = vmatpush1.bf16.msra.mxu0 %v10571_v58  ;;  %v10614_v58 = vcombine.high %v5203_v52, %v5207_v53  ;;  %v5274_v53 = vld [vmem:[#allocation11 + $0xa90] sm:$0xff] }
 0x50f   :  { %8604 = vmatpush1.bf16.msra.mxu1 %v10557_v7  ;;  %8445 = vmatprep.subr.bf16.mxu0 %v10580_v62  ;;  %v5226_v7 = vld [vmem:[#allocation11 + $0x910] sm:$0xff] }
 0x510   :  { %8605 = vmatprep.subr.bf16.mxu1 %v10566_v44  ;;  %v5230_v62 = vld [vmem:[#allocation11 + $0x930] sm:$0xff]  ;;  %v5211_v44 = vld [vmem:[#allocation11 + $0x898] sm:$0xff] }
 0x511   :  { %v10636_v8 = vcombine.high %v5226_v7, %v5230_v62  ;;  %v10635_v10 = vcombine.low %v5226_v7, %v5230_v62  ;;  %v10621_v18 = vcombine.low %v5211_v44, %v5215_v63 }
 0x512   :  { %8446 = vmatpush1.bf16.msra.mxu0 %v10579_v2  ;;  %v10622_v2 = vcombine.high %v5211_v44, %v5215_v63  ;;  %v5282_v63 = vld [vmem:[#allocation11 + $0xad0] sm:$0xff] }
 0x513   :  { %8606 = vmatpush1.bf16.msra.mxu1 %v10565_v3  ;;  %8447 = vmatprep.subr.bf16.mxu0 %v10588_v4  ;;  %v5234_v3 = vld [vmem:[#allocation11 + $0x950] sm:$0xff] }
 0x514   :  { %8607 = vmatprep.subr.bf16.mxu1 %v10574_v5  ;;  %v5238_v4 = vld [vmem:[#allocation11 + $0x970] sm:$0xff]  ;;  %v5219_v5 = vld [vmem:[#allocation11 + $0x8d8] sm:$0xff] }
 0x515   :  { %v10644_v11 = vcombine.high %v5234_v3, %v5238_v4  ;;  %v10629_v23 = vcombine.low %v5219_v5, %v5223_v61 }
 0x516   :  { %8448 = vmatpush1.bf16.msra.mxu0 %v10587_v14  ;;  %v5242_v14 = vld [vmem:[#allocation11 + $0x990] sm:$0xff] }
 0x517   :  { %8608 = vmatpush1.bf16.msra.mxu1 %v10573_v17  ;;  %8449 = vmatprep.subr.bf16.mxu0 %v10596_v20  ;;  %v5246_v17 = vld [vmem:[#allocation11 + $0x9b0] sm:$0xff]  ;;  %v5231_v20 = vld [vmem:[#allocation11 + $0x938] sm:$0xff] }
 0x518   :  { %8609 = vmatprep.subr.bf16.mxu1 %v10582_v21  ;;  %v10643_v21 = vcombine.low %v5234_v3, %v5238_v4  ;;  %v10652_v24 = vcombine.high %v5242_v14, %v5246_v17 }
 0x51a   :  { %8450 = vmatpush1.bf16.msra.mxu0 %v10595_v27  ;;  %v5254_v27 = vld [vmem:[#allocation11 + $0x9f0] sm:$0xff] }
 0x51b   :  { %8610 = vmatpush1.bf16.msra.mxu1 %v10581_v42  ;;  %8460 = vmatprep.subr.bf16.mxu0 %v10604_v47  ;;  %v5235_v42 = vld [vmem:[#allocation11 + $0x958] sm:$0xff]  ;;  %v10660_v31 = vcombine.high %v5250_v9, %v5254_v27 }
 0x51c   :  { %8611 = vmatprep.subr.bf16.mxu1 %v10590_v28  ;;  %v5239_v47 = vld [vmem:[#allocation11 + $0x978] sm:$0xff]  ;;  %v10651_v28 = vcombine.low %v5242_v14, %v5246_v17 }
 0x51d   :  { %8452 = vmatmul.mubr.bf16.vlgmr.msra.gmra.mrb[12].mxu0 %v11916_v26  ;;  %v10646_v32 = vcombine.high %v5235_v42, %v5239_v47  ;;  %v10645_v39 = vcombine.low %v5235_v42, %v5239_v47  ;;  %v5306_v47 = vld [vmem:[#allocation11 + $0xb90] sm:$0xff] }
 0x51e   :  { %8461 = vmatpush1.bf16.msra.mxu0 %v10603_v36  ;;  %8492 = vmatprep.mubr.bf16.mxu0 %v11932_v19  ;;  %v5262_v36 = vld [vmem:[#allocation11 + $0xa30] sm:$0xff] }
 0x51f   :  { %8612 = vmatpush1.bf16.msra.mxu1 %v10589_v37  ;;  %8462 = vmatprep.subr.bf16.mxu0 %v10612_v22  ;;  %v5243_v37 = vld [vmem:[#allocation11 + $0x998] sm:$0xff]  ;;  %v10668_v41 = vcombine.high %v5258_v56, %v5262_v36 }
 0x520   :  { %8613 = vmatprep.subr.bf16.mxu1 %v10598_v38  ;;  %v5247_v22 = vld [vmem:[#allocation11 + $0x9b8] sm:$0xff]  ;;  %v10659_v38 = vcombine.low %v5250_v9, %v5254_v27 }
 0x521   :  { %v10654_v46 = vcombine.high %v5243_v37, %v5247_v22  ;;  %v10653_v59 = vcombine.low %v5243_v37, %v5247_v22  ;;  %v5314_v22 = vld [vmem:[#allocation11 + $0xbd0] sm:$0xff] }
 0x522   :  { %8463 = vmatpush1.bf16.msra.mxu0 %v10611_v50  ;;  %v5270_v50 = vld [vmem:[#allocation11 + $0xa70] sm:$0xff] }
 0x523   :  { %8614 = vmatpush1.bf16.msra.mxu1 %v10597_v55  ;;  %8464 = vmatprep.subr.bf16.mxu0 %v10620_v51  ;;  %v5251_v55 = vld [vmem:[#allocation11 + $0x9d8] sm:$0xff]  ;;  %v10676_v35 = vcombine.high %v5266_v49, %v5270_v50 }
 0x524   :  { %8624 = vmatprep.subr.bf16.mxu1 %v10606_v34  ;;  %v5255_v51 = vld [vmem:[#allocation11 + $0x9f8] sm:$0xff]  ;;  %v10667_v34 = vcombine.low %v5258_v56, %v5262_v36 }
 0x525   :  { %v10662_v52 = vcombine.high %v5251_v55, %v5255_v51  ;;  %v10661_v7 = vcombine.low %v5251_v55, %v5255_v51  ;;  %v5322_v51 = vld [vmem:[#allocation11 + $0xc10] sm:$0xff] }
 0x526   :  { %8465 = vmatpush1.bf16.msra.mxu0 %v10619_v54  ;;  %8616 = vmatmul.mubr.bf16.vlgmr.msra.gmra.mrb[28].mxu1 %v11916_v26  ;;  %v10630_v26 = vcombine.high %v5219_v5, %v5223_v61  ;;  %v5278_v54 = vld [vmem:[#allocation11 + $0xab0] sm:$0xff] }
 0x527   :  { %8625 = vmatpush1.bf16.msra.mxu1 %v10605_v6  ;;  %8656 = vmatprep.mubr.bf16.mxu1 %v11932_v19  ;;  %v5227_v19 = vld [vmem:[#allocation11 + $0x918] sm:$0xff]  ;;  %v10684_v62 = vcombine.high %v5274_v53, %v5278_v54  ;;  %v5290_v61 = vld [vmem:[#allocation11 + $0xb10] sm:$0xff] }
 0x528   :  { %8466 = vmatprep.subr.bf16.mxu0 %v10628_v33  ;;  %8626 = vmatprep.subr.bf16.mxu1 %v10614_v58  ;;  %v10638_v25 = vcombine.high %v5227_v19, %v5231_v20  ;;  %v10637_v12 = vcombine.low %v5227_v19, %v5231_v20  ;;  %v5259_v6 = vld [vmem:[#allocation11 + $0xa18] sm:$0xff]  ;;  %v10675_v58 = vcombine.low %v5266_v49, %v5270_v50  ;;  %v5298_v20 = vld [vmem:[#allocation11 + $0xb50] sm:$0xff] }
 0x529   :  { %v5263_v33 = vld [vmem:[#allocation11 + $0xa38] sm:$0xff] }
 0x52a   :  { %8467 = vmatpush1.bf16.msra.mxu0 %v10627_v0  ;;  %v10670_v44 = vcombine.high %v5259_v6, %v5263_v33  ;;  %v5286_v0 = vld [vmem:[#allocation11 + $0xaf0] sm:$0xff]  ;;  %v10669_v3 = vcombine.low %v5259_v6, %v5263_v33 }
 0x52b   :  { %8627 = vmatpush1.bf16.msra.mxu1 %v10613_v1  ;;  %8468 = vmatprep.subr.bf16.mxu0 %v10636_v8  ;;  %v5267_v1 = vld [vmem:[#allocation11 + $0xa58] sm:$0xff]  ;;  %v10692_v4 = vcombine.high %v5282_v63, %v5286_v0  ;;  %v5330_v33 = vld [vmem:[#allocation11 + $0xc50] sm:$0xff] }
 0x52c   :  { %8628 = vmatprep.subr.bf16.mxu1 %v10622_v2  ;;  %v5271_v8 = vld [vmem:[#allocation11 + $0xa78] sm:$0xff]  ;;  %v10683_v2 = vcombine.low %v5274_v53, %v5278_v54 }
 0x52d   :  { %v10678_v5 = vcombine.high %v5267_v1, %v5271_v8  ;;  %v10677_v14 = vcombine.low %v5267_v1, %v5271_v8  ;;  %v5338_v8 = vld [vmem:[#allocation11 + $0xc90] sm:$0xff] }
 0x52e   :  { %8469 = vmatpush1.bf16.msra.mxu0 %v10635_v10  ;;  %v5294_v10 = vld [vmem:[#allocation11 + $0xb30] sm:$0xff] }
 0x52f   :  { %8629 = vmatpush1.bf16.msra.mxu1 %v10621_v18  ;;  %8470 = vmatprep.subr.bf16.mxu0 %v10644_v11  ;;  %v5275_v18 = vld [vmem:[#allocation11 + $0xa98] sm:$0xff]  ;;  %v10700_v17 = vcombine.high %v5290_v61, %v5294_v10 }
 0x530   :  { %8630 = vmatprep.subr.bf16.mxu1 %v10630_v26  ;;  %v5279_v11 = vld [vmem:[#allocation11 + $0xab8] sm:$0xff]  ;;  %v10691_v26 = vcombine.low %v5282_v63, %v5286_v0 }
 0x531   :  { %v10686_v19 = vcombine.high %v5275_v18, %v5279_v11  ;;  %v10685_v9 = vcombine.low %v5275_v18, %v5279_v11  ;;  %v5346_v11 = vld [vmem:[#allocation11 + $0xcd0] sm:$0xff] }
 0x532   :  { %8471 = vmatpush1.bf16.msra.mxu0 %v10643_v21  ;;  %v5302_v21 = vld [vmem:[#allocation11 + $0xb70] sm:$0xff] }
 0x533   :  { %8631 = vmatpush1.bf16.msra.mxu1 %v10629_v23  ;;  %8472 = vmatprep.subr.bf16.mxu0 %v10652_v24  ;;  %v5283_v23 = vld [vmem:[#allocation11 + $0xad8] sm:$0xff]  ;;  %v10708_v27 = vcombine.high %v5298_v20, %v5302_v21 }
 0x534   :  { %8632 = vmatprep.subr.bf16.mxu1 %v10638_v25  ;;  %v5287_v24 = vld [vmem:[#allocation11 + $0xaf8] sm:$0xff]  ;;  %v10699_v25 = vcombine.low %v5290_v61, %v5294_v10 }
 0x535   :  { %v10694_v42 = vcombine.high %v5283_v23, %v5287_v24  ;;  %v10693_v56 = vcombine.low %v5283_v23, %v5287_v24  ;;  %v5354_v24 = vld [vmem:[#allocation11 + $0xd10] sm:$0xff] }
 0x536   :  { %8473 = vmatpush1.bf16.msra.mxu0 %v10651_v28  ;;  %v5310_v28 = vld [vmem:[#allocation11 + $0xbb0] sm:$0xff] }
 0x537   :  { %8633 = vmatpush1.bf16.msra.mxu1 %v10637_v12  ;;  %8474 = vmatprep.subr.bf16.mxu0 %v10660_v31  ;;  %v5291_v12 = vld [vmem:[#allocation11 + $0xb18] sm:$0xff]  ;;  %v10716_v36 = vcombine.high %v5306_v47, %v5310_v28 }
 0x538   :  { %8634 = vmatprep.subr.bf16.mxu1 %v10646_v32  ;;  %v5295_v31 = vld [vmem:[#allocation11 + $0xb38] sm:$0xff]  ;;  %v10707_v32 = vcombine.low %v5298_v20, %v5302_v21 }
 0x539   :  { %v10702_v37 = vcombine.high %v5291_v12, %v5295_v31  ;;  %v10701_v49 = vcombine.low %v5291_v12, %v5295_v31  ;;  %v5362_v31 = vld [vmem:[#allocation11 + $0xd50] sm:$0xff] }
 0x53a   :  { %8475 = vmatpush1.bf16.msra.mxu0 %v10659_v38  ;;  %v5318_v38 = vld [vmem:[#allocation11 + $0xbf0] sm:$0xff] }
 0x53b   :  { %8635 = vmatpush1.bf16.msra.mxu1 %v10645_v39  ;;  %8476 = vmatprep.subr.bf16.mxu0 %v10668_v41  ;;  %v5299_v39 = vld [vmem:[#allocation11 + $0xb58] sm:$0xff]  ;;  %v10724_v50 = vcombine.high %v5314_v22, %v5318_v38 }
 0x53c   :  { %8636 = vmatprep.subr.bf16.mxu1 %v10654_v46  ;;  %v5303_v41 = vld [vmem:[#allocation11 + $0xb78] sm:$0xff]  ;;  %v10715_v46 = vcombine.low %v5306_v47, %v5310_v28 }
 0x53d   :  { %v10710_v55 = vcombine.high %v5299_v39, %v5303_v41  ;;  %v10709_v53 = vcombine.low %v5299_v39, %v5303_v41  ;;  %v5370_v39 = vld [vmem:[#allocation11 + $0xd90] sm:$0xff] }
 0x53e   :  { %8477 = vmatpush1.bf16.msra.mxu0 %v10667_v34  ;;  %v5326_v34 = vld [vmem:[#allocation11 + $0xc30] sm:$0xff] }
 0x53f   :  { %8637 = vmatpush1.bf16.msra.mxu1 %v10653_v59  ;;  %8478 = vmatprep.subr.bf16.mxu0 %v10676_v35  ;;  %v5307_v59 = vld [vmem:[#allocation11 + $0xb98] sm:$0xff]  ;;  %v10732_v54 = vcombine.high %v5322_v51, %v5326_v34  ;;  %v5374_v41 = vld [vmem:[#allocation11 + $0xdb0] sm:$0xff] }
 0x540   :  { %8638 = vmatprep.subr.bf16.mxu1 %v10662_v52  ;;  %v5311_v35 = vld [vmem:[#allocation11 + $0xbb8] sm:$0xff]  ;;  %v10723_v52 = vcombine.low %v5314_v22, %v5318_v38 }
 0x541   :  { %v10718_v6 = vcombine.high %v5307_v59, %v5311_v35  ;;  %v10717_v63 = vcombine.low %v5307_v59, %v5311_v35  ;;  %v5378_v59 = vld [vmem:[#allocation11 + $0xdd0] sm:$0xff] }
 0x542   :  { %8479 = vmatpush1.bf16.msra.mxu0 %v10675_v58  ;;  %v5334_v58 = vld [vmem:[#allocation11 + $0xc70] sm:$0xff] }
 0x543   :  { %8639 = vmatpush1.bf16.msra.mxu1 %v10661_v7  ;;  %8480 = vmatprep.subr.bf16.mxu0 %v10684_v62  ;;  %v5315_v7 = vld [vmem:[#allocation11 + $0xbd8] sm:$0xff]  ;;  %v10740_v0 = vcombine.high %v5330_v33, %v5334_v58  ;;  %v5382_v35 = vld [vmem:[#allocation11 + $0xdf0] sm:$0xff] }
 0x544   :  { %8640 = vmatprep.subr.bf16.mxu1 %v10670_v44  ;;  %v5319_v62 = vld [vmem:[#allocation11 + $0xbf8] sm:$0xff]  ;;  %v10731_v44 = vcombine.low %v5322_v51, %v5326_v34 }
 0x545   :  { %v10726_v1 = vcombine.high %v5315_v7, %v5319_v62  ;;  %v10725_v61 = vcombine.low %v5315_v7, %v5319_v62  ;;  %v10788_v62 = vcombine.high %v5378_v59, %v5382_v35 }
 0x546   :  { %8481 = vmatpush1.bf16.msra.mxu0 %v10683_v2  ;;  %v5342_v2 = vld [vmem:[#allocation11 + $0xcb0] sm:$0xff] }
 0x547   :  { %8641 = vmatpush1.bf16.msra.mxu1 %v10669_v3  ;;  %8482 = vmatprep.subr.bf16.mxu0 %v10692_v4  ;;  %v5323_v3 = vld [vmem:[#allocation11 + $0xc18] sm:$0xff]  ;;  %v10748_v10 = vcombine.high %v5338_v8, %v5342_v2 }
 0x548   :  { %8642 = vmatprep.subr.bf16.mxu1 %v10678_v5  ;;  %v5327_v4 = vld [vmem:[#allocation11 + $0xc38] sm:$0xff]  ;;  %v10739_v5 = vcombine.low %v5330_v33, %v5334_v58  ;;  %v10779_v33 = vcombine.low %v5370_v39, %v5374_v41 }
 0x549   :  { %v10734_v18 = vcombine.high %v5323_v3, %v5327_v4  ;;  %v10733_v20 = vcombine.low %v5323_v3, %v5327_v4 }
 0x54a   :  { %8483 = vmatpush1.bf16.msra.mxu0 %v10691_v26  ;;  %v5350_v26 = vld [vmem:[#allocation11 + $0xcf0] sm:$0xff] }
 0x54b   :  { %8643 = vmatpush1.bf16.msra.mxu1 %v10677_v14  ;;  %8484 = vmatprep.subr.bf16.mxu0 %v10700_v17  ;;  %v5331_v14 = vld [vmem:[#allocation11 + $0xc58] sm:$0xff]  ;;  %v10756_v21 = vcombine.high %v5346_v11, %v5350_v26 }
 0x54c   :  { %8644 = vmatprep.subr.bf16.mxu1 %v10686_v19  ;;  %v5335_v17 = vld [vmem:[#allocation11 + $0xc78] sm:$0xff]  ;;  %v10747_v19 = vcombine.low %v5338_v8, %v5342_v2  ;;  %v10787_v2 = vcombine.low %v5378_v59, %v5382_v35  ;;  %v5426_v35 = vld [vmem:[#allocation11 + $0xf50] sm:$0xff] }
 0x54d   :  { %v10742_v23 = vcombine.high %v5331_v14, %v5335_v17  ;;  %v10741_v47 = vcombine.low %v5331_v14, %v5335_v17  ;;  %v5375_v8 = vld [vmem:[#allocation11 + $0xdb8] sm:$0xff] }
 0x54e   :  { %8485 = vmatpush1.bf16.msra.mxu0 %v10699_v25  ;;  %v5358_v25 = vld [vmem:[#allocation11 + $0xd30] sm:$0xff] }
 0x54f   :  { %8645 = vmatpush1.bf16.msra.mxu1 %v10685_v9  ;;  %8486 = vmatprep.subr.bf16.mxu0 %v10708_v27  ;;  %v5339_v9 = vld [vmem:[#allocation11 + $0xc98] sm:$0xff]  ;;  %v10764_v28 = vcombine.high %v5354_v24, %v5358_v25 }
 0x550   :  { %8646 = vmatprep.subr.bf16.mxu1 %v10694_v42  ;;  %v5343_v27 = vld [vmem:[#allocation11 + $0xcb8] sm:$0xff]  ;;  %v10755_v42 = vcombine.low %v5346_v11, %v5350_v26 }
 0x551   :  { %v10750_v12 = vcombine.high %v5339_v9, %v5343_v27  ;;  %v10749_v22 = vcombine.low %v5339_v9, %v5343_v27  ;;  %v5379_v11 = vld [vmem:[#allocation11 + $0xdd8] sm:$0xff]  ;;  %v5406_v9 = vld [vmem:[#allocation11 + $0xeb0] sm:$0xff] }
 0x552   :  { %8487 = vmatpush1.bf16.msra.mxu0 %v10707_v32  ;;  %v5366_v32 = vld [vmem:[#allocation11 + $0xd70] sm:$0xff]  ;;  %v5383_v26 = vld [vmem:[#allocation11 + $0xdf8] sm:$0xff] }
 0x553   :  { %8647 = vmatpush1.bf16.msra.mxu1 %v10693_v56  ;;  %8488 = vmatprep.subr.bf16.mxu0 %v10716_v36  ;;  %v5347_v56 = vld [vmem:[#allocation11 + $0xcd8] sm:$0xff]  ;;  %v10772_v38 = vcombine.high %v5362_v31, %v5366_v32 }
 0x554   :  { %8648 = vmatprep.subr.bf16.mxu1 %v10702_v37  ;;  %v5351_v36 = vld [vmem:[#allocation11 + $0xcf8] sm:$0xff]  ;;  %v10763_v37 = vcombine.low %v5354_v24, %v5358_v25  ;;  %v10790_v24 = vcombine.high %v5379_v11, %v5383_v26  ;;  %v5402_v25 = vld [vmem:[#allocation11 + $0xe90] sm:$0xff] }
 0x555   :  { %v5387_v27 = vld [vmem:[#allocation11 + $0xe18] sm:$0xff] }
 0x556   :  { %8489 = vmatpush1.bf16.msra.mxu0 %v10715_v46  ;;  %v5359_v46 = vld [vmem:[#allocation11 + $0xd38] sm:$0xff] }
 0x557   :  { %8649 = vmatpush1.bf16.msra.mxu1 %v10701_v49  ;;  %8490 = vmatprep.subr.bf16.mxu0 %v10724_v50  ;;  %v10771_v49 = vcombine.low %v5362_v31, %v5366_v32  ;;  %v10757_v50 = vcombine.low %v5347_v56, %v5351_v36  ;;  %v5410_v32 = vld [vmem:[#allocation11 + $0xed0] sm:$0xff] }
 0x558   :  { %8650 = vmatprep.subr.bf16.mxu1 %v10710_v55  ;;  %v10780_v55 = vcombine.high %v5370_v39, %v5374_v41  ;;  %v5418_v41 = vld [vmem:[#allocation11 + $0xf10] sm:$0xff] }
 0x55a   :  { %8491 = vmatpush1.bf16.msra.mxu0 %v10723_v52 }
 0x55b   :  { %8651 = vmatpush1.bf16.msra.mxu1 %v10709_v53  ;;  %8501 = vmatprep.subr.bf16.mxu0 %v10732_v54  ;;  %v5363_v53 = vld [vmem:[#allocation11 + $0xd58] sm:$0xff] }
 0x55c   :  { %8652 = vmatprep.subr.bf16.mxu1 %v10718_v6  ;;  %v5367_v54 = vld [vmem:[#allocation11 + $0xd78] sm:$0xff] }
 0x55d   :  { %8493 = vmatmul.mubr.bf16.vlgmr.msra.gmra.mrb[12].mxu0 %v11936_v48  ;;  %v10773_v3 = vcombine.low %v5363_v53, %v5367_v54 }
 0x55e   :  { %8502 = vmatpush1.bf16.msra.mxu0 %v10731_v44  ;;  %8533 = vmatprep.mubr.bf16.mxu0 %v11949_v15  ;;  %v10774_v44 = vcombine.high %v5363_v53, %v5367_v54  ;;  %v5430_v53 = vld [vmem:[#allocation11 + $0xf70] sm:$0xff]  ;;  %v5411_v54 = vld [vmem:[#allocation11 + $0xed8] sm:$0xff] }
 0x55f   :  { %8653 = vmatpush1.bf16.msra.mxu1 %v10717_v63  ;;  %8503 = vmatprep.subr.bf16.mxu0 %v10740_v0  ;;  %v5386_v63 = vld [vmem:[#allocation11 + $0xe10] sm:$0xff] }
 0x560   :  { %8654 = vmatprep.subr.bf16.mxu1 %v10726_v1  ;;  %v5390_v0 = vld [vmem:[#allocation11 + $0xe30] sm:$0xff]  ;;  %v5371_v1 = vld [vmem:[#allocation11 + $0xd98] sm:$0xff] }
 0x561   :  { %v10796_v4 = vcombine.high %v5386_v63, %v5390_v0  ;;  %v10795_v17 = vcombine.low %v5386_v63, %v5390_v0  ;;  %v5438_v63 = vld [vmem:[#allocation11 + $0xfb0] sm:$0xff]  ;;  %v11981_v0 = vld [vmem:[#allocation13] sm:$0xff] }
 0x562   :  { %8504 = vmatpush1.bf16.msra.mxu0 %v10739_v5  ;;  %v10782_v5 = vcombine.high %v5371_v1, %v5375_v8 }
 0x563   :  { %8655 = vmatpush1.bf16.msra.mxu1 %v10725_v61  ;;  %8505 = vmatprep.subr.bf16.mxu0 %v10748_v10  ;;  %v5394_v61 = vld [vmem:[#allocation11 + $0xe50] sm:$0xff] }
 0x564   :  { %8665 = vmatprep.subr.bf16.mxu1 %v10734_v18  ;;  %v5398_v10 = vld [vmem:[#allocation11 + $0xe70] sm:$0xff] }
 0x566   :  { %8506 = vmatpush1.bf16.msra.mxu0 %v10747_v19  ;;  %8657 = vmatmul.mubr.bf16.vlgmr.msra.gmra.mrb[28].mxu1 %v11936_v48  ;;  %v10758_v48 = vcombine.high %v5347_v56, %v5351_v36  ;;  %v5414_v56 = vld [vmem:[#allocation11 + $0xef0] sm:$0xff]  ;;  %v5395_v36 = vld [vmem:[#allocation11 + $0xe58] sm:$0xff] }
 0x567   :  { %8666 = vmatpush1.bf16.msra.mxu1 %v10733_v20  ;;  %8697 = vmatprep.mubr.bf16.mxu1 %v11949_v15  ;;  %v5355_v15 = vld [vmem:[#allocation11 + $0xd18] sm:$0xff]  ;;  %v10781_v20 = vcombine.low %v5371_v1, %v5375_v8 }
 0x568   :  { %8507 = vmatprep.subr.bf16.mxu0 %v10756_v21  ;;  %8667 = vmatprep.subr.bf16.mxu1 %v10742_v23  ;;  %v10766_v34 = vcombine.high %v5355_v15, %v5359_v46  ;;  %v10765_v7 = vcombine.low %v5355_v15, %v5359_v46  ;;  %v10804_v21 = vcombine.high %v5394_v61, %v5398_v10  ;;  %v5422_v15 = vld [vmem:[#allocation11 + $0xf30] sm:$0xff]  ;;  %v5403_v46 = vld [vmem:[#allocation11 + $0xe98] sm:$0xff] }
 0x569   :  { %v5419_v1 = vld [vmem:[#allocation11 + $0xf18] sm:$0xff] }
 0x56a   :  { %8508 = vmatpush1.bf16.msra.mxu0 %v10755_v42  ;;  %v5391_v42 = vld [vmem:[#allocation11 + $0xe38] sm:$0xff] }
 0x56b   :  { %8668 = vmatpush1.bf16.msra.mxu1 %v10741_v47  ;;  %8509 = vmatprep.subr.bf16.mxu0 %v10764_v28  ;;  %v10803_v47 = vcombine.low %v5394_v61, %v5398_v10  ;;  %v10789_v28 = vcombine.low %v5379_v11, %v5383_v26  ;;  %v10798_v31 = vcombine.high %v5387_v27, %v5391_v42  ;;  %v5423_v8 = vld [vmem:[#allocation11 + $0xf38] sm:$0xff]  ;;  %v5442_v10 = vld [vmem:[#allocation11 + $0xfd0] sm:$0xff] }
 0x56c   :  { %8669 = vmatprep.subr.bf16.mxu1 %v10750_v12  ;;  %v10812_v12 = vcombine.high %v5402_v25, %v5406_v9  ;;  %v10830_v61 = vcombine.high %v5419_v1, %v5423_v8  ;;  %v5446_v11 = vld [vmem:[#allocation11 + $0xff0] sm:$0xff]  ;;  %v5427_v26 = vld [vmem:[#allocation11 + $0xf58] sm:$0xff] }
 0x56e   :  { %8510 = vmatpush1.bf16.msra.mxu0 %v10763_v37  ;;  %v5399_v37 = vld [vmem:[#allocation11 + $0xe78] sm:$0xff] }
 0x56f   :  { %8670 = vmatpush1.bf16.msra.mxu1 %v10749_v22  ;;  %8511 = vmatprep.subr.bf16.mxu0 %v10772_v38  ;;  %v10811_v22 = vcombine.low %v5402_v25, %v5406_v9  ;;  %v10797_v38 = vcombine.low %v5387_v27, %v5391_v42  ;;  %v10806_v39 = vcombine.high %v5395_v36, %v5399_v37  ;;  %v5435_v25 = vld [vmem:[#allocation11 + $0xf98] sm:$0xff] }
 0x570   :  { %v11973_v51 = vpop.f32.mrb[8].mxu0  ;;  %8671 = vmatprep.subr.bf16.mxu1 %v10758_v48  ;;  %v10820_v48 = vcombine.high %v5410_v32, %v5414_v56  ;;  %v5439_v9 = vld [vmem:[#allocation11 + $0xfb8] sm:$0xff]  ;;  %v10851_v27 = vcombine.low %v5442_v10, %v5446_v11 }
 0x571   :  { %v11975_v52 = vpop.f32.mrb[9].mxu0 }
 0x572   :  { %v8211_v6 = vpop.f32.mrb[10].mxu0  ;;  %8512 = vmatpush1.bf16.msra.mxu0 %v10771_v49  ;;  %v5407_v49 = vld [vmem:[#allocation11 + $0xeb8] sm:$0xff] }
 0x573   :  { %v8212_v58 = vpop.f32.mrb[11].mxu0  ;;  %8672 = vmatpush1.bf16.msra.mxu1 %v10757_v50  ;;  %8513 = vmatprep.subr.bf16.mxu0 %v10780_v55  ;;  %v10819_v50 = vcombine.low %v5410_v32, %v5414_v56  ;;  %v10805_v55 = vcombine.low %v5395_v36, %v5399_v37  ;;  %v10814_v59 = vcombine.high %v5403_v46, %v5407_v49  ;;  %v5415_v6 = vld [vmem:[#allocation11 + $0xef8] sm:$0xff]  ;;  %v11124_v56 = vld [vmem:[#allocation14] ss:$8 sps:$4 sm:$0xff]  }
 0x574   :  { %8673 = vmatprep.subr.bf16.mxu1 %v10766_v34  ;;  %v10828_v34 = vcombine.high %v5418_v41, %v5422_v15  ;;  %v10813_v58 = vcombine.low %v5403_v46, %v5407_v49  ;;  %v5447_v32 = vld [vmem:[#allocation11 + $0xff8] sm:$0xff]  ;;  %v11138_v49 = vld [vmem:[#allocation14 + $0x44] ss:$8 sps:$4 sm:$0xff]  }
 0x575   :  { %v11129_v36 = vld [vmem:[#allocation14 + $0x14] ss:$8 sps:$4 sm:$0xff]   ;;  %v11133_v46 = vld [vmem:[#allocation14 + $0x30] ss:$8 sps:$4 sm:$0xff]  }
 0x576   :  { %8514 = vmatpush1.bf16.msra.mxu0 %v10779_v33  ;;  %v10827_v33 = vcombine.low %v5418_v41, %v5422_v15  ;;  %v11130_v41 = vld [vmem:[#allocation14 + $0x20] ss:$8 sps:$4 sm:$0xff]   ;;  %v11135_v15 = vld [vmem:[#allocation14 + $0x34] ss:$8 sps:$4 sm:$0xff]  }
 0x577   :  { %8674 = vmatpush1.bf16.msra.mxu1 %v10765_v7  ;;  %8515 = vmatprep.subr.bf16.mxu0 %v10788_v62  ;;  %v10836_v7 = vcombine.high %v5426_v35, %v5430_v53  ;;  %v10822_v62 = vcombine.high %v5411_v54, %v5415_v6 }
 0x578   :  { %8675 = vmatprep.subr.bf16.mxu1 %v10774_v44  ;;  %v5434_v44 = vld [vmem:[#allocation11 + $0xf90] sm:$0xff] }
 0x579   :  { %v11977_v18 = vpop.f32.mrb[24].mxu1 }
 0x57a   :  { %8516 = vmatpush1.bf16.msra.mxu0 %v10787_v2  ;;  %v11979_v14 = vpop.f32.mrb[25].mxu1  ;;  %v10835_v2 = vcombine.low %v5426_v35, %v5430_v53  ;;  %v11142_v35 = vld [vmem:[#allocation14 + $0x60] ss:$8 sps:$4 sm:$0xff]   ;;  %v11147_v53 = vld [vmem:[#allocation14 + $0x74] ss:$8 sps:$4 sm:$0xff]  }
 0x57b   :  { %v8375_v19 = vpop.f32.mrb[26].mxu1  ;;  %8676 = vmatpush1.bf16.msra.mxu1 %v10773_v3  ;;  %8517 = vmatprep.subr.bf16.mxu0 %v10796_v4  ;;  %v10821_v3 = vcombine.low %v5411_v54, %v5415_v6  ;;  %v10844_v4 = vcombine.high %v5434_v44, %v5438_v63  ;;  %v11145_v54 = vld [vmem:[#allocation14 + $0x70] ss:$8 sps:$4 sm:$0xff]   ;;  %v11150_v6 = vld [vmem:[#allocation14 + $0x84] ss:$8 sps:$4 sm:$0xff]  }
 0x57c   :  { %v8376_v23 = vpop.f32.mrb[27].mxu1  ;;  %8677 = vmatprep.subr.bf16.mxu1 %v10782_v5  ;;  %v5457_v5 = vrot.slane %v11981_v0, %v11789_v45  ;;  %v10843_v19 = vcombine.low %v5434_v44, %v5438_v63  ;;  %v11159_v44 = vld [vmem:[#allocation14 + $0xb4] ss:$8 sps:$4 sm:$0xff]   ;;  %v11157_v63 = vld [vmem:[#allocation14 + $0xb0] ss:$8 sps:$4 sm:$0xff]  }
 0x57e   :  { %8518 = vmatpush1.bf16.msra.mxu0 %v10795_v17  ;;  %v5431_v17 = vld [vmem:[#allocation11 + $0xf78] sm:$0xff]  ;;  %v10992_v23 = vadd.f32 %v11975_v52, %v5457_v5  ;;  %v10845_v52 = vcombine.low %v5435_v25, %v5439_v9  ;;  %v11168_v5 = vld [vmem:[#allocation14 + $0xe4] ss:$8 sps:$4 sm:$0xff]  }
 0x57f   :  { %8678 = vmatpush1.bf16.msra.mxu1 %v10781_v20  ;;  %8519 = vmatprep.subr.bf16.mxu0 %v10804_v21  ;;  %v10829_v20 = vcombine.low %v5419_v1, %v5423_v8  ;;  %v10852_v21 = vcombine.high %v5442_v10, %v5446_v11  ;;  %v10837_v42 = vcombine.low %v5427_v26, %v5431_v17  ;;  %v11162_v1 = vld [vmem:[#allocation14 + $0xc4] ss:$8 sps:$4 sm:$0xff]   ;;  %v11160_v8 = vld [vmem:[#allocation14 + $0xc0] ss:$8 sps:$4 sm:$0xff]  }
 0x580   :  { %8679 = vmatprep.subr.bf16.mxu1 %v10790_v24  ;;  %v10838_v24 = vcombine.high %v5427_v26, %v5431_v17  ;;  %v11166_v10 = vld [vmem:[#allocation14 + $0xe0] ss:$8 sps:$4 sm:$0xff]   ;;  %v11171_v26 = vld [vmem:[#allocation14 + $0xf4] ss:$8 sps:$4 sm:$0xff]  }
 0x582   :  { %8520 = vmatpush1.bf16.msra.mxu0 %v10803_v47  ;;  %v11126_v47 = vld [vmem:[#allocation14 + $0x4] ss:$8 sps:$4 sm:$0xff]  }
 0x583   :  { %8680 = vmatpush1.bf16.msra.mxu1 %v10789_v28  ;;  %8521 = vmatprep.subr.bf16.mxu0 %v10812_v12  ;;  %v8707_v28 = vmax.f32 %v10992_v23, 0.0  ;;  %v10846_v12 = vcombine.high %v5435_v25, %v5439_v9  ;;  %v11177_v9 = vld [vmem:[#allocation14 + $0x114] ss:$8 sps:$4 sm:$0xff]  }
 0x584   :  { %8681 = vmatprep.subr.bf16.mxu1 %v10798_v31  ;;  %v5443_v31 = vld [vmem:[#allocation11 + $0xfd8] sm:$0xff] }
 0x585   :  { %v8715_v37 = vpack.c.bf16 %v8707_v28, %v8707_v28  ;;  %v11186_v28 = vld [vmem:[#allocation14 + $0x144] ss:$8 sps:$4 sm:$0xff]  }
 0x586   :  { %8522 = vmatpush1.bf16.msra.mxu0 %v10811_v22  ;;  %v10854_v22 = vcombine.high %v5443_v31, %v5447_v32 }
 0x587   :  { %8682 = vmatpush1.bf16.msra.mxu1 %v10797_v38  ;;  %8523 = vmatprep.subr.bf16.mxu0 %v10820_v48  ;;  %v11127_v38 = vld [vmem:[#allocation14 + $0x10] ss:$8 sps:$4 sm:$0xff]   ;;  %v10853_v48 = vcombine.low %v5443_v31, %v5447_v32  ;;  %v11189_v31 = vld [vmem:[#allocation14 + $0x154] ss:$8 sps:$4 sm:$0xff]  }
 0x588   :  { %8683 = vmatprep.subr.bf16.mxu1 %v10806_v39  ;;  %v11132_v39 = vld [vmem:[#allocation14 + $0x24] ss:$8 sps:$4 sm:$0xff]   ;;  %v11187_v32 = vld [vmem:[#allocation14 + $0x150] ss:$8 sps:$4 sm:$0xff]  }
 0x58a   :  { %8524 = vmatpush1.bf16.msra.mxu0 %v10819_v50  ;;  %v11136_v50 = vld [vmem:[#allocation14 + $0x40] ss:$8 sps:$4 sm:$0xff]  }
 0x58b   :  { %8684 = vmatpush1.bf16.msra.mxu1 %v10805_v55  ;;  %8525 = vmatprep.subr.bf16.mxu0 %v10828_v34  ;;  %v11141_v55 = vld [vmem:[#allocation14 + $0x54] ss:$8 sps:$4 sm:$0xff]   ;;  %v11139_v34 = vld [vmem:[#allocation14 + $0x50] ss:$8 sps:$4 sm:$0xff]  }
 0x58c   :  { %8685 = vmatprep.subr.bf16.mxu1 %v10814_v59  ;;  %v11144_v59 = vld [vmem:[#allocation14 + $0x64] ss:$8 sps:$4 sm:$0xff]  }
 0x58e   :  { %8526 = vmatpush1.bf16.msra.mxu0 %v10827_v33  ;;  %v11153_v33 = vld [vmem:[#allocation14 + $0x94] ss:$8 sps:$4 sm:$0xff]  }
 0x58f   :  { %8686 = vmatpush1.bf16.msra.mxu1 %v10813_v58  ;;  %8527 = vmatprep.subr.bf16.mxu0 %v10836_v7  ;;  %v11151_v58 = vld [vmem:[#allocation14 + $0x90] ss:$8 sps:$4 sm:$0xff]   ;;  %v11156_v7 = vld [vmem:[#allocation14 + $0xa4] ss:$8 sps:$4 sm:$0xff]  }
 0x590   :  { %8687 = vmatprep.subr.bf16.mxu1 %v10822_v62  ;;  %v11154_v62 = vld [vmem:[#allocation14 + $0xa0] ss:$8 sps:$4 sm:$0xff]  }
 0x592   :  { %8528 = vmatpush1.bf16.msra.mxu0 %v10835_v2  ;;  %v11165_v2 = vld [vmem:[#allocation14 + $0xd4] ss:$8 sps:$4 sm:$0xff]  }
 0x593   :  { %8688 = vmatpush1.bf16.msra.mxu1 %v10821_v3  ;;  %8529 = vmatprep.subr.bf16.mxu0 %v10844_v4  ;;  %v11163_v3 = vld [vmem:[#allocation14 + $0xd0] ss:$8 sps:$4 sm:$0xff]   ;;  %v5453_v4 = vrot.slane %v11981_v0, %v11784_v40 }
 0x594   :  { %8689 = vmatprep.subr.bf16.mxu1 %v10830_v61  ;;  %v5465_v61 = vrot.slane %v11981_v0, %v11810_v60 }
 0x595   :  { %v10991_v11 = vadd.f32 %v11973_v51, %v5453_v4  ;;  %v11175_v51 = vld [vmem:[#allocation14 + $0x110] ss:$8 sps:$4 sm:$0xff]   ;;  %v11232_v4 = vld [vmem:[#allocation14 + $0x240] ss:$8 sps:$4 sm:$0xff]  }
 0x596   :  { %8530 = vmatpush1.bf16.msra.mxu0 %v10843_v19  ;;  %v10994_v17 = vadd.f32 %v11979_v14, %v5465_v61  ;;  %v11169_v19 = vld [vmem:[#allocation14 + $0xf0] ss:$8 sps:$4 sm:$0xff]   ;;  %v11178_v14 = vld [vmem:[#allocation14 + $0x120] ss:$8 sps:$4 sm:$0xff]  }
 0x597   :  { %8690 = vmatpush1.bf16.msra.mxu1 %v10829_v20  ;;  %8531 = vmatprep.subr.bf16.mxu0 %v10852_v21  ;;  %v8706_v20 = vmax.f32 %v10991_v11, 0.0  ;;  %v11174_v21 = vld [vmem:[#allocation14 + $0x104] ss:$8 sps:$4 sm:$0xff]   ;;  %v11235_v61 = vld [vmem:[#allocation14 + $0x250] ss:$8 sps:$4 sm:$0xff]  }
 0x598   :  { %8691 = vmatprep.subr.bf16.mxu1 %v10838_v24  ;;  %v8709_v23 = vmax.f32 %v10994_v17, 0.0  ;;  %v11172_v24 = vld [vmem:[#allocation14 + $0x100] ss:$8 sps:$4 sm:$0xff]   ;;  %v11241_v17 = vld [vmem:[#allocation14 + $0x270] ss:$8 sps:$4 sm:$0xff]  }
 0x599   :  { %v8714_v25 = vpack.c.bf16 %v8706_v20, %v8706_v20  ;;  %v11238_v11 = vld [vmem:[#allocation14 + $0x260] ss:$8 sps:$4 sm:$0xff]  }
 0x59a   :  { %8532 = vmatpush1.bf16.msra.mxu0 %v10851_v27  ;;  %v8717_v60 = vpack.c.bf16 %v8709_v23, %v8709_v23  ;;  %v11180_v27 = vld [vmem:[#allocation14 + $0x124] ss:$8 sps:$4 sm:$0xff]   ;;  %v11244_v20 = vld [vmem:[#allocation14 + $0x280] ss:$8 sps:$4 sm:$0xff]   ;;  %v11247_v23 = vld [vmem:[#allocation14 + $0x290] ss:$8 sps:$4 sm:$0xff]  }
 0x59b   :  { %8692 = vmatpush1.bf16.msra.mxu1 %v10837_v42  ;;  %9502 = vmatprep.subr.bf16.mxu0 %v11126_v47  ;;  %v11183_v42 = vld [vmem:[#allocation14 + $0x134] ss:$8 sps:$4 sm:$0xff]   ;;  %v11181_v47 = vld [vmem:[#allocation14 + $0x130] ss:$8 sps:$4 sm:$0xff]  }
 0x59c   :  { %8693 = vmatprep.subr.bf16.mxu1 %v10846_v12  ;;  %v11184_v12 = vld [vmem:[#allocation14 + $0x140] ss:$8 sps:$4 sm:$0xff]  }
 0x59d   :  { %8534 = vmatmul.mubr.bf16.vlgmr.msra.gmra.mrb[12].mxu0 %v11955_v30 }
 0x59e   :  { %9503 = vmatpush1.bf16.msra.mxu0 %v11124_v56  ;;  %9534 = vmatprep.mubr.bf16.mxu0 %v8715_v37  ;;  %v11192_v56 = vld [vmem:[#allocation14 + $0x164] ss:$8 sps:$4 sm:$0xff]   ;;  %v11193_v37 = vld [vmem:[#allocation14 + $0x170] ss:$8 sps:$4 sm:$0xff]  }
 0x59f   :  { %8694 = vmatpush1.bf16.msra.mxu1 %v10845_v52  ;;  %9504 = vmatprep.subr.bf16.mxu0 %v11129_v36  ;;  %v11190_v52 = vld [vmem:[#allocation14 + $0x160] ss:$8 sps:$4 sm:$0xff]   ;;  %v11195_v36 = vld [vmem:[#allocation14 + $0x174] ss:$8 sps:$4 sm:$0xff]  }
 0x5a0   :  { %8695 = vmatprep.subr.bf16.mxu1 %v10854_v22  ;;  %v11198_v22 = vld [vmem:[#allocation14 + $0x184] ss:$8 sps:$4 sm:$0xff]  }
 0x5a2   :  { %9505 = vmatpush1.bf16.msra.mxu0 %v11127_v38  ;;  %v11196_v38 = vld [vmem:[#allocation14 + $0x180] ss:$8 sps:$4 sm:$0xff]  }
 0x5a3   :  { %8696 = vmatpush1.bf16.msra.mxu1 %v10853_v48  ;;  %9506 = vmatprep.subr.bf16.mxu0 %v11132_v39  ;;  %v11201_v48 = vld [vmem:[#allocation14 + $0x194] ss:$8 sps:$4 sm:$0xff]   ;;  %v11199_v39 = vld [vmem:[#allocation14 + $0x190] ss:$8 sps:$4 sm:$0xff]  }
 0x5a6   :  { %9507 = vmatpush1.bf16.msra.mxu0 %v11130_v41  ;;  %8698 = vmatmul.mubr.bf16.vlgmr.msra.gmra.mrb[28].mxu1 %v11955_v30  ;;  %v11148_v30 = vld [vmem:[#allocation14 + $0x80] ss:$8 sps:$4 sm:$0xff]   ;;  %v11204_v41 = vld [vmem:[#allocation14 + $0x1a4] ss:$8 sps:$4 sm:$0xff]  }
 0x5a7   :  { %9508 = vmatprep.subr.bf16.mxu0 %v11135_v15  ;;  %v11202_v15 = vld [vmem:[#allocation14 + $0x1a0] ss:$8 sps:$4 sm:$0xff]  }
 0x5aa   :  { %9509 = vmatpush1.bf16.msra.mxu0 %v11133_v46  ;;  %v11207_v46 = vld [vmem:[#allocation14 + $0x1b4] ss:$8 sps:$4 sm:$0xff]  }
 0x5ab   :  { %9510 = vmatprep.subr.bf16.mxu0 %v11138_v49  ;;  %v11205_v49 = vld [vmem:[#allocation14 + $0x1b0] ss:$8 sps:$4 sm:$0xff]  }
 0x5ae   :  { %9511 = vmatpush1.bf16.msra.mxu0 %v11136_v50  ;;  %v11210_v50 = vld [vmem:[#allocation14 + $0x1c4] ss:$8 sps:$4 sm:$0xff]  }
 0x5af   :  { %9512 = vmatprep.subr.bf16.mxu0 %v11141_v55  ;;  %v11208_v55 = vld [vmem:[#allocation14 + $0x1c0] ss:$8 sps:$4 sm:$0xff]  }
 0x5b2   :  { %9513 = vmatpush1.bf16.msra.mxu0 %v11139_v34  ;;  %v11213_v34 = vld [vmem:[#allocation14 + $0x1d4] ss:$8 sps:$4 sm:$0xff]  }
 0x5b3   :  { %9514 = vmatprep.subr.bf16.mxu0 %v11144_v59  ;;  %v11211_v59 = vld [vmem:[#allocation14 + $0x1d0] ss:$8 sps:$4 sm:$0xff]  }
 0x5b6   :  { %9515 = vmatpush1.bf16.msra.mxu0 %v11142_v35  ;;  %v5461_v35 = vrot.slane %v11981_v0, %v11807_v57  ;;  %v11223_v57 = vld [vmem:[#allocation14 + $0x210] ss:$8 sps:$4 sm:$0xff]  }
 0x5b7   :  { %9516 = vmatprep.subr.bf16.mxu0 %v11147_v53  ;;  %v11216_v53 = vld [vmem:[#allocation14 + $0x1e4] ss:$8 sps:$4 sm:$0xff]  }
 0x5ba   :  { %9517 = vmatpush1.bf16.msra.mxu0 %v11145_v54  ;;  %v11214_v54 = vld [vmem:[#allocation14 + $0x1e0] ss:$8 sps:$4 sm:$0xff]  }
 0x5bb   :  { %9518 = vmatprep.subr.bf16.mxu0 %v11150_v6  ;;  %v10993_v6 = vadd.f32 %v11977_v18, %v5461_v35  ;;  %v11231_v18 = vld [vmem:[#allocation14 + $0x234] ss:$8 sps:$4 sm:$0xff]  }
 0x5be   :  { %9519 = vmatpush1.bf16.msra.mxu0 %v11148_v30  ;;  %v11219_v30 = vld [vmem:[#allocation14 + $0x1f4] ss:$8 sps:$4 sm:$0xff]  }
 0x5bf   :  { %9520 = vmatprep.subr.bf16.mxu0 %v11153_v33  ;;  %v11217_v33 = vld [vmem:[#allocation14 + $0x1f0] ss:$8 sps:$4 sm:$0xff]  }
 0x5c2   :  { %9521 = vmatpush1.bf16.msra.mxu0 %v11151_v58  ;;  %v8708_v58 = vmax.f32 %v10993_v6, 0.0 }
 0x5c3   :  { %9522 = vmatprep.subr.bf16.mxu0 %v11156_v7  ;;  %v11222_v7 = vld [vmem:[#allocation14 + $0x204] ss:$8 sps:$4 sm:$0xff]  }
 0x5c6   :  { %9523 = vmatpush1.bf16.msra.mxu0 %v11154_v62  ;;  %v11220_v62 = vld [vmem:[#allocation14 + $0x200] ss:$8 sps:$4 sm:$0xff]  }
 0x5c7   :  { %9524 = vmatprep.subr.bf16.mxu0 %v11159_v44  ;;  %v8716_v44 = vpack.c.bf16 %v8708_v58, %v8708_v58 }
 0x5ca   :  { %9525 = vmatpush1.bf16.msra.mxu0 %v11157_v63  ;;  %v11225_v63 = vld [vmem:[#allocation14 + $0x214] ss:$8 sps:$4 sm:$0xff]  }
 0x5cb   :  { %9526 = vmatprep.subr.bf16.mxu0 %v11162_v1  ;;  %v11228_v1 = vld [vmem:[#allocation14 + $0x224] ss:$8 sps:$4 sm:$0xff]  }
 0x5ce   :  { %9527 = vmatpush1.bf16.msra.mxu0 %v11160_v8  ;;  %v11226_v8 = vld [vmem:[#allocation14 + $0x220] ss:$8 sps:$4 sm:$0xff]  }
 0x5cf   :  { %9528 = vmatprep.subr.bf16.mxu0 %v11165_v2  ;;  %v11229_v2 = vld [vmem:[#allocation14 + $0x230] ss:$8 sps:$4 sm:$0xff]  }
 0x5d2   :  { %9529 = vmatpush1.bf16.msra.mxu0 %v11163_v3  ;;  %v11234_v3 = vld [vmem:[#allocation14 + $0x244] ss:$8 sps:$4 sm:$0xff]  }
 0x5d3   :  { %9530 = vmatprep.subr.bf16.mxu0 %v11168_v5  ;;  %v11237_v5 = vld [vmem:[#allocation14 + $0x254] ss:$8 sps:$4 sm:$0xff]  }
 0x5d6   :  { %9531 = vmatpush1.bf16.msra.mxu0 %v11166_v10  ;;  %v11240_v10 = vld [vmem:[#allocation14 + $0x264] ss:$8 sps:$4 sm:$0xff]  }
 0x5d7   :  { %9532 = vmatprep.subr.bf16.mxu0 %v11171_v26  ;;  %v11243_v26 = vld [vmem:[#allocation14 + $0x274] ss:$8 sps:$4 sm:$0xff]  }
 0x5da   :  { %9533 = vmatpush1.bf16.msra.mxu0 %v11169_v19  ;;  %v11246_v19 = vld [vmem:[#allocation14 + $0x284] ss:$8 sps:$4 sm:$0xff]  }
 0x5db   :  { %9543 = vmatprep.subr.bf16.mxu0 %v11174_v21  ;;  %v11249_v21 = vld [vmem:[#allocation14 + $0x294] ss:$8 sps:$4 sm:$0xff]  }
 0x5dd   :  { %9535 = vmatmul.mubr.bf16.vlgmr.msra.gmra.mrb[16].mxu0 %v8714_v25  ;;  %v11250_v25 = vld [vmem:[#allocation14 + $0x2a0] ss:$8 sps:$4 sm:$0xff]  }
 0x5de   :  { %9544 = vmatpush1.bf16.msra.mxu0 %v11172_v24  ;;  %9575 = vmatprep.mubr.bf16.mxu0 %v8717_v60  ;;  %v11252_v24 = vld [vmem:[#allocation14 + $0x2a4] ss:$8 sps:$4 sm:$0xff]   ;;  %v11253_v60 = vld [vmem:[#allocation14 + $0x2b0] ss:$8 sps:$4 sm:$0xff]  }
 0x5df   :  { %9545 = vmatprep.subr.bf16.mxu0 %v11177_v9  ;;  %v11255_v9 = vld [vmem:[#allocation14 + $0x2b4] ss:$8 sps:$4 sm:$0xff]  }
 0x5e2   :  { %9546 = vmatpush1.bf16.msra.mxu0 %v11175_v51  ;;  %v11258_v51 = vld [vmem:[#allocation14 + $0x2c4] ss:$8 sps:$4 sm:$0xff]  }
 0x5e3   :  { %9547 = vmatprep.subr.bf16.mxu0 %v11180_v27  ;;  %v11256_v27 = vld [vmem:[#allocation14 + $0x2c0] ss:$8 sps:$4 sm:$0xff]  }
 0x5e6   :  { %9548 = vmatpush1.bf16.msra.mxu0 %v11178_v14  ;;  %v11261_v14 = vld [vmem:[#allocation14 + $0x2d4] ss:$8 sps:$4 sm:$0xff]  }
 0x5e7   :  { %9549 = vmatprep.subr.bf16.mxu0 %v11183_v42  ;;  %v11259_v42 = vld [vmem:[#allocation14 + $0x2d0] ss:$8 sps:$4 sm:$0xff]  }
 0x5ea   :  { %9550 = vmatpush1.bf16.msra.mxu0 %v11181_v47  ;;  %v11264_v47 = vld [vmem:[#allocation14 + $0x2e4] ss:$8 sps:$4 sm:$0xff]  }
 0x5eb   :  { %9551 = vmatprep.subr.bf16.mxu0 %v11186_v28  ;;  %v11262_v28 = vld [vmem:[#allocation14 + $0x2e0] ss:$8 sps:$4 sm:$0xff]  }
 0x5ee   :  { %9552 = vmatpush1.bf16.msra.mxu0 %v11184_v12  ;;  %v11267_v12 = vld [vmem:[#allocation14 + $0x2f4] ss:$8 sps:$4 sm:$0xff]  }
 0x5ef   :  { %9553 = vmatprep.subr.bf16.mxu0 %v11189_v31  ;;  %v11265_v31 = vld [vmem:[#allocation14 + $0x2f0] ss:$8 sps:$4 sm:$0xff]  }
 0x5f2   :  { %9554 = vmatpush1.bf16.msra.mxu0 %v11187_v32  ;;  %v11270_v32 = vld [vmem:[#allocation14 + $0x304] ss:$8 sps:$4 sm:$0xff]  }
 0x5f3   :  { %9555 = vmatprep.subr.bf16.mxu0 %v11192_v56  ;;  %v5469_v56 = vrot.slane %v11981_v0, %v11825_v43 }
 0x5f6   :  { %9556 = vmatpush1.bf16.msra.mxu0 %v11190_v52  ;;  %v5473_v52 = vrot.slane %v11981_v0, %v11828_v29 }
 0x5f7   :  { %9557 = vmatprep.subr.bf16.mxu0 %v11195_v36 }
 0x5fa   :  { %9558 = vmatpush1.bf16.msra.mxu0 %v11193_v37 }
 0x5fb   :  { %9559 = vmatprep.subr.bf16.mxu0 %v11198_v22 }
 0x5fe   :  { %9560 = vmatpush1.bf16.msra.mxu0 %v11196_v38 }
 0x5ff   :  { %9561 = vmatprep.subr.bf16.mxu0 %v11201_v48 }
 0x602   :  { %9562 = vmatpush1.bf16.msra.mxu0 %v11199_v39 }
 0x603   :  { %9563 = vmatprep.subr.bf16.mxu0 %v11204_v41 }
 0x606   :  { %9564 = vmatpush1.bf16.msra.mxu0 %v11202_v15 }
 0x607   :  { %9565 = vmatprep.subr.bf16.mxu0 %v11207_v46 }
 0x60a   :  { %9566 = vmatpush1.bf16.msra.mxu0 %v11205_v49  ;;  %v11268_v49 = vld [vmem:[#allocation14 + $0x300] ss:$8 sps:$4 sm:$0xff]  }
 0x60b   :  { %9567 = vmatprep.subr.bf16.mxu0 %v11210_v50 }
 0x60e   :  { %9568 = vmatpush1.bf16.msra.mxu0 %v11208_v55  ;;  %v5481_v55 = vrot.slane %v11981_v0, %v11846_v16  ;;  %v11277_v16 = vld [vmem:[#allocation14 + $0x330] ss:$8 sps:$4 sm:$0xff]  }
 0x60f   :  { %9569 = vmatprep.subr.bf16.mxu0 %v11213_v34  ;;  %v11273_v34 = vld [vmem:[#allocation14 + $0x314] ss:$8 sps:$4 sm:$0xff]  }
 0x612   :  { %9570 = vmatpush1.bf16.msra.mxu0 %v11211_v59  ;;  %v11271_v59 = vld [vmem:[#allocation14 + $0x310] ss:$8 sps:$4 sm:$0xff]  }
 0x613   :  { %9571 = vmatprep.subr.bf16.mxu0 %v11216_v53 }
 0x616   :  { %9572 = vmatpush1.bf16.msra.mxu0 %v11214_v54  ;;  %v11276_v54 = vld [vmem:[#allocation14 + $0x324] ss:$8 sps:$4 sm:$0xff]  }
 0x617   :  { %9573 = vmatprep.subr.bf16.mxu0 %v11219_v30 }
 0x61a   :  { %9574 = vmatpush1.bf16.msra.mxu0 %v11217_v33  ;;  %v11274_v33 = vld [vmem:[#allocation14 + $0x320] ss:$8 sps:$4 sm:$0xff]  }
 0x61b   :  { %9584 = vmatprep.subr.bf16.mxu0 %v11222_v7  ;;  %v11279_v7 = vld [vmem:[#allocation14 + $0x334] ss:$8 sps:$4 sm:$0xff]  }
 0x61d   :  { %9576 = vmatmul.mubr.bf16.vlgmr.msra.gmra.mrb[16].mxu0 %v8716_v44  ;;  %v11280_v44 = vld [vmem:[#allocation14 + $0x340] ss:$8 sps:$4 sm:$0xff]  }
 0x61e   :  { %9585 = vmatpush1.bf16.msra.mxu0 %v11220_v62  ;;  %v11282_v62 = vld [vmem:[#allocation14 + $0x344] ss:$8 sps:$4 sm:$0xff]  }
 0x61f   :  { %9586 = vmatprep.subr.bf16.mxu0 %v11225_v63  ;;  %v11285_v63 = vld [vmem:[#allocation14 + $0x354] ss:$8 sps:$4 sm:$0xff]  }
 0x622   :  { %9587 = vmatpush1.bf16.msra.mxu0 %v11223_v57  ;;  %v11283_v57 = vld [vmem:[#allocation14 + $0x350] ss:$8 sps:$4 sm:$0xff]  }
 0x623   :  { %9588 = vmatprep.subr.bf16.mxu0 %v11228_v1  ;;  %v11288_v1 = vld [vmem:[#allocation14 + $0x364] ss:$8 sps:$4 sm:$0xff]  }
 0x626   :  { %9589 = vmatpush1.bf16.msra.mxu0 %v11226_v8  ;;  %v11286_v8 = vld [vmem:[#allocation14 + $0x360] ss:$8 sps:$4 sm:$0xff]  }
 0x627   :  { %9590 = vmatprep.subr.bf16.mxu0 %v11231_v18  ;;  %v11291_v18 = vld [vmem:[#allocation14 + $0x374] ss:$8 sps:$4 sm:$0xff]  }
 0x62a   :  { %9591 = vmatpush1.bf16.msra.mxu0 %v11229_v2  ;;  %v11289_v2 = vld [vmem:[#allocation14 + $0x370] ss:$8 sps:$4 sm:$0xff]  }
 0x62b   :  { %9592 = vmatprep.subr.bf16.mxu0 %v11234_v3  ;;  %v11294_v3 = vld [vmem:[#allocation14 + $0x384] ss:$8 sps:$4 sm:$0xff]  }
 0x62e   :  { %9593 = vmatpush1.bf16.msra.mxu0 %v11232_v4  ;;  %v11292_v4 = vld [vmem:[#allocation14 + $0x380] ss:$8 sps:$4 sm:$0xff]  }
 0x62f   :  { %9594 = vmatprep.subr.bf16.mxu0 %v11237_v5  ;;  %v11297_v5 = vld [vmem:[#allocation14 + $0x394] ss:$8 sps:$4 sm:$0xff]  }
 0x632   :  { %9595 = vmatpush1.bf16.msra.mxu0 %v11235_v61  ;;  %v11295_v61 = vld [vmem:[#allocation14 + $0x390] ss:$8 sps:$4 sm:$0xff]  }
 0x633   :  { %9596 = vmatprep.subr.bf16.mxu0 %v11240_v10  ;;  %v11300_v10 = vld [vmem:[#allocation14 + $0x3a4] ss:$8 sps:$4 sm:$0xff]  }
 0x636   :  { %9597 = vmatpush1.bf16.msra.mxu0 %v11238_v11  ;;  %v11298_v11 = vld [vmem:[#allocation14 + $0x3a0] ss:$8 sps:$4 sm:$0xff]  }
 0x637   :  { %9598 = vmatprep.subr.bf16.mxu0 %v11243_v26  ;;  %v11303_v26 = vld [vmem:[#allocation14 + $0x3b4] ss:$8 sps:$4 sm:$0xff]  }
 0x63a   :  { %9599 = vmatpush1.bf16.msra.mxu0 %v11241_v17  ;;  %v11301_v17 = vld [vmem:[#allocation14 + $0x3b0] ss:$8 sps:$4 sm:$0xff]  }
 0x63b   :  { %9600 = vmatprep.subr.bf16.mxu0 %v11246_v19  ;;  %v11306_v19 = vld [vmem:[#allocation14 + $0x3c4] ss:$8 sps:$4 sm:$0xff]  }
 0x63e   :  { %9601 = vmatpush1.bf16.msra.mxu0 %v11244_v20  ;;  %v11304_v20 = vld [vmem:[#allocation14 + $0x3c0] ss:$8 sps:$4 sm:$0xff]  }
 0x63f   :  { %9602 = vmatprep.subr.bf16.mxu0 %v11249_v21  ;;  %v11309_v21 = vld [vmem:[#allocation14 + $0x3d4] ss:$8 sps:$4 sm:$0xff]  }
 0x642   :  { %9603 = vmatpush1.bf16.msra.mxu0 %v11247_v23  ;;  %v11307_v23 = vld [vmem:[#allocation14 + $0x3d0] ss:$8 sps:$4 sm:$0xff]  }
 0x643   :  { %9604 = vmatprep.subr.bf16.mxu0 %v11252_v24  ;;  %v5477_v24 = vrot.slane %v11981_v0, %v11843_v13 }
 0x646   :  { %9605 = vmatpush1.bf16.msra.mxu0 %v11250_v25  ;;  %v11312_v25 = vld [vmem:[#allocation14 + $0x3e4] ss:$8 sps:$4 sm:$0xff]  }
 0x647   :  { %9606 = vmatprep.subr.bf16.mxu0 %v11255_v9  ;;  %v11310_v9 = vld [vmem:[#allocation14 + $0x3e0] ss:$8 sps:$4 sm:$0xff]  }
 0x64a   :  { %9607 = vmatpush1.bf16.msra.mxu0 %v11253_v60 }
 0x64b   :  { %9608 = vmatprep.subr.bf16.mxu0 %v11258_v51  ;;  %v11315_v51 = vld [vmem:[#allocation14 + $0x3f4] ss:$8 sps:$4 sm:$0xff]  }
 0x64e   :  { %9609 = vmatpush1.bf16.msra.mxu0 %v11256_v27  ;;  %v11313_v27 = vld [vmem:[#allocation14 + $0x3f0] ss:$8 sps:$4 sm:$0xff]  }
 0x64f   :  { %9610 = vmatprep.subr.bf16.mxu0 %v11261_v14 }
 0x652   :  { %9611 = vmatpush1.bf16.msra.mxu0 %v11259_v42 }
 0x653   :  { %9612 = vmatprep.subr.bf16.mxu0 %v11264_v47 }
 0x656   :  { %9613 = vmatpush1.bf16.msra.mxu0 %v11262_v28 }
 0x657   :  { %9614 = vmatprep.subr.bf16.mxu0 %v11267_v12 }
 0x65a   :  { %9615 = vmatpush1.bf16.msra.mxu0 %v11265_v31 }
 0x65b   :  { %9625 = vmatprep.subr.bf16.mxu0 %v11270_v32 }
 0x670   :  { %v8535_v36 = vpop.f32.mrb[12].mxu0 }
 0x671   :  { %v10995_v37 = vadd.f32 %v8535_v36, %v5469_v56  ;;  %v8537_v22 = vpop.f32.mrb[13].mxu0 }
 0x672   :  { %v10996_v38 = vadd.f32 %v8537_v22, %v5473_v52  ;;  %v8539_v48 = vpop.f32.mrb[14].mxu0 }
 0x673   :  { %v8710_v39 = vmax.f32 %v10995_v37, 0.0  ;;  %v8540_v41 = vpop.f32.mrb[15].mxu0 }
 0x674   :  { %v8711_v15 = vmax.f32 %v10996_v38, 0.0 }
 0x675   :  { %v8718_v50 = vpack.c.bf16 %v8710_v39, %v8710_v39 }
 0x676   :  { %v8719_v46 = vpack.c.bf16 %v8711_v15, %v8711_v15 }
 0x678   :  { %9616 = vmatprep.mubr.bf16.mxu0 %v8719_v46 }
 0x679   :  { %9617 = vmatmul.mubr.bf16.vlgmr.msra.gmra.mrb[16].mxu0 %v8718_v50  ;;  %v12003_v43 = vpop.f32.mrb[28].mxu1 }
 0x67a   :  { %9626 = vmatpush1.bf16.msra.mxu0 %v11268_v49  ;;  %v8701_v29 = vpop.f32.mrb[29].mxu1  ;;  %v10997_v60 = vadd.f32 %v12003_v43, %v5477_v24 }
 0x67b   :  { %v10998_v35 = vadd.f32 %v8701_v29, %v5481_v55  ;;  %v8703_v53 = vpop.f32.mrb[30].mxu1  ;;  %9627 = vmatprep.subr.bf16.mxu0 %v11273_v34 }
 0x67c   :  { %v8704_v6 = vpop.f32.mrb[31].mxu1  ;;  %v8712_v14 = vmax.f32 %v10997_v60, 0.0 }
 0x67d   :  { %v8713_v30 = vmax.f32 %v10998_v35, 0.0 }
 0x67e   :  { %9628 = vmatpush1.bf16.msra.mxu0 %v11271_v59  ;;  %v8720_v42 = vpack.c.bf16 %v8712_v14, %v8712_v14 }
 0x67f   :  { %v8721_v58 = vpack.c.bf16 %v8713_v30, %v8713_v30  ;;  %9629 = vmatprep.subr.bf16.mxu0 %v11276_v54 }
 0x681   :  { %9657 = vmatprep.mubr.bf16.mxu0 %v8721_v58 }
 0x682   :  { %9630 = vmatpush1.bf16.msra.mxu0 %v11274_v33 }
 0x683   :  { %9631 = vmatprep.subr.bf16.mxu0 %v11279_v7 }
 0x686   :  { %9632 = vmatpush1.bf16.msra.mxu0 %v11277_v16 }
 0x687   :  { %9633 = vmatprep.subr.bf16.mxu0 %v11282_v62 }
 0x68a   :  { %9634 = vmatpush1.bf16.msra.mxu0 %v11280_v44 }
 0x68b   :  { %9635 = vmatprep.subr.bf16.mxu0 %v11285_v63 }
 0x68e   :  { %9636 = vmatpush1.bf16.msra.mxu0 %v11283_v57 }
 0x68f   :  { %9637 = vmatprep.subr.bf16.mxu0 %v11288_v1 }
 0x692   :  { %9638 = vmatpush1.bf16.msra.mxu0 %v11286_v8 }
 0x693   :  { %9639 = vmatprep.subr.bf16.mxu0 %v11291_v18 }
 0x696   :  { %9640 = vmatpush1.bf16.msra.mxu0 %v11289_v2 }
 0x697   :  { %9641 = vmatprep.subr.bf16.mxu0 %v11294_v3 }
 0x69a   :  { %9642 = vmatpush1.bf16.msra.mxu0 %v11292_v4 }
 0x69b   :  { %9643 = vmatprep.subr.bf16.mxu0 %v11297_v5 }
 0x69e   :  { %9644 = vmatpush1.bf16.msra.mxu0 %v11295_v61 }
 0x69f   :  { %9645 = vmatprep.subr.bf16.mxu0 %v11300_v10 }
 0x6a2   :  { %9646 = vmatpush1.bf16.msra.mxu0 %v11298_v11 }
 0x6a3   :  { %9647 = vmatprep.subr.bf16.mxu0 %v11303_v26 }
 0x6a6   :  { %9648 = vmatpush1.bf16.msra.mxu0 %v11301_v17 }
 0x6a7   :  { %9649 = vmatprep.subr.bf16.mxu0 %v11306_v19 }
 0x6aa   :  { %9650 = vmatpush1.bf16.msra.mxu0 %v11304_v20 }
 0x6ab   :  { %9651 = vmatprep.subr.bf16.mxu0 %v11309_v21 }
 0x6ae   :  { %9652 = vmatpush1.bf16.msra.mxu0 %v11307_v23 }
 0x6af   :  { %9653 = vmatprep.subr.bf16.mxu0 %v11312_v25 }
 0x6b2   :  { %9654 = vmatpush1.bf16.msra.mxu0 %v11310_v9 }
 0x6b3   :  { %9655 = vmatprep.subr.bf16.mxu0 %v11315_v51 }
 0x6b6   :  { %9656 = vmatpush1.bf16.msra.mxu0 %v11313_v27 }
 0x6b9   :  { %9658 = vmatmul.mubr.bf16.vlgmr.msra.gmra.mrb[16].mxu0 %v8720_v42 }
 0x6ba   :  { %11527 = shalt.err (!%p11524_p6)
}
 0x6bb   :  { %s11528_s26 = scalar_lea.hbm %s12043_s9, 1024 }
 0x6bc   :  { %p11529_p7 = scmp.ne.s32.totalorder %s12043_s9, %s11528_s26  ;;  %p11532_p8 = scmp.lt.u32.totalorder %s11528_s26, %s12043_s9 }
 0x6be   :  { %p11534_p9 = pnand %p11532_p8, %p11529_p7 }
 0x6c0   :  { %11537 = shalt.err (!%p11534_p9)
}
 0x6c1   :  { %9679 = dma.vmem_to_hbm [thread:$0]  %s9677_s28, 1024, %s12043_s9, [#allocation4]   ;;  %v8850_v13 = vld [vmem:[#allocation16] sm:$0x3] }
 0x6c2   :  { %v8855_v0 = vrot.slane %v8850_v13, %v11784_v40  ;;  %v8859_v47 = vrot.slane %v8850_v13, %v11789_v45  ;;  %s11588_s14 = smov [#allocation18]  }
 0x6c3   :  { %s9686_s19 = sshll.u32 %s11588_s14, 4  ;;  %s9687_s19 = int_to_ptr.vmem [resolvable:$true] %s9686_s19 }
 0x6c4   :  { %s11538_s20 = scalar_lea.vmem %s9687_s19, 256  ;;  %p11543_p11 = scmp.lt.s32.totalorder %s9687_s19, %s9687_s19 }
 0x6c5   :  { %p11539_p10 = scmp.ne.s32.totalorder %s9687_s19, %s11538_s20  ;;  %p11544_p12 = scmp.lt.s32.totalorder %s11538_s20, %s11538_s20 }
 0x6c7   :  { %p11545_p13 = por %p11544_p12, %p11543_p11 }
 0x6c9   :  { %p11546_p0 = pnand %p11545_p13, %p11539_p10 }
 0x78c   :  { %v9659_v28 = vpop.f32.mrb[16].mxu0 }
 0x78d   :  { %v10999_v12 = vadd.f32 %v9659_v28, %v8855_v0  ;;  %v9661_v31 = vpop.f32.mrb[17].mxu0 }
 0x78e   :  { %v11000_v32 = vadd.f32 %v9661_v31, %v8859_v47  ;;  %v9663_v56 = vpop.f32.mrb[18].mxu0 }
 0x78f   :  { %v9666_v52 = vmax.f32 %v10999_v12, 0.0  ;;  %v9664_v36 = vpop.f32.mrb[19].mxu0 }
 0x790   :  { %v9667_v37 = vmax.f32 %v11000_v32, 0.0 }
 0x791   :  { %9668 = vst [vmem:[#allocation18] sm:$0xff] %v9666_v52 }
 0x792   :  { %9669 = vst [vmem:[#allocation18 + $0x8] sm:$0xff] %v9667_v37 }
 0x793   :  { %11549 = shalt.err (!%p11546_p0)
}
 0x794   :  { %s11550_s5 = scalar_lea.hbm %s12044_s10, 256 }
 0x795   :  { %p11551_p1 = scmp.ne.s32.totalorder %s12044_s10, %s11550_s5  ;;  %p11554_p2 = scmp.lt.u32.totalorder %s11550_s5, %s12044_s10 }
 0x797   :  { %p11556_p3 = pnand %p11554_p2, %p11551_p1 }
 0x799   :  { %11559 = shalt.err (!%p11556_p3)
}
 0x79a   :  { %9689 = dma.vmem_to_hbm [thread:$0]  %s9687_s19, 256, %s12044_s10, [#allocation19]  }
 0x79b   :  { %11570 = dma.done.wait [#allocation4], 1024  }
 0x79c   :  { %11571 = vsyncadd [#allocation4], 4294966272 }
 0x79d   :  { %11572 = dma.done.wait [#allocation19], 256  }
 0x79e   :  { %11573 = vsyncadd [#allocation19], 4294967040 }
 0x79f   :  { %9696 = vsyncpa [#allocation3], 1 }
 0x7a0   :  { %9697 = vsyncpa [#allocation6], 1 }
 0x7a1   :  { %9698 = vsyncpa [#allocation9], 1 }
 0x7a2   :  { %9699 = vsyncpa [#allocation12], 1 }
 0x7a3   :  { %9700 = vsyncpa [#allocation15], 1 }
 0x7a4   :  { %9701 = vsyncpa [#allocation4], 1 }
 0x7a5   :  { %9702 = vsyncpa [#allocation19], 1 }

</bundles_post_ra>
